<compile_context>
chip_gen: v6e
topology: v6e:2x2x1
jax: 0.10.0
libtpu: 0.0.40
codegen_flags: <defaults>
</compile_context>

<pallas_src>
from functools import partial

import jax
import jax.numpy as jnp
from jax.experimental import pallas as pl
from jax.experimental.pallas import tpu as pltpu


def batchnorm_kernel(x_ref, gb_ref, o_ref, *, eps, inv_n):
    """Per-channel batch-norm on a (C_tile, S) block.

    x_ref:  (C_tile, S)   -- channels on sublanes, spatial on lanes
    gb_ref: (C_tile, 2)   -- column 0 = gamma, column 1 = beta
    o_ref:  (C_tile, S)
    """
    # Stats sweep: sum(x) and sum(x*x).  S is tiny (49) and accumulation is
    # f32, so E[x^2] - mean^2 is numerically fine; clamp guards cancellation.
    x = x_ref[...].astype(jnp.float32)
    mean = jnp.sum(x, axis=-1, keepdims=True) * inv_n             # (C_tile, 1)
    ex2 = jnp.sum(x * x, axis=-1, keepdims=True) * inv_n          # (C_tile, 1)
    var = jnp.maximum(ex2 - mean * mean, 0.0)                     # biased (/S)

    # Fold gamma/beta/mean/var into per-channel scale & shift so the
    # normalize pass is a single mul + add per element.
    gamma = gb_ref[:, 0:1]                                        # (C_tile, 1)
    beta = gb_ref[:, 1:2]                                         # (C_tile, 1)
    scale = gamma * jax.lax.rsqrt(var + eps)                      # (C_tile, 1)
    shift = beta - mean * scale                                   # (C_tile, 1)

    # Re-read x from VMEM for the fused mul-add so the full tile value does
    # not have to stay live in vregs across the stats pass.
    o_ref[...] = (x_ref[...].astype(jnp.float32) * scale + shift).astype(o_ref.dtype)


def _pick_channel_block(C):
    """Prefer exactly 2 blocks (one per v7x TensorCore) if C/2 is 8-aligned,
    otherwise a single full-C block (block == full array dim is always legal)."""
    half = C // 2
    if C % 2 == 0 and half % 8 == 0:
        return half
    return C


def batchnorm2d(x_nchw, gamma, beta, eps=1e-3):
    N, C, H, W = x_nchw.shape
    HW = H * W

    if N == 1:
        # Native layout: (1, C, H, W) -> (C, H*W) is a free reshape.
        x2d = x_nchw.reshape(C, HW)
    else:
        # TODO(synk): N > 1 needs a (N,C,HW)->(C,N*HW) transpose; the module
        # only ever sees N == 1, so this is just a correctness fallback.
        x2d = jnp.transpose(x_nchw.reshape(N, C, HW), (1, 0, 2)).reshape(C, N * HW)

    S = x2d.shape[1]
    # Fuse gamma and beta into a single (C, 2) buffer: one DMA per grid step.
    gb = jnp.stack(
        [gamma.astype(jnp.float32), beta.astype(jnp.float32)], axis=-1
    )                                                              # (C, 2)

    block_c = _pick_channel_block(C)     # 1032 for C=2064 -> grid=(2,)
    grid = (C // block_c,)

    kernel = partial(batchnorm_kernel, eps=float(eps), inv_n=1.0 / float(S))

    y2d = pl.pallas_call(
        kernel,
        out_shape=jax.ShapeDtypeStruct((C, S), x_nchw.dtype),
        grid=grid,
        in_specs=[
            pl.BlockSpec((block_c, S), lambda i: (i, 0)),
            pl.BlockSpec((block_c, 2), lambda i: (i, 0)),
        ],
        out_specs=pl.BlockSpec((block_c, S), lambda i: (i, 0)),
        compiler_params=pltpu.CompilerParams(
            dimension_semantics=("parallel",)),
    )(x2d, gb)

    if N == 1:
        return y2d.reshape(N, C, H, W)
    return jnp.transpose(y2d.reshape(C, N, HW), (1, 0, 2)).reshape(N, C, H, W)


if __name__ == "__main__":
    key = jax.random.PRNGKey(0)
    kx, kg, kb = jax.random.split(key, 3)

    # Shapes implied by the module: BatchNorm2d(2064) on [1, 2064, 7, 7].
    N, C, H, W = 1, 2064, 7, 7
    x = jax.random.normal(kx, (N, C, H, W), dtype=jnp.float32)

    # Affine parameters (PyTorch default init is weight=1, bias=0; use
    # deterministic random values to exercise the affine path).
    gamma = 1.0 + 0.1 * jax.random.normal(kg, (C,), dtype=jnp.float32)
    beta = 0.1 * jax.random.normal(kb, (C,), dtype=jnp.float32)

    y = batchnorm2d(x, gamma, beta, eps=1e-3)
    jax.block_until_ready(y)

    # Pure-jnp reference of the training-mode forward (batch statistics).
    mean = jnp.mean(x, axis=(0, 2, 3), keepdims=True)
    var = jnp.mean((x - mean) ** 2, axis=(0, 2, 3), keepdims=True)
    y_ref = (x - mean) * jax.lax.rsqrt(var + 1e-3) * gamma.reshape(1, C, 1, 1) \
        + beta.reshape(1, C, 1, 1)

    assert y.shape == (N, C, H, W) and y.dtype == x.dtype
    assert float(jnp.max(jnp.abs(y - y_ref))) < 2e-4

    print("KERNEL_OK")
</pallas_src>

<mosaic_0001>
module attributes {stable_mosaic.version = 11 : i64} {
  func.func @batchnorm_kernel(%arg0: i32, %arg1: memref<1032x49xf32, #tpu.memory_space<vmem>>, %arg2: memref<1032x2xf32, #tpu.memory_space<vmem>>, %arg3: memref<1032x49xf32, #tpu.memory_space<vmem>>) attributes {dimension_semantics = [#tpu.dimension_semantics<parallel>], iteration_bounds = array<i64: 2>, scalar_prefetch = 0 : i64, scratch_operands = 0 : i64, tpu.core_type = #tpu.core_type<tc>, window_params = [{transform_indices = @transform_0, window_bounds = array<i64: 1032, 49>}, {transform_indices = @transform_1, window_bounds = array<i64: 1032, 2>}, {transform_indices = @transform_2, window_bounds = array<i64: 1032, 49>}]} {
    %c0 = arith.constant 0 : index
    %c0_0 = arith.constant 0 : index
    %0 = vector.load %arg1[%c0, %c0_0] : memref<1032x49xf32, #tpu.memory_space<vmem>>, vector<1032x49xf32>
    %cst = arith.constant dense<0.000000e+00> : vector<1032xf32>
    %1 = vector.multi_reduction <add>, %0, %cst [1] : vector<1032x49xf32> to vector<1032xf32>
    %2 = vector.shape_cast %1 : vector<1032xf32> to vector<1032x1xf32>
    %cst_1 = arith.constant 0.0204081628 : f32
    %3 = vector.broadcast %cst_1 : f32 to vector<1032x1xf32>
    %4 = arith.mulf %2, %3 : vector<1032x1xf32>
    %5 = arith.mulf %0, %0 : vector<1032x49xf32>
    %cst_2 = arith.constant dense<0.000000e+00> : vector<1032xf32>
    %6 = vector.multi_reduction <add>, %5, %cst_2 [1] : vector<1032x49xf32> to vector<1032xf32>
    %7 = vector.shape_cast %6 : vector<1032xf32> to vector<1032x1xf32>
    %cst_3 = arith.constant 0.0204081628 : f32
    %8 = vector.broadcast %cst_3 : f32 to vector<1032x1xf32>
    %9 = arith.mulf %7, %8 : vector<1032x1xf32>
    %10 = arith.mulf %4, %4 : vector<1032x1xf32>
    %11 = arith.subf %9, %10 : vector<1032x1xf32>
    %cst_4 = arith.constant 0.000000e+00 : f32
    %12 = vector.broadcast %cst_4 : f32 to vector<1032x1xf32>
    %13 = arith.maximumf %11, %12 : vector<1032x1xf32>
    %c0_5 = arith.constant 0 : index
    %c0_6 = arith.constant 0 : index
    %14 = vector.load %arg2[%c0_5, %c0_6] : memref<1032x2xf32, #tpu.memory_space<vmem>>, vector<1032x1xf32>
    %c0_7 = arith.constant 0 : index
    %c1 = arith.constant 1 : index
    %15 = vector.load %arg2[%c0_7, %c1] : memref<1032x2xf32, #tpu.memory_space<vmem>>, vector<1032x1xf32>
    %cst_8 = arith.constant 1.000000e-03 : f32
    %16 = vector.broadcast %cst_8 : f32 to vector<1032x1xf32>
    %17 = arith.addf %13, %16 : vector<1032x1xf32>
    %18 = math.rsqrt %17 : vector<1032x1xf32>
    %19 = arith.mulf %14, %18 : vector<1032x1xf32>
    %20 = arith.mulf %4, %19 : vector<1032x1xf32>
    %21 = arith.subf %15, %20 : vector<1032x1xf32>
    %c0_9 = arith.constant 0 : index
    %c0_10 = arith.constant 0 : index
    %22 = vector.load %arg1[%c0_9, %c0_10] : memref<1032x49xf32, #tpu.memory_space<vmem>>, vector<1032x49xf32>
    %23 = vector.broadcast %19 : vector<1032x1xf32> to vector<1032x49xf32>
    %24 = arith.mulf %22, %23 : vector<1032x49xf32>
    %25 = vector.broadcast %21 : vector<1032x1xf32> to vector<1032x49xf32>
    %26 = arith.addf %24, %25 : vector<1032x49xf32>
    %c0_11 = arith.constant 0 : index
    %c0_12 = arith.constant 0 : index
    %27 = vector.load %arg3[%c0_11, %c0_12] : memref<1032x49xf32, #tpu.memory_space<vmem>>, vector<1032x49xf32>
    tpu.vector_store %arg3[%c0_11, %c0_12], %26 {strides = array<i32>} : memref<1032x49xf32, #tpu.memory_space<vmem>>, vector<1032x49xf32>,
    return
  }
  func.func @transform_0(%arg0: i32) -> (i32, i32) {
    %c0_i32 = arith.constant 0 : i32
    %c0_i32_0 = arith.constant 0 : i32
    return %arg0, %c0_i32 : i32, i32
  }
  func.func @transform_1(%arg0: i32) -> (i32, i32) {
    %c0_i32 = arith.constant 0 : i32
    %c0_i32_0 = arith.constant 0 : i32
    return %arg0, %c0_i32 : i32, i32
  }
  func.func @transform_2(%arg0: i32) -> (i32, i32) {
    %c0_i32 = arith.constant 0 : i32
    %c0_i32_0 = arith.constant 0 : i32
    return %arg0, %c0_i32 : i32, i32
  }
}

</mosaic_0001>

<bundles_post_ra>
// kernel: tpu_custom_call.1
= control target key start
LH: loop header
LB: loop body
LE: loop exit
PB: predicated region body
PF: predicated region fallthrough
CT: control target
= control target key end

     0   :  { %s5511_s9 = smov 0   ;;  %s10274_s0 = inlined_call_operand.vmem [shape: f32[2064,49], index: 0, kind: input, shape index: {}]   ;;  %s10275_s1 = inlined_call_operand.vmem [shape: f32[2064,2], index: 1, kind: input, shape index: {}]   ;;  %s10276_s2 = inlined_call_operand.vmem [shape: f32[2064,49], index: 2, kind: output, shape index: {}]  }
   0x1 LB: > { %s4882_s10 = sadd.s32 4294967295, %s5491_s9   ;;  %p4886_p0 = scmp.ge.s32.totalorder %s5491_s9, 1  ;;  %s5491_s9 = sphi %s5511_s9, %s12_s9  }
   0x2   : > { %p124_p1 = scmp.lt.s32.totalorder %s5491_s9, 3 }
   0x4   : > { %p125_p2 = pnand %p4886_p0, %p124_p1 }
   0x6   : > { %128 = sbr.rel (%p125_p2) target bundleno = 1472 (0x5c0), region = 28 }
   0xb   : > { %s151_s11 = smul.u32 129, %s4882_s10  ;;  %vm298_vm0 = vcmask 400384   ;;  %s5493_s19 = smov 1  }
   0xd   : > { %p152_p3 = scmp.lt.s32.totalorder %s151_s11, 257 }
   0xf   : > { %s11866_s11 = smov (!%p152_p3, %s151_s11), 257 }
  0x10   : > { %s5519_s12 = sshll.u32 %s11866_s11, 3 }
  0x11   : > { %s5525_s15 = scalar_lea.vmem %s10274_s0, %s5519_s12  ;;  %s7146_s18 = scalar_lea.vmem %s10275_s1, %s5519_s12 }
  0x12   : > { %v5528_v0 = vld [vmem:[%s5525_s15 + $0x10] sm:$0xff]  ;;  %v5531_v1 = vld [vmem:[%s5525_s15] sm:$0xff]  ;;  %v5534_v2 = vld [vmem:[%s5525_s15 + $0x18] sm:$0xff]  ;;  %s9623_s22 = scalar_lea.vmem %s10276_s2, %s5519_s12 }
  0x13   : > { %v305_v3 = vsel %vm298_vm0, %v5528_v0, 0.0  ;;  %v299_v4 = vsel %vm298_vm0, %v5531_v1, 0.0  ;;  %v5541_v5 = vld [vmem:[%s5525_s15 + $0x8] sm:$0xff]  ;;  %v308_v6 = vsel %vm298_vm0, %v5534_v2, 0.0  ;;  %v5551_v9 = vld [vmem:[%s5525_s15 + $0x20] sm:$0xff]  ;;  %v5558_v12 = vld [vmem:[%s5525_s15 + $0x38] sm:$0xff] }
  0x14   : > { %306 = vadd.xlane.f32.xlu1 %v305_v3  ;;  %300 = vadd.xlane.f32.xlu0 %v299_v4  ;;  %v302_v7 = vsel %vm298_vm0, %v5541_v5, 0.0  ;;  %v5548_v8 = vld [vmem:[%s5525_s15 + $0x28] sm:$0xff]  ;;  %v311_v11 = vsel %vm298_vm0, %v5551_v9, 0.0  ;;  %v5561_v13 = vld [vmem:[%s5525_s15 + $0x30] sm:$0xff]  ;;  %v320_v14 = vsel %vm298_vm0, %v5558_v12, 0.0  ;;  %v5571_v17 = vld [vmem:[%s5525_s15 + $0x40] sm:$0xff] }
  0x15   : > { %v314_v10 = vsel %vm298_vm0, %v5548_v8, 0.0  ;;  %v317_v15 = vsel %vm298_vm0, %v5561_v13, 0.0  ;;  %v5568_v16 = vld [vmem:[%s5525_s15 + $0x48] sm:$0xff]  ;;  %v323_v19 = vsel %vm298_vm0, %v5571_v17, 0.0  ;;  %v5578_v20 = vld [vmem:[%s5525_s15 + $0x58] sm:$0xff]  ;;  %v5581_v21 = vld [vmem:[%s5525_s15 + $0x50] sm:$0xff] }
  0x16   : > { %v326_v18 = vsel %vm298_vm0, %v5568_v16, 0.0  ;;  %v332_v22 = vsel %vm298_vm0, %v5578_v20, 0.0  ;;  %v329_v23 = vsel %vm298_vm0, %v5581_v21, 0.0  ;;  %v5588_v24 = vld [vmem:[%s5525_s15 + $0x68] sm:$0xff]  ;;  %v5591_v25 = vld [vmem:[%s5525_s15 + $0x60] sm:$0xff]  ;;  %v5598_v28 = vld [vmem:[%s5525_s15 + $0x78] sm:$0xff] }
  0x17   : > { %v338_v26 = vsel %vm298_vm0, %v5588_v24, 0.0  ;;  %v335_v27 = vsel %vm298_vm0, %v5591_v25, 0.0  ;;  %v5601_v29 = vld [vmem:[%s5525_s15 + $0x70] sm:$0xff]  ;;  %v344_v30 = vsel %vm298_vm0, %v5598_v28, 0.0  ;;  %v5608_v32 = vld [vmem:[%s5525_s15 + $0x88] sm:$0xff]  ;;  %v5611_v33 = vld [vmem:[%s5525_s15 + $0x80] sm:$0xff] }
  0x18   : > { %309 = vadd.xlane.f32.xlu1 %v308_v6  ;;  %303 = vadd.xlane.f32.xlu0 %v302_v7  ;;  %v341_v31 = vsel %vm298_vm0, %v5601_v29, 0.0  ;;  %v350_v34 = vsel %vm298_vm0, %v5608_v32, 0.0  ;;  %v347_v35 = vsel %vm298_vm0, %v5611_v33, 0.0  ;;  %v5618_v36 = vld [vmem:[%s5525_s15 + $0x98] sm:$0xff]  ;;  %v5621_v37 = vld [vmem:[%s5525_s15 + $0x90] sm:$0xff]  ;;  %v5628_v40 = vld [vmem:[%s5525_s15 + $0xa8] sm:$0xff] }
  0x19   : > { %v356_v38 = vsel %vm298_vm0, %v5618_v36, 0.0  ;;  %v353_v39 = vsel %vm298_vm0, %v5621_v37, 0.0  ;;  %v5631_v41 = vld [vmem:[%s5525_s15 + $0xa0] sm:$0xff]  ;;  %v362_v42 = vsel %vm298_vm0, %v5628_v40, 0.0  ;;  %v5638_v44 = vld [vmem:[%s5525_s15 + $0xb8] sm:$0xff]  ;;  %v5641_v45 = vld [vmem:[%s5525_s15 + $0xb0] sm:$0xff] }
  0x1a   : > { %v359_v43 = vsel %vm298_vm0, %v5631_v41, 0.0  ;;  %v368_v46 = vsel %vm298_vm0, %v5638_v44, 0.0  ;;  %v365_v47 = vsel %vm298_vm0, %v5641_v45, 0.0  ;;  %v5648_v48 = vld [vmem:[%s5525_s15 + $0xc8] sm:$0xff]  ;;  %v5651_v49 = vld [vmem:[%s5525_s15 + $0xc0] sm:$0xff]  ;;  %v5658_v52 = vld [vmem:[%s5525_s15 + $0xd8] sm:$0xff] }
  0x1b   : > { %v374_v50 = vsel %vm298_vm0, %v5648_v48, 0.0  ;;  %v371_v51 = vsel %vm298_vm0, %v5651_v49, 0.0  ;;  %v5661_v53 = vld [vmem:[%s5525_s15 + $0xd0] sm:$0xff]  ;;  %v380_v54 = vsel %vm298_vm0, %v5658_v52, 0.0  ;;  %v5668_v56 = vld [vmem:[%s5525_s15 + $0xe8] sm:$0xff]  ;;  %v5671_v57 = vld [vmem:[%s5525_s15 + $0xe0] sm:$0xff] }
  0x1c   : > { %315 = vadd.xlane.f32.xlu1 %v314_v10  ;;  %312 = vadd.xlane.f32.xlu0 %v311_v11  ;;  %v377_v55 = vsel %vm298_vm0, %v5661_v53, 0.0  ;;  %v386_v58 = vsel %vm298_vm0, %v5668_v56, 0.0  ;;  %v383_v59 = vsel %vm298_vm0, %v5671_v57, 0.0  ;;  %v5678_v60 = vld [vmem:[%s5525_s15 + $0xf8] sm:$0xff]  ;;  %v5681_v61 = vld [vmem:[%s5525_s15 + $0xf0] sm:$0xff]  ;;  %v5688_v3 = vld [vmem:[%s5525_s15 + $0x108] sm:$0xff] }
  0x1d   : > { %v392_v62 = vsel %vm298_vm0, %v5678_v60, 0.0  ;;  %v389_v63 = vsel %vm298_vm0, %v5681_v61, 0.0  ;;  %v5691_v4 = vld [vmem:[%s5525_s15 + $0x100] sm:$0xff]  ;;  %v398_v6 = vsel %vm298_vm0, %v5688_v3, 0.0  ;;  %v5698_v10 = vld [vmem:[%s5525_s15 + $0x118] sm:$0xff]  ;;  %v5701_v11 = vld [vmem:[%s5525_s15 + $0x110] sm:$0xff] }
  0x1e   : > { %v395_v7 = vsel %vm298_vm0, %v5691_v4, 0.0 }
  0x20   : > { %321 = vadd.xlane.f32.xlu1 %v320_v14  ;;  %318 = vadd.xlane.f32.xlu0 %v317_v15  ;;  %v404_v14 = vsel %vm298_vm0, %v5698_v10, 0.0  ;;  %v401_v15 = vsel %vm298_vm0, %v5701_v11, 0.0 }
  0x24   : > { %327 = vadd.xlane.f32.xlu1 %v326_v18  ;;  %324 = vadd.xlane.f32.xlu0 %v323_v19  ;;  %v5708_v18 = vld [vmem:[%s5525_s15 + $0x128] sm:$0xff]  ;;  %v5711_v19 = vld [vmem:[%s5525_s15 + $0x120] sm:$0xff] }
  0x28   : > { %333 = vadd.xlane.f32.xlu1 %v332_v22  ;;  %330 = vadd.xlane.f32.xlu0 %v329_v23  ;;  %v410_v22 = vsel %vm298_vm0, %v5708_v18, 0.0  ;;  %v407_v23 = vsel %vm298_vm0, %v5711_v19, 0.0 }
  0x2c   : > { %339 = vadd.xlane.f32.xlu1 %v338_v26  ;;  %336 = vadd.xlane.f32.xlu0 %v335_v27  ;;  %v5718_v26 = vld [vmem:[%s5525_s15 + $0x138] sm:$0xff]  ;;  %v5721_v27 = vld [vmem:[%s5525_s15 + $0x130] sm:$0xff] }
  0x30   : > { %345 = vadd.xlane.f32.xlu1 %v344_v30  ;;  %342 = vadd.xlane.f32.xlu0 %v341_v31  ;;  %v416_v30 = vsel %vm298_vm0, %v5718_v26, 0.0  ;;  %v413_v31 = vsel %vm298_vm0, %v5721_v27, 0.0 }
  0x34   : > { %351 = vadd.xlane.f32.xlu1 %v350_v34  ;;  %348 = vadd.xlane.f32.xlu0 %v347_v35  ;;  %v5728_v34 = vld [vmem:[%s5525_s15 + $0x148] sm:$0xff]  ;;  %v5731_v35 = vld [vmem:[%s5525_s15 + $0x140] sm:$0xff] }
  0x38   : > { %357 = vadd.xlane.f32.xlu1 %v356_v38  ;;  %354 = vadd.xlane.f32.xlu0 %v353_v39  ;;  %v422_v38 = vsel %vm298_vm0, %v5728_v34, 0.0  ;;  %v419_v39 = vsel %vm298_vm0, %v5731_v35, 0.0 }
  0x3c   : > { %363 = vadd.xlane.f32.xlu1 %v362_v42  ;;  %360 = vadd.xlane.f32.xlu0 %v359_v43  ;;  %v5738_v42 = vld [vmem:[%s5525_s15 + $0x158] sm:$0xff]  ;;  %v5741_v43 = vld [vmem:[%s5525_s15 + $0x150] sm:$0xff] }
  0x40   : > { %369 = vadd.xlane.f32.xlu1 %v368_v46  ;;  %366 = vadd.xlane.f32.xlu0 %v365_v47  ;;  %v428_v46 = vsel %vm298_vm0, %v5738_v42, 0.0  ;;  %v425_v47 = vsel %vm298_vm0, %v5741_v43, 0.0 }
  0x44   : > { %375 = vadd.xlane.f32.xlu1 %v374_v50  ;;  %372 = vadd.xlane.f32.xlu0 %v371_v51  ;;  %v5748_v50 = vld [vmem:[%s5525_s15 + $0x168] sm:$0xff]  ;;  %v5751_v51 = vld [vmem:[%s5525_s15 + $0x160] sm:$0xff] }
  0x48   : > { %381 = vadd.xlane.f32.xlu1 %v380_v54  ;;  %378 = vadd.xlane.f32.xlu0 %v377_v55  ;;  %v434_v54 = vsel %vm298_vm0, %v5748_v50, 0.0  ;;  %v431_v55 = vsel %vm298_vm0, %v5751_v51, 0.0 }
  0x4c   : > { %387 = vadd.xlane.f32.xlu1 %v386_v58  ;;  %384 = vadd.xlane.f32.xlu0 %v383_v59  ;;  %v5758_v58 = vld [vmem:[%s5525_s15 + $0x178] sm:$0xff]  ;;  %v5761_v59 = vld [vmem:[%s5525_s15 + $0x170] sm:$0xff] }
  0x50   : > { %393 = vadd.xlane.f32.xlu1 %v392_v62  ;;  %390 = vadd.xlane.f32.xlu0 %v389_v63  ;;  %v440_v62 = vsel %vm298_vm0, %v5758_v58, 0.0  ;;  %v437_v63 = vsel %vm298_vm0, %v5761_v59, 0.0 }
  0x54   : > { %399 = vadd.xlane.f32.xlu1 %v398_v6  ;;  %396 = vadd.xlane.f32.xlu0 %v395_v7  ;;  %v5768_v6 = vld [vmem:[%s5525_s15 + $0x188] sm:$0xff]  ;;  %v5771_v7 = vld [vmem:[%s5525_s15 + $0x180] sm:$0xff] }
  0x58   : > { %405 = vadd.xlane.f32.xlu1 %v404_v14  ;;  %402 = vadd.xlane.f32.xlu0 %v401_v15  ;;  %v446_v14 = vsel %vm298_vm0, %v5768_v6, 0.0  ;;  %v443_v15 = vsel %vm298_vm0, %v5771_v7, 0.0 }
  0x5c   : > { %411 = vadd.xlane.f32.xlu1 %v410_v22  ;;  %408 = vadd.xlane.f32.xlu0 %v407_v23  ;;  %v5778_v22 = vld [vmem:[%s5525_s15 + $0x198] sm:$0xff]  ;;  %v5781_v23 = vld [vmem:[%s5525_s15 + $0x190] sm:$0xff] }
  0x5d   : > { %10518 = vst [vmem:[#allocation2_spill] sm:$0xff] %v5778_v22 }
  0x60   : > { %417 = vadd.xlane.f32.xlu1 %v416_v30  ;;  %414 = vadd.xlane.f32.xlu0 %v413_v31  ;;  %v452_v30 = vsel %vm298_vm0, %v5778_v22, 0.0  ;;  %v449_v31 = vsel %vm298_vm0, %v5781_v23, 0.0 }
  0x64   : > { %423 = vadd.xlane.f32.xlu1 %v422_v38  ;;  %420 = vadd.xlane.f32.xlu0 %v419_v39  ;;  %v5788_v38 = vld [vmem:[%s5525_s15 + $0x1a8] sm:$0xff]  ;;  %v5791_v39 = vld [vmem:[%s5525_s15 + $0x1a0] sm:$0xff] }
  0x65   : > { %10519 = vst [vmem:[#allocation3_spill] sm:$0xff] %v5788_v38  ;;  %10520 = vst [vmem:[#allocation4_spill] sm:$0xff] %v5791_v39 }
  0x68   : > { %429 = vadd.xlane.f32.xlu1 %v428_v46  ;;  %426 = vadd.xlane.f32.xlu0 %v425_v47  ;;  %v458_v46 = vsel %vm298_vm0, %v5788_v38, 0.0  ;;  %v455_v47 = vsel %vm298_vm0, %v5791_v39, 0.0  ;;  %v5839_v38 = vld [vmem:[%s5525_s15 + $0x1f0] sm:$0xff] }
  0x69   : > { %10529 = vst [vmem:[#allocation13_spill] sm:$0xff] %v5839_v38  ;;  %v295_v39 = vld [vmem:[%s5525_s15 + $0x3f0] sm:$0xff] }
  0x6c   : > { %435 = vadd.xlane.f32.xlu1 %v434_v54  ;;  %432 = vadd.xlane.f32.xlu0 %v431_v55  ;;  %v5798_v54 = vld [vmem:[%s5525_s15 + $0x1b8] sm:$0xff]  ;;  %v5801_v55 = vld [vmem:[%s5525_s15 + $0x1b0] sm:$0xff] }
  0x6d   : > { %10521 = vst [vmem:[#allocation5_spill] sm:$0xff] %v5798_v54  ;;  %10522 = vst [vmem:[#allocation6_spill] sm:$0xff] %v5801_v55 }
  0x70   : > { %441 = vadd.xlane.f32.xlu1 %v440_v62  ;;  %438 = vadd.xlane.f32.xlu0 %v437_v63  ;;  %v464_v62 = vsel %vm298_vm0, %v5798_v54, 0.0  ;;  %v461_v63 = vsel %vm298_vm0, %v5801_v55, 0.0  ;;  %v5828_v54 = vld [vmem:[%s5525_s15 + $0x1e8] sm:$0xff]  ;;  %v240_v55 = vld [vmem:[%s5525_s15 + $0x238] sm:$0xff] }
  0x71   : > { %10527 = vst [vmem:[#allocation11_spill] sm:$0xff] %v5828_v54 }
  0x74   : > { %447 = vadd.xlane.f32.xlu1 %v446_v14  ;;  %444 = vadd.xlane.f32.xlu0 %v443_v15  ;;  %v5808_v14 = vld [vmem:[%s5525_s15 + $0x1c8] sm:$0xff]  ;;  %v5811_v15 = vld [vmem:[%s5525_s15 + $0x1c0] sm:$0xff] }
  0x75   : > { %10523 = vst [vmem:[#allocation7_spill] sm:$0xff] %v5808_v14  ;;  %10524 = vst [vmem:[#allocation8_spill] sm:$0xff] %v5811_v15 }
  0x78   : > { %453 = vadd.xlane.f32.xlu1 %v452_v30  ;;  %450 = vadd.xlane.f32.xlu0 %v449_v31  ;;  %v470_v30 = vsel %vm298_vm0, %v5808_v14, 0.0  ;;  %v467_v31 = vsel %vm298_vm0, %v5811_v15, 0.0  ;;  %v5831_v14 = vld [vmem:[%s5525_s15 + $0x1e0] sm:$0xff]  ;;  %v232_v15 = vld [vmem:[%s5525_s15 + $0x1f8] sm:$0xff] }
  0x79   : > { %10528 = vst [vmem:[#allocation12_spill] sm:$0xff] %v5831_v14 }
  0x7c   : > { %459 = vadd.xlane.f32.xlu1 %v458_v46  ;;  %456 = vadd.xlane.f32.xlu0 %v455_v47  ;;  %v5818_v46 = vld [vmem:[%s5525_s15 + $0x1d8] sm:$0xff]  ;;  %v5821_v47 = vld [vmem:[%s5525_s15 + $0x1d0] sm:$0xff] }
  0x7d   : > { %10525 = vst [vmem:[#allocation9_spill] sm:$0xff] %v5818_v46  ;;  %10526 = vst [vmem:[#allocation10_spill] sm:$0xff] %v5821_v47 }
  0x80   : > { %465 = vadd.xlane.f32.xlu1 %v464_v62  ;;  %462 = vadd.xlane.f32.xlu0 %v461_v63  ;;  %v476_v62 = vsel %vm298_vm0, %v5818_v46, 0.0  ;;  %v473_v63 = vsel %vm298_vm0, %v5821_v47, 0.0  ;;  %v488_v46 = vsel %vm298_vm0, %v232_v15, 0.0  ;;  %v5846_v47 = vld [vmem:[%s5525_s15 + $0x200] sm:$0xff] }
  0x81   : > { %10530 = vst [vmem:[#allocation14_spill] sm:$0xff] %v5846_v47 }
  0x84   : > { %471 = vadd.xlane.f32.xlu1 %v470_v30  ;;  %468 = vadd.xlane.f32.xlu0 %v467_v31  ;;  %v482_v30 = vsel %vm298_vm0, %v5828_v54, 0.0  ;;  %v479_v31 = vsel %vm298_vm0, %v5831_v14, 0.0  ;;  %v236_v14 = vld [vmem:[%s5525_s15 + $0x218] sm:$0xff] }
  0x85   : > { %v500_v15 = vsel %vm298_vm0, %v236_v14, 0.0 }
  0x88   : > { %477 = vadd.xlane.f32.xlu1 %v476_v62  ;;  %474 = vadd.xlane.f32.xlu0 %v473_v63  ;;  %v485_v62 = vsel %vm298_vm0, %v5839_v38, 0.0  ;;  %v234_v63 = vld [vmem:[%s5525_s15 + $0x208] sm:$0xff] }
  0x89   : > { %v494_v54 = vsel %vm298_vm0, %v234_v63, 0.0 }
  0x8c   : > { %483 = vadd.xlane.f32.xlu1 %v482_v30  ;;  %480 = vadd.xlane.f32.xlu0 %v479_v31  ;;  %v491_v30 = vsel %vm298_vm0, %v5846_v47, 0.0  ;;  %v5853_v31 = vld [vmem:[%s5525_s15 + $0x210] sm:$0xff] }
  0x8d   : > { %10531 = vst [vmem:[#allocation15_spill] sm:$0xff] %v5853_v31  ;;  %v497_v38 = vsel %vm298_vm0, %v5853_v31, 0.0  ;;  %v512_v31 = vsel %vm298_vm0, %v240_v55, 0.0  ;;  %v243_v55 = vld [vmem:[%s5525_s15 + $0x250] sm:$0xff] }
  0x90   : > { %489 = vadd.xlane.f32.xlu1 %v488_v46  ;;  %486 = vadd.xlane.f32.xlu0 %v485_v62  ;;  %v238_v46 = vld [vmem:[%s5525_s15 + $0x228] sm:$0xff]  ;;  %v5860_v62 = vld [vmem:[%s5525_s15 + $0x220] sm:$0xff] }
  0x91   : > { %10532 = vst [vmem:[#allocation16_spill] sm:$0xff] %v5860_v62  ;;  %v506_v63 = vsel %vm298_vm0, %v238_v46, 0.0  ;;  %v503_v47 = vsel %vm298_vm0, %v5860_v62, 0.0  ;;  %v241_v46 = vld [vmem:[%s5525_s15 + $0x240] sm:$0xff] }
  0x94   : > { %495 = vadd.xlane.f32.xlu1 %v494_v54  ;;  %492 = vadd.xlane.f32.xlu0 %v491_v30  ;;  %v5867_v54 = vld [vmem:[%s5525_s15 + $0x230] sm:$0xff] }
  0x95   : > { %10533 = vst [vmem:[#allocation17_spill] sm:$0xff] %v5867_v54 }
  0x98   : > { %501 = vadd.xlane.f32.xlu1 %v500_v15  ;;  %498 = vadd.xlane.f32.xlu0 %v497_v38  ;;  %v509_v38 = vsel %vm298_vm0, %v5867_v54, 0.0  ;;  %v242_v15 = vld [vmem:[%s5525_s15 + $0x248] sm:$0xff] }
  0x9c   : > { %507 = vadd.xlane.f32.xlu1 %v506_v63  ;;  %504 = vadd.xlane.f32.xlu0 %v503_v47  ;;  %v518_v47 = vsel %vm298_vm0, %v242_v15, 0.0  ;;  %v515_v63 = vsel %vm298_vm0, %v241_v46, 0.0 }
  0x9d   : > { %v5869_v14 = vpop.xlane.xlu1 %306  ;;  %v5871_v30 = vpop.xlane.xlu0 %300 }
  0x9e   : > { %10534 = vst [vmem:[#allocation18_spill] sm:$0xff] %v5869_v14  ;;  %10535 = vst [vmem:[#allocation19_spill] sm:$0xff] %v5871_v30  ;;  %v244_v14 = vld [vmem:[%s5525_s15 + $0x258] sm:$0xff] }
  0xa0   : > { %513 = vadd.xlane.f32.xlu1 %v512_v31  ;;  %510 = vadd.xlane.f32.xlu0 %v509_v38  ;;  %v524_v31 = vsel %vm298_vm0, %v244_v14, 0.0  ;;  %v521_v38 = vsel %vm298_vm0, %v243_v55, 0.0 }
  0xa1   : > { %v5878_v62 = vpop.xlane.xlu1 %309  ;;  %v5880_v22 = vpop.xlane.xlu0 %303 }
  0xa2   : > { %10536 = vst [vmem:[#allocation20_spill] sm:$0xff] %v5878_v62  ;;  %10537 = vst [vmem:[#allocation21_spill] sm:$0xff] %v5880_v22  ;;  %v246_v62 = vld [vmem:[%s5525_s15 + $0x268] sm:$0xff]  ;;  %v245_v22 = vld [vmem:[%s5525_s15 + $0x260] sm:$0xff] }
  0xa4   : > { %519 = vadd.xlane.f32.xlu1 %v518_v47  ;;  %516 = vadd.xlane.f32.xlu0 %v515_v63  ;;  %v530_v47 = vsel %vm298_vm0, %v246_v62, 0.0  ;;  %v527_v63 = vsel %vm298_vm0, %v245_v22, 0.0 }
  0xa5   : > { %v5886_v30 = vpop.xlane.xlu1 %315  ;;  %v5888_v54 = vpop.xlane.xlu0 %312 }
  0xa6   : > { %10538 = vst [vmem:[#allocation22_spill] sm:$0xff] %v5886_v30  ;;  %10539 = vst [vmem:[#allocation23_spill] sm:$0xff] %v5888_v54  ;;  %v248_v30 = vld [vmem:[%s5525_s15 + $0x278] sm:$0xff]  ;;  %v247_v54 = vld [vmem:[%s5525_s15 + $0x270] sm:$0xff] }
  0xa8   : > { %525 = vadd.xlane.f32.xlu1 %v524_v31  ;;  %522 = vadd.xlane.f32.xlu0 %v521_v38  ;;  %v536_v31 = vsel %vm298_vm0, %v248_v30, 0.0  ;;  %v533_v38 = vsel %vm298_vm0, %v247_v54, 0.0 }
  0xa9   : > { %v5894_v15 = vpop.xlane.xlu1 %321  ;;  %v5896_v46 = vpop.xlane.xlu0 %318 }
  0xaa   : > { %10540 = vst [vmem:[#allocation24_spill] sm:$0xff] %v5894_v15  ;;  %10541 = vst [vmem:[#allocation25_spill] sm:$0xff] %v5896_v46  ;;  %v250_v15 = vld [vmem:[%s5525_s15 + $0x288] sm:$0xff]  ;;  %v249_v46 = vld [vmem:[%s5525_s15 + $0x280] sm:$0xff] }
  0xac   : > { %531 = vadd.xlane.f32.xlu1 %v530_v47  ;;  %528 = vadd.xlane.f32.xlu0 %v527_v63  ;;  %v542_v47 = vsel %vm298_vm0, %v250_v15, 0.0  ;;  %v539_v63 = vsel %vm298_vm0, %v249_v46, 0.0 }
  0xad   : > { %v5902_v14 = vpop.xlane.xlu1 %327  ;;  %v5904_v55 = vpop.xlane.xlu0 %324 }
  0xae   : > { %10542 = vst [vmem:[#allocation26_spill] sm:$0xff] %v5902_v14  ;;  %10543 = vst [vmem:[#allocation27_spill] sm:$0xff] %v5904_v55  ;;  %v252_v14 = vld [vmem:[%s5525_s15 + $0x298] sm:$0xff]  ;;  %v251_v55 = vld [vmem:[%s5525_s15 + $0x290] sm:$0xff] }
  0xb0   : > { %537 = vadd.xlane.f32.xlu1 %v536_v31  ;;  %534 = vadd.xlane.f32.xlu0 %v533_v38  ;;  %v548_v31 = vsel %vm298_vm0, %v252_v14, 0.0  ;;  %v545_v38 = vsel %vm298_vm0, %v251_v55, 0.0 }
  0xb1   : > { %v5910_v22 = vpop.xlane.xlu1 %333  ;;  %v5912_v62 = vpop.xlane.xlu0 %330 }
  0xb2   : > { %10544 = vst [vmem:[#allocation28_spill] sm:$0xff] %v5910_v22  ;;  %10545 = vst [vmem:[#allocation29_spill] sm:$0xff] %v5912_v62  ;;  %v254_v22 = vld [vmem:[%s5525_s15 + $0x2a8] sm:$0xff]  ;;  %v253_v62 = vld [vmem:[%s5525_s15 + $0x2a0] sm:$0xff] }
  0xb4   : > { %543 = vadd.xlane.f32.xlu1 %v542_v47  ;;  %540 = vadd.xlane.f32.xlu0 %v539_v63  ;;  %v554_v47 = vsel %vm298_vm0, %v254_v22, 0.0  ;;  %v551_v63 = vsel %vm298_vm0, %v253_v62, 0.0 }
  0xb5   : > { %v5918_v54 = vpop.xlane.xlu1 %339  ;;  %v5920_v30 = vpop.xlane.xlu0 %336 }
  0xb6   : > { %10546 = vst [vmem:[#allocation30_spill] sm:$0xff] %v5918_v54  ;;  %10547 = vst [vmem:[#allocation31_spill] sm:$0xff] %v5920_v30  ;;  %v256_v54 = vld [vmem:[%s5525_s15 + $0x2b8] sm:$0xff]  ;;  %v255_v30 = vld [vmem:[%s5525_s15 + $0x2b0] sm:$0xff] }
  0xb8   : > { %549 = vadd.xlane.f32.xlu1 %v548_v31  ;;  %546 = vadd.xlane.f32.xlu0 %v545_v38  ;;  %v560_v31 = vsel %vm298_vm0, %v256_v54, 0.0  ;;  %v557_v38 = vsel %vm298_vm0, %v255_v30, 0.0 }
  0xb9   : > { %v5926_v15 = vpop.xlane.xlu1 %345  ;;  %v5928_v46 = vpop.xlane.xlu0 %342 }
  0xba   : > { %10548 = vst [vmem:[#allocation32_spill] sm:$0xff] %v5926_v15  ;;  %10549 = vst [vmem:[#allocation33_spill] sm:$0xff] %v5928_v46  ;;  %v258_v15 = vld [vmem:[%s5525_s15 + $0x2c8] sm:$0xff]  ;;  %v257_v46 = vld [vmem:[%s5525_s15 + $0x2c0] sm:$0xff] }
  0xbc   : > { %555 = vadd.xlane.f32.xlu1 %v554_v47  ;;  %552 = vadd.xlane.f32.xlu0 %v551_v63  ;;  %v566_v47 = vsel %vm298_vm0, %v258_v15, 0.0  ;;  %v563_v63 = vsel %vm298_vm0, %v257_v46, 0.0 }
  0xbd   : > { %v5934_v14 = vpop.xlane.xlu1 %351  ;;  %v5936_v55 = vpop.xlane.xlu0 %348 }
  0xbe   : > { %10550 = vst [vmem:[#allocation34_spill] sm:$0xff] %v5934_v14  ;;  %10551 = vst [vmem:[#allocation35_spill] sm:$0xff] %v5936_v55  ;;  %v260_v14 = vld [vmem:[%s5525_s15 + $0x2d8] sm:$0xff]  ;;  %v259_v55 = vld [vmem:[%s5525_s15 + $0x2d0] sm:$0xff] }
  0xc0   : > { %561 = vadd.xlane.f32.xlu1 %v560_v31  ;;  %558 = vadd.xlane.f32.xlu0 %v557_v38  ;;  %v572_v31 = vsel %vm298_vm0, %v260_v14, 0.0  ;;  %v569_v38 = vsel %vm298_vm0, %v259_v55, 0.0 }
  0xc1   : > { %v5942_v22 = vpop.xlane.xlu1 %357  ;;  %v5944_v62 = vpop.xlane.xlu0 %354 }
  0xc2   : > { %10552 = vst [vmem:[#allocation36_spill] sm:$0xff] %v5942_v22  ;;  %10553 = vst [vmem:[#allocation37_spill] sm:$0xff] %v5944_v62  ;;  %v262_v22 = vld [vmem:[%s5525_s15 + $0x2e8] sm:$0xff]  ;;  %v261_v62 = vld [vmem:[%s5525_s15 + $0x2e0] sm:$0xff] }
  0xc4   : > { %567 = vadd.xlane.f32.xlu1 %v566_v47  ;;  %564 = vadd.xlane.f32.xlu0 %v563_v63  ;;  %v578_v47 = vsel %vm298_vm0, %v262_v22, 0.0  ;;  %v575_v63 = vsel %vm298_vm0, %v261_v62, 0.0 }
  0xc5   : > { %v5950_v54 = vpop.xlane.xlu1 %363  ;;  %v5952_v30 = vpop.xlane.xlu0 %360 }
  0xc6   : > { %10554 = vst [vmem:[#allocation38_spill] sm:$0xff] %v5950_v54  ;;  %10555 = vst [vmem:[#allocation39_spill] sm:$0xff] %v5952_v30  ;;  %v264_v54 = vld [vmem:[%s5525_s15 + $0x2f8] sm:$0xff]  ;;  %v263_v30 = vld [vmem:[%s5525_s15 + $0x2f0] sm:$0xff] }
  0xc8   : > { %573 = vadd.xlane.f32.xlu1 %v572_v31  ;;  %570 = vadd.xlane.f32.xlu0 %v569_v38  ;;  %v584_v31 = vsel %vm298_vm0, %v264_v54, 0.0  ;;  %v581_v38 = vsel %vm298_vm0, %v263_v30, 0.0 }
  0xc9   : > { %v5958_v15 = vpop.xlane.xlu1 %369  ;;  %v5960_v46 = vpop.xlane.xlu0 %366 }
  0xca   : > { %10556 = vst [vmem:[#allocation40_spill] sm:$0xff] %v5958_v15  ;;  %10557 = vst [vmem:[#allocation41_spill] sm:$0xff] %v5960_v46  ;;  %v266_v15 = vld [vmem:[%s5525_s15 + $0x308] sm:$0xff]  ;;  %v265_v46 = vld [vmem:[%s5525_s15 + $0x300] sm:$0xff] }
  0xcc   : > { %579 = vadd.xlane.f32.xlu1 %v578_v47  ;;  %576 = vadd.xlane.f32.xlu0 %v575_v63  ;;  %v590_v47 = vsel %vm298_vm0, %v266_v15, 0.0  ;;  %v587_v63 = vsel %vm298_vm0, %v265_v46, 0.0 }
  0xcd   : > { %v5966_v14 = vpop.xlane.xlu1 %375  ;;  %v5968_v55 = vpop.xlane.xlu0 %372 }
  0xce   : > { %10558 = vst [vmem:[#allocation42_spill] sm:$0xff] %v5966_v14  ;;  %10559 = vst [vmem:[#allocation43_spill] sm:$0xff] %v5968_v55  ;;  %v268_v14 = vld [vmem:[%s5525_s15 + $0x318] sm:$0xff]  ;;  %v267_v55 = vld [vmem:[%s5525_s15 + $0x310] sm:$0xff] }
  0xd0   : > { %585 = vadd.xlane.f32.xlu1 %v584_v31  ;;  %582 = vadd.xlane.f32.xlu0 %v581_v38  ;;  %v596_v31 = vsel %vm298_vm0, %v268_v14, 0.0  ;;  %v593_v38 = vsel %vm298_vm0, %v267_v55, 0.0 }
  0xd1   : > { %v5974_v22 = vpop.xlane.xlu1 %381  ;;  %v5976_v62 = vpop.xlane.xlu0 %378 }
  0xd2   : > { %10560 = vst [vmem:[#allocation44_spill] sm:$0xff] %v5974_v22  ;;  %10561 = vst [vmem:[#allocation45_spill] sm:$0xff] %v5976_v62  ;;  %v270_v22 = vld [vmem:[%s5525_s15 + $0x328] sm:$0xff]  ;;  %v269_v62 = vld [vmem:[%s5525_s15 + $0x320] sm:$0xff] }
  0xd4   : > { %591 = vadd.xlane.f32.xlu1 %v590_v47  ;;  %588 = vadd.xlane.f32.xlu0 %v587_v63  ;;  %v602_v47 = vsel %vm298_vm0, %v270_v22, 0.0  ;;  %v599_v63 = vsel %vm298_vm0, %v269_v62, 0.0 }
  0xd5   : > { %v5982_v54 = vpop.xlane.xlu1 %387  ;;  %v5984_v30 = vpop.xlane.xlu0 %384 }
  0xd6   : > { %10562 = vst [vmem:[#allocation46_spill] sm:$0xff] %v5982_v54  ;;  %10563 = vst [vmem:[#allocation47_spill] sm:$0xff] %v5984_v30  ;;  %v272_v54 = vld [vmem:[%s5525_s15 + $0x338] sm:$0xff]  ;;  %v271_v30 = vld [vmem:[%s5525_s15 + $0x330] sm:$0xff] }
  0xd8   : > { %597 = vadd.xlane.f32.xlu1 %v596_v31  ;;  %594 = vadd.xlane.f32.xlu0 %v593_v38  ;;  %v608_v31 = vsel %vm298_vm0, %v272_v54, 0.0  ;;  %v605_v38 = vsel %vm298_vm0, %v271_v30, 0.0 }
  0xd9   : > { %v5990_v15 = vpop.xlane.xlu1 %393  ;;  %v5992_v46 = vpop.xlane.xlu0 %390 }
  0xda   : > { %10564 = vst [vmem:[#allocation48_spill] sm:$0xff] %v5990_v15  ;;  %10565 = vst [vmem:[#allocation49_spill] sm:$0xff] %v5992_v46  ;;  %v274_v15 = vld [vmem:[%s5525_s15 + $0x348] sm:$0xff]  ;;  %v273_v46 = vld [vmem:[%s5525_s15 + $0x340] sm:$0xff] }
  0xdc   : > { %603 = vadd.xlane.f32.xlu1 %v602_v47  ;;  %600 = vadd.xlane.f32.xlu0 %v599_v63  ;;  %v614_v47 = vsel %vm298_vm0, %v274_v15, 0.0  ;;  %v611_v63 = vsel %vm298_vm0, %v273_v46, 0.0 }
  0xdd   : > { %v5998_v14 = vpop.xlane.xlu1 %399  ;;  %v6000_v55 = vpop.xlane.xlu0 %396 }
  0xde   : > { %10566 = vst [vmem:[#allocation50_spill] sm:$0xff] %v5998_v14  ;;  %10567 = vst [vmem:[#allocation51_spill] sm:$0xff] %v6000_v55  ;;  %v276_v14 = vld [vmem:[%s5525_s15 + $0x358] sm:$0xff]  ;;  %v275_v55 = vld [vmem:[%s5525_s15 + $0x350] sm:$0xff] }
  0xe0   : > { %609 = vadd.xlane.f32.xlu1 %v608_v31  ;;  %606 = vadd.xlane.f32.xlu0 %v605_v38  ;;  %v620_v31 = vsel %vm298_vm0, %v276_v14, 0.0  ;;  %v617_v38 = vsel %vm298_vm0, %v275_v55, 0.0 }
  0xe1   : > { %v6006_v22 = vpop.xlane.xlu1 %405  ;;  %v6008_v62 = vpop.xlane.xlu0 %402 }
  0xe2   : > { %10568 = vst [vmem:[#allocation52_spill] sm:$0xff] %v6006_v22  ;;  %10569 = vst [vmem:[#allocation53_spill] sm:$0xff] %v6008_v62  ;;  %v278_v22 = vld [vmem:[%s5525_s15 + $0x368] sm:$0xff]  ;;  %v277_v62 = vld [vmem:[%s5525_s15 + $0x360] sm:$0xff] }
  0xe4   : > { %615 = vadd.xlane.f32.xlu1 %v614_v47  ;;  %612 = vadd.xlane.f32.xlu0 %v611_v63  ;;  %v626_v47 = vsel %vm298_vm0, %v278_v22, 0.0  ;;  %v623_v63 = vsel %vm298_vm0, %v277_v62, 0.0 }
  0xe5   : > { %v6014_v54 = vpop.xlane.xlu1 %411  ;;  %v6016_v30 = vpop.xlane.xlu0 %408 }
  0xe6   : > { %10570 = vst [vmem:[#allocation54_spill] sm:$0xff] %v6014_v54  ;;  %10571 = vst [vmem:[#allocation55_spill] sm:$0xff] %v6016_v30  ;;  %v280_v54 = vld [vmem:[%s5525_s15 + $0x378] sm:$0xff]  ;;  %v279_v30 = vld [vmem:[%s5525_s15 + $0x370] sm:$0xff] }
  0xe8   : > { %621 = vadd.xlane.f32.xlu1 %v620_v31  ;;  %618 = vadd.xlane.f32.xlu0 %v617_v38  ;;  %v632_v31 = vsel %vm298_vm0, %v280_v54, 0.0  ;;  %v629_v38 = vsel %vm298_vm0, %v279_v30, 0.0 }
  0xe9   : > { %v6022_v15 = vpop.xlane.xlu1 %417  ;;  %v6024_v46 = vpop.xlane.xlu0 %414 }
  0xea   : > { %10572 = vst [vmem:[#allocation56_spill] sm:$0xff] %v6022_v15  ;;  %10573 = vst [vmem:[#allocation57_spill] sm:$0xff] %v6024_v46  ;;  %v282_v15 = vld [vmem:[%s5525_s15 + $0x388] sm:$0xff]  ;;  %v281_v46 = vld [vmem:[%s5525_s15 + $0x380] sm:$0xff] }
  0xec   : > { %627 = vadd.xlane.f32.xlu1 %v626_v47  ;;  %624 = vadd.xlane.f32.xlu0 %v623_v63  ;;  %v638_v47 = vsel %vm298_vm0, %v282_v15, 0.0  ;;  %v635_v63 = vsel %vm298_vm0, %v281_v46, 0.0 }
  0xed   : > { %v6030_v14 = vpop.xlane.xlu1 %423  ;;  %v6032_v55 = vpop.xlane.xlu0 %420 }
  0xee   : > { %10574 = vst [vmem:[#allocation58_spill] sm:$0xff] %v6030_v14  ;;  %10575 = vst [vmem:[#allocation59_spill] sm:$0xff] %v6032_v55  ;;  %v284_v14 = vld [vmem:[%s5525_s15 + $0x398] sm:$0xff]  ;;  %v283_v55 = vld [vmem:[%s5525_s15 + $0x390] sm:$0xff] }
  0xf0   : > { %633 = vadd.xlane.f32.xlu1 %v632_v31  ;;  %630 = vadd.xlane.f32.xlu0 %v629_v38  ;;  %v644_v31 = vsel %vm298_vm0, %v284_v14, 0.0  ;;  %v641_v38 = vsel %vm298_vm0, %v283_v55, 0.0 }
  0xf1   : > { %v6038_v22 = vpop.xlane.xlu1 %429  ;;  %v6040_v62 = vpop.xlane.xlu0 %426 }
  0xf2   : > { %10576 = vst [vmem:[#allocation60_spill] sm:$0xff] %v6038_v22  ;;  %10577 = vst [vmem:[#allocation61_spill] sm:$0xff] %v6040_v62  ;;  %v286_v22 = vld [vmem:[%s5525_s15 + $0x3a8] sm:$0xff]  ;;  %v285_v62 = vld [vmem:[%s5525_s15 + $0x3a0] sm:$0xff] }
  0xf4   : > { %639 = vadd.xlane.f32.xlu1 %v638_v47  ;;  %636 = vadd.xlane.f32.xlu0 %v635_v63  ;;  %v650_v47 = vsel %vm298_vm0, %v286_v22, 0.0  ;;  %v647_v63 = vsel %vm298_vm0, %v285_v62, 0.0 }
  0xf5   : > { %v6046_v54 = vpop.xlane.xlu1 %435  ;;  %v6048_v30 = vpop.xlane.xlu0 %432 }
  0xf6   : > { %10578 = vst [vmem:[#allocation62_spill] sm:$0xff] %v6046_v54  ;;  %10579 = vst [vmem:[#allocation63_spill] sm:$0xff] %v6048_v30  ;;  %v288_v54 = vld [vmem:[%s5525_s15 + $0x3b8] sm:$0xff]  ;;  %v287_v30 = vld [vmem:[%s5525_s15 + $0x3b0] sm:$0xff] }
  0xf8   : > { %645 = vadd.xlane.f32.xlu1 %v644_v31  ;;  %642 = vadd.xlane.f32.xlu0 %v641_v38  ;;  %v656_v31 = vsel %vm298_vm0, %v288_v54, 0.0  ;;  %v653_v38 = vsel %vm298_vm0, %v287_v30, 0.0 }
  0xf9   : > { %v6054_v15 = vpop.xlane.xlu1 %441  ;;  %v6056_v46 = vpop.xlane.xlu0 %438 }
  0xfa   : > { %10580 = vst [vmem:[#allocation64_spill] sm:$0xff] %v6054_v15  ;;  %10581 = vst [vmem:[#allocation65_spill] sm:$0xff] %v6056_v46  ;;  %v290_v15 = vld [vmem:[%s5525_s15 + $0x3c8] sm:$0xff]  ;;  %v289_v46 = vld [vmem:[%s5525_s15 + $0x3c0] sm:$0xff] }
  0xfc   : > { %651 = vadd.xlane.f32.xlu1 %v650_v47  ;;  %648 = vadd.xlane.f32.xlu0 %v647_v63  ;;  %v662_v47 = vsel %vm298_vm0, %v290_v15, 0.0  ;;  %v659_v63 = vsel %vm298_vm0, %v289_v46, 0.0 }
  0xfd   : > { %v6062_v14 = vpop.xlane.xlu1 %447  ;;  %v6064_v55 = vpop.xlane.xlu0 %444 }
  0xfe   : > { %10582 = vst [vmem:[#allocation66_spill] sm:$0xff] %v6062_v14  ;;  %10583 = vst [vmem:[#allocation67_spill] sm:$0xff] %v6064_v55  ;;  %v292_v14 = vld [vmem:[%s5525_s15 + $0x3d8] sm:$0xff]  ;;  %v291_v55 = vld [vmem:[%s5525_s15 + $0x3d0] sm:$0xff] }
 0x100   : > { %657 = vadd.xlane.f32.xlu1 %v656_v31  ;;  %654 = vadd.xlane.f32.xlu0 %v653_v38  ;;  %v668_v31 = vsel %vm298_vm0, %v292_v14, 0.0  ;;  %v665_v38 = vsel %vm298_vm0, %v291_v55, 0.0 }
 0x101   : > { %v6070_v22 = vpop.xlane.xlu1 %453  ;;  %v6072_v62 = vpop.xlane.xlu0 %450 }
 0x102   : > { %10584 = vst [vmem:[#allocation68_spill] sm:$0xff] %v6070_v22  ;;  %10585 = vst [vmem:[#allocation69_spill] sm:$0xff] %v6072_v62  ;;  %v294_v22 = vld [vmem:[%s5525_s15 + $0x3e8] sm:$0xff]  ;;  %v293_v62 = vld [vmem:[%s5525_s15 + $0x3e0] sm:$0xff] }
 0x104   : > { %663 = vadd.xlane.f32.xlu1 %v662_v47  ;;  %660 = vadd.xlane.f32.xlu0 %v659_v63  ;;  %v674_v47 = vsel %vm298_vm0, %v294_v22, 0.0  ;;  %v671_v63 = vsel %vm298_vm0, %v293_v62, 0.0 }
 0x105   : > { %v6078_v54 = vpop.xlane.xlu1 %459  ;;  %v6080_v30 = vpop.xlane.xlu0 %456 }
 0x106   : > { %10586 = vst [vmem:[#allocation70_spill] sm:$0xff] %v6078_v54  ;;  %10587 = vst [vmem:[#allocation71_spill] sm:$0xff] %v6080_v30  ;;  %v296_v54 = vld [vmem:[%s5525_s15 + $0x3f8] sm:$0xff] }
 0x107   : > { %v680_v30 = vsel %vm298_vm0, %v296_v54, 0.0 }
 0x108   : > { %669 = vadd.xlane.f32.xlu1 %v668_v31  ;;  %666 = vadd.xlane.f32.xlu0 %v665_v38  ;;  %v677_v31 = vsel %vm298_vm0, %v295_v39, 0.0  ;;  %v815_v38 = vmul.f32 %v5531_v1, %v5531_v1  ;;  %v816_v39 = vmul.f32 %v5541_v5, %v5541_v5 }
 0x109   : > { %v6086_v15 = vpop.xlane.xlu1 %465  ;;  %v6088_v46 = vpop.xlane.xlu0 %462 }
 0x10a   : > { %10588 = vst [vmem:[#allocation72_spill] sm:$0xff] %v6088_v46  ;;  %v297_v46 = vld [vmem:[%s5525_s15 + $0x400] sm:$0xff] }
 0x10c   : > { %675 = vadd.xlane.f32.xlu1 %v674_v47  ;;  %672 = vadd.xlane.f32.xlu0 %v671_v63  ;;  %v944_v47 = vsel %vm298_vm0, %v815_v38, 0.0  ;;  %v683_v63 = vsel %vm298_vm0, %v297_v46, 0.0  ;;  %v819_v38 = vmul.f32 %v5551_v9, %v5551_v9  ;;  %v818_v46 = vmul.f32 %v5534_v2, %v5534_v2 }
 0x10d   : > { %v6094_v14 = vpop.xlane.xlu1 %471  ;;  %v6096_v55 = vpop.xlane.xlu0 %468 }
 0x10e   : > { %10589 = vst [vmem:[#allocation73_spill] sm:$0xff] %v6096_v55  ;;  %v817_v55 = vmul.f32 %v5528_v0, %v5528_v0 }
 0x110   : > { %681 = vadd.xlane.f32.xlu1 %v680_v30  ;;  %678 = vadd.xlane.f32.xlu0 %v677_v31  ;;  %v950_v30 = vsel %vm298_vm0, %v817_v55, 0.0  ;;  %v947_v31 = vsel %vm298_vm0, %v816_v39, 0.0  ;;  %v821_v55 = vmul.f32 %v5561_v13, %v5561_v13  ;;  %v820_v39 = vmul.f32 %v5548_v8, %v5548_v8 }
 0x111   : > { %v6103_v22 = vpop.xlane.xlu1 %477  ;;  %v6105_v62 = vpop.xlane.xlu0 %474 }
 0x114   : > { %945 = vadd.xlane.f32.xlu1 %v944_v47  ;;  %684 = vadd.xlane.f32.xlu0 %v683_v63  ;;  %v956_v47 = vsel %vm298_vm0, %v819_v38, 0.0  ;;  %v953_v63 = vsel %vm298_vm0, %v818_v46, 0.0  ;;  %v823_v38 = vmul.f32 %v5571_v17, %v5571_v17  ;;  %v822_v46 = vmul.f32 %v5558_v12, %v5558_v12 }
 0x115   : > { %v6113_v1 = vpop.xlane.xlu1 %483  ;;  %v6115_v54 = vpop.xlane.xlu0 %480 }
 0x118   : > { %951 = vadd.xlane.f32.xlu1 %v950_v30  ;;  %948 = vadd.xlane.f32.xlu0 %v947_v31  ;;  %v962_v30 = vsel %vm298_vm0, %v821_v55, 0.0  ;;  %v959_v31 = vsel %vm298_vm0, %v820_v39, 0.0  ;;  %v825_v55 = vmul.f32 %v5581_v21, %v5581_v21  ;;  %v824_v39 = vmul.f32 %v5568_v16, %v5568_v16 }
 0x119   : > { %v6123_v0 = vpop.xlane.xlu1 %489  ;;  %v6125_v5 = vpop.xlane.xlu0 %486 }
 0x11c   : > { %957 = vadd.xlane.f32.xlu1 %v956_v47  ;;  %954 = vadd.xlane.f32.xlu0 %v953_v63  ;;  %v968_v47 = vsel %vm298_vm0, %v823_v38, 0.0  ;;  %v965_v63 = vsel %vm298_vm0, %v822_v46, 0.0  ;;  %v827_v38 = vmul.f32 %v5591_v25, %v5591_v25  ;;  %v826_v46 = vmul.f32 %v5578_v20, %v5578_v20 }
 0x11d   : > { %v6133_v9 = vpop.xlane.xlu1 %495  ;;  %v6135_v2 = vpop.xlane.xlu0 %492 }
 0x11e   : > { %10590 = vst [vmem:[#allocation74_spill] sm:$0xff] %v6135_v2 }
 0x120   : > { %963 = vadd.xlane.f32.xlu1 %v962_v30  ;;  %960 = vadd.xlane.f32.xlu0 %v959_v31  ;;  %v974_v30 = vsel %vm298_vm0, %v825_v55, 0.0  ;;  %v971_v31 = vsel %vm298_vm0, %v824_v39, 0.0  ;;  %v829_v55 = vmul.f32 %v5601_v29, %v5601_v29  ;;  %v828_v39 = vmul.f32 %v5588_v24, %v5588_v24 }
 0x121   : > { %v6143_v13 = vpop.xlane.xlu1 %501  ;;  %v6145_v8 = vpop.xlane.xlu0 %498 }
 0x122   : > { %10591 = vst [vmem:[#allocation75_spill] sm:$0xff] %v6143_v13  ;;  %10592 = vst [vmem:[#allocation76_spill] sm:$0xff] %v6145_v8 }
 0x124   : > { %969 = vadd.xlane.f32.xlu1 %v968_v47  ;;  %966 = vadd.xlane.f32.xlu0 %v965_v63  ;;  %v980_v47 = vsel %vm298_vm0, %v827_v38, 0.0  ;;  %v977_v63 = vsel %vm298_vm0, %v826_v46, 0.0  ;;  %v831_v38 = vmul.f32 %v5611_v33, %v5611_v33  ;;  %v830_v46 = vmul.f32 %v5598_v28, %v5598_v28 }
 0x125   : > { %v6153_v17 = vpop.xlane.xlu1 %507  ;;  %v6155_v12 = vpop.xlane.xlu0 %504 }
 0x126   : > { %10593 = vst [vmem:[#allocation77_spill] sm:$0xff] %v6153_v17  ;;  %10594 = vst [vmem:[#allocation78_spill] sm:$0xff] %v6155_v12  ;;  %v5186_v17 = vld [vmem:[%s5525_s15 + $0x2b8] sm:$0xff] }
 0x128   : > { %975 = vadd.xlane.f32.xlu1 %v974_v30  ;;  %972 = vadd.xlane.f32.xlu0 %v971_v31  ;;  %v986_v30 = vsel %vm298_vm0, %v829_v55, 0.0  ;;  %v983_v31 = vsel %vm298_vm0, %v828_v39, 0.0  ;;  %v833_v55 = vmul.f32 %v5621_v37, %v5621_v37  ;;  %v832_v39 = vmul.f32 %v5608_v32, %v5608_v32 }
 0x129   : > { %v6163_v21 = vpop.xlane.xlu1 %513  ;;  %v6165_v16 = vpop.xlane.xlu0 %510 }
 0x12a   : > { %10595 = vst [vmem:[#allocation79_spill] sm:$0xff] %v6163_v21  ;;  %10596 = vst [vmem:[#allocation80_spill] sm:$0xff] %v6165_v16 }
 0x12c   : > { %981 = vadd.xlane.f32.xlu1 %v980_v47  ;;  %978 = vadd.xlane.f32.xlu0 %v977_v63  ;;  %v992_v47 = vsel %vm298_vm0, %v831_v38, 0.0  ;;  %v989_v63 = vsel %vm298_vm0, %v830_v46, 0.0  ;;  %v835_v38 = vmul.f32 %v5631_v41, %v5631_v41  ;;  %v834_v46 = vmul.f32 %v5618_v36, %v5618_v36 }
 0x12d   : > { %v6173_v25 = vpop.xlane.xlu1 %519  ;;  %v6175_v20 = vpop.xlane.xlu0 %516 }
 0x12e   : > { %10597 = vst [vmem:[#allocation81_spill] sm:$0xff] %v6173_v25  ;;  %10598 = vst [vmem:[#allocation82_spill] sm:$0xff] %v6175_v20 }
 0x130   : > { %987 = vadd.xlane.f32.xlu1 %v986_v30  ;;  %984 = vadd.xlane.f32.xlu0 %v983_v31  ;;  %v998_v30 = vsel %vm298_vm0, %v833_v55, 0.0  ;;  %v995_v31 = vsel %vm298_vm0, %v832_v39, 0.0  ;;  %v837_v55 = vmul.f32 %v5641_v45, %v5641_v45  ;;  %v836_v39 = vmul.f32 %v5628_v40, %v5628_v40 }
 0x131   : > { %v6183_v29 = vpop.xlane.xlu1 %525  ;;  %v6185_v24 = vpop.xlane.xlu0 %522 }
 0x132   : > { %10599 = vst [vmem:[#allocation83_spill] sm:$0xff] %v6183_v29  ;;  %10600 = vst [vmem:[#allocation84_spill] sm:$0xff] %v6185_v24 }
 0x134   : > { %993 = vadd.xlane.f32.xlu1 %v992_v47  ;;  %990 = vadd.xlane.f32.xlu0 %v989_v63  ;;  %v1004_v47 = vsel %vm298_vm0, %v835_v38, 0.0  ;;  %v1001_v63 = vsel %vm298_vm0, %v834_v46, 0.0  ;;  %v839_v38 = vmul.f32 %v5651_v49, %v5651_v49  ;;  %v838_v46 = vmul.f32 %v5638_v44, %v5638_v44 }
 0x135   : > { %v6193_v33 = vpop.xlane.xlu1 %531  ;;  %v6195_v28 = vpop.xlane.xlu0 %528 }
 0x136   : > { %10601 = vst [vmem:[#allocation85_spill] sm:$0xff] %v6193_v33  ;;  %10602 = vst [vmem:[#allocation86_spill] sm:$0xff] %v6195_v28  ;;  %v5180_v28 = vld [vmem:[%s5525_s15 + $0x288] sm:$0xff] }
 0x137   : > { %v896_v33 = vmul.f32 %v5180_v28, %v5180_v28  ;;  %v10697_v28 = vld [vmem:[#allocation33_spill] sm:$0xff] }
 0x138   : > { %999 = vadd.xlane.f32.xlu1 %v998_v30  ;;  %996 = vadd.xlane.f32.xlu0 %v995_v31  ;;  %v1010_v30 = vsel %vm298_vm0, %v837_v55, 0.0  ;;  %v1007_v31 = vsel %vm298_vm0, %v836_v39, 0.0  ;;  %v841_v55 = vmul.f32 %v5661_v53, %v5661_v53  ;;  %v840_v39 = vmul.f32 %v5648_v48, %v5648_v48 }
 0x139   : > { %v6203_v37 = vpop.xlane.xlu1 %537  ;;  %v6205_v32 = vpop.xlane.xlu0 %534 }
 0x13a   : > { %10603 = vst [vmem:[#allocation87_spill] sm:$0xff] %v6203_v37  ;;  %10604 = vst [vmem:[#allocation88_spill] sm:$0xff] %v6205_v32  ;;  %v5179_v32 = vld [vmem:[%s5525_s15 + $0x290] sm:$0xff] }
 0x13b   : > { %v897_v37 = vmul.f32 %v5179_v32, %v5179_v32  ;;  %v6614_v32 = vmul.f32 0.020408163, %v10697_v28 }
 0x13c   : > { %1005 = vadd.xlane.f32.xlu1 %v1004_v47  ;;  %1002 = vadd.xlane.f32.xlu0 %v1001_v63  ;;  %v1016_v47 = vsel %vm298_vm0, %v839_v38, 0.0  ;;  %v1013_v63 = vsel %vm298_vm0, %v838_v46, 0.0  ;;  %v843_v38 = vmul.f32 %v5671_v57, %v5671_v57  ;;  %v842_v46 = vmul.f32 %v5658_v52, %v5658_v52 }
 0x13d   : > { %v6213_v41 = vpop.xlane.xlu1 %543  ;;  %v6215_v36 = vpop.xlane.xlu0 %540  ;;  %v6638_v16 = vmul.f32 %v6614_v32, %v6614_v32 }
 0x13e   : > { %10605 = vst [vmem:[#allocation89_spill] sm:$0xff] %v6213_v41  ;;  %10606 = vst [vmem:[#allocation90_spill] sm:$0xff] %v6215_v36 }
 0x140   : > { %1011 = vadd.xlane.f32.xlu1 %v1010_v30  ;;  %1008 = vadd.xlane.f32.xlu0 %v1007_v31  ;;  %v1022_v30 = vsel %vm298_vm0, %v841_v55, 0.0  ;;  %v1019_v31 = vsel %vm298_vm0, %v840_v39, 0.0  ;;  %v845_v55 = vmul.f32 %v5681_v61, %v5681_v61  ;;  %v844_v39 = vmul.f32 %v5668_v56, %v5668_v56 }
 0x141   : > { %v6223_v45 = vpop.xlane.xlu1 %549  ;;  %v6225_v40 = vpop.xlane.xlu0 %546 }
 0x142   : > { %10607 = vst [vmem:[#allocation91_spill] sm:$0xff] %v6223_v45  ;;  %10608 = vst [vmem:[#allocation92_spill] sm:$0xff] %v6225_v40  ;;  %v5178_v45 = vld [vmem:[%s5525_s15 + $0x278] sm:$0xff] }
 0x144   : > { %1017 = vadd.xlane.f32.xlu1 %v1016_v47  ;;  %1014 = vadd.xlane.f32.xlu0 %v1013_v63  ;;  %v1028_v47 = vsel %vm298_vm0, %v843_v38, 0.0  ;;  %v1025_v63 = vsel %vm298_vm0, %v842_v46, 0.0  ;;  %v847_v38 = vmul.f32 %v5691_v4, %v5691_v4  ;;  %v846_v46 = vmul.f32 %v5678_v60, %v5678_v60 }
 0x145   : > { %v6233_v49 = vpop.xlane.xlu1 %555  ;;  %v6235_v44 = vpop.xlane.xlu0 %552 }
 0x146   : > { %10609 = vst [vmem:[#allocation93_spill] sm:$0xff] %v6233_v49  ;;  %10610 = vst [vmem:[#allocation94_spill] sm:$0xff] %v6235_v44 }
 0x148   : > { %1023 = vadd.xlane.f32.xlu1 %v1022_v30  ;;  %1020 = vadd.xlane.f32.xlu0 %v1019_v31  ;;  %v1034_v30 = vsel %vm298_vm0, %v845_v55, 0.0  ;;  %v1031_v31 = vsel %vm298_vm0, %v844_v39, 0.0  ;;  %v849_v55 = vmul.f32 %v5701_v11, %v5701_v11  ;;  %v848_v39 = vmul.f32 %v5688_v3, %v5688_v3 }
 0x149   : > { %v6243_v53 = vpop.xlane.xlu1 %561  ;;  %v6245_v48 = vpop.xlane.xlu0 %558 }
 0x14a   : > { %10611 = vst [vmem:[#allocation95_spill] sm:$0xff] %v6243_v53  ;;  %10612 = vst [vmem:[#allocation96_spill] sm:$0xff] %v6245_v48 }
 0x14c   : > { %1029 = vadd.xlane.f32.xlu1 %v1028_v47  ;;  %1026 = vadd.xlane.f32.xlu0 %v1025_v63  ;;  %v1040_v47 = vsel %vm298_vm0, %v847_v38, 0.0  ;;  %v1037_v63 = vsel %vm298_vm0, %v846_v46, 0.0  ;;  %v851_v38 = vmul.f32 %v5711_v19, %v5711_v19  ;;  %v850_v46 = vmul.f32 %v5698_v10, %v5698_v10 }
 0x14d   : > { %v6253_v57 = vpop.xlane.xlu1 %567  ;;  %v6255_v52 = vpop.xlane.xlu0 %564 }
 0x14e   : > { %10613 = vst [vmem:[#allocation97_spill] sm:$0xff] %v6253_v57  ;;  %10614 = vst [vmem:[#allocation98_spill] sm:$0xff] %v6255_v52  ;;  %v5176_v52 = vld [vmem:[%s5525_s15 + $0x268] sm:$0xff] }
 0x14f   : > { %v892_v57 = vmul.f32 %v5176_v52, %v5176_v52  ;;  %v10689_v52 = vld [vmem:[#allocation29_spill] sm:$0xff] }
 0x150   : > { %1035 = vadd.xlane.f32.xlu1 %v1034_v30  ;;  %1032 = vadd.xlane.f32.xlu0 %v1031_v31  ;;  %v1046_v30 = vsel %vm298_vm0, %v849_v55, 0.0  ;;  %v1043_v31 = vsel %vm298_vm0, %v848_v39, 0.0  ;;  %v853_v55 = vmul.f32 %v5721_v27, %v5721_v27  ;;  %v852_v39 = vmul.f32 %v5708_v18, %v5708_v18 }
 0x151   : > { %v6263_v61 = vpop.xlane.xlu1 %573  ;;  %v6265_v56 = vpop.xlane.xlu0 %570 }
 0x152   : > { %10615 = vst [vmem:[#allocation99_spill] sm:$0xff] %v6263_v61  ;;  %10616 = vst [vmem:[#allocation100_spill] sm:$0xff] %v6265_v56  ;;  %v5175_v56 = vld [vmem:[%s5525_s15 + $0x270] sm:$0xff] }
 0x153   : > { %v893_v61 = vmul.f32 %v5175_v56, %v5175_v56  ;;  %v6562_v56 = vmul.f32 0.020408163, %v10689_v52 }
 0x154   : > { %1041 = vadd.xlane.f32.xlu1 %v1040_v47  ;;  %1038 = vadd.xlane.f32.xlu0 %v1037_v63  ;;  %v1052_v47 = vsel %vm298_vm0, %v851_v38, 0.0  ;;  %v1049_v63 = vsel %vm298_vm0, %v850_v46, 0.0  ;;  %v855_v38 = vmul.f32 %v5731_v35, %v5731_v35  ;;  %v854_v46 = vmul.f32 %v5718_v26, %v5718_v26 }
 0x155   : > { %v6273_v4 = vpop.xlane.xlu1 %579  ;;  %v6275_v60 = vpop.xlane.xlu0 %576 }
 0x156   : > { %10617 = vst [vmem:[#allocation101_spill] sm:$0xff] %v6273_v4  ;;  %10618 = vst [vmem:[#allocation102_spill] sm:$0xff] %v6275_v60 }
 0x158   : > { %1047 = vadd.xlane.f32.xlu1 %v1046_v30  ;;  %1044 = vadd.xlane.f32.xlu0 %v1043_v31  ;;  %v1058_v30 = vsel %vm298_vm0, %v853_v55, 0.0  ;;  %v1055_v31 = vsel %vm298_vm0, %v852_v39, 0.0  ;;  %v857_v55 = vmul.f32 %v5741_v43, %v5741_v43  ;;  %v856_v39 = vmul.f32 %v5728_v34, %v5728_v34 }
 0x159   : > { %v6283_v11 = vpop.xlane.xlu1 %585  ;;  %v6285_v3 = vpop.xlane.xlu0 %582 }
 0x15a   : > { %10619 = vst [vmem:[#allocation103_spill] sm:$0xff] %v6283_v11  ;;  %10620 = vst [vmem:[#allocation104_spill] sm:$0xff] %v6285_v3  ;;  %v5174_v11 = vld [vmem:[%s5525_s15 + $0x258] sm:$0xff] }
 0x15c   : > { %1053 = vadd.xlane.f32.xlu1 %v1052_v47  ;;  %1050 = vadd.xlane.f32.xlu0 %v1049_v63  ;;  %v1064_v47 = vsel %vm298_vm0, %v855_v38, 0.0  ;;  %v1061_v63 = vsel %vm298_vm0, %v854_v46, 0.0  ;;  %v859_v38 = vmul.f32 %v5751_v51, %v5751_v51  ;;  %v858_v46 = vmul.f32 %v5738_v42, %v5738_v42 }
 0x15d   : > { %v6293_v19 = vpop.xlane.xlu1 %591  ;;  %v6295_v10 = vpop.xlane.xlu0 %588 }
 0x15e   : > { %10621 = vst [vmem:[#allocation105_spill] sm:$0xff] %v6293_v19  ;;  %10622 = vst [vmem:[#allocation106_spill] sm:$0xff] %v6295_v10 }
 0x160   : > { %1059 = vadd.xlane.f32.xlu1 %v1058_v30  ;;  %1056 = vadd.xlane.f32.xlu0 %v1055_v31  ;;  %v1070_v30 = vsel %vm298_vm0, %v857_v55, 0.0  ;;  %v1067_v31 = vsel %vm298_vm0, %v856_v39, 0.0  ;;  %v861_v55 = vmul.f32 %v5761_v59, %v5761_v59  ;;  %v860_v39 = vmul.f32 %v5748_v50, %v5748_v50 }
 0x161   : > { %v6303_v27 = vpop.xlane.xlu1 %597  ;;  %v6305_v18 = vpop.xlane.xlu0 %594 }
 0x162   : > { %10623 = vst [vmem:[#allocation107_spill] sm:$0xff] %v6303_v27  ;;  %10624 = vst [vmem:[#allocation108_spill] sm:$0xff] %v6305_v18  ;;  %v10675_v18 = vld [vmem:[#allocation23_spill] sm:$0xff] }
 0x164   : > { %1065 = vadd.xlane.f32.xlu1 %v1064_v47  ;;  %1062 = vadd.xlane.f32.xlu0 %v1061_v63  ;;  %v1076_v47 = vsel %vm298_vm0, %v859_v38, 0.0  ;;  %v1073_v63 = vsel %vm298_vm0, %v858_v46, 0.0  ;;  %v863_v38 = vmul.f32 %v5771_v7, %v5771_v7  ;;  %v862_v46 = vmul.f32 %v5758_v58, %v5758_v58 }
 0x165   : > { %v6313_v35 = vpop.xlane.xlu1 %603  ;;  %v6315_v26 = vpop.xlane.xlu0 %600 }
 0x166   : > { %10625 = vst [vmem:[#allocation109_spill] sm:$0xff] %v6313_v35  ;;  %10626 = vst [vmem:[#allocation110_spill] sm:$0xff] %v6315_v26 }
 0x168   : > { %1071 = vadd.xlane.f32.xlu1 %v1070_v30  ;;  %1068 = vadd.xlane.f32.xlu0 %v1067_v31  ;;  %v1082_v30 = vsel %vm298_vm0, %v861_v55, 0.0  ;;  %v1079_v31 = vsel %vm298_vm0, %v860_v39, 0.0  ;;  %v865_v55 = vmul.f32 %v5781_v23, %v5781_v23  ;;  %v864_v39 = vmul.f32 %v5768_v6, %v5768_v6 }
 0x169   : > { %v6323_v43 = vpop.xlane.xlu1 %609  ;;  %v6325_v34 = vpop.xlane.xlu0 %606 }
 0x16a   : > { %10627 = vst [vmem:[#allocation111_spill] sm:$0xff] %v6323_v43  ;;  %10628 = vst [vmem:[#allocation112_spill] sm:$0xff] %v6325_v34 }
 0x16c   : > { %1077 = vadd.xlane.f32.xlu1 %v1076_v47  ;;  %1074 = vadd.xlane.f32.xlu0 %v1073_v63  ;;  %v1088_v47 = vsel %vm298_vm0, %v863_v38, 0.0  ;;  %v1085_v63 = vsel %vm298_vm0, %v862_v46, 0.0  ;;  %v10636_v46 = vld [vmem:[#allocation2_spill] sm:$0xff] }
 0x16d   : > { %v6333_v51 = vpop.xlane.xlu1 %615  ;;  %v6335_v42 = vpop.xlane.xlu0 %612 }
 0x16e   : > { %10629 = vst [vmem:[#allocation113_spill] sm:$0xff] %v6333_v51  ;;  %10630 = vst [vmem:[#allocation114_spill] sm:$0xff] %v6335_v42 }
 0x170   : > { %1083 = vadd.xlane.f32.xlu1 %v1082_v30  ;;  %1080 = vadd.xlane.f32.xlu0 %v1079_v31  ;;  %v1094_v30 = vsel %vm298_vm0, %v865_v55, 0.0  ;;  %v1091_v31 = vsel %vm298_vm0, %v864_v39, 0.0  ;;  %v10640_v39 = vld [vmem:[#allocation3_spill] sm:$0xff] }
 0x171   : > { %v6343_v59 = vpop.xlane.xlu1 %621  ;;  %v6345_v50 = vpop.xlane.xlu0 %618 }
 0x172   : > { %10631 = vst [vmem:[#allocation115_spill] sm:$0xff] %v6343_v59  ;;  %10632 = vst [vmem:[#allocation116_spill] sm:$0xff] %v6345_v50  ;;  %v10635_v50 = vld [vmem:[#allocation4_spill] sm:$0xff]  ;;  %v866_v59 = vmul.f32 %v10636_v46, %v10636_v46 }
 0x173   : > { %v867_v38 = vmul.f32 %v10635_v50, %v10635_v50 }
 0x174   : > { %1089 = vadd.xlane.f32.xlu1 %v1088_v47  ;;  %1086 = vadd.xlane.f32.xlu0 %v1085_v63  ;;  %v1097_v63 = vsel %vm298_vm0, %v866_v59, 0.0  ;;  %v10644_v59 = vld [vmem:[#allocation5_spill] sm:$0xff] }
 0x175   : > { %v6353_v7 = vpop.xlane.xlu1 %627  ;;  %v6355_v58 = vpop.xlane.xlu0 %624  ;;  %v1100_v47 = vsel %vm298_vm0, %v867_v38, 0.0 }
 0x176   : > { %10633 = vst [vmem:[#allocation117_spill] sm:$0xff] %v6353_v7  ;;  %10634 = vst [vmem:[#allocation118_spill] sm:$0xff] %v6355_v58  ;;  %v10639_v58 = vld [vmem:[#allocation6_spill] sm:$0xff]  ;;  %v868_v7 = vmul.f32 %v10640_v39, %v10640_v39 }
 0x177   : > { %v869_v55 = vmul.f32 %v10639_v58, %v10639_v58 }
 0x178   : > { %1095 = vadd.xlane.f32.xlu1 %v1094_v30  ;;  %1092 = vadd.xlane.f32.xlu0 %v1091_v31  ;;  %v1103_v46 = vsel %vm298_vm0, %v868_v7, 0.0  ;;  %v10648_v7 = vld [vmem:[#allocation7_spill] sm:$0xff] }
 0x179   : > { %v6363_v23 = vpop.xlane.xlu1 %633  ;;  %v6365_v6 = vpop.xlane.xlu0 %630  ;;  %v1106_v31 = vsel %vm298_vm0, %v869_v55, 0.0 }
 0x17a   : > { %10637 = vst [vmem:[#allocation4_spill] sm:$0xff] %v6363_v23  ;;  %10638 = vst [vmem:[#allocation2_spill] sm:$0xff] %v6365_v6  ;;  %v10643_v6 = vld [vmem:[#allocation8_spill] sm:$0xff]  ;;  %v870_v23 = vmul.f32 %v10644_v59, %v10644_v59 }
 0x17b   : > { %v871_v38 = vmul.f32 %v10643_v6, %v10643_v6 }
 0x17c   : > { %1101 = vadd.xlane.f32.xlu1 %v1100_v47  ;;  %1098 = vadd.xlane.f32.xlu0 %v1097_v63  ;;  %v1109_v39 = vsel %vm298_vm0, %v870_v23, 0.0  ;;  %v10652_v23 = vld [vmem:[#allocation9_spill] sm:$0xff] }
 0x17d   : > { %v6373_v50 = vpop.xlane.xlu1 %639  ;;  %v6375_v30 = vpop.xlane.xlu0 %636  ;;  %v1112_v63 = vsel %vm298_vm0, %v871_v38, 0.0 }
 0x17e   : > { %10641 = vst [vmem:[#allocation6_spill] sm:$0xff] %v6373_v50  ;;  %10642 = vst [vmem:[#allocation3_spill] sm:$0xff] %v6375_v30  ;;  %v10647_v30 = vld [vmem:[#allocation10_spill] sm:$0xff]  ;;  %v872_v50 = vmul.f32 %v10648_v7, %v10648_v7 }
 0x17f   : > { %v873_v55 = vmul.f32 %v10647_v30, %v10647_v30 }
 0x180   : > { %1107 = vadd.xlane.f32.xlu1 %v1106_v31  ;;  %1104 = vadd.xlane.f32.xlu0 %v1103_v46  ;;  %v1115_v59 = vsel %vm298_vm0, %v872_v50, 0.0 }
 0x181   : > { %v6383_v58 = vpop.xlane.xlu1 %645  ;;  %v6385_v47 = vpop.xlane.xlu0 %642  ;;  %v1118_v46 = vsel %vm298_vm0, %v873_v55, 0.0  ;;  %v10655_v55 = vld [vmem:[#allocation13_spill] sm:$0xff] }
 0x182   : > { %10645 = vst [vmem:[#allocation8_spill] sm:$0xff] %v6383_v58  ;;  %10646 = vst [vmem:[#allocation5_spill] sm:$0xff] %v6385_v47  ;;  %v10651_v47 = vld [vmem:[#allocation12_spill] sm:$0xff]  ;;  %v874_v58 = vmul.f32 %v10652_v23, %v10652_v23  ;;  %v877_v50 = vmul.f32 %v10655_v55, %v10655_v55 }
 0x183   : > { %v875_v38 = vmul.f32 %v10651_v47, %v10651_v47 }
 0x184   : > { %1113 = vadd.xlane.f32.xlu1 %v1112_v63  ;;  %1110 = vadd.xlane.f32.xlu0 %v1109_v39  ;;  %v1121_v7 = vsel %vm298_vm0, %v874_v58, 0.0 }
 0x185   : > { %v6393_v6 = vpop.xlane.xlu1 %651  ;;  %v6395_v31 = vpop.xlane.xlu0 %648  ;;  %v1124_v39 = vsel %vm298_vm0, %v875_v38, 0.0  ;;  %v10659_v38 = vld [vmem:[#allocation14_spill] sm:$0xff] }
 0x186   : > { %10649 = vst [vmem:[#allocation10_spill] sm:$0xff] %v6393_v6  ;;  %10650 = vst [vmem:[#allocation7_spill] sm:$0xff] %v6395_v31  ;;  %v10656_v31 = vld [vmem:[#allocation11_spill] sm:$0xff]  ;;  %v879_v58 = vmul.f32 %v10659_v38, %v10659_v38 }
 0x187   : > { %v876_v47 = vmul.f32 %v10656_v31, %v10656_v31 }
 0x188   : > { %1119 = vadd.xlane.f32.xlu1 %v1118_v46  ;;  %1116 = vadd.xlane.f32.xlu0 %v1115_v59  ;;  %v1130_v59 = vsel %vm298_vm0, %v877_v50, 0.0 }
 0x189   : > { %v6403_v30 = vpop.xlane.xlu1 %657  ;;  %v6405_v63 = vpop.xlane.xlu0 %654 }
 0x18a   : > { %10653 = vst [vmem:[#allocation12_spill] sm:$0xff] %v6403_v30  ;;  %10654 = vst [vmem:[#allocation9_spill] sm:$0xff] %v6405_v63  ;;  %v1127_v63 = vsel %vm298_vm0, %v876_v47, 0.0  ;;  %v5165_v30 = vld [vmem:[%s5525_s15 + $0x1f8] sm:$0xff]  ;;  %v5166_v47 = vld [vmem:[%s5525_s15 + $0x208] sm:$0xff] }
 0x18b   : > { %v878_v6 = vmul.f32 %v5165_v30, %v5165_v30 }
 0x18c   : > { %1125 = vadd.xlane.f32.xlu1 %v1124_v39  ;;  %1122 = vadd.xlane.f32.xlu0 %v1121_v7  ;;  %v1136_v7 = vsel %vm298_vm0, %v879_v58, 0.0 }
 0x18d   : > { %v6413_v23 = vpop.xlane.xlu1 %663  ;;  %v6415_v46 = vpop.xlane.xlu0 %660  ;;  %v1133_v55 = vsel %vm298_vm0, %v878_v6, 0.0  ;;  %v5167_v6 = vld [vmem:[%s5525_s15 + $0x218] sm:$0xff] }
 0x18e   : > { %10657 = vst [vmem:[#allocation13_spill] sm:$0xff] %v6413_v23  ;;  %10658 = vst [vmem:[#allocation11_spill] sm:$0xff] %v6415_v46  ;;  %v10662_v46 = vld [vmem:[#allocation15_spill] sm:$0xff]  ;;  %v880_v23 = vmul.f32 %v5166_v47, %v5166_v47 }
 0x18f   : > { %v881_v50 = vmul.f32 %v10662_v46, %v10662_v46 }
 0x190   : > { %1131 = vadd.xlane.f32.xlu1 %v1130_v59  ;;  %1128 = vadd.xlane.f32.xlu0 %v1127_v63  ;;  %v1139_v38 = vsel %vm298_vm0, %v880_v23, 0.0 }
 0x191   : > { %v6422_v31 = vpop.xlane.xlu1 %669  ;;  %v6424_v39 = vpop.xlane.xlu0 %666  ;;  %v1142_v63 = vsel %vm298_vm0, %v881_v50, 0.0  ;;  %v10668_v50 = vld [vmem:[#allocation17_spill] sm:$0xff] }
 0x192   : > { %10660 = vst [vmem:[#allocation14_spill] sm:$0xff] %v6422_v31  ;;  %10661 = vst [vmem:[#allocation119_spill] sm:$0xff] %v6424_v39  ;;  %v10665_v39 = vld [vmem:[#allocation16_spill] sm:$0xff]  ;;  %v882_v31 = vmul.f32 %v5167_v6, %v5167_v6  ;;  %v885_v23 = vmul.f32 %v10668_v50, %v10668_v50 }
 0x193   : > { %v883_v58 = vmul.f32 %v10665_v39, %v10665_v39  ;;  %v10669_v39 = vld [vmem:[#allocation19_spill] sm:$0xff] }
 0x194   : > { %1137 = vadd.xlane.f32.xlu1 %v1136_v7  ;;  %1134 = vadd.xlane.f32.xlu0 %v1133_v55  ;;  %v1145_v47 = vsel %vm298_vm0, %v882_v31, 0.0  ;;  %v6450_v42 = vmul.f32 0.020408163, %v10669_v39 }
 0x195   : > { %v6431_v30 = vpop.xlane.xlu1 %675  ;;  %v6433_v59 = vpop.xlane.xlu0 %672  ;;  %v1148_v55 = vsel %vm298_vm0, %v883_v58, 0.0  ;;  %v1154_v58 = vsel %vm298_vm0, %v885_v23, 0.0 }
 0x196   : > { %10663 = vst [vmem:[#allocation15_spill] sm:$0xff] %v6431_v30  ;;  %10664 = vst [vmem:[#allocation120_spill] sm:$0xff] %v6433_v59  ;;  %v5168_v59 = vld [vmem:[%s5525_s15 + $0x228] sm:$0xff]  ;;  %v6463_v39 = vmul.f32 %v6450_v42, %v6450_v42 }
 0x197   : > { %v884_v30 = vmul.f32 %v5168_v59, %v5168_v59  ;;  %10670 = vst [vmem:[#allocation17_spill] sm:$0xff] %v6450_v42  ;;  %v5170_v59 = vld [vmem:[%s5525_s15 + $0x238] sm:$0xff] }
 0x198   : > { %1143 = vadd.xlane.f32.xlu1 %v1142_v63  ;;  %1140 = vadd.xlane.f32.xlu0 %v1139_v38  ;;  %v10671_v63 = vld [vmem:[#allocation18_spill] sm:$0xff]  ;;  %v886_v51 = vmul.f32 %v5170_v59, %v5170_v59 }
 0x199   : > { %v6440_v46 = vpop.xlane.xlu1 %681  ;;  %v6442_v7 = vpop.xlane.xlu0 %678  ;;  %v6453_v38 = vmul.f32 0.020408163, %v10671_v63  ;;  %v1151_v31 = vsel %vm298_vm0, %v884_v30, 0.0  ;;  %v10674_v63 = vld [vmem:[#allocation21_spill] sm:$0xff]  ;;  %v6485_v30 = vmul.f32 0.020408163, %v10675_v18 }
 0x19a   : > { %10666 = vst [vmem:[#allocation16_spill] sm:$0xff] %v6440_v46  ;;  %10667 = vst [vmem:[#allocation121_spill] sm:$0xff] %v6442_v7  ;;  %v5169_v46 = vld [vmem:[%s5525_s15 + $0x240] sm:$0xff]  ;;  %v1157_v34 = vsel %vm298_vm0, %v886_v51, 0.0 }
 0x19b   : > { %10672 = vst [vmem:[#allocation19_spill] sm:$0xff] %v6453_v38  ;;  %v887_v50 = vmul.f32 %v5169_v46, %v5169_v46  ;;  %v6472_v23 = vmul.f32 %v6453_v38, %v6453_v38  ;;  %10676 = vst [vmem:[#allocation21_spill] sm:$0xff] %v6485_v30  ;;  %v10679_v51 = vld [vmem:[#allocation22_spill] sm:$0xff]  ;;  %v6507_v60 = vmul.f32 %v6485_v30, %v6485_v30  ;;  %v5188_v30 = vld [vmem:[%s5525_s15 + $0x2c8] sm:$0xff] }
 0x19c   : > { %1149 = vadd.xlane.f32.xlu1 %v1148_v55  ;;  %1146 = vadd.xlane.f32.xlu0 %v1145_v47  ;;  %v6466_v55 = vmul.f32 0.020408163, %v10674_v63  ;;  %v5171_v63 = vld [vmem:[%s5525_s15 + $0x250] sm:$0xff]  ;;  %v6495_v10 = vmul.f32 0.020408163, %v10679_v51  ;;  %v5173_v18 = vld [vmem:[%s5525_s15 + $0x260] sm:$0xff]  ;;  %v890_v51 = vmul.f32 %v5174_v11, %v5174_v11 }
 0x19d   : > { %v946_v6 = vpop.xlane.xlu1 %945  ;;  %v6455_v7 = vpop.xlane.xlu0 %684  ;;  %v889_v43 = vmul.f32 %v5171_v63, %v5171_v63  ;;  %v891_v19 = vmul.f32 %v5173_v18, %v5173_v18  ;;  %v10681_v63 = vld [vmem:[#allocation25_spill] sm:$0xff]  ;;  %v10685_v18 = vld [vmem:[#allocation24_spill] sm:$0xff] }
 0x19e   : > { %10673 = vst [vmem:[#allocation18_spill] sm:$0xff] %v6455_v7  ;;  %v6468_v47 = vmul.f32 0.020408163, %v946_v6  ;;  %v1160_v7 = vsel %vm298_vm0, %v887_v50, 0.0  ;;  %v5172_v6 = vld [vmem:[%s5525_s15 + $0x248] sm:$0xff]  ;;  %v6482_v35 = vmul.f32 %v6466_v55, %v6466_v55  ;;  %v10677_v50 = vld [vmem:[#allocation20_spill] sm:$0xff] }
 0x19f   : > { %v888_v26 = vmul.f32 %v5172_v6, %v5172_v6  ;;  %v6492_v27 = vmul.f32 0.020408163, %v10677_v50  ;;  %10680 = vst [vmem:[#allocation20_spill] sm:$0xff] %v6495_v10  ;;  %v6510_v6 = vmul.f32 0.020408163, %v10681_v63  ;;  %v1172_v63 = vsel %vm298_vm0, %v891_v19, 0.0 }
 0x1a0   : > { %1155 = vadd.xlane.f32.xlu1 %v1154_v58  ;;  %1152 = vadd.xlane.f32.xlu0 %v1151_v31  ;;  %v6544_v53 = vmul.f32 0.020408163, %v10685_v18  ;;  %v1175_v18 = vsel %vm298_vm0, %v892_v57, 0.0 }
 0x1a1   : > { %v952_v46 = vpop.xlane.xlu1 %951  ;;  %v949_v59 = vpop.xlane.xlu0 %948  ;;  %10678 = vst [vmem:[#allocation23_spill] sm:$0xff] %v6492_v27  ;;  %v1163_v50 = vsel %vm298_vm0, %v888_v26, 0.0  ;;  %10682 = vst [vmem:[#allocation22_spill] sm:$0xff] %v6510_v6  ;;  %v6522_v26 = vmul.f32 %v6495_v10, %v6495_v10  ;;  %v6534_v48 = vmul.f32 %v6510_v6, %v6510_v6  ;;  %v5184_v6 = vld [vmem:[%s5525_s15 + $0x2a8] sm:$0xff] }
 0x1a2   : > { %v6487_v58 = vmul.f32 0.020408163, %v952_v46  ;;  %v6489_v31 = vmul.f32 0.020408163, %v949_v59  ;;  %v1166_v59 = vsel %vm298_vm0, %v889_v43, 0.0 }
 0x1a4   : > { %1161 = vadd.xlane.f32.xlu1 %v1160_v7  ;;  %1158 = vadd.xlane.f32.xlu0 %v1157_v34  ;;  %v6516_v7 = vmul.f32 %v6492_v27, %v6492_v27 }
 0x1a5   : > { %v958_v46 = vpop.xlane.xlu1 %957  ;;  %v955_v3 = vpop.xlane.xlu0 %954 }
 0x1a6   : > { %v6512_v34 = vmul.f32 0.020408163, %v958_v46  ;;  %v6518_v43 = vmul.f32 0.020408163, %v955_v3  ;;  %v1169_v3 = vsel %vm298_vm0, %v890_v51, 0.0  ;;  %v10687_v51 = vld [vmem:[#allocation26_spill] sm:$0xff] }
 0x1a7   : > { %v6547_v44 = vmul.f32 0.020408163, %v10687_v51  ;;  %v894_v51 = vmul.f32 %v5178_v45, %v5178_v45  ;;  %10690 = vst [vmem:[#allocation26_spill] sm:$0xff] %v6562_v56 }
 0x1a8   : > { %1167 = vadd.xlane.f32.xlu1 %v1166_v59  ;;  %1164 = vadd.xlane.f32.xlu0 %v1163_v50  ;;  %v10683_v59 = vld [vmem:[#allocation27_spill] sm:$0xff] }
 0x1a9   : > { %v964_v46 = vpop.xlane.xlu1 %963  ;;  %v961_v4 = vpop.xlane.xlu0 %960  ;;  %v6537_v50 = vmul.f32 0.020408163, %v10683_v59  ;;  %10686 = vst [vmem:[#allocation27_spill] sm:$0xff] %v6544_v53  ;;  %10688 = vst [vmem:[#allocation24_spill] sm:$0xff] %v6547_v44  ;;  %v5177_v59 = vld [vmem:[%s5525_s15 + $0x280] sm:$0xff]  ;;  %v6574_v57 = vmul.f32 %v6547_v44, %v6547_v44  ;;  %v6586_v44 = vmul.f32 %v6562_v56, %v6562_v56 }
 0x1aa   : > { %v6539_v19 = vmul.f32 0.020408163, %v964_v46  ;;  %v6541_v11 = vmul.f32 0.020408163, %v961_v4  ;;  %v895_v49 = vmul.f32 %v5177_v59, %v5177_v59  ;;  %v1178_v4 = vsel %vm298_vm0, %v893_v61, 0.0  ;;  %v10693_v59 = vld [vmem:[#allocation28_spill] sm:$0xff] }
 0x1ab   : > { %10684 = vst [vmem:[#allocation25_spill] sm:$0xff] %v6537_v50  ;;  %v6559_v36 = vmul.f32 %v6537_v50, %v6537_v50  ;;  %v6596_v24 = vmul.f32 0.020408163, %v10693_v59  ;;  %v1187_v59 = vsel %vm298_vm0, %v896_v33, 0.0  ;;  %v5182_v50 = vld [vmem:[%s5525_s15 + $0x298] sm:$0xff] }
 0x1ac   : > { %1173 = vadd.xlane.f32.xlu1 %v1172_v63  ;;  %1170 = vadd.xlane.f32.xlu0 %v1169_v3  ;;  %v6568_v3 = vmul.f32 %v6544_v53, %v6544_v53  ;;  %v1184_v52 = vsel %vm298_vm0, %v895_v49, 0.0 }
 0x1ad   : > { %v970_v46 = vpop.xlane.xlu1 %969  ;;  %v967_v40 = vpop.xlane.xlu0 %966 }
 0x1ae   : > { %v6564_v63 = vmul.f32 0.020408163, %v970_v46  ;;  %v6570_v61 = vmul.f32 0.020408163, %v967_v40  ;;  %v1181_v40 = vsel %vm298_vm0, %v894_v51, 0.0  ;;  %v10695_v51 = vld [vmem:[#allocation30_spill] sm:$0xff] }
 0x1af   : > { %v6599_v29 = vmul.f32 0.020408163, %v10695_v51  ;;  %v898_v51 = vmul.f32 %v5182_v50, %v5182_v50  ;;  %10698 = vst [vmem:[#allocation30_spill] sm:$0xff] %v6614_v32 }
 0x1b0   : > { %1179 = vadd.xlane.f32.xlu1 %v1178_v4  ;;  %1176 = vadd.xlane.f32.xlu0 %v1175_v18  ;;  %v10691_v4 = vld [vmem:[#allocation31_spill] sm:$0xff] }
 0x1b1   : > { %v976_v46 = vpop.xlane.xlu1 %975  ;;  %v973_v41 = vpop.xlane.xlu0 %972  ;;  %v6589_v18 = vmul.f32 0.020408163, %v10691_v4  ;;  %10694 = vst [vmem:[#allocation31_spill] sm:$0xff] %v6596_v24  ;;  %10696 = vst [vmem:[#allocation28_spill] sm:$0xff] %v6599_v29  ;;  %v5181_v4 = vld [vmem:[%s5525_s15 + $0x2a0] sm:$0xff]  ;;  %v6626_v33 = vmul.f32 %v6599_v29, %v6599_v29  ;;  %v900_v29 = vmul.f32 %v5184_v6, %v5184_v6 }
 0x1b2   : > { %v6591_v49 = vmul.f32 0.020408163, %v976_v46  ;;  %v6593_v45 = vmul.f32 0.020408163, %v973_v41  ;;  %v899_v56 = vmul.f32 %v5181_v4, %v5181_v4  ;;  %v1190_v41 = vsel %vm298_vm0, %v897_v37, 0.0  ;;  %v10701_v4 = vld [vmem:[#allocation32_spill] sm:$0xff] }
 0x1b3   : > { %10692 = vst [vmem:[#allocation29_spill] sm:$0xff] %v6589_v18  ;;  %v6611_v53 = vmul.f32 %v6589_v18, %v6589_v18  ;;  %v6648_v10 = vmul.f32 0.020408163, %v10701_v4  ;;  %v1199_v4 = vsel %vm298_vm0, %v900_v29, 0.0 }
 0x1b4   : > { %1185 = vadd.xlane.f32.xlu1 %v1184_v52  ;;  %1182 = vadd.xlane.f32.xlu0 %v1181_v40  ;;  %v6620_v40 = vmul.f32 %v6596_v24, %v6596_v24  ;;  %v1196_v28 = vsel %vm298_vm0, %v899_v56, 0.0  ;;  %v5183_v24 = vld [vmem:[%s5525_s15 + $0x2b0] sm:$0xff] }
 0x1b5   : > { %v982_v46 = vpop.xlane.xlu1 %981  ;;  %v979_v20 = vpop.xlane.xlu0 %978  ;;  %v901_v25 = vmul.f32 %v5183_v24, %v5183_v24  ;;  %v10706_v24 = vld [vmem:[#allocation37_spill] sm:$0xff] }
 0x1b6   : > { %v6616_v52 = vmul.f32 0.020408163, %v982_v46  ;;  %v6622_v37 = vmul.f32 0.020408163, %v979_v20  ;;  %v1193_v20 = vsel %vm298_vm0, %v898_v51, 0.0  ;;  %v10703_v51 = vld [vmem:[#allocation34_spill] sm:$0xff] }
 0x1b7   : > { %v6651_v21 = vmul.f32 0.020408163, %v10703_v51  ;;  %v902_v51 = vmul.f32 %v5186_v17, %v5186_v17  ;;  %v6666_v6 = vmul.f32 0.020408163, %v10706_v24 }
 0x1b8   : > { %1191 = vadd.xlane.f32.xlu1 %v1190_v41  ;;  %1188 = vadd.xlane.f32.xlu0 %v1187_v59  ;;  %v10699_v41 = vld [vmem:[#allocation35_spill] sm:$0xff] }
 0x1b9   : > { %v988_v46 = vpop.xlane.xlu1 %987  ;;  %v985_v18 = vpop.xlane.xlu0 %984  ;;  %v6641_v59 = vmul.f32 0.020408163, %v10699_v41  ;;  %10702 = vst [vmem:[#allocation35_spill] sm:$0xff] %v6648_v10  ;;  %10704 = vst [vmem:[#allocation32_spill] sm:$0xff] %v6651_v21  ;;  %v5185_v41 = vld [vmem:[%s5525_s15 + $0x2c0] sm:$0xff]  ;;  %v6678_v29 = vmul.f32 %v6651_v21, %v6651_v21  ;;  %v904_v21 = vmul.f32 %v5188_v30, %v5188_v30  ;;  %v6690_v27 = vmul.f32 %v6666_v6, %v6666_v6 }
 0x1ba   : > { %v6643_v56 = vmul.f32 0.020408163, %v988_v46  ;;  %v6645_v50 = vmul.f32 0.020408163, %v985_v18  ;;  %v903_v32 = vmul.f32 %v5185_v41, %v5185_v41  ;;  %v1202_v18 = vsel %vm298_vm0, %v901_v25, 0.0  ;;  %10707 = vst [vmem:[#allocation37_spill] sm:$0xff] %v6666_v6 }
 0x1bb   : > { %10700 = vst [vmem:[#allocation33_spill] sm:$0xff] %v6641_v59  ;;  %v6663_v8 = vmul.f32 %v6641_v59, %v6641_v59  ;;  %10709 = vst [vmem:[#allocation123_spill] sm:$0xff] %v6678_v29  ;;  %v10715_v41 = vld [vmem:[#allocation36_spill] sm:$0xff] }
 0x1bc   : > { %1197 = vadd.xlane.f32.xlu1 %v1196_v28  ;;  %1194 = vadd.xlane.f32.xlu0 %v1193_v20  ;;  %v6672_v20 = vmul.f32 %v6648_v10, %v6648_v10  ;;  %v1208_v24 = vsel %vm298_vm0, %v903_v32, 0.0  ;;  %v5187_v10 = vld [vmem:[%s5525_s15 + $0x2d0] sm:$0xff]  ;;  %10710 = vst [vmem:[#allocation124_spill] sm:$0xff] %v6690_v27  ;;  %v6700_v38 = vmul.f32 0.020408163, %v10715_v41  ;;  %v1211_v41 = vsel %vm298_vm0, %v904_v21, 0.0 }
 0x1bd   : > { %v994_v46 = vpop.xlane.xlu1 %993  ;;  %v991_v12 = vpop.xlane.xlu0 %990  ;;  %10705 = vst [vmem:[#allocation34_spill] sm:$0xff] %v6663_v8  ;;  %v905_v13 = vmul.f32 %v5187_v10, %v5187_v10  ;;  %v10720_v10 = vld [vmem:[#allocation41_spill] sm:$0xff] }
 0x1be   : > { %v6668_v28 = vmul.f32 0.020408163, %v994_v46  ;;  %v6674_v25 = vmul.f32 0.020408163, %v991_v12  ;;  %v1205_v12 = vsel %vm298_vm0, %v902_v51, 0.0  ;;  %10716 = vst [vmem:[#allocation36_spill] sm:$0xff] %v6700_v38 }
 0x1bf   : > { %v10717_v51 = vld [vmem:[#allocation38_spill] sm:$0xff]  ;;  %v6718_v30 = vmul.f32 0.020408163, %v10720_v10 }
 0x1c0   : > { %10708 = vst [vmem:[#allocation122_spill] sm:$0xff] %v6668_v28  ;;  %1203 = vadd.xlane.f32.xlu1 %v1202_v18  ;;  %1200 = vadd.xlane.f32.xlu0 %v1199_v4  ;;  %v10711_v18 = vld [vmem:[#allocation39_spill] sm:$0xff]  ;;  %v6703_v42 = vmul.f32 0.020408163, %v10717_v51  ;;  %v5190_v28 = vld [vmem:[%s5525_s15 + $0x2d8] sm:$0xff] }
 0x1c1   : > { %v1000_v46 = vpop.xlane.xlu1 %999  ;;  %v997_v59 = vpop.xlane.xlu0 %996  ;;  %v6693_v4 = vmul.f32 0.020408163, %v10711_v18  ;;  %v5189_v18 = vld [vmem:[%s5525_s15 + $0x2e0] sm:$0xff]  ;;  %v906_v51 = vmul.f32 %v5190_v28, %v5190_v28  ;;  %10721 = vst [vmem:[#allocation41_spill] sm:$0xff] %v6718_v30  ;;  %v6742_v27 = vmul.f32 %v6718_v30, %v6718_v30  ;;  %v10731_v28 = vld [vmem:[#allocation40_spill] sm:$0xff] }
 0x1c2   : > { %v6695_v32 = vmul.f32 0.020408163, %v1000_v46  ;;  %v6697_v17 = vmul.f32 0.020408163, %v997_v59  ;;  %10718 = vst [vmem:[#allocation38_spill] sm:$0xff] %v6703_v42  ;;  %v907_v6 = vmul.f32 %v5189_v18, %v5189_v18  ;;  %v1214_v59 = vsel %vm298_vm0, %v905_v13, 0.0 }
 0x1c3   : > { %10712 = vst [vmem:[#allocation39_spill] sm:$0xff] %v6693_v4  ;;  %v6715_v2 = vmul.f32 %v6693_v4, %v6693_v4  ;;  %v6730_v21 = vmul.f32 %v6703_v42, %v6703_v42  ;;  %10726 = vst [vmem:[#allocation132_spill] sm:$0xff] %v6742_v27 }
 0x1c4   : > { %10713 = vst [vmem:[#allocation125_spill] sm:$0xff] %v6695_v32  ;;  %10714 = vst [vmem:[#allocation126_spill] sm:$0xff] %v6697_v17  ;;  %1209 = vadd.xlane.f32.xlu1 %v1208_v24  ;;  %1206 = vadd.xlane.f32.xlu0 %v1205_v12  ;;  %v6724_v12 = vmul.f32 %v6700_v38, %v6700_v38  ;;  %v1220_v10 = vsel %vm298_vm0, %v907_v6, 0.0  ;;  %v5191_v38 = vld [vmem:[%s5525_s15 + $0x2f0] sm:$0xff]  ;;  %v5192_v17 = vld [vmem:[%s5525_s15 + $0x2e8] sm:$0xff] }
 0x1c5   : > { %v1006_v46 = vpop.xlane.xlu1 %1005  ;;  %v1003_v8 = vpop.xlane.xlu0 %1002  ;;  %10719 = vst [vmem:[#allocation127_spill] sm:$0xff] %v6715_v2  ;;  %10725 = vst [vmem:[#allocation131_spill] sm:$0xff] %v6730_v21  ;;  %v909_v29 = vmul.f32 %v5191_v38, %v5191_v38  ;;  %v908_v42 = vmul.f32 %v5192_v17, %v5192_v17  ;;  %v10736_v38 = vld [vmem:[#allocation45_spill] sm:$0xff]  ;;  %v10747_v21 = vld [vmem:[#allocation46_spill] sm:$0xff] }
 0x1c6   : > { %v6720_v24 = vmul.f32 0.020408163, %v1006_v46  ;;  %10723 = vst [vmem:[#allocation129_spill] sm:$0xff] %v6724_v12  ;;  %v6726_v13 = vmul.f32 0.020408163, %v1003_v8  ;;  %v1217_v8 = vsel %vm298_vm0, %v906_v51, 0.0 }
 0x1c7   : > { %v6752_v12 = vmul.f32 0.020408163, %v10731_v28  ;;  %v10733_v51 = vld [vmem:[#allocation42_spill] sm:$0xff]  ;;  %v1223_v28 = vsel %vm298_vm0, %v908_v42, 0.0  ;;  %v6770_v17 = vmul.f32 0.020408163, %v10736_v38 }
 0x1c8   : > { %10722 = vst [vmem:[#allocation128_spill] sm:$0xff] %v6720_v24  ;;  %10724 = vst [vmem:[#allocation130_spill] sm:$0xff] %v6726_v13  ;;  %1215 = vadd.xlane.f32.xlu1 %v1214_v59  ;;  %1212 = vadd.xlane.f32.xlu0 %v1211_v41  ;;  %v10727_v59 = vld [vmem:[#allocation43_spill] sm:$0xff]  ;;  %v6755_v13 = vmul.f32 0.020408163, %v10733_v51  ;;  %v5194_v24 = vld [vmem:[%s5525_s15 + $0x2f8] sm:$0xff] }
 0x1c9   : > { %v1012_v46 = vpop.xlane.xlu1 %1011  ;;  %v1009_v4 = vpop.xlane.xlu0 %1008  ;;  %v6745_v41 = vmul.f32 0.020408163, %v10727_v59  ;;  %10732 = vst [vmem:[#allocation40_spill] sm:$0xff] %v6752_v12  ;;  %v5193_v59 = vld [vmem:[%s5525_s15 + $0x300] sm:$0xff]  ;;  %v910_v51 = vmul.f32 %v5194_v24, %v5194_v24  ;;  %10737 = vst [vmem:[#allocation45_spill] sm:$0xff] %v6770_v17  ;;  %v6794_v24 = vmul.f32 %v6770_v17, %v6770_v17 }
 0x1ca   : > { %v6747_v6 = vmul.f32 0.020408163, %v1012_v46  ;;  %v6749_v18 = vmul.f32 0.020408163, %v1009_v4  ;;  %10734 = vst [vmem:[#allocation42_spill] sm:$0xff] %v6755_v13  ;;  %v911_v30 = vmul.f32 %v5193_v59, %v5193_v59  ;;  %v1226_v4 = vsel %vm298_vm0, %v909_v29, 0.0 }
 0x1cb   : > { %10728 = vst [vmem:[#allocation43_spill] sm:$0xff] %v6745_v41  ;;  %v6767_v32 = vmul.f32 %v6745_v41, %v6745_v41  ;;  %v6782_v42 = vmul.f32 %v6755_v13, %v6755_v13  ;;  %10741 = vst [vmem:[#allocation139_spill] sm:$0xff] %v6794_v24  ;;  %v5199_v24 = vld [vmem:[%s5525_s15 + $0x330] sm:$0xff] }
 0x1cc   : > { %10729 = vst [vmem:[#allocation133_spill] sm:$0xff] %v6747_v6  ;;  %10730 = vst [vmem:[#allocation134_spill] sm:$0xff] %v6749_v18  ;;  %1221 = vadd.xlane.f32.xlu1 %v1220_v10  ;;  %1218 = vadd.xlane.f32.xlu0 %v1217_v8  ;;  %v6776_v8 = vmul.f32 %v6752_v12, %v6752_v12  ;;  %v1232_v38 = vsel %vm298_vm0, %v911_v30, 0.0  ;;  %v5195_v12 = vld [vmem:[%s5525_s15 + $0x310] sm:$0xff]  ;;  %v5196_v6 = vld [vmem:[%s5525_s15 + $0x308] sm:$0xff] }
 0x1cd   : > { %v1018_v46 = vpop.xlane.xlu1 %1017  ;;  %v1015_v2 = vpop.xlane.xlu0 %1014  ;;  %10735 = vst [vmem:[#allocation135_spill] sm:$0xff] %v6767_v32  ;;  %v913_v27 = vmul.f32 %v5195_v12, %v5195_v12  ;;  %v912_v13 = vmul.f32 %v5196_v6, %v5196_v6  ;;  %v6815_v18 = vmul.f32 0.020408163, %v10747_v21 }
 0x1ce   : > { %v6772_v10 = vmul.f32 0.020408163, %v1018_v46  ;;  %10739 = vst [vmem:[#allocation137_spill] sm:$0xff] %v6776_v8  ;;  %v6778_v29 = vmul.f32 0.020408163, %v1015_v2  ;;  %v1229_v2 = vsel %vm298_vm0, %v910_v51, 0.0 }
 0x1cf   : > { %v10745_v8 = vld [vmem:[#allocation44_spill] sm:$0xff]  ;;  %v5197_v51 = vld [vmem:[%s5525_s15 + $0x320] sm:$0xff]  ;;  %10748 = vst [vmem:[#allocation46_spill] sm:$0xff] %v6815_v18  ;;  %v6842_v21 = vmul.f32 %v6815_v18, %v6815_v18 }
 0x1d0   : > { %10738 = vst [vmem:[#allocation136_spill] sm:$0xff] %v6772_v10  ;;  %10740 = vst [vmem:[#allocation138_spill] sm:$0xff] %v6778_v29  ;;  %1227 = vadd.xlane.f32.xlu1 %v1226_v4  ;;  %1224 = vadd.xlane.f32.xlu0 %v1223_v28  ;;  %v10742_v4 = vld [vmem:[#allocation47_spill] sm:$0xff]  ;;  %v6804_v29 = vmul.f32 0.020408163, %v10745_v8  ;;  %v915_v17 = vmul.f32 %v5197_v51, %v5197_v51  ;;  %v5198_v10 = vld [vmem:[%s5525_s15 + $0x318] sm:$0xff] }
 0x1d1   : > { %v1024_v46 = vpop.xlane.xlu1 %1023  ;;  %v1021_v41 = vpop.xlane.xlu0 %1020  ;;  %v6797_v28 = vmul.f32 0.020408163, %v10742_v4  ;;  %v914_v8 = vmul.f32 %v5198_v10, %v5198_v10  ;;  %10753 = vst [vmem:[#allocation143_spill] sm:$0xff] %v6842_v21  ;;  %v5206_v21 = vld [vmem:[%s5525_s15 + $0x358] sm:$0xff] }
 0x1d2   : > { %v6799_v30 = vmul.f32 0.020408163, %v1024_v46  ;;  %v6801_v59 = vmul.f32 0.020408163, %v1021_v41  ;;  %10746 = vst [vmem:[#allocation44_spill] sm:$0xff] %v6804_v29  ;;  %v1238_v46 = vsel %vm298_vm0, %v913_v27, 0.0  ;;  %v6828_v27 = vmul.f32 %v6804_v29, %v6804_v29 }
 0x1d3   : > { %10743 = vst [vmem:[#allocation47_spill] sm:$0xff] %v6797_v28  ;;  %v1235_v41 = vsel %vm298_vm0, %v912_v13, 0.0  ;;  %v6819_v12 = vmul.f32 %v6797_v28, %v6797_v28  ;;  %v1244_v10 = vsel %vm298_vm0, %v915_v17, 0.0  ;;  %v917_v29 = vmul.f32 %v5199_v24, %v5199_v24 }
 0x1d4   : > { %10744 = vst [vmem:[#allocation140_spill] sm:$0xff] %v6799_v30  ;;  %1233 = vadd.xlane.f32.xlu1 %v1232_v38  ;;  %1230 = vadd.xlane.f32.xlu0 %v1229_v2  ;;  %v10749_v38 = vld [vmem:[#allocation49_spill] sm:$0xff]  ;;  %10751 = vst [vmem:[#allocation141_spill] sm:$0xff] %v6828_v27  ;;  %v5200_v30 = vld [vmem:[%s5525_s15 + $0x328] sm:$0xff] }
 0x1d5   : > { %v1030_v32 = vpop.xlane.xlu1 %1029  ;;  %v1027_v4 = vpop.xlane.xlu0 %1026  ;;  %v6822_v2 = vmul.f32 0.020408163, %v10749_v38  ;;  %v5202_v27 = vld [vmem:[%s5525_s15 + $0x338] sm:$0xff] }
 0x1d6   : > { %v6824_v51 = vmul.f32 0.020408163, %v1030_v32  ;;  %v6830_v13 = vmul.f32 0.020408163, %v1027_v4  ;;  %v1241_v32 = vsel %vm298_vm0, %v914_v8, 0.0  ;;  %v916_v4 = vmul.f32 %v5200_v30, %v5200_v30 }
 0x1d7   : > { %10750 = vst [vmem:[#allocation49_spill] sm:$0xff] %v6822_v2  ;;  %v6846_v17 = vmul.f32 %v6822_v2, %v6822_v2  ;;  %v1250_v2 = vsel %vm298_vm0, %v917_v29, 0.0 }
 0x1d8   : > { %10752 = vst [vmem:[#allocation142_spill] sm:$0xff] %v6830_v13  ;;  %1239 = vadd.xlane.f32.xlu1 %v1238_v46  ;;  %1236 = vadd.xlane.f32.xlu0 %v1235_v41  ;;  %v918_v13 = vmul.f32 %v5202_v27, %v5202_v27 }
 0x1d9   : > { %v1036_v38 = vpop.xlane.xlu1 %1035  ;;  %v1033_v28 = vpop.xlane.xlu0 %1032  ;;  %10754 = vst [vmem:[#allocation144_spill] sm:$0xff] %v6846_v17  ;;  %v5203_v17 = vld [vmem:[%s5525_s15 + $0x350] sm:$0xff] }
 0x1da   : > { %v6848_v46 = vmul.f32 0.020408163, %v1036_v38  ;;  %v6850_v41 = vmul.f32 0.020408163, %v1033_v28  ;;  %v1247_v38 = vsel %vm298_vm0, %v916_v4, 0.0  ;;  %v5201_v28 = vld [vmem:[%s5525_s15 + $0x340] sm:$0xff]  ;;  %v921_v29 = vmul.f32 %v5203_v17, %v5203_v17 }
 0x1db   : > { %v919_v18 = vmul.f32 %v5201_v28, %v5201_v28  ;;  %v1253_v24 = vsel %vm298_vm0, %v918_v13, 0.0  ;;  %v922_v13 = vmul.f32 %v5206_v21, %v5206_v21 }
 0x1dc   : > { %10755 = vst [vmem:[#allocation145_spill] sm:$0xff] %v6848_v46  ;;  %10756 = vst [vmem:[#allocation146_spill] sm:$0xff] %v6850_v41  ;;  %1245 = vadd.xlane.f32.xlu1 %v1244_v10  ;;  %1242 = vadd.xlane.f32.xlu0 %v1241_v32  ;;  %v5204_v46 = vld [vmem:[%s5525_s15 + $0x348] sm:$0xff]  ;;  %v10779_v41 = vld [vmem:[#allocation48_spill] sm:$0xff] }
 0x1dd   : > { %v6856_v30 = vpop.xlane.xlu1 %1041  ;;  %v6858_v6 = vpop.xlane.xlu0 %1038  ;;  %v1256_v32 = vsel %vm298_vm0, %v919_v18, 0.0  ;;  %v920_v4 = vmul.f32 %v5204_v46, %v5204_v46 }
 0x1de   : > { %10757 = vst [vmem:[#allocation147_spill] sm:$0xff] %v6856_v30 }
 0x1df   : > { %v1259_v28 = vsel %vm298_vm0, %v920_v4, 0.0 }
 0x1e0   : > { %1251 = vadd.xlane.f32.xlu1 %v1250_v2  ;;  %1248 = vadd.xlane.f32.xlu0 %v1247_v38  ;;  %v1262_v38 = vsel %vm298_vm0, %v921_v29, 0.0 }
 0x1e1   : > { %v6864_v8 = vpop.xlane.xlu1 %1047  ;;  %v6866_v10 = vpop.xlane.xlu0 %1044 }
 0x1e2   : > { %10758 = vst [vmem:[#allocation148_spill] sm:$0xff] %v6864_v8  ;;  %10759 = vst [vmem:[#allocation149_spill] sm:$0xff] %v6866_v10  ;;  %v5205_v10 = vld [vmem:[%s5525_s15 + $0x360] sm:$0xff] }
 0x1e3   : > { %v923_v18 = vmul.f32 %v5205_v10, %v5205_v10 }
 0x1e4   : > { %1257 = vadd.xlane.f32.xlu1 %v1256_v32  ;;  %1254 = vadd.xlane.f32.xlu0 %v1253_v24  ;;  %v1265_v32 = vsel %vm298_vm0, %v922_v13, 0.0 }
 0x1e5   : > { %v6872_v27 = vpop.xlane.xlu1 %1053  ;;  %v6874_v2 = vpop.xlane.xlu0 %1050  ;;  %v1268_v24 = vsel %vm298_vm0, %v923_v18, 0.0 }
 0x1e6   : > { %10760 = vst [vmem:[#allocation150_spill] sm:$0xff] %v6872_v27  ;;  %10761 = vst [vmem:[#allocation151_spill] sm:$0xff] %v6874_v2  ;;  %v5207_v2 = vld [vmem:[%s5525_s15 + $0x370] sm:$0xff]  ;;  %v5208_v27 = vld [vmem:[%s5525_s15 + $0x368] sm:$0xff] }
 0x1e7   : > { %v925_v29 = vmul.f32 %v5207_v2, %v5207_v2  ;;  %v924_v4 = vmul.f32 %v5208_v27, %v5208_v27 }
 0x1e8   : > { %1263 = vadd.xlane.f32.xlu1 %v1262_v38  ;;  %1260 = vadd.xlane.f32.xlu0 %v1259_v28 }
 0x1e9   : > { %v6880_v17 = vpop.xlane.xlu1 %1059  ;;  %v6882_v46 = vpop.xlane.xlu0 %1056  ;;  %v1274_v38 = vsel %vm298_vm0, %v925_v29, 0.0  ;;  %v1271_v28 = vsel %vm298_vm0, %v924_v4, 0.0 }
 0x1ea   : > { %10762 = vst [vmem:[#allocation152_spill] sm:$0xff] %v6880_v17  ;;  %10763 = vst [vmem:[#allocation153_spill] sm:$0xff] %v6882_v46  ;;  %v5209_v46 = vld [vmem:[%s5525_s15 + $0x380] sm:$0xff]  ;;  %v5210_v17 = vld [vmem:[%s5525_s15 + $0x378] sm:$0xff] }
 0x1eb   : > { %v927_v18 = vmul.f32 %v5209_v46, %v5209_v46  ;;  %v926_v13 = vmul.f32 %v5210_v17, %v5210_v17 }
 0x1ec   : > { %1269 = vadd.xlane.f32.xlu1 %v1268_v24  ;;  %1266 = vadd.xlane.f32.xlu0 %v1265_v32 }
 0x1ed   : > { %v6888_v21 = vpop.xlane.xlu1 %1065  ;;  %v6890_v10 = vpop.xlane.xlu0 %1062  ;;  %v1280_v24 = vsel %vm298_vm0, %v927_v18, 0.0  ;;  %v1277_v32 = vsel %vm298_vm0, %v926_v13, 0.0 }
 0x1ee   : > { %10764 = vst [vmem:[#allocation154_spill] sm:$0xff] %v6888_v21  ;;  %10765 = vst [vmem:[#allocation155_spill] sm:$0xff] %v6890_v10  ;;  %v5211_v10 = vld [vmem:[%s5525_s15 + $0x390] sm:$0xff]  ;;  %v5212_v21 = vld [vmem:[%s5525_s15 + $0x388] sm:$0xff] }
 0x1ef   : > { %v929_v29 = vmul.f32 %v5211_v10, %v5211_v10  ;;  %v928_v4 = vmul.f32 %v5212_v21, %v5212_v21 }
 0x1f0   : > { %1275 = vadd.xlane.f32.xlu1 %v1274_v38  ;;  %1272 = vadd.xlane.f32.xlu0 %v1271_v28 }
 0x1f1   : > { %v6896_v27 = vpop.xlane.xlu1 %1071  ;;  %v6898_v2 = vpop.xlane.xlu0 %1068  ;;  %v1286_v38 = vsel %vm298_vm0, %v929_v29, 0.0  ;;  %v1283_v28 = vsel %vm298_vm0, %v928_v4, 0.0 }
 0x1f2   : > { %10766 = vst [vmem:[#allocation156_spill] sm:$0xff] %v6896_v27  ;;  %10767 = vst [vmem:[#allocation157_spill] sm:$0xff] %v6898_v2  ;;  %v5213_v2 = vld [vmem:[%s5525_s15 + $0x3a0] sm:$0xff]  ;;  %v5214_v27 = vld [vmem:[%s5525_s15 + $0x398] sm:$0xff] }
 0x1f3   : > { %v931_v18 = vmul.f32 %v5213_v2, %v5213_v2  ;;  %v930_v13 = vmul.f32 %v5214_v27, %v5214_v27 }
 0x1f4   : > { %1281 = vadd.xlane.f32.xlu1 %v1280_v24  ;;  %1278 = vadd.xlane.f32.xlu0 %v1277_v32 }
 0x1f5   : > { %v6904_v17 = vpop.xlane.xlu1 %1077  ;;  %v6906_v46 = vpop.xlane.xlu0 %1074  ;;  %v1292_v24 = vsel %vm298_vm0, %v931_v18, 0.0  ;;  %v1289_v32 = vsel %vm298_vm0, %v930_v13, 0.0 }
 0x1f6   : > { %10768 = vst [vmem:[#allocation158_spill] sm:$0xff] %v6904_v17  ;;  %10769 = vst [vmem:[#allocation159_spill] sm:$0xff] %v6906_v46  ;;  %v5215_v46 = vld [vmem:[%s5525_s15 + $0x3b0] sm:$0xff]  ;;  %v5216_v17 = vld [vmem:[%s5525_s15 + $0x3a8] sm:$0xff] }
 0x1f7   : > { %v933_v29 = vmul.f32 %v5215_v46, %v5215_v46  ;;  %v932_v4 = vmul.f32 %v5216_v17, %v5216_v17 }
 0x1f8   : > { %1287 = vadd.xlane.f32.xlu1 %v1286_v38  ;;  %1284 = vadd.xlane.f32.xlu0 %v1283_v28 }
 0x1f9   : > { %v6912_v21 = vpop.xlane.xlu1 %1083  ;;  %v6914_v10 = vpop.xlane.xlu0 %1080  ;;  %v1298_v38 = vsel %vm298_vm0, %v933_v29, 0.0  ;;  %v1295_v28 = vsel %vm298_vm0, %v932_v4, 0.0 }
 0x1fa   : > { %10770 = vst [vmem:[#allocation160_spill] sm:$0xff] %v6912_v21  ;;  %10771 = vst [vmem:[#allocation161_spill] sm:$0xff] %v6914_v10  ;;  %v5217_v21 = vld [vmem:[%s5525_s15 + $0x3c0] sm:$0xff]  ;;  %v5218_v10 = vld [vmem:[%s5525_s15 + $0x3b8] sm:$0xff] }
 0x1fb   : > { %v935_v18 = vmul.f32 %v5217_v21, %v5217_v21  ;;  %v934_v13 = vmul.f32 %v5218_v10, %v5218_v10 }
 0x1fc   : > { %1293 = vadd.xlane.f32.xlu1 %v1292_v24  ;;  %1290 = vadd.xlane.f32.xlu0 %v1289_v32 }
 0x1fd   : > { %v6920_v27 = vpop.xlane.xlu1 %1089  ;;  %v6922_v2 = vpop.xlane.xlu0 %1086  ;;  %v1304_v24 = vsel %vm298_vm0, %v935_v18, 0.0  ;;  %v1301_v32 = vsel %vm298_vm0, %v934_v13, 0.0 }
 0x1fe   : > { %10772 = vst [vmem:[#allocation162_spill] sm:$0xff] %v6920_v27  ;;  %10773 = vst [vmem:[#allocation163_spill] sm:$0xff] %v6922_v2  ;;  %v5219_v2 = vld [vmem:[%s5525_s15 + $0x3d0] sm:$0xff]  ;;  %v5220_v27 = vld [vmem:[%s5525_s15 + $0x3c8] sm:$0xff] }
 0x1ff   : > { %v937_v29 = vmul.f32 %v5219_v2, %v5219_v2  ;;  %v936_v4 = vmul.f32 %v5220_v27, %v5220_v27  ;;  %v10778_v2 = vsub.f32 %v6489_v31, %v6482_v35 }
 0x200   : > { %1299 = vadd.xlane.f32.xlu1 %v1298_v38  ;;  %1296 = vadd.xlane.f32.xlu0 %v1295_v28 }
 0x201   : > { %v6928_v17 = vpop.xlane.xlu1 %1095  ;;  %v6930_v46 = vpop.xlane.xlu0 %1092  ;;  %v1310_v38 = vsel %vm298_vm0, %v937_v29, 0.0  ;;  %v1307_v28 = vsel %vm298_vm0, %v936_v4, 0.0  ;;  %v1719_v27 = vmax.f32 %v10778_v2, 0.0  ;;  %v5223_v29 = vld [vmem:[%s5525_s15 + $0x3f0] sm:$0xff]  ;;  %v10783_v4 = vsub.f32 %v6468_v47, %v6463_v39 }
 0x202   : > { %10774 = vst [vmem:[#allocation164_spill] sm:$0xff] %v6928_v17  ;;  %10775 = vst [vmem:[#allocation165_spill] sm:$0xff] %v6930_v46  ;;  %v5221_v17 = vld [vmem:[%s5525_s15 + $0x3e0] sm:$0xff]  ;;  %v5222_v46 = vld [vmem:[%s5525_s15 + $0x3d8] sm:$0xff]  ;;  %v10790_v39 = vsub.f32 %v6487_v58, %v6472_v23 }
 0x203   : > { %v939_v18 = vmul.f32 %v5221_v17, %v5221_v17  ;;  %v938_v13 = vmul.f32 %v5222_v46, %v5222_v46  ;;  %v1718_v17 = vmax.f32 %v10783_v4, 0.0  ;;  %v1977_v4 = vadd.f32 0.001, %v1719_v27  ;;  %v5225_v27 = vld [vmem:[%s5525_s15 + $0x400] sm:$0xff] }
 0x204   : > { %1305 = vadd.xlane.f32.xlu1 %v1304_v24  ;;  %1302 = vadd.xlane.f32.xlu0 %v1301_v32  ;;  %v6948_v24 = vmul.f32 0.020408163, %v10779_v41  ;;  %v10781_v32 = vld [vmem:[#allocation50_spill] sm:$0xff]  ;;  %v5224_v41 = vld [vmem:[%s5525_s15 + $0x3e8] sm:$0xff]  ;;  %v1720_v47 = vmax.f32 %v10790_v39, 0.0  ;;  %v943_v39 = vmul.f32 %v5225_v27, %v5225_v27 }
 0x205   : > { %v6936_v21 = vpop.xlane.xlu1 %1101  ;;  %v6938_v10 = vpop.xlane.xlu0 %1098  ;;  %v1316_v35 = vsel %vm298_vm0, %v939_v18, 0.0  ;;  %v1313_v31 = vsel %vm298_vm0, %v938_v13, 0.0  ;;  %v940_v2 = vmul.f32 %v5224_v41, %v5224_v41  ;;  %v10792_v13 = vld [vmem:[#allocation53_spill] sm:$0xff]  ;;  %v10794_v41 = vld [vmem:[#allocation54_spill] sm:$0xff]  ;;  %4907 = vrsqrt.f32 %v1977_v4 }
 0x206   : > { %10776 = vst [vmem:[#allocation166_spill] sm:$0xff] %v6936_v21  ;;  %10777 = vst [vmem:[#allocation167_spill] sm:$0xff] %v6938_v10  ;;  %v6951_v21 = vmul.f32 0.020408163, %v10781_v32  ;;  %v941_v10 = vmul.f32 %v5223_v29, %v5223_v29  ;;  %v10786_v32 = vld [vmem:[#allocation51_spill] sm:$0xff]  ;;  %v6975_v18 = vmul.f32 %v6948_v24, %v6948_v24  ;;  %v10807_v4 = vld [vmem:[#allocation58_spill] sm:$0xff] }
 0x207   : > { %10780 = vst [vmem:[#allocation48_spill] sm:$0xff] %v6948_v24  ;;  %v1319_v58 = vsel %vm298_vm0, %v940_v2, 0.0  ;;  %v5226_v24 = vld [vmem:[%s5525_s15 + $0x3f8] sm:$0xff]  ;;  %v10800_v2 = vld [vmem:[#allocation56_spill] sm:$0xff] }
 0x208   : > { %10782 = vst [vmem:[#allocation50_spill] sm:$0xff] %v6951_v21  ;;  %1311 = vadd.xlane.f32.xlu1 %v1310_v38  ;;  %1308 = vadd.xlane.f32.xlu0 %v1307_v28  ;;  %v6965_v38 = vmul.f32 0.020408163, %v10786_v32  ;;  %v10788_v28 = vld [vmem:[#allocation52_spill] sm:$0xff]  ;;  %10791 = vst [vmem:[#allocation170_spill] sm:$0xff] %v6975_v18  ;;  %v1322_v32 = vsel %vm298_vm0, %v941_v10, 0.0  ;;  %v942_v18 = vmul.f32 %v5226_v24, %v5226_v24 }
 0x209   : > { %v6957_v8 = vpop.xlane.xlu1 %1107  ;;  %v6959_v46 = vpop.xlane.xlu0 %1104  ;;  %v6968_v29 = vmul.f32 0.020408163, %v10788_v28  ;;  %v1976_v28 = vadd.f32 0.001, %v1718_v17  ;;  %v1978_v17 = vadd.f32 0.001, %v1720_v47  ;;  %v10802_v24 = vsub.f32 %v6518_v43, %v6516_v7 }
 0x20a   : > { %10784 = vst [vmem:[#allocation168_spill] sm:$0xff] %v6957_v8  ;;  %10785 = vst [vmem:[#allocation169_spill] sm:$0xff] %v6959_v46  ;;  %v6978_v8 = vmul.f32 0.020408163, %v10792_v13  ;;  %v6981_v46 = vmul.f32 0.020408163, %v10794_v41  ;;  %v6993_v13 = vmul.f32 %v6951_v21, %v6951_v21 }
 0x20b   : > { %10787 = vst [vmem:[#allocation51_spill] sm:$0xff] %v6965_v38  ;;  %10789 = vst [vmem:[#allocation52_spill] sm:$0xff] %v6968_v29  ;;  %v7001_v10 = vmul.f32 %v6968_v29, %v6968_v29  ;;  %v7007_v27 = vmul.f32 0.020408163, %v10800_v2  ;;  %v10804_v47 = vld [vmem:[#allocation57_spill] sm:$0xff]  ;;  %4909 = vrsqrt.f32 %v1976_v28 }
 0x20c   : > { %10793 = vst [vmem:[#allocation53_spill] sm:$0xff] %v6978_v8  ;;  %10795 = vst [vmem:[#allocation54_spill] sm:$0xff] %v6981_v46  ;;  %1317 = vadd.xlane.f32.xlu1 %v1316_v35  ;;  %1314 = vadd.xlane.f32.xlu0 %v1313_v31  ;;  %v6997_v35 = vmul.f32 %v6965_v38, %v6965_v38  ;;  %v10798_v31 = vld [vmem:[#allocation55_spill] sm:$0xff]  ;;  %v7018_v29 = vmul.f32 %v6981_v46, %v6981_v46  ;;  %v7021_v21 = vmul.f32 0.020408163, %v10804_v47 }
 0x20d   : > { %v6984_v30 = vpop.xlane.xlu1 %1113  ;;  %v6986_v23 = vpop.xlane.xlu0 %1110  ;;  %v7004_v41 = vmul.f32 0.020408163, %v10798_v31  ;;  %10801 = vst [vmem:[#allocation56_spill] sm:$0xff] %v7007_v27  ;;  %v10806_v31 = vsub.f32 %v6512_v34, %v6507_v60  ;;  %v7027_v7 = vmul.f32 0.020408163, %v10807_v4  ;;  %v1328_v46 = vsel %vm298_vm0, %v943_v39, 0.0 }
 0x20e   : > { %10796 = vst [vmem:[#allocation171_spill] sm:$0xff] %v6984_v30  ;;  %10797 = vst [vmem:[#allocation172_spill] sm:$0xff] %v6986_v23  ;;  %v1721_v23 = vmax.f32 %v10802_v24, 0.0  ;;  %v7014_v30 = vmul.f32 %v6978_v8, %v6978_v8  ;;  %v1325_v8 = vsel %vm298_vm0, %v942_v18, 0.0  ;;  %v10811_v47 = vld [vmem:[#allocation59_spill] sm:$0xff]  ;;  %v10815_v34 = vld [vmem:[#allocation61_spill] sm:$0xff]  ;;  %4911 = vrsqrt.f32 %v1978_v17 }
 0x20f   : > { %10799 = vst [vmem:[#allocation55_spill] sm:$0xff] %v7004_v41  ;;  %10803 = vst [vmem:[#allocation173_spill] sm:$0xff] %v7018_v29  ;;  %v1722_v2 = vmax.f32 %v10806_v31, 0.0  ;;  %v7036_v38 = vmul.f32 0.020408163, %v10811_v47  ;;  %v10813_v29 = vld [vmem:[#allocation60_spill] sm:$0xff]  ;;  %v7046_v28 = vmul.f32 %v7004_v41, %v7004_v41  ;;  %v10817_v18 = vsub.f32 %v6541_v11, %v6522_v26 }
 0x210   : > { %10805 = vst [vmem:[#allocation57_spill] sm:$0xff] %v7021_v21  ;;  %1323 = vadd.xlane.f32.xlu1 %v1322_v32  ;;  %1320 = vadd.xlane.f32.xlu0 %v1319_v58  ;;  %10808 = vst [vmem:[#allocation58_spill] sm:$0xff] %v7027_v7  ;;  %v7039_v60 = vmul.f32 0.020408163, %v10813_v29  ;;  %v7042_v32 = vmul.f32 0.020408163, %v10815_v34  ;;  %v7050_v58 = vmul.f32 %v7007_v27, %v7007_v27 }
 0x211   : > { %v7029_v43 = vpop.xlane.xlu1 %1119  ;;  %v7031_v24 = vpop.xlane.xlu0 %1116  ;;  %10812 = vst [vmem:[#allocation59_spill] sm:$0xff] %v7036_v38  ;;  %v1979_v39 = vadd.f32 0.001, %v1721_v23  ;;  %v1723_v31 = vmax.f32 %v10817_v18, 0.0  ;;  %v7057_v29 = vmul.f32 %v7021_v21, %v7021_v21  ;;  %v10818_v4 = vld [vmem:[#allocation62_spill] sm:$0xff]  ;;  %v10820_v34 = vsub.f32 %v6539_v19, %v6534_v48  ;;  %v10821_v26 = vld [vmem:[#allocation63_spill] sm:$0xff] }
 0x212   : > { %10809 = vst [vmem:[#allocation174_spill] sm:$0xff] %v7029_v43  ;;  %10810 = vst [vmem:[#allocation175_spill] sm:$0xff] %v7031_v24  ;;  %v7060_v47 = vmul.f32 0.020408163, %v10818_v4  ;;  %v1980_v17 = vadd.f32 0.001, %v1722_v2  ;;  %v7067_v23 = vmul.f32 %v7027_v7, %v7027_v7  ;;  %v7084_v48 = vmul.f32 %v7036_v38, %v7036_v38 }
 0x213   : > { %10814 = vst [vmem:[#allocation60_spill] sm:$0xff] %v7039_v60  ;;  %10816 = vst [vmem:[#allocation61_spill] sm:$0xff] %v7042_v32  ;;  %v1724_v43 = vmax.f32 %v10820_v34, 0.0  ;;  %v7070_v11 = vmul.f32 0.020408163, %v10821_v26  ;;  %v10823_v18 = vld [vmem:[#allocation64_spill] sm:$0xff]  ;;  %v7088_v19 = vmul.f32 %v7039_v60, %v7039_v60  ;;  %4913 = vrsqrt.f32 %v1979_v39 }
 0x214   : > { %10819 = vst [vmem:[#allocation62_spill] sm:$0xff] %v7060_v47  ;;  %1329 = vadd.xlane.f32.xlu1 %v1328_v46  ;;  %1326 = vadd.xlane.f32.xlu0 %v1325_v8  ;;  %v7073_v27 = vmul.f32 0.020408163, %v10823_v18  ;;  %v10825_v24 = vld [vmem:[#allocation65_spill] sm:$0xff]  ;;  %v7092_v8 = vmul.f32 %v7042_v32, %v7042_v32  ;;  %v10829_v46 = vld [vmem:[#allocation66_spill] sm:$0xff]  ;;  %v7105_v60 = vmul.f32 %v7060_v47, %v7060_v47  ;;  %4915 = vrsqrt.f32 %v1980_v17  ;;  %v10843_v47 = vld [vmem:[#allocation71_spill] sm:$0xff] }
 0x215   : > { %10822 = vst [vmem:[#allocation63_spill] sm:$0xff] %v7070_v11  ;;  %v7076_v4 = vmul.f32 0.020408163, %v10825_v24  ;;  %v7078_v2 = vpop.xlane.xlu1 %1125  ;;  %v7080_v21 = vpop.xlane.xlu0 %1122  ;;  %v7095_v34 = vmul.f32 0.020408163, %v10829_v46  ;;  %v10831_v24 = vld [vmem:[#allocation67_spill] sm:$0xff]  ;;  %v10834_v46 = vsub.f32 %v6564_v63, %v6559_v36 }
 0x216   : > { %10824 = vst [vmem:[#allocation64_spill] sm:$0xff] %v7073_v27  ;;  %10827 = vst [vmem:[#allocation176_spill] sm:$0xff] %v7078_v2  ;;  %v7098_v26 = vmul.f32 0.020408163, %v10831_v24  ;;  %v1981_v18 = vadd.f32 0.001, %v1723_v31  ;;  %v7112_v24 = vmul.f32 %v7070_v11, %v7070_v11  ;;  %v7116_v39 = vmul.f32 %v7073_v27, %v7073_v27  ;;  %v4908_v11 = vpop.eup %4907 }
 0x217   : > { %10826 = vst [vmem:[#allocation65_spill] sm:$0xff] %v7076_v4  ;;  %10828 = vst [vmem:[#allocation177_spill] sm:$0xff] %v7080_v21  ;;  %v10833_v21 = vsub.f32 %v6570_v61, %v6568_v3  ;;  %v1982_v32 = vadd.f32 0.001, %v1724_v43  ;;  %v1726_v2 = vmax.f32 %v10834_v46, 0.0  ;;  %v7120_v3 = vmul.f32 %v7076_v4, %v7076_v4  ;;  %v10835_v61 = vld [vmem:[#allocation68_spill] sm:$0xff] }
 0x218   : > { %10830 = vst [vmem:[#allocation66_spill] sm:$0xff] %v7095_v34  ;;  %10832 = vst [vmem:[#allocation67_spill] sm:$0xff] %v7098_v26  ;;  %v7131_v36 = vmul.f32 %v7095_v34, %v7095_v34  ;;  %v10839_v63 = vld [vmem:[#allocation69_spill] sm:$0xff]  ;;  %v10841_v46 = vld [vmem:[#allocation70_spill] sm:$0xff]  ;;  %v7140_v4 = vmul.f32 0.020408163, %v10843_v47  ;;  %4917 = vrsqrt.f32 %v1981_v18 }
 0x219   : > { %v1725_v7 = vmax.f32 %v10833_v21, 0.0  ;;  %v7123_v21 = vmul.f32 0.020408163, %v10835_v61  ;;  %v7125_v43 = vpop.xlane.xlu1 %1131  ;;  %v7127_v31 = vpop.xlane.xlu0 %1128  ;;  %v7134_v17 = vmul.f32 0.020408163, %v10839_v63  ;;  %v7150_v61 = vmul.f32 %v7098_v26, %v7098_v26  ;;  %v1848_v41 = vld [vmem:[%s7146_s18 + $0x8] sm:$0xff] }
 0x21a   : > { %10837 = vst [vmem:[#allocation178_spill] sm:$0xff] %v7125_v43  ;;  %10838 = vst [vmem:[#allocation179_spill] sm:$0xff] %v7127_v31  ;;  %v7137_v27 = vmul.f32 0.020408163, %v10841_v46  ;;  %v10845_v63 = vsub.f32 %v6593_v45, %v6574_v57  ;;  %v7156_v47 = vmul.f32 0.020408163, %v6086_v15  ;;  %4919 = vrsqrt.f32 %v1982_v32 }
 0x21b   : > { %10836 = vst [vmem:[#allocation68_spill] sm:$0xff] %v7123_v21  ;;  %10840 = vst [vmem:[#allocation69_spill] sm:$0xff] %v7134_v17  ;;  %v1983_v34 = vadd.f32 0.001, %v1725_v7  ;;  %v1984_v31 = vadd.f32 0.001, %v1726_v2  ;;  %v10847_v43 = vsub.f32 %v6591_v49, %v6586_v44  ;;  %v7164_v26 = vmul.f32 %v7123_v21, %v7123_v21  ;;  %v4910_v49 = vpop.eup %4909 }
 0x21c   : > { %10842 = vst [vmem:[#allocation70_spill] sm:$0xff] %v7137_v27  ;;  %10844 = vst [vmem:[#allocation71_spill] sm:$0xff] %v7140_v4  ;;  %v1727_v46 = vmax.f32 %v10845_v63, 0.0  ;;  %v10849_v7 = vld [vmem:[#allocation72_spill] sm:$0xff]  ;;  %v7170_v57 = vmul.f32 0.020408163, %v6094_v14  ;;  %v7181_v2 = vmul.f32 %v7134_v17, %v7134_v17  ;;  %v7189_v14 = vmul.f32 %v7140_v4, %v7140_v4 }
 0x21d   : > { %10846 = vst [vmem:[#allocation180_spill] sm:$0xff] %v7156_v47  ;;  %v1728_v38 = vmax.f32 %v10847_v43, 0.0  ;;  %10848 = vst [vmem:[#allocation181_spill] sm:$0xff] %v7164_v26  ;;  %v7167_v18 = vmul.f32 0.020408163, %v10849_v7  ;;  %v10852_v15 = vld [vmem:[#allocation73_spill] sm:$0xff]  ;;  %v7175_v32 = vpop.xlane.xlu1 %1137  ;;  %v7177_v44 = vpop.xlane.xlu0 %1134  ;;  %v7185_v43 = vmul.f32 %v7137_v27, %v7137_v27  ;;  %4921 = vrsqrt.f32 %v1983_v34 }
 0x21e   : > { %10851 = vst [vmem:[#allocation182_spill] sm:$0xff] %v7170_v57  ;;  %v7173_v45 = vmul.f32 0.020408163, %v10852_v15  ;;  %10854 = vst [vmem:[#allocation183_spill] sm:$0xff] %v7175_v32  ;;  %v7192_v63 = vmul.f32 0.020408163, %v6103_v22  ;;  %v4912_v7 = vpop.eup %4911  ;;  %v10858_v21 = vsub.f32 %v6622_v37, %v6620_v40  ;;  %v7197_v17 = vmul.f32 %v4908_v11, %v1848_v41 }
 0x21f   : > { %10850 = vst [vmem:[#allocation72_spill] sm:$0xff] %v7167_v18  ;;  %10855 = vst [vmem:[#allocation184_spill] sm:$0xff] %v7177_v44  ;;  %v1985_v15 = vadd.f32 0.001, %v1727_v46  ;;  %v1849_v32 = vld [vmem:[%s7146_s18 + $0x10] sm:$0xff]  ;;  %v1847_v26 = vld [vmem:[%s7146_s18] sm:$0xff]  ;;  %v7203_v27 = vmul.f32 %v7156_v47, %v7156_v47  ;;  %4923 = vrsqrt.f32 %v1984_v31  ;;  %v10860_v22 = vsub.f32 %v6616_v52, %v6611_v53 }
 0x220   : > { %10853 = vst [vmem:[#allocation73_spill] sm:$0xff] %v7173_v45  ;;  %10856 = vst [vmem:[#allocation185_spill] sm:$0xff] %v7185_v43  ;;  %v1729_v44 = vmax.f32 %v10858_v21, 0.0  ;;  %v1986_v4 = vadd.f32 0.001, %v1728_v38  ;;  %v7210_v34 = vmul.f32 %v7167_v18, %v7167_v18  ;;  %v7214_v40 = vmul.f32 %v7170_v57, %v7170_v57 }
 0x221   : > { %10857 = vst [vmem:[#allocation186_spill] sm:$0xff] %v7192_v63  ;;  %10859 = vst [vmem:[#allocation187_spill] sm:$0xff] %v7197_v17  ;;  %v1730_v43 = vmax.f32 %v10860_v22, 0.0  ;;  %v7218_v37 = vmul.f32 %v7173_v45, %v7173_v45  ;;  %v7221_v41 = vmul.f32 0.020408163, %v6105_v62  ;;  %v7223_v38 = vpop.xlane.xlu1 %1143  ;;  %v7225_v53 = vpop.xlane.xlu0 %1140  ;;  %v7229_v52 = vmul.f32 %v7192_v63, %v7192_v63 }
 0x222   : > { %10862 = vst [vmem:[#allocation189_spill] sm:$0xff] %v7223_v38  ;;  %10863 = vst [vmem:[#allocation190_spill] sm:$0xff] %v7225_v53  ;;  %v7232_v11 = vmul.f32 0.020408163, %v6113_v1  ;;  %v7234_v21 = vmul.f32 %v4912_v7, %v1849_v32  ;;  %v7236_v31 = vmul.f32 %v4910_v49, %v1847_v26  ;;  %4925 = vrsqrt.f32 %v1985_v15  ;;  %v4914_v45 = vpop.eup %4913  ;;  %v1850_v49 = vld [vmem:[%s7146_s18 + $0x18] sm:$0xff] }
 0x223   : > { %10861 = vst [vmem:[#allocation188_spill] sm:$0xff] %v7221_v41  ;;  %v1987_v46 = vadd.f32 0.001, %v1729_v44  ;;  %v10867_v62 = vsub.f32 %v6645_v50, %v6626_v33  ;;  %v2364_v57 = vmul.f32 %v7197_v17, %v6466_v55  ;;  %v7244_v63 = vmul.f32 0.020408163, %v6115_v54  ;;  %v4916_v44 = vpop.eup %4915 }
 0x224   : > { %10864 = vst [vmem:[#allocation191_spill] sm:$0xff] %v7232_v11  ;;  %10865 = vst [vmem:[#allocation192_spill] sm:$0xff] %v7234_v21  ;;  %4927 = vrsqrt.f32 %v1986_v4  ;;  %v1988_v1 = vadd.f32 0.001, %v1730_v43  ;;  %v10869_v26 = vsub.f32 %v6643_v56, %v6638_v16  ;;  %v7252_v33 = vmul.f32 %v7221_v41, %v7221_v41  ;;  %v1851_v56 = vld [vmem:[%s7146_s18 + $0x20] sm:$0xff] }
 0x225   : > { %10866 = vst [vmem:[#allocation193_spill] sm:$0xff] %v7236_v31  ;;  %v1731_v22 = vmax.f32 %v10867_v62, 0.0  ;;  %10868 = vst [vmem:[#allocation194_spill] sm:$0xff] %v7244_v63  ;;  %v7255_v50 = vmul.f32 0.020408163, %v6123_v0  ;;  %v10872_v54 = vsub.f32 %v6674_v25, %v6672_v20  ;;  %v7263_v43 = vpop.xlane.xlu1 %1149  ;;  %2623 = vrot.lane.b32.xlu1 %v2364_v57, %s5493_s19  ;;  %v7266_v16 = vpop.xlane.xlu0 %1146  ;;  %v10876_v0 = vld [vmem:[#allocation74_spill] sm:$0xff]  ;;  %4929 = vrsqrt.f32 %v1987_v46 }
 0x226   : > { %v1732_v32 = vmax.f32 %v10869_v26, 0.0  ;;  %v7258_v55 = vmul.f32 0.020408163, %v6125_v5  ;;  %10873 = vst [vmem:[#allocation197_spill] sm:$0xff] %v7263_v43  ;;  %10874 = vst [vmem:[#allocation198_spill] sm:$0xff] %v7266_v16  ;;  %v10878_v5 = vld [vmem:[#allocation122_spill] sm:$0xff]  ;;  %v7282_v47 = vmul.f32 %v4914_v45, %v1850_v49  ;;  %4931 = vrsqrt.f32 %v1988_v1 }
 0x227   : > { %10870 = vst [vmem:[#allocation195_spill] sm:$0xff] %v7255_v50  ;;  %v1733_v4 = vmax.f32 %v10872_v54, 0.0  ;;  %v7270_v7 = vmul.f32 0.020408163, %v6133_v9  ;;  %v7273_v15 = vmul.f32 0.020408163, %v10876_v0  ;;  %v4918_v9 = vpop.eup %4917  ;;  %v7292_v46 = vmul.f32 %v7232_v11, %v7232_v11 }
 0x228   : > { %10871 = vst [vmem:[#allocation196_spill] sm:$0xff] %v7258_v55  ;;  %v10879_v62 = vld [vmem:[#allocation34_spill] sm:$0xff]  ;;  %v10881_v25 = vld [vmem:[#allocation17_spill] sm:$0xff]  ;;  %v1989_v17 = vadd.f32 0.001, %v1731_v22  ;;  %v10882_v57 = vld [vmem:[#allocation19_spill] sm:$0xff]  ;;  %v7296_v22 = vmul.f32 %v7244_v63, %v7244_v63 }
 0x229   : > { %10875 = vst [vmem:[#allocation199_spill] sm:$0xff] %v7270_v7  ;;  %10877 = vst [vmem:[#allocation74_spill] sm:$0xff] %v7273_v15  ;;  %v10880_v26 = vsub.f32 %v10878_v5, %v10879_v62  ;;  %v2363_v54 = vmul.f32 %v7236_v31, %v10881_v25  ;;  %v2365_v41 = vmul.f32 %v7234_v21, %v10882_v57  ;;  %v1990_v18 = vadd.f32 0.001, %v1732_v32  ;;  %v10884_v0 = vld [vmem:[#allocation125_spill] sm:$0xff]  ;;  %v10885_v43 = vld [vmem:[#allocation124_spill] sm:$0xff]  ;;  %v7301_v57 = vpop.xlane.xlu1 %1155 }
 0x22a   : > { %10883 = vst [vmem:[#allocation122_spill] sm:$0xff] %v7282_v47  ;;  %v10886_v16 = vsub.f32 %v10884_v0, %v10885_v43  ;;  %v7287_v5 = vmul.f32 %v4916_v44, %v1851_v56  ;;  %v1852_v62 = vld [vmem:[%s7146_s18 + $0x28] sm:$0xff]  ;;  %v1991_v45 = vadd.f32 0.001, %v1733_v4  ;;  %v10888_v49 = vld [vmem:[#allocation126_spill] sm:$0xff]  ;;  %10891 = vst [vmem:[#allocation17_spill] sm:$0xff] %v7301_v57  ;;  %v7304_v44 = vpop.xlane.xlu0 %1152  ;;  %v7313_v56 = vmul.f32 %v7258_v55, %v7258_v55 }
 0x22b   : > { %v1734_v20 = vmax.f32 %v10880_v26, 0.0  ;;  %v4920_v26 = vpop.eup %4919  ;;  %v10889_v1 = vld [vmem:[#allocation123_spill] sm:$0xff]  ;;  %2625 = vrot.lane.b32.xlu1 %v2365_v41, %s5493_s19  ;;  %10892 = vst [vmem:[#allocation19_spill] sm:$0xff] %v7304_v44  ;;  %v1853_v43 = vld [vmem:[%s7146_s18 + $0x30] sm:$0xff]  ;;  %v7317_v4 = vmul.f32 %v7270_v7, %v7270_v7  ;;  %2621 = vrot.lane.b32.xlu0 %v2363_v54, %s5493_s19  ;;  %v7322_v41 = vmul.f32 %v7273_v15, %v7273_v15  ;;  %4933 = vrsqrt.f32 %v1989_v17  ;;  %v1854_v54 = vld [vmem:[%s7146_s18 + $0x38] sm:$0xff] }
 0x22c   : > { %v1736_v38 = vmax.f32 %v10886_v16, 0.0  ;;  %10887 = vst [vmem:[#allocation34_spill] sm:$0xff] %v7287_v5  ;;  %v10890_v32 = vsub.f32 %v10888_v49, %v10889_v1  ;;  %v7309_v16 = vmul.f32 %v7255_v50, %v7255_v50  ;;  %v10895_v49 = vld [vmem:[#allocation23_spill] sm:$0xff]  ;;  %v4922_v21 = vpop.eup %4921  ;;  %4935 = vrsqrt.f32 %v1990_v18  ;;  %v10897_v50 = vld [vmem:[#allocation21_spill] sm:$0xff]  ;;  %v10901_v63 = vld [vmem:[#allocation128_spill] sm:$0xff] }
 0x22d   : > { %10894 = vst [vmem:[#allocation124_spill] sm:$0xff] %v7317_v4  ;;  %v1992_v0 = vadd.f32 0.001, %v1734_v20  ;;  %v2366_v1 = vmul.f32 %v7282_v47, %v10895_v49  ;;  %v2367_v7 = vmul.f32 %v7287_v5, %v10897_v50  ;;  %v7330_v20 = vmul.f32 %v4920_v26, %v1853_v43  ;;  %v4924_v55 = vpop.eup %4923  ;;  %v10899_v11 = vld [vmem:[#allocation75_spill] sm:$0xff]  ;;  %v10906_v50 = vld [vmem:[#allocation76_spill] sm:$0xff]  ;;  %v10908_v43 = vld [vmem:[#allocation77_spill] sm:$0xff] }
 0x22e   : > { %v1735_v25 = vmax.f32 %v10890_v32, 0.0  ;;  %10893 = vst [vmem:[#allocation125_spill] sm:$0xff] %v7309_v16  ;;  %v7326_v32 = vmul.f32 %v4918_v9, %v1852_v62  ;;  %v1994_v31 = vadd.f32 0.001, %v1736_v38  ;;  %v7334_v15 = vmul.f32 0.020408163, %v10899_v11  ;;  %v7339_v62 = vpop.xlane.xlu1 %1161  ;;  %v7342_v18 = vpop.xlane.xlu0 %1158 }
 0x22f   : > { %10898 = vst [vmem:[#allocation123_spill] sm:$0xff] %v7330_v20  ;;  %4937 = vrsqrt.f32 %v1991_v45  ;;  %v10902_v49 = vld [vmem:[#allocation127_spill] sm:$0xff]  ;;  %10904 = vst [vmem:[#allocation21_spill] sm:$0xff] %v7339_v62  ;;  %2627 = vrot.lane.b32.xlu1 %v2366_v1, %s5493_s19  ;;  %v1855_v38 = vld [vmem:[%s7146_s18 + $0x40] sm:$0xff]  ;;  %v7346_v26 = vmul.f32 0.020408163, %v10906_v50  ;;  %2629 = vrot.lane.b32.xlu0 %v2367_v7, %s5493_s19  ;;  %v7363_v57 = vmul.f32 %v4922_v21, %v1854_v54 }
 0x230   : > { %10896 = vst [vmem:[#allocation126_spill] sm:$0xff] %v7326_v32  ;;  %10900 = vst [vmem:[#allocation23_spill] sm:$0xff] %v7334_v15  ;;  %v1993_v17 = vadd.f32 0.001, %v1735_v25  ;;  %v10903_v47 = vsub.f32 %v10901_v63, %v10902_v49  ;;  %v7349_v11 = vmul.f32 0.020408163, %v10908_v43  ;;  %4939 = vrsqrt.f32 %v1992_v0  ;;  %v4926_v43 = vpop.eup %4925 }
 0x231   : > { %10905 = vst [vmem:[#allocation75_spill] sm:$0xff] %v7342_v18  ;;  %10907 = vst [vmem:[#allocation128_spill] sm:$0xff] %v7346_v26  ;;  %v10910_v45 = vld [vmem:[#allocation130_spill] sm:$0xff]  ;;  %v10911_v25 = vld [vmem:[#allocation129_spill] sm:$0xff]  ;;  %4941 = vrsqrt.f32 %v1994_v31 }
 0x232   : > { %v1738_v9 = vmax.f32 %v10903_v47, 0.0  ;;  %10909 = vst [vmem:[#allocation127_spill] sm:$0xff] %v7349_v11  ;;  %v10912_v5 = vsub.f32 %v10910_v45, %v10911_v25  ;;  %v10913_v47 = vld [vmem:[#allocation78_spill] sm:$0xff]  ;;  %v10915_v1 = vld [vmem:[#allocation79_spill] sm:$0xff]  ;;  %v10917_v62 = vld [vmem:[#allocation20_spill] sm:$0xff]  ;;  %v7370_v45 = vmul.f32 %v4924_v55, %v1855_v38  ;;  %4943 = vrsqrt.f32 %v1993_v17  ;;  %v7379_v53 = vpop.xlane.xlu1 %1167  ;;  %v7382_v31 = vpop.xlane.xlu0 %1164 }
 0x233   : > { %v7356_v49 = vmul.f32 0.020408163, %v10913_v47  ;;  %v7359_v18 = vmul.f32 0.020408163, %v10915_v1  ;;  %v2368_v50 = vmul.f32 %v7326_v32, %v10917_v62  ;;  %10918 = vst [vmem:[#allocation130_spill] sm:$0xff] %v7363_v57  ;;  %v10919_v0 = vld [vmem:[#allocation80_spill] sm:$0xff]  ;;  %v4928_v47 = vpop.eup %4927  ;;  %v7387_v38 = vmul.f32 %v7334_v15, %v7334_v15 }
 0x234   : > { %v1737_v63 = vmax.f32 %v10912_v5, 0.0  ;;  %v7366_v44 = vmul.f32 0.020408163, %v10919_v0  ;;  %v10921_v5 = vld [vmem:[#allocation22_spill] sm:$0xff]  ;;  %10922 = vst [vmem:[#allocation78_spill] sm:$0xff] %v7370_v45  ;;  %v1856_v25 = vld [vmem:[%s7146_s18 + $0x48] sm:$0xff]  ;;  %v7391_v17 = vmul.f32 %v7346_v26, %v7346_v26 }
 0x235   : > { %10914 = vst [vmem:[#allocation76_spill] sm:$0xff] %v7356_v49  ;;  %10916 = vst [vmem:[#allocation77_spill] sm:$0xff] %v7359_v18  ;;  %v2369_v7 = vmul.f32 %v7330_v20, %v10921_v5  ;;  %v10923_v1 = vld [vmem:[#allocation81_spill] sm:$0xff]  ;;  %v1996_v62 = vadd.f32 0.001, %v1738_v9  ;;  %v10925_v32 = vld [vmem:[#allocation134_spill] sm:$0xff]  ;;  %2631 = vrot.lane.b32.xlu1 %v2368_v50, %s5493_s19  ;;  %v7399_v50 = vmul.f32 %v7349_v11, %v7349_v11 }
 0x236   : > { %10920 = vst [vmem:[#allocation129_spill] sm:$0xff] %v7366_v44  ;;  %v7374_v4 = vmul.f32 0.020408163, %v10923_v1  ;;  %v10926_v21 = vld [vmem:[#allocation131_spill] sm:$0xff]  ;;  %10928 = vst [vmem:[#allocation20_spill] sm:$0xff] %v7379_v53  ;;  %v1857_v55 = vld [vmem:[%s7146_s18 + $0x50] sm:$0xff]  ;;  %v7407_v15 = vmul.f32 %v4926_v43, %v1856_v25 }
 0x237   : > { %v10927_v54 = vsub.f32 %v10925_v32, %v10926_v21  ;;  %10929 = vst [vmem:[#allocation80_spill] sm:$0xff] %v7382_v31  ;;  %v1995_v9 = vadd.f32 0.001, %v1737_v63  ;;  %v10930_v0 = vld [vmem:[#allocation133_spill] sm:$0xff]  ;;  %v10931_v32 = vld [vmem:[#allocation132_spill] sm:$0xff]  ;;  %2633 = vrot.lane.b32.xlu0 %v2369_v7, %s5493_s19  ;;  %10933 = vst [vmem:[#allocation22_spill] sm:$0xff] %v7399_v50  ;;  %v7403_v21 = vmul.f32 %v7356_v49, %v7356_v49  ;;  %v4930_v63 = vpop.eup %4929  ;;  %4945 = vrsqrt.f32 %v1996_v62 }
 0x238   : > { %10924 = vst [vmem:[#allocation79_spill] sm:$0xff] %v7374_v4  ;;  %v10932_v5 = vsub.f32 %v10930_v0, %v10931_v32  ;;  %10936 = vst [vmem:[#allocation134_spill] sm:$0xff] %v7407_v15  ;;  %v7411_v0 = vmul.f32 %v7359_v18, %v7359_v18  ;;  %v7415_v7 = vmul.f32 %v7366_v44, %v7366_v44  ;;  %v10939_v32 = vld [vmem:[#allocation25_spill] sm:$0xff]  ;;  %v4932_v26 = vpop.eup %4931  ;;  %v10942_v25 = vld [vmem:[#allocation82_spill] sm:$0xff]  ;;  %v7429_v18 = vpop.xlane.xlu1 %1173 }
 0x239   : > { %v1739_v16 = vmax.f32 %v10927_v54, 0.0  ;;  %10934 = vst [vmem:[#allocation81_spill] sm:$0xff] %v7403_v21  ;;  %v10935_v54 = vld [vmem:[#allocation27_spill] sm:$0xff]  ;;  %v7419_v11 = vmul.f32 %v4928_v47, %v1857_v55  ;;  %v1858_v49 = vld [vmem:[%s7146_s18 + $0x58] sm:$0xff]  ;;  %v7424_v43 = vmul.f32 %v7374_v4, %v7374_v4  ;;  %10944 = vst [vmem:[#allocation82_spill] sm:$0xff] %v7429_v18  ;;  %v7432_v44 = vpop.xlane.xlu0 %1170  ;;  %4947 = vrsqrt.f32 %v1995_v9  ;;  %v4934_v9 = vpop.eup %4933 }
 0x23a   : > { %v1740_v1 = vmax.f32 %v10932_v5, 0.0  ;;  %v2370_v20 = vmul.f32 %v7363_v57, %v10935_v54  ;;  %10937 = vst [vmem:[#allocation131_spill] sm:$0xff] %v7411_v0  ;;  %10938 = vst [vmem:[#allocation133_spill] sm:$0xff] %v7415_v7  ;;  %v2371_v5 = vmul.f32 %v7370_v45, %v10939_v32  ;;  %v7427_v54 = vmul.f32 0.020408163, %v10942_v25  ;;  %v1859_v47 = vld [vmem:[%s7146_s18 + $0x60] sm:$0xff] }
 0x23b   : > { %10940 = vst [vmem:[#allocation132_spill] sm:$0xff] %v7419_v11  ;;  %10941 = vst [vmem:[#allocation27_spill] sm:$0xff] %v7424_v43  ;;  %v1997_v57 = vadd.f32 0.001, %v1739_v16  ;;  %v10946_v55 = vld [vmem:[#allocation83_spill] sm:$0xff]  ;;  %v10948_v4 = vld [vmem:[#allocation136_spill] sm:$0xff] }
 0x23c   : > { %10943 = vst [vmem:[#allocation25_spill] sm:$0xff] %v7427_v54  ;;  %2635 = vrot.lane.b32.xlu1 %v2370_v20, %s5493_s19  ;;  %10945 = vst [vmem:[#allocation200_spill] sm:$0xff] %v7432_v44  ;;  %v7436_v32 = vmul.f32 0.020408163, %v10946_v55  ;;  %v1998_v45 = vadd.f32 0.001, %v1740_v1  ;;  %2637 = vrot.lane.b32.xlu0 %v2371_v5, %s5493_s19  ;;  %v7450_v55 = vmul.f32 %v4930_v63, %v1858_v49 }
 0x23d   : > { %v10949_v43 = vld [vmem:[#allocation135_spill] sm:$0xff]  ;;  %v10951_v16 = vld [vmem:[#allocation84_spill] sm:$0xff]  ;;  %v10953_v18 = vld [vmem:[#allocation138_spill] sm:$0xff]  ;;  %4949 = vrsqrt.f32 %v1997_v57 }
 0x23e   : > { %10947 = vst [vmem:[#allocation83_spill] sm:$0xff] %v7436_v32  ;;  %v10950_v53 = vsub.f32 %v10948_v4, %v10949_v43  ;;  %v7443_v62 = vmul.f32 0.020408163, %v10951_v16  ;;  %v10954_v20 = vld [vmem:[#allocation137_spill] sm:$0xff]  ;;  %v10956_v0 = vld [vmem:[#allocation24_spill] sm:$0xff]  ;;  %10957 = vst [vmem:[#allocation135_spill] sm:$0xff] %v7450_v55  ;;  %v7460_v16 = vmul.f32 %v4932_v26, %v1859_v47  ;;  %v7476_v26 = vpop.xlane.xlu0 %1176  ;;  %4951 = vrsqrt.f32 %v1998_v45 }
 0x23f   : > { %v10955_v31 = vsub.f32 %v10953_v18, %v10954_v20  ;;  %v2372_v7 = vmul.f32 %v7407_v15, %v10956_v0  ;;  %v10958_v1 = vld [vmem:[#allocation85_spill] sm:$0xff]  ;;  %v10962_v5 = vld [vmem:[#allocation26_spill] sm:$0xff]  ;;  %v1860_v18 = vld [vmem:[%s7146_s18 + $0x68] sm:$0xff]  ;;  %v7465_v0 = vmul.f32 %v7427_v54, %v7427_v54  ;;  %v7481_v15 = vmul.f32 %v7436_v32, %v7436_v32 }
 0x240   : > { %v1742_v25 = vmax.f32 %v10950_v53, 0.0  ;;  %10952 = vst [vmem:[#allocation136_spill] sm:$0xff] %v7443_v62  ;;  %v7453_v50 = vmul.f32 0.020408163, %v10958_v1  ;;  %v10960_v53 = vld [vmem:[#allocation86_spill] sm:$0xff]  ;;  %v2373_v43 = vmul.f32 %v7419_v11, %v10962_v5  ;;  %10963 = vst [vmem:[#allocation137_spill] sm:$0xff] %v7460_v16  ;;  %v7494_v32 = vmul.f32 %v4934_v9, %v1860_v18 }
 0x241   : > { %v1741_v44 = vmax.f32 %v10955_v31, 0.0  ;;  %v7456_v4 = vmul.f32 0.020408163, %v10960_v53  ;;  %v4936_v31 = vpop.eup %4935  ;;  %10964 = vst [vmem:[#allocation24_spill] sm:$0xff] %v7465_v0  ;;  %v10965_v49 = vld [vmem:[#allocation87_spill] sm:$0xff]  ;;  %v10967_v20 = vld [vmem:[#allocation88_spill] sm:$0xff]  ;;  %v7473_v53 = vpop.xlane.xlu1 %1179  ;;  %2639 = vrot.lane.b32.xlu1 %v2372_v7, %s5493_s19  ;;  %v7490_v7 = vmul.f32 %v7443_v62, %v7443_v62 }
 0x242   : > { %10959 = vst [vmem:[#allocation84_spill] sm:$0xff] %v7453_v50  ;;  %v7468_v63 = vmul.f32 0.020408163, %v10965_v49  ;;  %v7471_v1 = vmul.f32 0.020408163, %v10967_v20  ;;  %10969 = vst [vmem:[#allocation26_spill] sm:$0xff] %v7473_v53  ;;  %v4938_v5 = vpop.eup %4937  ;;  %v10972_v20 = vsub.f32 %v6801_v59, %v6782_v42  ;;  %2641 = vrot.lane.b32.xlu0 %v2373_v43, %s5493_s19 }
 0x243   : > { %10961 = vst [vmem:[#allocation138_spill] sm:$0xff] %v7456_v4  ;;  %10970 = vst [vmem:[#allocation87_spill] sm:$0xff] %v7476_v26  ;;  %v1861_v47 = vld [vmem:[%s7146_s18 + $0x70] sm:$0xff]  ;;  %v2000_v49 = vadd.f32 0.001, %v1742_v25  ;;  %v1862_v57 = vld [vmem:[%s7146_s18 + $0x78] sm:$0xff]  ;;  %v4940_v54 = vpop.eup %4939  ;;  %v7499_v25 = vmul.f32 %v7453_v50, %v7453_v50  ;;  %v7510_v9 = vmul.f32 %v7456_v4, %v7456_v4 }
 0x244   : > { %10966 = vst [vmem:[#allocation85_spill] sm:$0xff] %v7468_v63  ;;  %10968 = vst [vmem:[#allocation86_spill] sm:$0xff] %v7471_v1  ;;  %v1743_v11 = vmax.f32 %v10972_v20, 0.0  ;;  %v1999_v53 = vadd.f32 0.001, %v1741_v44  ;;  %v10973_v26 = vld [vmem:[#allocation31_spill] sm:$0xff]  ;;  %v7506_v62 = vmul.f32 %v4936_v31, %v1861_v47  ;;  %v4942_v44 = vpop.eup %4941  ;;  %v7514_v18 = vmul.f32 %v7468_v63, %v7468_v63 }
 0x245   : > { %10971 = vst [vmem:[#allocation88_spill] sm:$0xff] %v7481_v15  ;;  %v2374_v0 = vmul.f32 %v7450_v55, %v10973_v26  ;;  %10974 = vst [vmem:[#allocation31_spill] sm:$0xff] %v7494_v32  ;;  %v1863_v45 = vld [vmem:[%s7146_s18 + $0x80] sm:$0xff]  ;;  %v10976_v42 = vld [vmem:[#allocation140_spill] sm:$0xff]  ;;  %v7518_v26 = vmul.f32 %v7471_v1, %v7471_v1  ;;  %v7525_v31 = vmul.f32 %v4938_v5, %v1862_v57  ;;  %v4944_v47 = vpop.eup %4943  ;;  %4953 = vrsqrt.f32 %v2000_v49 }
 0x246   : > { %10975 = vst [vmem:[#allocation201_spill] sm:$0xff] %v7499_v25  ;;  %v10977_v59 = vld [vmem:[#allocation139_spill] sm:$0xff]  ;;  %v10979_v15 = vld [vmem:[#allocation29_spill] sm:$0xff]  ;;  %10980 = vst [vmem:[#allocation140_spill] sm:$0xff] %v7506_v62  ;;  %4955 = vrsqrt.f32 %v1999_v53  ;;  %v1362_v5 = vmul.f32 0.020408163, %v6858_v6 }
 0x247   : > { %v10978_v43 = vsub.f32 %v10976_v42, %v10977_v59  ;;  %v2375_v21 = vmul.f32 %v7460_v16, %v10979_v15  ;;  %10981 = vst [vmem:[#allocation139_spill] sm:$0xff] %v7510_v9  ;;  %10982 = vst [vmem:[#allocation29_spill] sm:$0xff] %v7514_v18  ;;  %v7520_v42 = vpop.xlane.xlu1 %1185  ;;  %2643 = vrot.lane.b32.xlu1 %v2374_v0, %s5493_s19  ;;  %v7523_v15 = vpop.xlane.xlu0 %1182  ;;  %v2001_v59 = vadd.f32 0.001, %v1743_v11  ;;  %v1864_v63 = vld [vmem:[%s7146_s18 + $0x88] sm:$0xff]  ;;  %v1865_v1 = vld [vmem:[%s7146_s18 + $0x90] sm:$0xff] }
 0x248   : > { %10983 = vst [vmem:[#allocation202_spill] sm:$0xff] %v7518_v26  ;;  %10984 = vst [vmem:[#allocation203_spill] sm:$0xff] %v7520_v42  ;;  %v7531_v16 = vmul.f32 %v4940_v54, %v1863_v45  ;;  %v10989_v50 = vld [vmem:[#allocation142_spill] sm:$0xff]  ;;  %v10990_v0 = vld [vmem:[#allocation141_spill] sm:$0xff] }
 0x249   : > { %v1744_v20 = vmax.f32 %v10978_v43, 0.0  ;;  %10985 = vst [vmem:[#allocation204_spill] sm:$0xff] %v7523_v15  ;;  %10986 = vst [vmem:[#allocation205_spill] sm:$0xff] %v7525_v31  ;;  %v10987_v43 = vsub.f32 %v6824_v51, %v6819_v12  ;;  %2645 = vrot.lane.b32.xlu0 %v2375_v21, %s5493_s19  ;;  %v10991_v4 = vsub.f32 %v10989_v50, %v10990_v0  ;;  %v10992_v57 = vld [vmem:[#allocation28_spill] sm:$0xff]  ;;  %v10993_v49 = vld [vmem:[#allocation89_spill] sm:$0xff]  ;;  %4957 = vrsqrt.f32 %v2001_v59 }
 0x24a   : > { %10988 = vst [vmem:[#allocation206_spill] sm:$0xff] %v7531_v16  ;;  %v2376_v11 = vmul.f32 %v7494_v32, %v10992_v57  ;;  %v7542_v26 = vmul.f32 0.020408163, %v10993_v49  ;;  %v10995_v51 = vld [vmem:[#allocation147_spill] sm:$0xff]  ;;  %v10996_v54 = vld [vmem:[#allocation30_spill] sm:$0xff]  ;;  %v7559_v57 = vmul.f32 %v4942_v44, %v1865_v1  ;;  %v4946_v49 = vpop.eup %4945  ;;  %v11005_v32 = vld [vmem:[#allocation33_spill] sm:$0xff] }
 0x24b   : > { %v1746_v55 = vmax.f32 %v10987_v43, 0.0  ;;  %v1745_v18 = vmax.f32 %v10991_v4, 0.0  ;;  %v2002_v12 = vadd.f32 0.001, %v1744_v20  ;;  %v1363_v21 = vmul.f32 0.020408163, %v10995_v51  ;;  %v7550_v50 = vpop.xlane.xlu1 %1191  ;;  %v7553_v6 = vpop.xlane.xlu0 %1188 }
 0x24c   : > { %10994 = vst [vmem:[#allocation142_spill] sm:$0xff] %v7542_v26  ;;  %v2377_v45 = vmul.f32 %v7506_v62, %v10996_v54  ;;  %v10997_v53 = vld [vmem:[#allocation90_spill] sm:$0xff]  ;;  %10999 = vst [vmem:[#allocation28_spill] sm:$0xff] %v7550_v50  ;;  %2647 = vrot.lane.b32.xlu1 %v2376_v11, %s5493_s19  ;;  %v11001_v4 = vld [vmem:[#allocation35_spill] sm:$0xff]  ;;  %v7557_v20 = vmul.f32 %v4944_v47, %v1864_v63  ;;  %v2379_v11 = vmul.f32 %v7531_v16, %v11005_v32 }
 0x24d   : > { %v7548_v43 = vmul.f32 0.020408163, %v10997_v53  ;;  %11000 = vst [vmem:[#allocation89_spill] sm:$0xff] %v7553_v6  ;;  %v2378_v0 = vmul.f32 %v7525_v31, %v11001_v4  ;;  %11003 = vst [vmem:[#allocation30_spill] sm:$0xff] %v7559_v57  ;;  %v2004_v51 = vadd.f32 0.001, %v1746_v55  ;;  %v4948_v6 = vpop.eup %4947  ;;  %4959 = vrsqrt.f32 %v2002_v12 }
 0x24e   : > { %11002 = vst [vmem:[#allocation147_spill] sm:$0xff] %v7557_v20  ;;  %v11004_v54 = vld [vmem:[#allocation148_spill] sm:$0xff]  ;;  %2649 = vrot.lane.b32.xlu0 %v2377_v45, %s5493_s19  ;;  %v1867_v62 = vld [vmem:[%s7146_s18 + $0xa0] sm:$0xff]  ;;  %v2003_v50 = vadd.f32 0.001, %v1745_v18  ;;  %v11007_v15 = vld [vmem:[#allocation143_spill] sm:$0xff]  ;;  %v1621_v32 = vsub.f32 %v1363_v21, %v6997_v35  ;;  %v7579_v18 = vmul.f32 %v7542_v26, %v7542_v26 }
 0x24f   : > { %10998 = vst [vmem:[#allocation141_spill] sm:$0xff] %v7548_v43  ;;  %v1365_v53 = vmul.f32 0.020408163, %v11004_v54  ;;  %v11006_v25 = vld [vmem:[#allocation146_spill] sm:$0xff]  ;;  %v11010_v44 = vld [vmem:[#allocation149_spill] sm:$0xff]  ;;  %v11012_v54 = vld [vmem:[#allocation144_spill] sm:$0xff]  ;;  %v7590_v35 = vmul.f32 %v4946_v49, %v1867_v62  ;;  %4961 = vrsqrt.f32 %v2004_v51 }
 0x250   : > { %v11008_v4 = vsub.f32 %v11006_v25, %v11007_v15  ;;  %v11009_v47 = vld [vmem:[#allocation170_spill] sm:$0xff]  ;;  %v1364_v31 = vmul.f32 0.020408163, %v11010_v44  ;;  %v1866_v59 = vld [vmem:[%s7146_s18 + $0x98] sm:$0xff]  ;;  %v7581_v25 = vpop.xlane.xlu1 %1197  ;;  %2651 = vrot.lane.b32.xlu1 %v2378_v0, %s5493_s19  ;;  %v7584_v15 = vpop.xlane.xlu0 %1194  ;;  %4963 = vrsqrt.f32 %v2003_v50  ;;  %v1750_v49 = vmax.f32 %v1621_v32, 0.0 }
 0x251   : > { %v1620_v1 = vsub.f32 %v1362_v5, %v11009_v47  ;;  %v11011_v55 = vld [vmem:[#allocation145_spill] sm:$0xff]  ;;  %v11014_v16 = vld [vmem:[#allocation150_spill] sm:$0xff]  ;;  %v11015_v5 = vld [vmem:[#allocation32_spill] sm:$0xff]  ;;  %11017 = vst [vmem:[#allocation90_spill] sm:$0xff] %v7590_v35  ;;  %v1623_v21 = vsub.f32 %v1365_v53, %v7014_v30  ;;  %v7595_v0 = vmul.f32 %v4948_v6, %v1866_v59  ;;  %v7604_v53 = vmul.f32 %v7548_v43, %v7548_v43 }
 0x252   : > { %v1747_v63 = vmax.f32 %v11008_v4, 0.0  ;;  %v11013_v42 = vsub.f32 %v11011_v55, %v11012_v54  ;;  %v1367_v9 = vmul.f32 0.020408163, %v11014_v16  ;;  %v2380_v12 = vmul.f32 %v7557_v20, %v11015_v5  ;;  %v4950_v16 = vpop.eup %4949  ;;  %v11018_v47 = vld [vmem:[#allocation151_spill] sm:$0xff]  ;;  %2653 = vrot.lane.b32.xlu0 %v2379_v11, %s5493_s19  ;;  %v11023_v59 = vld [vmem:[#allocation153_spill] sm:$0xff]  ;;  %v11029_v43 = vld [vmem:[#allocation92_spill] sm:$0xff] }
 0x253   : > { %v1366_v44 = vmul.f32 0.020408163, %v11018_v47  ;;  %11019 = vst [vmem:[#allocation35_spill] sm:$0xff] %v7595_v0  ;;  %v1868_v55 = vld [vmem:[%s7146_s18 + $0xa8] sm:$0xff]  ;;  %v4952_v54 = vpop.eup %4951  ;;  %v1749_v5 = vmax.f32 %v1620_v1, 0.0  ;;  %v1622_v20 = vsub.f32 %v1364_v31, %v6993_v13 }
 0x254   : > { %v1748_v45 = vmax.f32 %v11013_v42, 0.0  ;;  %v11016_v42 = vld [vmem:[#allocation37_spill] sm:$0xff]  ;;  %v2005_v26 = vadd.f32 0.001, %v1747_v63  ;;  %v1625_v51 = vsub.f32 %v1367_v9, %v7046_v28  ;;  %v11021_v6 = vld [vmem:[#allocation91_spill] sm:$0xff]  ;;  %v7610_v63 = vpop.xlane.xlu1 %1203  ;;  %2655 = vrot.lane.b32.xlu1 %v2380_v12, %s5493_s19  ;;  %v7613_v13 = vpop.xlane.xlu0 %1200  ;;  %v7615_v31 = vmul.f32 %v4950_v16, %v1868_v55 }
 0x255   : > { %v2381_v4 = vmul.f32 %v7559_v57, %v11016_v42  ;;  %v1869_v42 = vld [vmem:[%s7146_s18 + $0xb0] sm:$0xff]  ;;  %v7607_v11 = vmul.f32 0.020408163, %v11021_v6  ;;  %v1368_v50 = vmul.f32 0.020408163, %v11023_v59  ;;  %11024 = vst [vmem:[#allocation33_spill] sm:$0xff] %v7610_v63  ;;  %v1624_v9 = vsub.f32 %v1366_v44, %v7001_v10  ;;  %v4954_v32 = vpop.eup %4953 }
 0x256   : > { %v2006_v62 = vadd.f32 0.001, %v1748_v45  ;;  %v11020_v57 = vld [vmem:[#allocation152_spill] sm:$0xff]  ;;  %11025 = vst [vmem:[#allocation146_spill] sm:$0xff] %v7615_v31  ;;  %v1752_v28 = vmax.f32 %v1623_v21, 0.0  ;;  %v7621_v45 = vmul.f32 %v4952_v54, %v1869_v42  ;;  %4965 = vrsqrt.f32 %v2005_v26  ;;  %v11028_v6 = vld [vmem:[#allocation39_spill] sm:$0xff]  ;;  %v4956_v55 = vpop.eup %4955 }
 0x257   : > { %v1369_v30 = vmul.f32 0.020408163, %v11020_v57  ;;  %11022 = vst [vmem:[#allocation148_spill] sm:$0xff] %v7607_v11  ;;  %2657 = vrot.lane.b32.xlu0 %v2381_v4, %s5493_s19  ;;  %v11026_v57 = vld [vmem:[#allocation36_spill] sm:$0xff]  ;;  %v2007_v47 = vadd.f32 0.001, %v1749_v5  ;;  %v2383_v16 = vmul.f32 %v7590_v35, %v11028_v6 }
 0x258   : > { %v2382_v1 = vmul.f32 %v7595_v0, %v11026_v57  ;;  %11027 = vst [vmem:[#allocation143_spill] sm:$0xff] %v7621_v45  ;;  %v1751_v12 = vmax.f32 %v1622_v20, 0.0  ;;  %4967 = vrsqrt.f32 %v2006_v62  ;;  %v2008_v21 = vadd.f32 0.001, %v1750_v49  ;;  %v1870_v44 = vld [vmem:[%s7146_s18 + $0xb8] sm:$0xff]  ;;  %v1871_v4 = vld [vmem:[%s7146_s18 + $0xc0] sm:$0xff]  ;;  %v7633_v5 = vpop.xlane.xlu1 %1209  ;;  %v7636_v20 = vpop.xlane.xlu0 %1206 }
 0x259   : > { %v1754_v59 = vmax.f32 %v1625_v51, 0.0  ;;  %v1627_v10 = vsub.f32 %v1369_v30, %v7057_v29  ;;  %v7629_v63 = vmul.f32 0.020408163, %v11029_v43  ;;  %v11031_v54 = vld [vmem:[#allocation173_spill] sm:$0xff]  ;;  %v11032_v57 = vld [vmem:[#allocation154_spill] sm:$0xff]  ;;  %v1753_v51 = vmax.f32 %v1624_v9, 0.0 }
 0x25a   : > { %v1626_v42 = vsub.f32 %v1368_v50, %v11031_v54  ;;  %v1371_v26 = vmul.f32 0.020408163, %v11032_v57  ;;  %2659 = vrot.lane.b32.xlu1 %v2382_v1, %s5493_s19  ;;  %v11033_v62 = vld [vmem:[#allocation38_spill] sm:$0xff]  ;;  %v2010_v29 = vadd.f32 0.001, %v1752_v28  ;;  %v11034_v30 = vld [vmem:[#allocation155_spill] sm:$0xff]  ;;  %v4958_v54 = vpop.eup %4957  ;;  %4969 = vrsqrt.f32 %v2007_v47 }
 0x25b   : > { %11030 = vst [vmem:[#allocation170_spill] sm:$0xff] %v7629_v63  ;;  %v2384_v49 = vmul.f32 %v7615_v31, %v11033_v62  ;;  %v1370_v6 = vmul.f32 0.020408163, %v11034_v30  ;;  %2661 = vrot.lane.b32.xlu0 %v2383_v16, %s5493_s19  ;;  %v11035_v43 = vld [vmem:[#allocation41_spill] sm:$0xff]  ;;  %v2009_v57 = vadd.f32 0.001, %v1751_v12  ;;  %v7644_v1 = vmul.f32 %v4956_v55, %v1870_v44  ;;  %v4960_v30 = vpop.eup %4959 }
 0x25c   : > { %v2385_v50 = vmul.f32 %v7621_v45, %v11035_v43  ;;  %v7646_v0 = vmul.f32 %v4954_v32, %v1871_v4  ;;  %4971 = vrsqrt.f32 %v2008_v21  ;;  %v2012_v35 = vadd.f32 0.001, %v1754_v59  ;;  %v11038_v28 = vld [vmem:[#allocation156_spill] sm:$0xff]  ;;  %v1872_v31 = vld [vmem:[%s7146_s18 + $0xc8] sm:$0xff]  ;;  %v11039_v12 = vld [vmem:[#allocation157_spill] sm:$0xff]  ;;  %v7656_v55 = vpop.xlane.xlu1 %1215  ;;  %v7659_v32 = vpop.xlane.xlu0 %1212 }
 0x25d   : > { %11036 = vst [vmem:[#allocation149_spill] sm:$0xff] %v7644_v1  ;;  %v1756_v62 = vmax.f32 %v1627_v10, 0.0  ;;  %v1373_v9 = vmul.f32 0.020408163, %v11038_v28  ;;  %v7652_v16 = vmul.f32 %v7607_v11, %v7607_v11  ;;  %v1755_v43 = vmax.f32 %v1626_v42, 0.0  ;;  %11040 = vst [vmem:[#allocation144_spill] sm:$0xff] %v7659_v32 }
 0x25e   : > { %11037 = vst [vmem:[#allocation145_spill] sm:$0xff] %v7646_v0  ;;  %v1629_v47 = vsub.f32 %v1371_v26, %v7084_v48  ;;  %v1372_v45 = vmul.f32 0.020408163, %v11039_v12  ;;  %2663 = vrot.lane.b32.xlu1 %v2384_v49, %s5493_s19  ;;  %v1873_v21 = vld [vmem:[%s7146_s18 + $0xd0] sm:$0xff]  ;;  %v11041_v59 = vld [vmem:[#allocation93_spill] sm:$0xff]  ;;  %4973 = vrsqrt.f32 %v2010_v29  ;;  %v1628_v4 = vsub.f32 %v1370_v6, %v7050_v58  ;;  %v4962_v48 = vpop.eup %4961  ;;  %v11044_v28 = vld [vmem:[#allocation43_spill] sm:$0xff] }
 0x25f   : > { %v7663_v10 = vmul.f32 0.020408163, %v11041_v59  ;;  %v2011_v44 = vadd.f32 0.001, %v1753_v51  ;;  %2665 = vrot.lane.b32.xlu0 %v2385_v50, %s5493_s19  ;;  %4975 = vrsqrt.f32 %v2009_v57  ;;  %v11043_v42 = vld [vmem:[#allocation40_spill] sm:$0xff]  ;;  %v2387_v49 = vmul.f32 %v7646_v0, %v11044_v28  ;;  %v4964_v11 = vpop.eup %4963  ;;  %v1874_v58 = vld [vmem:[%s7146_s18 + $0xd8] sm:$0xff] }
 0x260   : > { %v2386_v26 = vmul.f32 %v7644_v1, %v11043_v42  ;;  %v7671_v12 = vmul.f32 %v4958_v54, %v1872_v31  ;;  %4977 = vrsqrt.f32 %v2012_v35  ;;  %v2014_v59 = vadd.f32 0.001, %v1756_v62  ;;  %v11047_v32 = vld [vmem:[#allocation158_spill] sm:$0xff]  ;;  %v7679_v1 = vpop.xlane.xlu1 %1221  ;;  %v7682_v31 = vpop.xlane.xlu0 %1218 }
 0x261   : > { %11042 = vst [vmem:[#allocation150_spill] sm:$0xff] %v7663_v10  ;;  %v1631_v29 = vsub.f32 %v1373_v9, %v7092_v8  ;;  %v7674_v51 = vmul.f32 %v4960_v30, %v1873_v21  ;;  %v2013_v6 = vadd.f32 0.001, %v1755_v43  ;;  %v1758_v50 = vmax.f32 %v1629_v47, 0.0  ;;  %11048 = vst [vmem:[#allocation151_spill] sm:$0xff] %v7679_v1  ;;  %v1875_v35 = vld [vmem:[%s7146_s18 + $0xe0] sm:$0xff] }
 0x262   : > { %11045 = vst [vmem:[#allocation32_spill] sm:$0xff] %v7671_v12  ;;  %v1630_v57 = vsub.f32 %v1372_v45, %v7067_v23  ;;  %v1375_v42 = vmul.f32 0.020408163, %v11047_v32  ;;  %2667 = vrot.lane.b32.xlu1 %v2386_v26, %s5493_s19  ;;  %v11049_v54 = vld [vmem:[#allocation94_spill] sm:$0xff]  ;;  %4979 = vrsqrt.f32 %v2011_v44  ;;  %v1757_v8 = vmax.f32 %v1628_v4, 0.0  ;;  %v11051_v9 = vld [vmem:[#allocation159_spill] sm:$0xff] }
 0x263   : > { %11046 = vst [vmem:[#allocation37_spill] sm:$0xff] %v7674_v51  ;;  %v7686_v62 = vmul.f32 0.020408163, %v11049_v54  ;;  %v1374_v30 = vmul.f32 0.020408163, %v11051_v9  ;;  %2669 = vrot.lane.b32.xlu0 %v2387_v49, %s5493_s19  ;;  %v7692_v23 = vmul.f32 %v7629_v63, %v7629_v63  ;;  %v11052_v45 = vld [vmem:[#allocation95_spill] sm:$0xff]  ;;  %v7699_v21 = vmul.f32 %v4964_v11, %v1874_v58  ;;  %v4966_v26 = vpop.eup %4965 }
 0x264   : > { %v7695_v43 = vmul.f32 0.020408163, %v11052_v45  ;;  %v11054_v47 = vld [vmem:[#allocation42_spill] sm:$0xff]  ;;  %4981 = vrsqrt.f32 %v2014_v59  ;;  %v1760_v44 = vmax.f32 %v1631_v29, 0.0  ;;  %v11056_v4 = vld [vmem:[#allocation45_spill] sm:$0xff]  ;;  %v7703_v49 = vmul.f32 %v4962_v48, %v1875_v35  ;;  %v1876_v54 = vld [vmem:[%s7146_s18 + $0xe8] sm:$0xff]  ;;  %v7707_v1 = vpop.xlane.xlu1 %1227  ;;  %v7710_v11 = vpop.xlane.xlu0 %1224 }
 0x265   : > { %11050 = vst [vmem:[#allocation152_spill] sm:$0xff] %v7686_v62  ;;  %v2388_v32 = vmul.f32 %v7671_v12, %v11054_v47  ;;  %11055 = vst [vmem:[#allocation153_spill] sm:$0xff] %v7699_v21  ;;  %v2389_v28 = vmul.f32 %v7674_v51, %v11056_v4  ;;  %v4968_v9 = vpop.eup %4967  ;;  %4983 = vrsqrt.f32 %v2013_v6  ;;  %v2016_v0 = vadd.f32 0.001, %v1758_v50  ;;  %v1877_v59 = vld [vmem:[%s7146_s18 + $0xf0] sm:$0xff] }
 0x266   : > { %11053 = vst [vmem:[#allocation91_spill] sm:$0xff] %v7695_v43  ;;  %11057 = vst [vmem:[#allocation36_spill] sm:$0xff] %v7703_v49  ;;  %v1759_v45 = vmax.f32 %v1630_v57, 0.0  ;;  %v1633_v63 = vsub.f32 %v1375_v42, %v7112_v24  ;;  %v7715_v29 = vmul.f32 %v7663_v10, %v7663_v10  ;;  %v7719_v48 = vmul.f32 %v7686_v62, %v7686_v62  ;;  %v11060_v24 = vld [vmem:[#allocation96_spill] sm:$0xff]  ;;  %v11062_v57 = vld [vmem:[#allocation161_spill] sm:$0xff] }
 0x267   : > { %11058 = vst [vmem:[#allocation39_spill] sm:$0xff] %v7707_v1  ;;  %2671 = vrot.lane.b32.xlu1 %v2388_v32, %s5493_s19  ;;  %11059 = vst [vmem:[#allocation92_spill] sm:$0xff] %v7710_v11  ;;  %v2015_v58 = vadd.f32 0.001, %v1757_v8  ;;  %v1632_v6 = vsub.f32 %v1374_v30, %v7088_v19  ;;  %2673 = vrot.lane.b32.xlu0 %v2389_v28, %s5493_s19  ;;  %v7724_v50 = vmul.f32 0.020408163, %v11060_v24  ;;  %v4970_v4 = vpop.eup %4969  ;;  %4985 = vrsqrt.f32 %v2016_v0 }
 0x268   : > { %v1376_v42 = vmul.f32 0.020408163, %v11062_v57  ;;  %v11063_v35 = vld [vmem:[#allocation44_spill] sm:$0xff]  ;;  %v7729_v32 = vmul.f32 %v4966_v26, %v1876_v54  ;;  %v2018_v12 = vadd.f32 0.001, %v1760_v44  ;;  %v11066_v8 = vld [vmem:[#allocation47_spill] sm:$0xff]  ;;  %v7734_v30 = vmul.f32 %v4968_v9, %v1877_v59  ;;  %v7741_v26 = vpop.xlane.xlu1 %1233  ;;  %v7744_v44 = vpop.xlane.xlu0 %1230 }
 0x269   : > { %11061 = vst [vmem:[#allocation173_spill] sm:$0xff] %v7724_v50  ;;  %v2390_v47 = vmul.f32 %v7699_v21, %v11063_v35  ;;  %v11065_v51 = vld [vmem:[#allocation160_spill] sm:$0xff]  ;;  %v2391_v19 = vmul.f32 %v7703_v49, %v11066_v8  ;;  %v1878_v28 = vld [vmem:[%s7146_s18 + $0xf8] sm:$0xff]  ;;  %v4972_v24 = vpop.eup %4971  ;;  %v7739_v57 = vmul.f32 %v7695_v43, %v7695_v43  ;;  %v2017_v35 = vadd.f32 0.001, %v1759_v45  ;;  %11068 = vst [vmem:[#allocation155_spill] sm:$0xff] %v7741_v26 }
 0x26a   : > { %11064 = vst [vmem:[#allocation154_spill] sm:$0xff] %v7729_v32  ;;  %v1377_v10 = vmul.f32 0.020408163, %v11065_v51  ;;  %11067 = vst [vmem:[#allocation38_spill] sm:$0xff] %v7734_v30  ;;  %v1762_v21 = vmax.f32 %v1633_v63, 0.0  ;;  %v1879_v51 = vld [vmem:[%s7146_s18 + $0x100] sm:$0xff]  ;;  %4987 = vrsqrt.f32 %v2015_v58  ;;  %v1634_v63 = vsub.f32 %v1376_v42, %v7105_v60 }
 0x26b   : > { %2675 = vrot.lane.b32.xlu1 %v2390_v47, %s5493_s19  ;;  %11069 = vst [vmem:[#allocation41_spill] sm:$0xff] %v7744_v44  ;;  %v11070_v54 = vld [vmem:[#allocation97_spill] sm:$0xff]  ;;  %v1761_v59 = vmax.f32 %v1632_v6, 0.0  ;;  %v11072_v8 = vld [vmem:[#allocation162_spill] sm:$0xff]  ;;  %2677 = vrot.lane.b32.xlu0 %v2391_v19, %s5493_s19  ;;  %v4974_v0 = vpop.eup %4973  ;;  %v11073_v45 = vld [vmem:[#allocation163_spill] sm:$0xff]  ;;  %v7756_v44 = vmul.f32 %v4970_v4, %v1878_v28  ;;  %4989 = vrsqrt.f32 %v2018_v12  ;;  %v7766_v42 = vmul.f32 %v7724_v50, %v7724_v50 }
 0x26c   : > { %v7748_v9 = vmul.f32 0.020408163, %v11070_v54  ;;  %v1379_v49 = vmul.f32 0.020408163, %v11072_v8  ;;  %v1378_v43 = vmul.f32 0.020408163, %v11073_v45  ;;  %v4976_v26 = vpop.eup %4975  ;;  %v1635_v58 = vsub.f32 %v1377_v10, %v7120_v3  ;;  %v7771_v12 = vpop.xlane.xlu1 %1239 }
 0x26d   : > { %v11074_v62 = vld [vmem:[#allocation46_spill] sm:$0xff]  ;;  %11075 = vst [vmem:[#allocation157_spill] sm:$0xff] %v7756_v44  ;;  %v11076_v6 = vld [vmem:[#allocation49_spill] sm:$0xff]  ;;  %v7761_v8 = vmul.f32 %v4972_v24, %v1879_v51  ;;  %v1880_v19 = vld [vmem:[%s7146_s18 + $0x108] sm:$0xff]  ;;  %v4978_v60 = vpop.eup %4977  ;;  %4991 = vrsqrt.f32 %v2017_v35  ;;  %v2020_v4 = vadd.f32 0.001, %v1762_v21  ;;  %v7774_v3 = vpop.xlane.xlu0 %1236 }
 0x26e   : > { %11071 = vst [vmem:[#allocation156_spill] sm:$0xff] %v7748_v9  ;;  %v2392_v47 = vmul.f32 %v7729_v32, %v11074_v62  ;;  %v2393_v54 = vmul.f32 %v7734_v30, %v11076_v6  ;;  %v11078_v62 = vld [vmem:[#allocation98_spill] sm:$0xff]  ;;  %11080 = vst [vmem:[#allocation43_spill] sm:$0xff] %v7771_v12  ;;  %v1881_v10 = vld [vmem:[%s7146_s18 + $0x110] sm:$0xff]  ;;  %v7779_v28 = vmul.f32 %v7748_v9, %v7748_v9  ;;  %v2019_v24 = vadd.f32 0.001, %v1761_v59 }
 0x26f   : > { %11077 = vst [vmem:[#allocation93_spill] sm:$0xff] %v7761_v8  ;;  %v7769_v45 = vmul.f32 0.020408163, %v11078_v62  ;;  %11081 = vst [vmem:[#allocation158_spill] sm:$0xff] %v7774_v3  ;;  %v1637_v51 = vsub.f32 %v1379_v49, %v7150_v61  ;;  %v11082_v6 = vld [vmem:[#allocation165_spill] sm:$0xff]  ;;  %v1883_v21 = vld [vmem:[%s7146_s18 + $0x120] sm:$0xff]  ;;  %v4980_v35 = vpop.eup %4979  ;;  %v1636_v30 = vsub.f32 %v1378_v43, %v7116_v39  ;;  %v7788_v12 = vmul.f32 %v4976_v26, %v1880_v19 }
 0x270   : > { %2679 = vrot.lane.b32.xlu1 %v2392_v47, %s5493_s19  ;;  %v1380_v62 = vmul.f32 0.020408163, %v11082_v6  ;;  %2681 = vrot.lane.b32.xlu0 %v2393_v54, %s5493_s19  ;;  %v1763_v32 = vmax.f32 %v1634_v63, 0.0  ;;  %v11083_v47 = vld [vmem:[#allocation48_spill] sm:$0xff]  ;;  %v1882_v3 = vld [vmem:[%s7146_s18 + $0x118] sm:$0xff]  ;;  %v1764_v9 = vmax.f32 %v1635_v58, 0.0  ;;  %v7794_v49 = vmul.f32 %v4974_v0, %v1881_v10  ;;  %v7803_v26 = vpop.xlane.xlu1 %1245 }
 0x271   : > { %11079 = vst [vmem:[#allocation40_spill] sm:$0xff] %v7769_v45  ;;  %v2394_v50 = vmul.f32 %v7756_v44, %v11083_v47  ;;  %11084 = vst [vmem:[#allocation94_spill] sm:$0xff] %v7788_v12  ;;  %v11085_v1 = vld [vmem:[#allocation164_spill] sm:$0xff]  ;;  %v11086_v11 = vld [vmem:[#allocation51_spill] sm:$0xff]  ;;  %v4982_v54 = vpop.eup %4981  ;;  %v7798_v39 = vmul.f32 %v7769_v45, %v7769_v45  ;;  %4993 = vrsqrt.f32 %v2020_v4  ;;  %v1766_v58 = vmax.f32 %v1637_v51, 0.0 }
 0x272   : > { %v1381_v59 = vmul.f32 0.020408163, %v11085_v1  ;;  %v2395_v61 = vmul.f32 %v7761_v8, %v11086_v11  ;;  %11087 = vst [vmem:[#allocation159_spill] sm:$0xff] %v7794_v49  ;;  %v11088_v43 = vld [vmem:[#allocation99_spill] sm:$0xff]  ;;  %11090 = vst [vmem:[#allocation42_spill] sm:$0xff] %v7803_v26  ;;  %v7806_v1 = vpop.xlane.xlu0 %1242  ;;  %v7808_v11 = vmul.f32 %v4978_v60, %v1883_v21  ;;  %v4984_v0 = vpop.eup %4983  ;;  %4995 = vrsqrt.f32 %v2019_v24  ;;  %v1885_v47 = vld [vmem:[%s7146_s18 + $0x130] sm:$0xff] }
 0x273   : > { %v7801_v63 = vmul.f32 0.020408163, %v11088_v43  ;;  %v1638_v19 = vsub.f32 %v1380_v62, %v7131_v36  ;;  %v7812_v10 = vmul.f32 %v4980_v35, %v1882_v3  ;;  %v1884_v6 = vld [vmem:[%s7146_s18 + $0x128] sm:$0xff]  ;;  %v2021_v4 = vadd.f32 0.001, %v1763_v32  ;;  %v11095_v24 = vld [vmem:[#allocation166_spill] sm:$0xff] }
 0x274   : > { %2683 = vrot.lane.b32.xlu1 %v2394_v50, %s5493_s19  ;;  %11091 = vst [vmem:[#allocation45_spill] sm:$0xff] %v7808_v11  ;;  %2685 = vrot.lane.b32.xlu0 %v2395_v61, %s5493_s19  ;;  %v1765_v43 = vmax.f32 %v1636_v30, 0.0  ;;  %v11093_v44 = vld [vmem:[#allocation167_spill] sm:$0xff]  ;;  %v11094_v50 = vld [vmem:[#allocation50_spill] sm:$0xff]  ;;  %v2022_v60 = vadd.f32 0.001, %v1764_v9  ;;  %v1639_v21 = vsub.f32 %v1381_v59, %v7181_v2  ;;  %v7835_v2 = vmul.f32 %v4984_v0, %v1884_v6  ;;  %v4986_v59 = vpop.eup %4985 }
 0x275   : > { %11089 = vst [vmem:[#allocation95_spill] sm:$0xff] %v7801_v63  ;;  %11092 = vst [vmem:[#allocation96_spill] sm:$0xff] %v7812_v10  ;;  %v1382_v8 = vmul.f32 0.020408163, %v11093_v44  ;;  %v2396_v45 = vmul.f32 %v7788_v12, %v11094_v50  ;;  %v1383_v51 = vmul.f32 0.020408163, %v11095_v24  ;;  %v7825_v3 = vmul.f32 %v7801_v63, %v7801_v63  ;;  %v7830_v44 = vpop.xlane.xlu1 %1251 }
 0x276   : > { %v11096_v36 = vld [vmem:[#allocation53_spill] sm:$0xff]  ;;  %v11097_v32 = vld [vmem:[#allocation100_spill] sm:$0xff]  ;;  %11099 = vst [vmem:[#allocation44_spill] sm:$0xff] %v7830_v44  ;;  %v7833_v9 = vpop.xlane.xlu0 %1248  ;;  %11101 = vst [vmem:[#allocation47_spill] sm:$0xff] %v7835_v2  ;;  %v7837_v35 = vmul.f32 %v4982_v54, %v1885_v47  ;;  %v2024_v61 = vadd.f32 0.001, %v1766_v58  ;;  %4997 = vrsqrt.f32 %v2021_v4 }
 0x277   : > { %v2397_v62 = vmul.f32 %v7794_v49, %v11096_v36  ;;  %v7828_v30 = vmul.f32 0.020408163, %v11097_v32  ;;  %11100 = vst [vmem:[#allocation160_spill] sm:$0xff] %v7833_v9  ;;  %v1767_v50 = vmax.f32 %v1638_v19, 0.0  ;;  %v11103_v24 = vld [vmem:[#allocation52_spill] sm:$0xff]  ;;  %v11104_v32 = vld [vmem:[#allocation55_spill] sm:$0xff]  ;;  %4999 = vrsqrt.f32 %v2022_v60 }
 0x278   : > { %2687 = vrot.lane.b32.xlu1 %v2396_v45, %s5493_s19  ;;  %11102 = vst [vmem:[#allocation97_spill] sm:$0xff] %v7837_v35  ;;  %v2398_v36 = vmul.f32 %v7812_v10, %v11103_v24  ;;  %v2399_v12 = vmul.f32 %v7808_v11, %v11104_v32  ;;  %v1887_v49 = vld [vmem:[%s7146_s18 + $0x140] sm:$0xff]  ;;  %v4988_v45 = vpop.eup %4987  ;;  %v2023_v63 = vadd.f32 0.001, %v1765_v43  ;;  %v11105_v44 = vld [vmem:[#allocation181_spill] sm:$0xff]  ;;  %v1768_v58 = vmax.f32 %v1639_v21, 0.0 }
 0x279   : > { %11098 = vst [vmem:[#allocation161_spill] sm:$0xff] %v7828_v30  ;;  %2689 = vrot.lane.b32.xlu0 %v2397_v62, %s5493_s19  ;;  %v1640_v0 = vsub.f32 %v1382_v8, %v11105_v44  ;;  %v11106_v6 = vld [vmem:[#allocation169_spill] sm:$0xff]  ;;  %v1641_v19 = vsub.f32 %v1383_v51, %v7189_v14  ;;  %v11107_v62 = vld [vmem:[#allocation168_spill] sm:$0xff]  ;;  %v4990_v24 = vpop.eup %4989  ;;  %v7852_v32 = vmul.f32 %v7828_v30, %v7828_v30  ;;  %v7854_v4 = vpop.xlane.xlu1 %1257  ;;  %v11110_v43 = vld [vmem:[#allocation54_spill] sm:$0xff]  ;;  %5001 = vrsqrt.f32 %v2024_v61 }
 0x27a   : > { %v1384_v54 = vmul.f32 0.020408163, %v11106_v6  ;;  %v1886_v47 = vld [vmem:[%s7146_s18 + $0x138] sm:$0xff]  ;;  %v1385_v9 = vmul.f32 0.020408163, %v11107_v62  ;;  %11108 = vst [vmem:[#allocation162_spill] sm:$0xff] %v7854_v4  ;;  %v7857_v8 = vpop.xlane.xlu0 %1254  ;;  %v2400_v60 = vmul.f32 %v7835_v2, %v11110_v43  ;;  %v7863_v51 = vmul.f32 %v4986_v59, %v1887_v49  ;;  %v4992_v44 = vpop.eup %4991 }
 0x27b   : > { %11109 = vst [vmem:[#allocation163_spill] sm:$0xff] %v7857_v8  ;;  %v11111_v21 = vld [vmem:[#allocation57_spill] sm:$0xff]  ;;  %v2025_v6 = vadd.f32 0.001, %v1767_v50  ;;  %v11113_v62 = vld [vmem:[#allocation171_spill] sm:$0xff]  ;;  %v7867_v11 = vmul.f32 %v4988_v45, %v1886_v47  ;;  %v1889_v30 = vld [vmem:[%s7146_s18 + $0x150] sm:$0xff]  ;;  %5003 = vrsqrt.f32 %v2023_v63 }
 0x27c   : > { %2691 = vrot.lane.b32.xlu1 %v2398_v36, %s5493_s19  ;;  %v2401_v14 = vmul.f32 %v7837_v35, %v11111_v21  ;;  %11112 = vst [vmem:[#allocation46_spill] sm:$0xff] %v7863_v51  ;;  %v1387_v10 = vmul.f32 0.020408163, %v11113_v62  ;;  %v1888_v36 = vld [vmem:[%s7146_s18 + $0x148] sm:$0xff]  ;;  %v1769_v8 = vmax.f32 %v1640_v0, 0.0  ;;  %v11115_v4 = vld [vmem:[#allocation185_spill] sm:$0xff]  ;;  %v1643_v59 = vsub.f32 %v1385_v9, %v7210_v34 }
 0x27d   : > { %2693 = vrot.lane.b32.xlu0 %v2399_v12, %s5493_s19  ;;  %11114 = vst [vmem:[#allocation49_spill] sm:$0xff] %v7867_v11  ;;  %v1642_v43 = vsub.f32 %v1384_v54, %v11115_v4  ;;  %v11116_v2 = vld [vmem:[#allocation172_spill] sm:$0xff]  ;;  %v2026_v21 = vadd.f32 0.001, %v1768_v58  ;;  %v1770_v49 = vmax.f32 %v1641_v19, 0.0  ;;  %v11117_v61 = vld [vmem:[#allocation175_spill] sm:$0xff]  ;;  %v7881_v47 = vpop.xlane.xlu1 %1263  ;;  %v7888_v0 = vmul.f32 %v4990_v24, %v1889_v30 }
 0x27e   : > { %v1386_v26 = vmul.f32 0.020408163, %v11116_v2  ;;  %v1388_v50 = vmul.f32 0.020408163, %v11117_v61  ;;  %v11118_v62 = vld [vmem:[#allocation101_spill] sm:$0xff]  ;;  %v11120_v12 = vld [vmem:[#allocation102_spill] sm:$0xff]  ;;  %v7884_v63 = vpop.xlane.xlu0 %1260  ;;  %v7886_v2 = vmul.f32 %v4992_v44, %v1888_v36  ;;  %v4994_v34 = vpop.eup %4993  ;;  %5005 = vrsqrt.f32 %v2025_v6 }
 0x27f   : > { %v7876_v35 = vmul.f32 0.020408163, %v11118_v62  ;;  %v7879_v45 = vmul.f32 0.020408163, %v11120_v12  ;;  %11122 = vst [vmem:[#allocation48_spill] sm:$0xff] %v7881_v47  ;;  %11123 = vst [vmem:[#allocation164_spill] sm:$0xff] %v7884_v63  ;;  %v1645_v9 = vsub.f32 %v1387_v10, %v7218_v37  ;;  %v4996_v61 = vpop.eup %4995  ;;  %5007 = vrsqrt.f32 %v2026_v21 }
 0x280   : > { %2695 = vrot.lane.b32.xlu1 %v2400_v60, %s5493_s19  ;;  %11124 = vst [vmem:[#allocation51_spill] sm:$0xff] %v7886_v2  ;;  %11125 = vst [vmem:[#allocation99_spill] sm:$0xff] %v7888_v0  ;;  %v11126_v54 = vld [vmem:[#allocation56_spill] sm:$0xff]  ;;  %v11127_v19 = vld [vmem:[#allocation59_spill] sm:$0xff]  ;;  %v2027_v62 = vadd.f32 0.001, %v1769_v8  ;;  %v1644_v44 = vsub.f32 %v1386_v26, %v7203_v27  ;;  %v1646_v10 = vsub.f32 %v1388_v50, %v7214_v40 }
 0x281   : > { %11119 = vst [vmem:[#allocation98_spill] sm:$0xff] %v7876_v35  ;;  %11121 = vst [vmem:[#allocation165_spill] sm:$0xff] %v7879_v45  ;;  %2697 = vrot.lane.b32.xlu0 %v2401_v14, %s5493_s19  ;;  %v2402_v58 = vmul.f32 %v7867_v11, %v11126_v54  ;;  %v2403_v4 = vmul.f32 %v7863_v51, %v11127_v19  ;;  %v1890_v60 = vld [vmem:[%s7146_s18 + $0x158] sm:$0xff]  ;;  %v1771_v12 = vmax.f32 %v1642_v43, 0.0  ;;  %v11128_v30 = vld [vmem:[#allocation174_spill] sm:$0xff]  ;;  %v1772_v37 = vmax.f32 %v1643_v59, 0.0  ;;  %v7906_v11 = vpop.xlane.xlu1 %1269 }
 0x282   : > { %v1389_v24 = vmul.f32 0.020408163, %v11128_v30  ;;  %v1891_v36 = vld [vmem:[%s7146_s18 + $0x160] sm:$0xff]  ;;  %v2028_v6 = vadd.f32 0.001, %v1770_v49  ;;  %v7903_v14 = vmul.f32 %v7876_v35, %v7876_v35  ;;  %v11129_v54 = vld [vmem:[#allocation176_spill] sm:$0xff]  ;;  %v7909_v8 = vpop.xlane.xlu0 %1266  ;;  %v7917_v50 = vmul.f32 %v4996_v61, %v1890_v60 }
 0x283   : > { %v1391_v19 = vmul.f32 0.020408163, %v11129_v54  ;;  %11130 = vst [vmem:[#allocation167_spill] sm:$0xff] %v7906_v11  ;;  %11131 = vst [vmem:[#allocation50_spill] sm:$0xff] %v7909_v8  ;;  %v11132_v27 = vld [vmem:[#allocation58_spill] sm:$0xff]  ;;  %v11133_v43 = vld [vmem:[#allocation61_spill] sm:$0xff]  ;;  %v7919_v30 = vmul.f32 %v4994_v34, %v1891_v36  ;;  %5009 = vrsqrt.f32 %v2027_v62 }
 0x284   : > { %2699 = vrot.lane.b32.xlu1 %v2402_v58, %s5493_s19  ;;  %v2404_v26 = vmul.f32 %v7886_v2, %v11132_v27  ;;  %v2405_v21 = vmul.f32 %v7888_v0, %v11133_v43  ;;  %v1774_v40 = vmax.f32 %v1645_v9, 0.0  ;;  %v11134_v49 = vld [vmem:[#allocation177_spill] sm:$0xff]  ;;  %11135 = vst [vmem:[#allocation166_spill] sm:$0xff] %v7917_v50  ;;  %v2029_v58 = vadd.f32 0.001, %v1771_v12  ;;  %v4998_v27 = vpop.eup %4997  ;;  %v11137_v43 = vld [vmem:[#allocation178_spill] sm:$0xff] }
 0x285   : > { %v1390_v59 = vmul.f32 0.020408163, %v11134_v49  ;;  %2701 = vrot.lane.b32.xlu0 %v2403_v4, %s5493_s19  ;;  %11136 = vst [vmem:[#allocation53_spill] sm:$0xff] %v7919_v30  ;;  %v1773_v54 = vmax.f32 %v1644_v44, 0.0  ;;  %v1647_v51 = vsub.f32 %v1389_v24, %v7252_v33  ;;  %5011 = vrsqrt.f32 %v2028_v6  ;;  %v1892_v0 = vld [vmem:[%s7146_s18 + $0x168] sm:$0xff]  ;;  %v5000_v49 = vpop.eup %4999  ;;  %v7933_v33 = vpop.xlane.xlu1 %1275  ;;  %v1893_v24 = vld [vmem:[%s7146_s18 + $0x170] sm:$0xff] }
 0x286   : > { %v2030_v2 = vadd.f32 0.001, %v1772_v37  ;;  %v1775_v35 = vmax.f32 %v1646_v10, 0.0  ;;  %v1393_v9 = vmul.f32 0.020408163, %v11137_v43  ;;  %v7926_v4 = vmul.f32 %v7879_v45, %v7879_v45  ;;  %v11138_v34 = vld [vmem:[#allocation103_spill] sm:$0xff]  ;;  %v7936_v44 = vpop.xlane.xlu0 %1272 }
 0x287   : > { %v7929_v60 = vmul.f32 0.020408163, %v11138_v34  ;;  %v1649_v61 = vsub.f32 %v1391_v19, %v7296_v22  ;;  %v11140_v62 = vld [vmem:[#allocation179_spill] sm:$0xff]  ;;  %11141 = vst [vmem:[#allocation52_spill] sm:$0xff] %v7933_v33  ;;  %11142 = vst [vmem:[#allocation55_spill] sm:$0xff] %v7936_v44  ;;  %v1648_v6 = vsub.f32 %v1390_v59, %v7229_v52  ;;  %v11143_v37 = vld [vmem:[#allocation60_spill] sm:$0xff]  ;;  %v5002_v19 = vpop.eup %5001  ;;  %5013 = vrsqrt.f32 %v2029_v58 }
 0x288   : > { %v1392_v12 = vmul.f32 0.020408163, %v11140_v62  ;;  %2703 = vrot.lane.b32.xlu1 %v2404_v26, %s5493_s19  ;;  %v2032_v36 = vadd.f32 0.001, %v1774_v40  ;;  %v2406_v10 = vmul.f32 %v7917_v50, %v11143_v37  ;;  %v11144_v43 = vld [vmem:[#allocation63_spill] sm:$0xff]  ;;  %v1776_v26 = vmax.f32 %v1647_v51, 0.0  ;;  %v5004_v45 = vpop.eup %5003 }
 0x289   : > { %11139 = vst [vmem:[#allocation100_spill] sm:$0xff] %v7929_v60  ;;  %2705 = vrot.lane.b32.xlu0 %v2405_v21, %s5493_s19  ;;  %v2407_v22 = vmul.f32 %v7919_v30, %v11144_v43  ;;  %v2031_v34 = vadd.f32 0.001, %v1773_v54  ;;  %v7945_v62 = vmul.f32 %v4998_v27, %v1892_v0  ;;  %5015 = vrsqrt.f32 %v2030_v2  ;;  %v1894_v21 = vld [vmem:[%s7146_s18 + $0x178] sm:$0xff]  ;;  %v11147_v33 = vld [vmem:[#allocation104_spill] sm:$0xff]  ;;  %v11149_v58 = vld [vmem:[#allocation183_spill] sm:$0xff]  ;;  %v7956_v30 = vpop.xlane.xlu1 %1281 }
 0x28a   : > { %v2033_v40 = vadd.f32 0.001, %v1775_v35  ;;  %v1651_v52 = vsub.f32 %v1393_v9, %v7313_v56  ;;  %v7948_v59 = vmul.f32 %v5000_v49, %v1893_v24  ;;  %v7952_v37 = vmul.f32 0.020408163, %v11147_v33  ;;  %11150 = vst [vmem:[#allocation54_spill] sm:$0xff] %v7956_v30  ;;  %v7959_v51 = vpop.xlane.xlu0 %1278  ;;  %v1895_v35 = vld [vmem:[%s7146_s18 + $0x180] sm:$0xff] }
 0x28b   : > { %11145 = vst [vmem:[#allocation181_spill] sm:$0xff] %v7945_v62  ;;  %v1778_v50 = vmax.f32 %v1649_v61, 0.0  ;;  %v1650_v43 = vsub.f32 %v1392_v12, %v7292_v46  ;;  %v1395_v54 = vmul.f32 0.020408163, %v11149_v58  ;;  %11151 = vst [vmem:[#allocation57_spill] sm:$0xff] %v7959_v51  ;;  %v7964_v56 = vmul.f32 %v7929_v60, %v7929_v60  ;;  %v11152_v0 = vld [vmem:[#allocation184_spill] sm:$0xff]  ;;  %v5006_v46 = vpop.eup %5005 }
 0x28c   : > { %11146 = vst [vmem:[#allocation169_spill] sm:$0xff] %v7948_v59  ;;  %11148 = vst [vmem:[#allocation168_spill] sm:$0xff] %v7952_v37  ;;  %2707 = vrot.lane.b32.xlu1 %v2406_v10, %s5493_s19  ;;  %5017 = vrsqrt.f32 %v2032_v36  ;;  %v1777_v2 = vmax.f32 %v1648_v6, 0.0  ;;  %v1394_v27 = vmul.f32 0.020408163, %v11152_v0  ;;  %v11153_v49 = vld [vmem:[#allocation62_spill] sm:$0xff]  ;;  %v7970_v12 = vmul.f32 %v5004_v45, %v1894_v21  ;;  %v5008_v58 = vpop.eup %5007 }
 0x28d   : > { %2709 = vrot.lane.b32.xlu0 %v2407_v22, %s5493_s19  ;;  %5019 = vrsqrt.f32 %v2031_v34  ;;  %v2034_v9 = vadd.f32 0.001, %v1776_v26  ;;  %v2408_v61 = vmul.f32 %v7945_v62, %v11153_v49  ;;  %v1780_v33 = vmax.f32 %v1651_v52, 0.0  ;;  %v11155_v24 = vld [vmem:[#allocation65_spill] sm:$0xff]  ;;  %v1896_v6 = vld [vmem:[%s7146_s18 + $0x188] sm:$0xff]  ;;  %v11157_v26 = vld [vmem:[#allocation190_spill] sm:$0xff]  ;;  %v7979_v51 = vpop.xlane.xlu1 %1287 }
 0x28e   : > { %11154 = vst [vmem:[#allocation171_spill] sm:$0xff] %v7970_v12  ;;  %5021 = vrsqrt.f32 %v2033_v40  ;;  %v2409_v10 = vmul.f32 %v7948_v59, %v11155_v24  ;;  %v7974_v36 = vmul.f32 %v5002_v19, %v1895_v35  ;;  %v2036_v0 = vadd.f32 0.001, %v1778_v50  ;;  %11158 = vst [vmem:[#allocation172_spill] sm:$0xff] %v7979_v51  ;;  %v7982_v45 = vpop.xlane.xlu0 %1284  ;;  %v1897_v40 = vld [vmem:[%s7146_s18 + $0x190] sm:$0xff]  ;;  %v11160_v52 = vld [vmem:[#allocation105_spill] sm:$0xff] }
 0x28f   : > { %v1779_v22 = vmax.f32 %v1650_v43, 0.0  ;;  %v1653_v34 = vsub.f32 %v1395_v54, %v7322_v41  ;;  %v1396_v60 = vmul.f32 0.020408163, %v11157_v26  ;;  %11159 = vst [vmem:[#allocation175_spill] sm:$0xff] %v7982_v45  ;;  %v7986_v21 = vmul.f32 0.020408163, %v11160_v52 }
 0x290   : > { %11156 = vst [vmem:[#allocation185_spill] sm:$0xff] %v7974_v36  ;;  %2711 = vrot.lane.b32.xlu1 %v2408_v61, %s5493_s19  ;;  %v2035_v19 = vadd.f32 0.001, %v1777_v2  ;;  %v11162_v35 = vld [vmem:[#allocation125_spill] sm:$0xff]  ;;  %v11164_v41 = vld [vmem:[#allocation106_spill] sm:$0xff]  ;;  %5023 = vrsqrt.f32 %v2034_v9  ;;  %v11166_v24 = vld [vmem:[#allocation64_spill] sm:$0xff]  ;;  %v7996_v26 = vmul.f32 %v5006_v46, %v1896_v6  ;;  %v5010_v62 = vpop.eup %5009  ;;  %v8000_v2 = vmul.f32 %v7952_v37, %v7952_v37 }
 0x291   : > { %11161 = vst [vmem:[#allocation101_spill] sm:$0xff] %v7986_v21  ;;  %v1652_v49 = vsub.f32 %v1394_v27, %v11162_v35  ;;  %v11163_v50 = vld [vmem:[#allocation189_spill] sm:$0xff]  ;;  %2713 = vrot.lane.b32.xlu0 %v2409_v10, %s5493_s19  ;;  %v7992_v54 = vmul.f32 0.020408163, %v11164_v41  ;;  %v2410_v61 = vmul.f32 %v7970_v12, %v11166_v24  ;;  %v2038_v27 = vadd.f32 0.001, %v1780_v33  ;;  %v8008_v46 = vpop.xlane.xlu1 %1293 }
 0x292   : > { %v1397_v43 = vmul.f32 0.020408163, %v11163_v50  ;;  %11167 = vst [vmem:[#allocation56_spill] sm:$0xff] %v7996_v26  ;;  %v11168_v52 = vld [vmem:[#allocation67_spill] sm:$0xff]  ;;  %v8004_v10 = vmul.f32 %v5008_v58, %v1897_v40  ;;  %v1898_v50 = vld [vmem:[%s7146_s18 + $0x198] sm:$0xff]  ;;  %v5012_v41 = vpop.eup %5011  ;;  %5025 = vrsqrt.f32 %v2036_v0  ;;  %v1782_v59 = vmax.f32 %v1653_v34, 0.0  ;;  %v8011_v6 = vpop.xlane.xlu0 %1290 }
 0x293   : > { %11165 = vst [vmem:[#allocation102_spill] sm:$0xff] %v7992_v54  ;;  %v2411_v35 = vmul.f32 %v7974_v36, %v11168_v52  ;;  %v2037_v9 = vadd.f32 0.001, %v1779_v22  ;;  %v11170_v24 = vld [vmem:[#allocation124_spill] sm:$0xff]  ;;  %11171 = vst [vmem:[#allocation174_spill] sm:$0xff] %v8008_v46  ;;  %v1899_v33 = vld [vmem:[%s7146_s18 + $0x1a0] sm:$0xff]  ;;  %5027 = vrsqrt.f32 %v2035_v19  ;;  %v8019_v0 = vmul.f32 %v7986_v21, %v7986_v21 }
 0x294   : > { %11169 = vst [vmem:[#allocation59_spill] sm:$0xff] %v8004_v10  ;;  %v1654_v12 = vsub.f32 %v1396_v60, %v11170_v24  ;;  %2715 = vrot.lane.b32.xlu1 %v2410_v61, %s5493_s19  ;;  %11172 = vst [vmem:[#allocation176_spill] sm:$0xff] %v8011_v6  ;;  %v1781_v45 = vmax.f32 %v1652_v49, 0.0  ;;  %v1655_v58 = vsub.f32 %v1397_v43, %v7391_v17  ;;  %v11173_v40 = vld [vmem:[#allocation198_spill] sm:$0xff]  ;;  %v5014_v49 = vpop.eup %5013  ;;  %5029 = vrsqrt.f32 %v2038_v27  ;;  %v11176_v17 = vld [vmem:[#allocation197_spill] sm:$0xff] }
 0x295   : > { %v1398_v52 = vmul.f32 0.020408163, %v11173_v40  ;;  %2717 = vrot.lane.b32.xlu0 %v2411_v35, %s5493_s19  ;;  %v8023_v60 = vmul.f32 %v7992_v54, %v7992_v54  ;;  %v11174_v22 = vld [vmem:[#allocation66_spill] sm:$0xff]  ;;  %v8027_v19 = vmul.f32 %v5010_v62, %v1898_v50  ;;  %v1399_v43 = vmul.f32 0.020408163, %v11176_v17  ;;  %v11177_v61 = vld [vmem:[#allocation69_spill] sm:$0xff] }
 0x296   : > { %v2412_v34 = vmul.f32 %v7996_v26, %v11174_v22  ;;  %v2413_v35 = vmul.f32 %v8004_v10, %v11177_v61  ;;  %v8032_v24 = vmul.f32 %v5012_v41, %v1899_v33  ;;  %v1900_v40 = vld [vmem:[%s7146_s18 + $0x1a8] sm:$0xff]  ;;  %v5016_v36 = vpop.eup %5015  ;;  %5031 = vrsqrt.f32 %v2037_v9  ;;  %v8038_v26 = vpop.xlane.xlu1 %1299  ;;  %v1901_v27 = vld [vmem:[%s7146_s18 + $0x1b0] sm:$0xff]  ;;  %v11190_v54 = vld [vmem:[#allocation81_spill] sm:$0xff] }
 0x297   : > { %11175 = vst [vmem:[#allocation58_spill] sm:$0xff] %v8027_v19  ;;  %v11179_v46 = vld [vmem:[#allocation107_spill] sm:$0xff]  ;;  %v2040_v6 = vadd.f32 0.001, %v1782_v59  ;;  %v1783_v22 = vmax.f32 %v1654_v12, 0.0  ;;  %11181 = vst [vmem:[#allocation178_spill] sm:$0xff] %v8038_v26  ;;  %v8041_v62 = vpop.xlane.xlu0 %1296  ;;  %v1656_v61 = vsub.f32 %v1398_v52, %v7387_v38 }
 0x298   : > { %11178 = vst [vmem:[#allocation61_spill] sm:$0xff] %v8032_v24  ;;  %v8036_v21 = vmul.f32 0.020408163, %v11179_v46  ;;  %2719 = vrot.lane.b32.xlu1 %v2412_v34, %s5493_s19  ;;  %11182 = vst [vmem:[#allocation103_spill] sm:$0xff] %v8041_v62  ;;  %v11183_v50 = vld [vmem:[#allocation108_spill] sm:$0xff]  ;;  %v1784_v33 = vmax.f32 %v1655_v58, 0.0  ;;  %v8055_v62 = vmul.f32 %v5014_v49, %v1900_v40 }
 0x299   : > { %v8045_v17 = vmul.f32 0.020408163, %v11183_v50  ;;  %v2039_v41 = vadd.f32 0.001, %v1781_v45  ;;  %2721 = vrot.lane.b32.xlu0 %v2413_v35, %s5493_s19  ;;  %v5018_v9 = vpop.eup %5017  ;;  %v11185_v59 = vld [vmem:[#allocation109_spill] sm:$0xff]  ;;  %v11187_v46 = vld [vmem:[#allocation19_spill] sm:$0xff]  ;;  %v1657_v45 = vsub.f32 %v1399_v43, %v11190_v54  ;;  %v8061_v35 = vmul.f32 %v5016_v36, %v1901_v27 }
 0x29a   : > { %11180 = vst [vmem:[#allocation177_spill] sm:$0xff] %v8036_v21  ;;  %v8050_v12 = vmul.f32 0.020408163, %v11185_v59  ;;  %v1400_v10 = vmul.f32 0.020408163, %v11187_v46  ;;  %v11188_v34 = vld [vmem:[#allocation68_spill] sm:$0xff]  ;;  %v5020_v50 = vpop.eup %5019  ;;  %v8066_v46 = vmul.f32 %v8036_v21, %v8036_v21  ;;  %5033 = vrsqrt.f32 %v2040_v6 }
 0x29b   : > { %11184 = vst [vmem:[#allocation179_spill] sm:$0xff] %v8045_v17  ;;  %v2414_v26 = vmul.f32 %v8027_v19, %v11188_v34  ;;  %11189 = vst [vmem:[#allocation63_spill] sm:$0xff] %v8055_v62  ;;  %v11191_v58 = vld [vmem:[#allocation17_spill] sm:$0xff]  ;;  %v11192_v38 = vld [vmem:[#allocation71_spill] sm:$0xff]  ;;  %v5022_v37 = vpop.eup %5021  ;;  %v2041_v49 = vadd.f32 0.001, %v1783_v22  ;;  %v8069_v19 = vpop.xlane.xlu1 %1305  ;;  %5035 = vrsqrt.f32 %v2039_v41  ;;  %v8080_v6 = vmul.f32 %v8045_v17, %v8045_v17 }
 0x29c   : > { %11186 = vst [vmem:[#allocation60_spill] sm:$0xff] %v8050_v12  ;;  %v1401_v51 = vmul.f32 0.020408163, %v11191_v58  ;;  %v2415_v52 = vmul.f32 %v8032_v24, %v11192_v38  ;;  %11193 = vst [vmem:[#allocation104_spill] sm:$0xff] %v8061_v35  ;;  %v1902_v59 = vld [vmem:[%s7146_s18 + $0x1b8] sm:$0xff]  ;;  %v8072_v54 = vpop.xlane.xlu0 %1302  ;;  %v1903_v43 = vld [vmem:[%s7146_s18 + $0x1c0] sm:$0xff] }
 0x29d   : > { %v11194_v40 = vld [vmem:[#allocation21_spill] sm:$0xff]  ;;  %11195 = vst [vmem:[#allocation183_spill] sm:$0xff] %v8069_v19  ;;  %2723 = vrot.lane.b32.xlu1 %v2414_v26, %s5493_s19  ;;  %11196 = vst [vmem:[#allocation184_spill] sm:$0xff] %v8072_v54  ;;  %v2042_v36 = vadd.f32 0.001, %v1784_v33  ;;  %v1785_v27 = vmax.f32 %v1656_v61, 0.0  ;;  %v8085_v54 = vmul.f32 %v5020_v50, %v1902_v59  ;;  %v5024_v21 = vpop.eup %5023  ;;  %5037 = vrsqrt.f32 %v2041_v49 }
 0x29e   : > { %v1403_v34 = vmul.f32 0.020408163, %v11194_v40  ;;  %v11197_v58 = vld [vmem:[#allocation75_spill] sm:$0xff]  ;;  %2725 = vrot.lane.b32.xlu0 %v2415_v52, %s5493_s19  ;;  %v11198_v22 = vld [vmem:[#allocation22_spill] sm:$0xff]  ;;  %v1786_v41 = vmax.f32 %v1657_v45, 0.0  ;;  %v11201_v33 = vld [vmem:[#allocation133_spill] sm:$0xff]  ;;  %v8090_v52 = vmul.f32 %v5018_v9, %v1903_v43  ;;  %v8106_v9 = vmul.f32 %v8050_v12, %v8050_v12 }
 0x29f   : > { %v1402_v38 = vmul.f32 0.020408163, %v11197_v58  ;;  %v1904_v24 = vld [vmem:[%s7146_s18 + $0x1c8] sm:$0xff]  ;;  %v1658_v40 = vsub.f32 %v1400_v10, %v11198_v22  ;;  %v11199_v19 = vld [vmem:[#allocation70_spill] sm:$0xff]  ;;  %11200 = vst [vmem:[#allocation62_spill] sm:$0xff] %v8085_v54  ;;  %v1659_v61 = vsub.f32 %v1401_v51, %v11201_v33  ;;  %v11202_v30 = vld [vmem:[#allocation72_spill] sm:$0xff]  ;;  %5039 = vrsqrt.f32 %v2042_v36 }
 0x2a0   : > { %v2416_v26 = vmul.f32 %v8055_v62, %v11199_v19  ;;  %v2417_v58 = vmul.f32 %v8061_v35, %v11202_v30  ;;  %11203 = vst [vmem:[#allocation65_spill] sm:$0xff] %v8090_v52  ;;  %v1905_v44 = vld [vmem:[%s7146_s18 + $0x1d0] sm:$0xff]  ;;  %v11204_v8 = vld [vmem:[#allocation110_spill] sm:$0xff]  ;;  %v8097_v19 = vpop.xlane.xlu1 %1311  ;;  %v8100_v50 = vpop.xlane.xlu0 %1308  ;;  %v8102_v51 = vmul.f32 %v5022_v37, %v1904_v24  ;;  %v11210_v45 = vld [vmem:[#allocation131_spill] sm:$0xff]  ;;  %v2044_v35 = vadd.f32 0.001, %v1786_v41 }
 0x2a1   : > { %v8094_v17 = vmul.f32 0.020408163, %v11204_v8  ;;  %v11206_v10 = vld [vmem:[#allocation24_spill] sm:$0xff]  ;;  %11207 = vst [vmem:[#allocation105_spill] sm:$0xff] %v8097_v19  ;;  %11208 = vst [vmem:[#allocation125_spill] sm:$0xff] %v8100_v50  ;;  %v5026_v30 = vpop.eup %5025  ;;  %v1660_v59 = vsub.f32 %v1402_v38, %v11210_v45  ;;  %v8113_v37 = vmul.f32 %v5024_v21, %v1905_v44  ;;  %v1906_v24 = vld [vmem:[%s7146_s18 + $0x1d8] sm:$0xff] }
 0x2a2   : > { %v1661_v22 = vsub.f32 %v1403_v34, %v11206_v10  ;;  %2727 = vrot.lane.b32.xlu1 %v2416_v26, %s5493_s19  ;;  %11209 = vst [vmem:[#allocation189_spill] sm:$0xff] %v8102_v51  ;;  %v2043_v8 = vadd.f32 0.001, %v1785_v27  ;;  %2729 = vrot.lane.b32.xlu0 %v2417_v58, %s5493_s19  ;;  %v5028_v49 = vpop.eup %5027  ;;  %v1787_v34 = vmax.f32 %v1658_v40, 0.0  ;;  %v11211_v43 = vld [vmem:[#allocation80_spill] sm:$0xff]  ;;  %v1907_v62 = vld [vmem:[%s7146_s18 + $0x1e0] sm:$0xff] }
 0x2a3   : > { %11205 = vst [vmem:[#allocation190_spill] sm:$0xff] %v8094_v17  ;;  %v1404_v33 = vmul.f32 0.020408163, %v11211_v43  ;;  %v11212_v26 = vld [vmem:[#allocation180_spill] sm:$0xff]  ;;  %11213 = vst [vmem:[#allocation106_spill] sm:$0xff] %v8113_v37  ;;  %v1788_v19 = vmax.f32 %v1659_v61, 0.0  ;;  %v5030_v58 = vpop.eup %5029  ;;  %v8122_v40 = vmul.f32 %v8094_v17, %v8094_v17 }
 0x2a4   : > { %v2418_v10 = vmul.f32 %v8085_v54, %v11212_v26  ;;  %v11214_v50 = vld [vmem:[#allocation20_spill] sm:$0xff]  ;;  %v11215_v27 = vld [vmem:[#allocation73_spill] sm:$0xff]  ;;  %v11216_v45 = vld [vmem:[#allocation111_spill] sm:$0xff]  ;;  %v1790_v44 = vmax.f32 %v1661_v22, 0.0  ;;  %v8127_v21 = vpop.xlane.xlu1 %1317  ;;  %v8130_v41 = vpop.xlane.xlu0 %1314  ;;  %5041 = vrsqrt.f32 %v2043_v8  ;;  %v8135_v54 = vmul.f32 %v5028_v49, %v1906_v24 }
 0x2a5   : > { %v1405_v36 = vmul.f32 0.020408163, %v11214_v50  ;;  %v2419_v38 = vmul.f32 %v8090_v52, %v11215_v27  ;;  %v8125_v43 = vmul.f32 0.020408163, %v11216_v45  ;;  %11218 = vst [vmem:[#allocation67_spill] sm:$0xff] %v8127_v21  ;;  %11219 = vst [vmem:[#allocation124_spill] sm:$0xff] %v8130_v41  ;;  %v5032_v26 = vpop.eup %5031  ;;  %v8137_v52 = vmul.f32 %v5026_v30, %v1907_v62 }
 0x2a6   : > { %2731 = vrot.lane.b32.xlu1 %v2418_v10, %s5493_s19  ;;  %v11220_v61 = vld [vmem:[#allocation182_spill] sm:$0xff]  ;;  %v1789_v27 = vmax.f32 %v1660_v59, 0.0  ;;  %11221 = vst [vmem:[#allocation198_spill] sm:$0xff] %v8135_v54  ;;  %v1908_v45 = vld [vmem:[%s7146_s18 + $0x1e8] sm:$0xff]  ;;  %v1909_v22 = vld [vmem:[%s7146_s18 + $0x1f0] sm:$0xff]  ;;  %5043 = vrsqrt.f32 %v2044_v35 }
 0x2a7   : > { %11217 = vst [vmem:[#allocation64_spill] sm:$0xff] %v8125_v43  ;;  %v2420_v50 = vmul.f32 %v8102_v51, %v11220_v61  ;;  %2733 = vrot.lane.b32.xlu0 %v2419_v38, %s5493_s19  ;;  %11222 = vst [vmem:[#allocation66_spill] sm:$0xff] %v8137_v52  ;;  %v2045_v12 = vadd.f32 0.001, %v1787_v34  ;;  %v11223_v21 = vld [vmem:[#allocation27_spill] sm:$0xff]  ;;  %v11224_v10 = vld [vmem:[#allocation200_spill] sm:$0xff]  ;;  %v1663_v8 = vsub.f32 %v1405_v36, %v7490_v7 }
 0x2a8   : > { %v1662_v17 = vsub.f32 %v1404_v33, %v11223_v21  ;;  %v1406_v11 = vmul.f32 0.020408163, %v11224_v10  ;;  %v11225_v41 = vld [vmem:[#allocation188_spill] sm:$0xff]  ;;  %v2046_v61 = vadd.f32 0.001, %v1788_v19  ;;  %v11226_v59 = vld [vmem:[#allocation82_spill] sm:$0xff]  ;;  %v8150_v30 = vpop.xlane.xlu1 %1323  ;;  %v8153_v34 = vpop.xlane.xlu0 %1320  ;;  %v8155_v33 = vmul.f32 %v5032_v26, %v1908_v45 }
 0x2a9   : > { %v2421_v63 = vmul.f32 %v8113_v37, %v11225_v41  ;;  %v1407_v38 = vmul.f32 0.020408163, %v11226_v59  ;;  %v11227_v49 = vld [vmem:[#allocation112_spill] sm:$0xff]  ;;  %v2048_v62 = vadd.f32 0.001, %v1790_v44  ;;  %11228 = vst [vmem:[#allocation197_spill] sm:$0xff] %v8150_v30  ;;  %v8157_v35 = vmul.f32 %v5030_v58, %v1909_v22  ;;  %v5034_v19 = vpop.eup %5033 }
 0x2aa   : > { %v8148_v24 = vmul.f32 0.020408163, %v11227_v49  ;;  %2735 = vrot.lane.b32.xlu1 %v2420_v50, %s5493_s19  ;;  %11229 = vst [vmem:[#allocation69_spill] sm:$0xff] %v8153_v34  ;;  %11230 = vst [vmem:[#allocation107_spill] sm:$0xff] %v8155_v33  ;;  %v8161_v7 = vmul.f32 %v8125_v43, %v8125_v43  ;;  %v2047_v36 = vadd.f32 0.001, %v1789_v27  ;;  %v5036_v10 = vpop.eup %5035  ;;  %5045 = vrsqrt.f32 %v2045_v12 }
 0x2ab   : > { %11231 = vst [vmem:[#allocation108_spill] sm:$0xff] %v8157_v35  ;;  %2737 = vrot.lane.b32.xlu0 %v2421_v63, %s5493_s19  ;;  %v11233_v44 = vld [vmem:[#allocation186_spill] sm:$0xff]  ;;  %v1791_v26 = vmax.f32 %v1662_v17, 0.0  ;;  %v11235_v45 = vld [vmem:[#allocation88_spill] sm:$0xff]  ;;  %v11236_v22 = vld [vmem:[#allocation87_spill] sm:$0xff]  ;;  %5047 = vrsqrt.f32 %v2046_v61  ;;  %v1792_v37 = vmax.f32 %v1663_v8, 0.0 }
 0x2ac   : > { %11232 = vst [vmem:[#allocation109_spill] sm:$0xff] %v8161_v7  ;;  %v2422_v21 = vmul.f32 %v8135_v54, %v11233_v44  ;;  %v11234_v41 = vld [vmem:[#allocation194_spill] sm:$0xff]  ;;  %v1664_v58 = vsub.f32 %v1406_v11, %v11235_v45  ;;  %v1408_v59 = vmul.f32 0.020408163, %v11236_v22  ;;  %v1910_v49 = vld [vmem:[%s7146_s18 + $0x1f8] sm:$0xff]  ;;  %v11237_v27 = vld [vmem:[#allocation139_spill] sm:$0xff]  ;;  %5049 = vrsqrt.f32 %v2048_v62  ;;  %v8178_v11 = vpop.xlane.xlu0 %1326  ;;  %v5038_v45 = vpop.eup %5037 }
 0x2ad   : > { %v2423_v50 = vmul.f32 %v8137_v52, %v11234_v41  ;;  %v1911_v51 = vld [vmem:[%s7146_s18 + $0x200] sm:$0xff]  ;;  %v1665_v63 = vsub.f32 %v1407_v38, %v11237_v27  ;;  %v11239_v44 = vld [vmem:[#allocation203_spill] sm:$0xff]  ;;  %v8175_v41 = vpop.xlane.xlu1 %1329  ;;  %11241 = vst [vmem:[#allocation68_spill] sm:$0xff] %v8178_v11  ;;  %v11243_v61 = vld [vmem:[#allocation196_spill] sm:$0xff]  ;;  %5051 = vrsqrt.f32 %v2047_v36  ;;  %v8186_v62 = vmul.f32 %v5036_v10, %v1910_v49  ;;  %v5040_v27 = vpop.eup %5039 }
 0x2ae   : > { %v11238_v30 = vld [vmem:[#allocation26_spill] sm:$0xff]  ;;  %v1411_v54 = vmul.f32 0.020408163, %v11239_v44  ;;  %11240 = vst [vmem:[#allocation19_spill] sm:$0xff] %v8175_v41  ;;  %2739 = vrot.lane.b32.xlu1 %v2422_v21, %s5493_s19  ;;  %v11242_v17 = vld [vmem:[#allocation191_spill] sm:$0xff]  ;;  %v2425_v8 = vmul.f32 %v8157_v35, %v11243_v61  ;;  %v11244_v38 = vld [vmem:[#allocation204_spill] sm:$0xff]  ;;  %v8188_v22 = vmul.f32 %v5034_v19, %v1911_v51 }
 0x2af   : > { %v1409_v34 = vmul.f32 0.020408163, %v11238_v30  ;;  %v2424_v12 = vmul.f32 %v8155_v33, %v11242_v17  ;;  %v1410_v30 = vmul.f32 0.020408163, %v11244_v38  ;;  %2741 = vrot.lane.b32.xlu0 %v2423_v50, %s5493_s19  ;;  %v1912_v21 = vld [vmem:[%s7146_s18 + $0x208] sm:$0xff]  ;;  %v1793_v52 = vmax.f32 %v1664_v58, 0.0 }
 0x2b0   : > { %v2049_v44 = vadd.f32 0.001, %v1791_v26  ;;  %v11245_v41 = vld [vmem:[#allocation201_spill] sm:$0xff]  ;;  %v11246_v17 = vld [vmem:[#allocation28_spill] sm:$0xff]  ;;  %v2050_v61 = vadd.f32 0.001, %v1792_v37  ;;  %v8198_v50 = vmul.f32 %v8148_v24, %v8148_v24  ;;  %v1669_v10 = vsub.f32 %v1411_v54, %v7604_v53  ;;  %v8207_v37 = vpop.permute.xlu0 %2621 }
 0x2b1   : > { %v1666_v11 = vsub.f32 %v1408_v59, %v11245_v41  ;;  %v1413_v33 = vmul.f32 0.020408163, %v11246_v17  ;;  %v1913_v43 = vld [vmem:[%s7146_s18 + $0x210] sm:$0xff]  ;;  %v1794_v35 = vmax.f32 %v1665_v63, 0.0  ;;  %v11247_v36 = vld [vmem:[#allocation202_spill] sm:$0xff]  ;;  %v11248_v38 = vld [vmem:[#allocation89_spill] sm:$0xff]  ;;  %v8204_v26 = vpop.permute.xlu1 %2623  ;;  %v8209_v58 = vmul.f32 %v5038_v45, %v1912_v21  ;;  %v5042_v53 = vpop.eup %5041 }
 0x2b2   : > { %v1667_v7 = vsub.f32 %v1409_v34, %v11247_v36  ;;  %v1412_v47 = vmul.f32 0.020408163, %v11248_v38  ;;  %v11249_v51 = vld [vmem:[#allocation113_spill] sm:$0xff]  ;;  %11250 = vst [vmem:[#allocation81_spill] sm:$0xff] %v8204_v26  ;;  %2743 = vrot.lane.b32.xlu1 %v2424_v12, %s5493_s19  ;;  %11251 = vst [vmem:[#allocation17_spill] sm:$0xff] %v8207_v37  ;;  %v11253_v49 = vld [vmem:[#allocation195_spill] sm:$0xff]  ;;  %v8217_v36 = vmul.f32 %v5040_v27, %v1913_v43  ;;  %5053 = vrsqrt.f32 %v2049_v44 }
 0x2b3   : > { %v8201_v19 = vmul.f32 0.020408163, %v11249_v51  ;;  %v11252_v34 = vld [vmem:[#allocation29_spill] sm:$0xff]  ;;  %2745 = vrot.lane.b32.xlu0 %v2425_v8, %s5493_s19  ;;  %v2426_v63 = vmul.f32 %v8186_v62, %v11253_v49  ;;  %v11254_v41 = vld [vmem:[#allocation74_spill] sm:$0xff]  ;;  %v2051_v54 = vadd.f32 0.001, %v1793_v52  ;;  %v1671_v45 = vsub.f32 %v1413_v33, %v7692_v23  ;;  %v5044_v51 = vpop.eup %5043 }
 0x2b4   : > { %v1668_v59 = vsub.f32 %v1410_v30, %v11252_v34  ;;  %v2427_v17 = vmul.f32 %v8188_v22, %v11254_v41  ;;  %v1795_v12 = vmax.f32 %v1666_v11, 0.0  ;;  %v1914_v21 = vld [vmem:[%s7146_s18 + $0x218] sm:$0xff]  ;;  %5055 = vrsqrt.f32 %v2050_v61  ;;  %v11255_v34 = vld [vmem:[#allocation114_spill] sm:$0xff]  ;;  %v8229_v52 = vpop.permute.xlu0 %2629  ;;  %v11258_v23 = vld [vmem:[#allocation199_spill] sm:$0xff] }
 0x2b5   : > { %v2052_v30 = vadd.f32 0.001, %v1794_v35  ;;  %v1796_v38 = vmax.f32 %v1667_v7, 0.0  ;;  %v1670_v8 = vsub.f32 %v1412_v47, %v7579_v18  ;;  %v8223_v49 = vmul.f32 0.020408163, %v11255_v34  ;;  %v8226_v27 = vpop.permute.xlu1 %2625  ;;  %11257 = vst [vmem:[#allocation21_spill] sm:$0xff] %v8229_v52 }
 0x2b6   : > { %v1798_v41 = vmax.f32 %v1669_v10, 0.0  ;;  %v1415_v43 = vmul.f32 0.020408163, %v7581_v25  ;;  %11256 = vst [vmem:[#allocation71_spill] sm:$0xff] %v8226_v27  ;;  %2747 = vrot.lane.b32.xlu1 %v2426_v63, %s5493_s19  ;;  %v2428_v33 = vmul.f32 %v8209_v58, %v11258_v23  ;;  %v1915_v35 = vld [vmem:[%s7146_s18 + $0x220] sm:$0xff]  ;;  %v1797_v7 = vmax.f32 %v1668_v59, 0.0 }
 0x2b7   : > { %v1414_v18 = vmul.f32 0.020408163, %v7584_v15  ;;  %2749 = vrot.lane.b32.xlu0 %v2427_v17, %s5493_s19  ;;  %v11259_v47 = vld [vmem:[#allocation128_spill] sm:$0xff]  ;;  %v8238_v25 = vmul.f32 %v5042_v53, %v1914_v21  ;;  %5057 = vrsqrt.f32 %v2051_v54  ;;  %v2053_v44 = vadd.f32 0.001, %v1795_v12  ;;  %v5046_v10 = vpop.eup %5045  ;;  %v1916_v59 = vld [vmem:[%s7146_s18 + $0x228] sm:$0xff] }
 0x2b8   : > { %v2429_v11 = vmul.f32 %v8217_v36, %v11259_v47  ;;  %v1800_v61 = vmax.f32 %v1671_v45, 0.0  ;;  %5059 = vrsqrt.f32 %v2052_v30  ;;  %v2054_v63 = vadd.f32 0.001, %v1796_v38  ;;  %v5048_v15 = vpop.eup %5047  ;;  %v8252_v21 = vpop.permute.xlu0 %2633  ;;  %v1917_v30 = vld [vmem:[%s7146_s18 + $0x230] sm:$0xff] }
 0x2b9   : > { %v1799_v34 = vmax.f32 %v1670_v8, 0.0  ;;  %v8240_v23 = vmul.f32 %v5044_v51, %v1915_v35  ;;  %v5494_v27 = vmov 0   ;;  %v8245_v17 = vmul.f32 %v8201_v19, %v8201_v19  ;;  %v8249_v45 = vpop.permute.xlu1 %2627  ;;  %11261 = vst [vmem:[#allocation22_spill] sm:$0xff] %v8252_v21  ;;  %v5050_v38 = vpop.eup %5049  ;;  %v11265_v21 = vld [vmem:[#allocation76_spill] sm:$0xff] }
 0x2ba   : > { %4903 = vset.pattern.permute.xlu1 %v5494_v27  ;;  %4904 = vset.pattern.permute.xlu0 %v5494_v27  ;;  %v2056_v53 = vadd.f32 0.001, %v1798_v41  ;;  %v1673_v54 = vsub.f32 %v1415_v43, %v7719_v48  ;;  %v1416_v12 = vmul.f32 0.020408163, %v7613_v13  ;;  %11260 = vst [vmem:[#allocation75_spill] sm:$0xff] %v8249_v45  ;;  %v8257_v8 = vmul.f32 %v8223_v49, %v8223_v49  ;;  %v11262_v27 = vld [vmem:[#allocation33_spill] sm:$0xff]  ;;  %v5052_v13 = vpop.eup %5051 }
 0x2bb   : > { %2751 = vrot.lane.b32.xlu1 %v2428_v33, %s5493_s19  ;;  %v2055_v51 = vadd.f32 0.001, %v1797_v7  ;;  %v1672_v41 = vsub.f32 %v1414_v18, %v7652_v16  ;;  %v1417_v48 = vmul.f32 0.020408163, %v11262_v27  ;;  %2753 = vrot.lane.b32.xlu0 %v2429_v11, %s5493_s19  ;;  %5061 = vrsqrt.f32 %v2053_v44  ;;  %v11263_v33 = vld [vmem:[#allocation23_spill] sm:$0xff]  ;;  %v1918_v16 = vld [vmem:[%s7146_s18 + $0x238] sm:$0xff] }
 0x2bc   : > { %v2058_v43 = vadd.f32 0.001, %v1800_v61  ;;  %v2430_v35 = vmul.f32 %v8238_v25, %v11263_v33  ;;  %v8264_v47 = vmul.f32 %v5046_v10, %v1916_v59  ;;  %5063 = vrsqrt.f32 %v2054_v63  ;;  %v8276_v10 = vpop.permute.xlu0 %2637  ;;  %v1919_v63 = vld [vmem:[%s7146_s18 + $0x240] sm:$0xff]  ;;  %v1920_v27 = vld [vmem:[%s7146_s18 + $0x248] sm:$0xff] }
 0x2bd   : > { %v2057_v45 = vadd.f32 0.001, %v1799_v34  ;;  %v2431_v7 = vmul.f32 %v8240_v23, %v11265_v21  ;;  %v8268_v52 = vmul.f32 %v5048_v15, %v1917_v30  ;;  %5065 = vrsqrt.f32 %v2056_v53  ;;  %v8273_v61 = vpop.permute.xlu1 %2631  ;;  %11268 = vst [vmem:[#allocation110_spill] sm:$0xff] %v8276_v10  ;;  %v11269_v53 = vld [vmem:[#allocation115_spill] sm:$0xff]  ;;  %v11272_v30 = vld [vmem:[#allocation116_spill] sm:$0xff] }
 0x2be   : > { %11264 = vst [vmem:[#allocation70_spill] sm:$0xff] %v8264_v47  ;;  %v1802_v18 = vmax.f32 %v1673_v54, 0.0  ;;  %v1674_v11 = vsub.f32 %v1416_v12, %v7715_v29  ;;  %v1418_v44 = vmul.f32 0.020408163, %v7636_v20  ;;  %11267 = vst [vmem:[#allocation72_spill] sm:$0xff] %v8273_v61  ;;  %5067 = vrsqrt.f32 %v2055_v51  ;;  %v11270_v20 = vld [vmem:[#allocation127_spill] sm:$0xff] }
 0x2bf   : > { %11266 = vst [vmem:[#allocation133_spill] sm:$0xff] %v8268_v52  ;;  %2755 = vrot.lane.b32.xlu1 %v2430_v35, %s5493_s19  ;;  %v1801_v34 = vmax.f32 %v1672_v41, 0.0  ;;  %v1675_v59 = vsub.f32 %v1417_v48, %v7766_v42  ;;  %v1419_v15 = vmul.f32 0.020408163, %v7633_v5  ;;  %2757 = vrot.lane.b32.xlu0 %v2431_v7, %s5493_s19  ;;  %v8283_v29 = vmul.f32 0.020408163, %v11269_v53  ;;  %v5054_v21 = vpop.eup %5053 }
 0x2c0   : > { %5069 = vrsqrt.f32 %v2058_v43  ;;  %v2432_v54 = vmul.f32 %v8264_v47, %v11270_v20  ;;  %v8287_v12 = vmul.f32 %v5052_v13, %v1918_v16  ;;  %v8290_v51 = vmul.f32 0.020408163, %v11272_v30  ;;  %v11273_v42 = vld [vmem:[#allocation129_spill] sm:$0xff]  ;;  %v8302_v16 = vpop.permute.xlu0 %2641 }
 0x2c1   : > { %5071 = vrsqrt.f32 %v2057_v45  ;;  %v2433_v5 = vmul.f32 %v8268_v52, %v11273_v42  ;;  %v8294_v41 = vmul.f32 %v5050_v38, %v1919_v63  ;;  %v5056_v48 = vpop.eup %5055  ;;  %v2060_v33 = vadd.f32 0.001, %v1802_v18  ;;  %v8299_v13 = vpop.permute.xlu1 %2635  ;;  %11276 = vst [vmem:[#allocation180_spill] sm:$0xff] %v8302_v16  ;;  %v1921_v45 = vld [vmem:[%s7146_s18 + $0x250] sm:$0xff]  ;;  %v11282_v42 = vld [vmem:[#allocation25_spill] sm:$0xff]  ;;  %v11307_v52 = vld [vmem:[#allocation86_spill] sm:$0xff] }
 0x2c2   : > { %11271 = vst [vmem:[#allocation24_spill] sm:$0xff] %v8287_v12  ;;  %v1803_v43 = vmax.f32 %v1674_v11, 0.0  ;;  %v1676_v35 = vsub.f32 %v1418_v44, %v7739_v57  ;;  %v1421_v7 = vmul.f32 0.020408163, %v7656_v55  ;;  %11275 = vst [vmem:[#allocation80_spill] sm:$0xff] %v8299_v13  ;;  %v1804_v20 = vmax.f32 %v1675_v59, 0.0 }
 0x2c3   : > { %11274 = vst [vmem:[#allocation131_spill] sm:$0xff] %v8294_v41  ;;  %2759 = vrot.lane.b32.xlu1 %v2432_v54, %s5493_s19  ;;  %v2059_v53 = vadd.f32 0.001, %v1801_v34  ;;  %v1677_v38 = vsub.f32 %v1419_v15, %v7798_v39  ;;  %v11277_v63 = vld [vmem:[#allocation144_spill] sm:$0xff]  ;;  %2761 = vrot.lane.b32.xlu0 %v2433_v5, %s5493_s19  ;;  %v8310_v57 = vmul.f32 %v8283_v29, %v8283_v29  ;;  %v11278_v55 = vld [vmem:[#allocation117_spill] sm:$0xff]  ;;  %v11281_v59 = vld [vmem:[#allocation118_spill] sm:$0xff]  ;;  %5073 = vrsqrt.f32 %v2060_v33 }
 0x2c4   : > { %v1420_v30 = vmul.f32 0.020408163, %v11277_v63  ;;  %v8313_v18 = vmul.f32 0.020408163, %v11278_v55  ;;  %v11279_v11 = vld [vmem:[#allocation77_spill] sm:$0xff]  ;;  %v8317_v54 = vmul.f32 %v5054_v21, %v1920_v27  ;;  %v5058_v34 = vpop.eup %5057  ;;  %v8321_v39 = vmul.f32 %v8290_v51, %v8290_v51  ;;  %v8335_v61 = vpop.permute.xlu0 %2645 }
 0x2c5   : > { %v2434_v44 = vmul.f32 %v8287_v12, %v11279_v11  ;;  %v8324_v15 = vmul.f32 0.020408163, %v11281_v59  ;;  %v2435_v5 = vmul.f32 %v8294_v41, %v11282_v42  ;;  %v8328_v63 = vmul.f32 %v5056_v48, %v1921_v45  ;;  %v1922_v55 = vld [vmem:[%s7146_s18 + $0x258] sm:$0xff]  ;;  %v5060_v13 = vpop.eup %5059  ;;  %v8332_v27 = vpop.permute.xlu1 %2639  ;;  %11285 = vst [vmem:[#allocation182_spill] sm:$0xff] %v8335_v61  ;;  %v1923_v59 = vld [vmem:[%s7146_s18 + $0x260] sm:$0xff]  ;;  %v11299_v12 = vld [vmem:[#allocation39_spill] sm:$0xff] }
 0x2c6   : > { %11280 = vst [vmem:[#allocation20_spill] sm:$0xff] %v8317_v54  ;;  %v2061_v11 = vadd.f32 0.001, %v1803_v43  ;;  %v1805_v16 = vmax.f32 %v1676_v35, 0.0  ;;  %v1679_v21 = vsub.f32 %v1421_v7, %v7852_v32  ;;  %11284 = vst [vmem:[#allocation111_spill] sm:$0xff] %v8332_v27  ;;  %5075 = vrsqrt.f32 %v2059_v53  ;;  %v11286_v43 = vld [vmem:[#allocation79_spill] sm:$0xff] }
 0x2c7   : > { %11283 = vst [vmem:[#allocation73_spill] sm:$0xff] %v8328_v63  ;;  %2763 = vrot.lane.b32.xlu1 %v2434_v44, %s5493_s19  ;;  %v2062_v10 = vadd.f32 0.001, %v1804_v20  ;;  %v1806_v42 = vmax.f32 %v1677_v38, 0.0  ;;  %v1678_v48 = vsub.f32 %v1420_v30, %v7779_v28  ;;  %2765 = vrot.lane.b32.xlu0 %v2435_v5, %s5493_s19  ;;  %v8342_v33 = vmul.f32 %v8313_v18, %v8313_v18  ;;  %v11288_v53 = vld [vmem:[#allocation4_spill] sm:$0xff]  ;;  %v11289_v38 = vld [vmem:[#allocation151_spill] sm:$0xff] }
 0x2c8   : > { %v1422_v32 = vmul.f32 0.020408163, %v7682_v31  ;;  %v2436_v35 = vmul.f32 %v8317_v54, %v11286_v43  ;;  %v8347_v7 = vmul.f32 %v5058_v34, %v1922_v55  ;;  %v5062_v45 = vpop.eup %5061  ;;  %v8350_v20 = vmul.f32 0.020408163, %v11288_v53  ;;  %v11290_v30 = vld [vmem:[#allocation136_spill] sm:$0xff]  ;;  %v1924_v27 = vld [vmem:[%s7146_s18 + $0x268] sm:$0xff]  ;;  %v8364_v53 = vpop.permute.xlu0 %2649 }
 0x2c9   : > { %v1423_v28 = vmul.f32 0.020408163, %v11289_v38  ;;  %v2437_v44 = vmul.f32 %v8328_v63, %v11290_v30  ;;  %v8355_v5 = vmul.f32 %v5060_v13, %v1923_v59  ;;  %v5064_v61 = vpop.eup %5063  ;;  %v11292_v31 = vld [vmem:[#allocation2_spill] sm:$0xff]  ;;  %5077 = vrsqrt.f32 %v2061_v11  ;;  %v8361_v55 = vpop.permute.xlu1 %2643  ;;  %11294 = vst [vmem:[#allocation82_spill] sm:$0xff] %v8364_v53  ;;  %v1925_v38 = vld [vmem:[%s7146_s18 + $0x270] sm:$0xff] }
 0x2ca   : > { %11287 = vst [vmem:[#allocation27_spill] sm:$0xff] %v8347_v7  ;;  %v8359_v37 = vmul.f32 0.020408163, %v11292_v31  ;;  %v2063_v43 = vadd.f32 0.001, %v1805_v16  ;;  %v1808_v34 = vmax.f32 %v1679_v21, 0.0  ;;  %v5066_v26 = vpop.eup %5065  ;;  %5079 = vrsqrt.f32 %v2062_v10 }
 0x2cb   : > { %11291 = vst [vmem:[#allocation200_spill] sm:$0xff] %v8355_v5  ;;  %11293 = vst [vmem:[#allocation188_spill] sm:$0xff] %v8361_v55  ;;  %2767 = vrot.lane.b32.xlu1 %v2436_v35, %s5493_s19  ;;  %v11295_v54 = vld [vmem:[#allocation6_spill] sm:$0xff]  ;;  %v2064_v59 = vadd.f32 0.001, %v1806_v42  ;;  %v1807_v30 = vmax.f32 %v1678_v48, 0.0  ;;  %2769 = vrot.lane.b32.xlu0 %v2437_v44, %s5493_s19  ;;  %v5068_v11 = vpop.eup %5067  ;;  %v1680_v16 = vsub.f32 %v1422_v32, %v7825_v3 }
 0x2cc   : > { %v8368_v13 = vmul.f32 0.020408163, %v11295_v54  ;;  %v11296_v21 = vld [vmem:[#allocation92_spill] sm:$0xff]  ;;  %v11297_v55 = vld [vmem:[#allocation83_spill] sm:$0xff]  ;;  %v8375_v53 = vmul.f32 %v5062_v45, %v1924_v27  ;;  %v1681_v54 = vsub.f32 %v1423_v28, %v7926_v4  ;;  %v1425_v10 = vmul.f32 0.020408163, %v11299_v12  ;;  %v8392_v12 = vpop.permute.xlu0 %2653 }
 0x2cd   : > { %v1424_v31 = vmul.f32 0.020408163, %v11296_v21  ;;  %v2438_v35 = vmul.f32 %v8347_v7, %v11297_v55  ;;  %v5070_v63 = vpop.eup %5069  ;;  %v11300_v42 = vld [vmem:[#allocation138_spill] sm:$0xff]  ;;  %v8381_v44 = vmul.f32 %v5064_v61, %v1925_v38  ;;  %v1926_v3 = vld [vmem:[%s7146_s18 + $0x278] sm:$0xff]  ;;  %v8386_v21 = vmul.f32 %v8324_v15, %v8324_v15  ;;  %v11301_v45 = vld [vmem:[#allocation155_spill] sm:$0xff]  ;;  %v8389_v4 = vpop.permute.xlu1 %2647  ;;  %11303 = vst [vmem:[#allocation194_spill] sm:$0xff] %v8392_v12 }
 0x2ce   : > { %11298 = vst [vmem:[#allocation112_spill] sm:$0xff] %v8375_v53  ;;  %v2439_v48 = vmul.f32 %v8355_v5, %v11300_v42  ;;  %v5072_v32 = vpop.eup %5071  ;;  %5081 = vrsqrt.f32 %v2063_v43  ;;  %v2066_v27 = vadd.f32 0.001, %v1808_v34  ;;  %v1427_v55 = vmul.f32 0.020408163, %v11301_v45  ;;  %11302 = vst [vmem:[#allocation186_spill] sm:$0xff] %v8389_v4 }
 0x2cf   : > { %2771 = vrot.lane.b32.xlu1 %v2438_v35, %s5493_s19  ;;  %v1927_v61 = vld [vmem:[%s7146_s18 + $0x280] sm:$0xff]  ;;  %v8397_v28 = vmul.f32 %v8350_v20, %v8350_v20  ;;  %5083 = vrsqrt.f32 %v2064_v59  ;;  %v2065_v38 = vadd.f32 0.001, %v1807_v30  ;;  %v11304_v42 = vld [vmem:[#allocation41_spill] sm:$0xff]  ;;  %v1928_v43 = vld [vmem:[%s7146_s18 + $0x288] sm:$0xff]  ;;  %v1809_v34 = vmax.f32 %v1680_v16, 0.0 }
 0x2d0   : > { %v1426_v7 = vmul.f32 0.020408163, %v11304_v42  ;;  %2773 = vrot.lane.b32.xlu0 %v2439_v48, %s5493_s19  ;;  %v1682_v45 = vsub.f32 %v1424_v31, %v7903_v14  ;;  %v11305_v4 = vld [vmem:[#allocation84_spill] sm:$0xff]  ;;  %v8405_v5 = vmul.f32 %v5068_v11, %v1926_v3  ;;  %v1810_v41 = vmax.f32 %v1681_v54, 0.0  ;;  %v11309_v48 = vld [vmem:[#allocation3_spill] sm:$0xff]  ;;  %v8420_v11 = vpop.permute.xlu0 %2657  ;;  %v5074_v31 = vpop.eup %5073  ;;  %v1930_v54 = vld [vmem:[%s7146_s18 + $0x298] sm:$0xff] }
 0x2d1   : > { %v2440_v35 = vmul.f32 %v8375_v53, %v11305_v4  ;;  %v1929_v12 = vld [vmem:[%s7146_s18 + $0x290] sm:$0xff]  ;;  %v1683_v47 = vsub.f32 %v1425_v10, %v8000_v2  ;;  %v2441_v59 = vmul.f32 %v8381_v44, %v11307_v52  ;;  %v8411_v30 = vmul.f32 %v5066_v26, %v1927_v61  ;;  %v8417_v16 = vpop.permute.xlu1 %2651  ;;  %11311 = vst [vmem:[#allocation26_spill] sm:$0xff] %v8420_v11 }
 0x2d2   : > { %11306 = vst [vmem:[#allocation88_spill] sm:$0xff] %v8405_v5  ;;  %v8414_v42 = vmul.f32 0.020408163, %v11309_v48  ;;  %5085 = vrsqrt.f32 %v2066_v27  ;;  %v1685_v14 = vsub.f32 %v1427_v55, %v8023_v60  ;;  %11310 = vst [vmem:[#allocation139_spill] sm:$0xff] %v8417_v16  ;;  %v8422_v2 = vmul.f32 %v5072_v32, %v1928_v43  ;;  %v11314_v55 = vld [vmem:[#allocation158_spill] sm:$0xff]  ;;  %v11315_v32 = vld [vmem:[#allocation85_spill] sm:$0xff] }
 0x2d3   : > { %11308 = vst [vmem:[#allocation87_spill] sm:$0xff] %v8411_v30  ;;  %2775 = vrot.lane.b32.xlu1 %v2440_v35, %s5493_s19  ;;  %v8426_v26 = vmul.f32 %v8359_v37, %v8359_v37  ;;  %5087 = vrsqrt.f32 %v2065_v38  ;;  %v1684_v52 = vsub.f32 %v1426_v7, %v7964_v56  ;;  %v8430_v60 = vmul.f32 %v5070_v63, %v1929_v12  ;;  %v5076_v10 = vpop.eup %5075  ;;  %v1931_v43 = vld [vmem:[%s7146_s18 + $0x2a0] sm:$0xff]  ;;  %v11316_v16 = vld [vmem:[#allocation43_spill] sm:$0xff]  ;;  %v11317_v56 = vld [vmem:[#allocation141_spill] sm:$0xff] }
 0x2d4   : > { %11312 = vst [vmem:[#allocation203_spill] sm:$0xff] %v8422_v2  ;;  %2777 = vrot.lane.b32.xlu0 %v2441_v59, %s5493_s19  ;;  %v2067_v3 = vadd.f32 0.001, %v1809_v34  ;;  %v1811_v27 = vmax.f32 %v1682_v45, 0.0  ;;  %v1428_v4 = vmul.f32 0.020408163, %v11314_v55  ;;  %v2442_v61 = vmul.f32 %v8405_v5, %v11315_v32 }
 0x2d5   : > { %11313 = vst [vmem:[#allocation191_spill] sm:$0xff] %v8430_v60  ;;  %v2068_v35 = vadd.f32 0.001, %v1810_v41  ;;  %v1812_v48 = vmax.f32 %v1683_v47, 0.0  ;;  %v1429_v38 = vmul.f32 0.020408163, %v11316_v16  ;;  %v2443_v7 = vmul.f32 %v8411_v30, %v11317_v56  ;;  %v8448_v45 = vpop.permute.xlu1 %2655  ;;  %v8451_v47 = vpop.permute.xlu0 %2661 }
 0x2d6   : > { %v8442_v63 = vmul.f32 %v8368_v13, %v8368_v13  ;;  %v8446_v12 = vmul.f32 %v8414_v42, %v8414_v42  ;;  %v1814_v34 = vmax.f32 %v1685_v14, 0.0  ;;  %11318 = vst [vmem:[#allocation196_spill] sm:$0xff] %v8448_v45  ;;  %11319 = vst [vmem:[#allocation204_spill] sm:$0xff] %v8451_v47  ;;  %v11320_v41 = vld [vmem:[#allocation142_spill] sm:$0xff]  ;;  %v5078_v16 = vpop.eup %5077  ;;  %v1813_v55 = vmax.f32 %v1684_v52, 0.0  ;;  %v1932_v45 = vld [vmem:[%s7146_s18 + $0x2a8] sm:$0xff] }
 0x2d7   : > { %2779 = vrot.lane.b32.xlu1 %v2442_v61, %s5493_s19  ;;  %v2444_v59 = vmul.f32 %v8422_v2, %v11320_v41  ;;  %v11321_v32 = vld [vmem:[#allocation170_spill] sm:$0xff]  ;;  %v8458_v11 = vmul.f32 %v5076_v10, %v1930_v54  ;;  %v8460_v14 = vmul.f32 %v5074_v31, %v1931_v43  ;;  %v5080_v5 = vpop.eup %5079  ;;  %5089 = vrsqrt.f32 %v2067_v3  ;;  %v1933_v41 = vld [vmem:[%s7146_s18 + $0x2b0] sm:$0xff]  ;;  %v11326_v31 = vld [vmem:[#allocation5_spill] sm:$0xff] }
 0x2d8   : > { %2781 = vrot.lane.b32.xlu0 %v2443_v7, %s5493_s19  ;;  %v2445_v56 = vmul.f32 %v8430_v60, %v11321_v32  ;;  %v2069_v61 = vadd.f32 0.001, %v1811_v27  ;;  %v1686_v47 = vsub.f32 %v1428_v4, %v8019_v0  ;;  %v1430_v30 = vmul.f32 0.020408163, %v7806_v1  ;;  %v11324_v2 = vld [vmem:[#allocation42_spill] sm:$0xff]  ;;  %v11325_v54 = vld [vmem:[#allocation8_spill] sm:$0xff] }
 0x2d9   : > { %11322 = vst [vmem:[#allocation201_spill] sm:$0xff] %v8458_v11  ;;  %11323 = vst [vmem:[#allocation28_spill] sm:$0xff] %v8460_v14  ;;  %5091 = vrsqrt.f32 %v2068_v35  ;;  %v2070_v52 = vadd.f32 0.001, %v1812_v48  ;;  %v1687_v7 = vsub.f32 %v1429_v38, %v8080_v6  ;;  %v1431_v32 = vmul.f32 0.020408163, %v11324_v2  ;;  %v8474_v27 = vpop.permute.xlu1 %2659  ;;  %v8477_v1 = vpop.permute.xlu0 %2665 }
 0x2da   : > { %v8469_v10 = vmul.f32 0.020408163, %v11325_v54  ;;  %v8472_v43 = vmul.f32 0.020408163, %v11326_v31  ;;  %v2072_v3 = vadd.f32 0.001, %v1814_v34  ;;  %v8479_v0 = vmul.f32 %v5078_v16, %v1932_v45 }
 0x2db   : > { %11327 = vst [vmem:[#allocation202_spill] sm:$0xff] %v8474_v27  ;;  %2783 = vrot.lane.b32.xlu1 %v2444_v59, %s5493_s19  ;;  %11328 = vst [vmem:[#allocation89_spill] sm:$0xff] %v8477_v1  ;;  %v5082_v4 = vpop.eup %5081  ;;  %v2071_v6 = vadd.f32 0.001, %v1813_v55  ;;  %v11330_v2 = vld [vmem:[#allocation148_spill] sm:$0xff]  ;;  %v8486_v34 = vmul.f32 %v5080_v5, %v1933_v41  ;;  %v1934_v54 = vld [vmem:[%s7146_s18 + $0x2b8] sm:$0xff]  ;;  %5093 = vrsqrt.f32 %v2069_v61  ;;  %v1688_v27 = vsub.f32 %v1430_v30, %v8066_v46 }
 0x2dc   : > { %11329 = vst [vmem:[#allocation113_spill] sm:$0xff] %v8479_v0  ;;  %2785 = vrot.lane.b32.xlu0 %v2445_v56, %s5493_s19  ;;  %v2446_v35 = vmul.f32 %v8458_v11, %v11330_v2  ;;  %v11331_v48 = vld [vmem:[#allocation152_spill] sm:$0xff]  ;;  %v5084_v31 = vpop.eup %5083  ;;  %v1815_v59 = vmax.f32 %v1686_v47, 0.0  ;;  %v1935_v1 = vld [vmem:[%s7146_s18 + $0x2c0] sm:$0xff]  ;;  %5095 = vrsqrt.f32 %v2070_v52  ;;  %v1816_v55 = vmax.f32 %v1687_v7, 0.0 }
 0x2dd   : > { %v2447_v38 = vmul.f32 %v8460_v14, %v11331_v48  ;;  %11332 = vst [vmem:[#allocation29_spill] sm:$0xff] %v8486_v34  ;;  %v11333_v45 = vld [vmem:[#allocation160_spill] sm:$0xff]  ;;  %v1689_v56 = vsub.f32 %v1431_v32, %v8122_v40  ;;  %5097 = vrsqrt.f32 %v2072_v3  ;;  %v11335_v48 = vld [vmem:[#allocation162_spill] sm:$0xff]  ;;  %v8495_v41 = vpop.permute.xlu1 %2663  ;;  %v8498_v47 = vpop.permute.xlu0 %2669  ;;  %v8502_v61 = vmul.f32 %v5082_v4, %v1934_v54  ;;  %v11340_v40 = vld [vmem:[#allocation163_spill] sm:$0xff] }
 0x2de   : > { %v1432_v16 = vmul.f32 0.020408163, %v11333_v45  ;;  %v11334_v2 = vld [vmem:[#allocation44_spill] sm:$0xff]  ;;  %v1435_v5 = vmul.f32 0.020408163, %v11335_v48  ;;  %11336 = vst [vmem:[#allocation195_spill] sm:$0xff] %v8495_v41  ;;  %5099 = vrsqrt.f32 %v2071_v6  ;;  %v8508_v45 = vmul.f32 %v5084_v31, %v1935_v1 }
 0x2df   : > { %v1433_v11 = vmul.f32 0.020408163, %v11334_v2  ;;  %2787 = vrot.lane.b32.xlu1 %v2446_v35, %s5493_s19  ;;  %11337 = vst [vmem:[#allocation74_spill] sm:$0xff] %v8498_v47  ;;  %v11338_v46 = vld [vmem:[#allocation150_spill] sm:$0xff]  ;;  %11339 = vst [vmem:[#allocation114_spill] sm:$0xff] %v8502_v61  ;;  %v5086_v52 = vpop.eup %5085  ;;  %v11341_v32 = vld [vmem:[#allocation173_spill] sm:$0xff] }
 0x2e0   : > { %v2448_v30 = vmul.f32 %v8479_v0, %v11338_v46  ;;  %v1434_v7 = vmul.f32 0.020408163, %v11340_v40  ;;  %2789 = vrot.lane.b32.xlu0 %v2447_v38, %s5493_s19  ;;  %v2449_v3 = vmul.f32 %v8486_v34, %v11341_v32  ;;  %11342 = vst [vmem:[#allocation199_spill] sm:$0xff] %v8508_v45  ;;  %v1936_v35 = vld [vmem:[%s7146_s18 + $0x2c8] sm:$0xff]  ;;  %v5088_v2 = vpop.eup %5087  ;;  %v2073_v48 = vadd.f32 0.001, %v1815_v59 }
 0x2e1   : > { %v1817_v41 = vmax.f32 %v1688_v27, 0.0  ;;  %v1690_v47 = vsub.f32 %v1432_v16, %v8106_v9  ;;  %v11343_v46 = vld [vmem:[#allocation48_spill] sm:$0xff]  ;;  %v2074_v0 = vadd.f32 0.001, %v1816_v55  ;;  %v1818_v6 = vmax.f32 %v1689_v56, 0.0  ;;  %v11345_v1 = vld [vmem:[#allocation10_spill] sm:$0xff]  ;;  %v8524_v59 = vpop.permute.xlu1 %2667  ;;  %v8527_v9 = vpop.permute.xlu0 %2673 }
 0x2e2   : > { %v1437_v4 = vmul.f32 0.020408163, %v11343_v46  ;;  %v1937_v54 = vld [vmem:[%s7146_s18 + $0x2d0] sm:$0xff]  ;;  %v1691_v40 = vsub.f32 %v1433_v11, %v8198_v50  ;;  %v8518_v32 = vmul.f32 %v8469_v10, %v8469_v10  ;;  %v8521_v31 = vmul.f32 0.020408163, %v11345_v1  ;;  %11346 = vst [vmem:[#allocation128_spill] sm:$0xff] %v8524_v59 }
 0x2e3   : > { %v11344_v14 = vld [vmem:[#allocation164_spill] sm:$0xff]  ;;  %v1693_v27 = vsub.f32 %v1435_v5, %v8257_v8  ;;  %2791 = vrot.lane.b32.xlu1 %v2448_v30, %s5493_s19  ;;  %11347 = vst [vmem:[#allocation33_spill] sm:$0xff] %v8527_v9  ;;  %v11348_v16 = vld [vmem:[#allocation91_spill] sm:$0xff]  ;;  %v11349_v11 = vld [vmem:[#allocation109_spill] sm:$0xff]  ;;  %v8535_v46 = vmul.f32 %v5088_v2, %v1936_v35  ;;  %v8537_v8 = vmul.f32 %v5086_v52, %v1937_v54  ;;  %5101 = vrsqrt.f32 %v2073_v48 }
 0x2e4   : > { %v1436_v38 = vmul.f32 0.020408163, %v11344_v14  ;;  %v2450_v50 = vmul.f32 %v8502_v61, %v11348_v16  ;;  %v1692_v14 = vsub.f32 %v1434_v7, %v11349_v11  ;;  %2793 = vrot.lane.b32.xlu0 %v2449_v3, %s5493_s19  ;;  %v11350_v55 = vld [vmem:[#allocation40_spill] sm:$0xff]  ;;  %v2075_v5 = vadd.f32 0.001, %v1817_v41  ;;  %v5090_v59 = vpop.eup %5089  ;;  %v1938_v3 = vld [vmem:[%s7146_s18 + $0x2d8] sm:$0xff] }
 0x2e5   : > { %v2451_v56 = vmul.f32 %v8508_v45, %v11350_v55  ;;  %11351 = vst [vmem:[#allocation23_spill] sm:$0xff] %v8535_v46  ;;  %11352 = vst [vmem:[#allocation76_spill] sm:$0xff] %v8537_v8  ;;  %v1819_v30 = vmax.f32 %v1690_v47, 0.0  ;;  %v1695_v1 = vsub.f32 %v1437_v4, %v8321_v39  ;;  %5103 = vrsqrt.f32 %v2074_v0  ;;  %v11353_v52 = vld [vmem:[#allocation7_spill] sm:$0xff]  ;;  %v8550_v54 = vpop.permute.xlu1 %2671  ;;  %v8553_v39 = vpop.permute.xlu0 %2677  ;;  %v11357_v4 = vld [vmem:[#allocation50_spill] sm:$0xff] }
 0x2e6   : > { %v2076_v16 = vadd.f32 0.001, %v1818_v6  ;;  %v1820_v9 = vmax.f32 %v1691_v40, 0.0  ;;  %v1694_v7 = vsub.f32 %v1436_v38, %v8245_v17  ;;  %v5092_v11 = vpop.eup %5091  ;;  %v8544_v35 = vmul.f32 %v8472_v43, %v8472_v43  ;;  %v11354_v47 = vld [vmem:[#allocation167_spill] sm:$0xff]  ;;  %11355 = vst [vmem:[#allocation115_spill] sm:$0xff] %v8550_v54  ;;  %11356 = vst [vmem:[#allocation127_spill] sm:$0xff] %v8553_v39 }
 0x2e7   : > { %v8547_v2 = vmul.f32 0.020408163, %v11353_v52  ;;  %v1822_v41 = vmax.f32 %v1693_v27, 0.0  ;;  %v1439_v48 = vmul.f32 0.020408163, %v11354_v47  ;;  %2795 = vrot.lane.b32.xlu1 %v2450_v50, %s5493_s19  ;;  %v1939_v17 = vld [vmem:[%s7146_s18 + $0x2e0] sm:$0xff]  ;;  %5105 = vrsqrt.f32 %v2075_v5 }
 0x2e8   : > { %v1821_v0 = vmax.f32 %v1692_v14, 0.0  ;;  %v1438_v6 = vmul.f32 0.020408163, %v11357_v4  ;;  %2797 = vrot.lane.b32.xlu0 %v2451_v56, %s5493_s19  ;;  %v11358_v40 = vld [vmem:[#allocation156_spill] sm:$0xff]  ;;  %v11359_v55 = vld [vmem:[#allocation161_spill] sm:$0xff]  ;;  %v1824_v47 = vmax.f32 %v1695_v1, 0.0  ;;  %v8562_v50 = vmul.f32 %v5090_v59, %v1938_v3  ;;  %v5094_v54 = vpop.eup %5093 }
 0x2e9   : > { %v2452_v38 = vmul.f32 %v8535_v46, %v11358_v40  ;;  %v2453_v27 = vmul.f32 %v8537_v8, %v11359_v55  ;;  %v2077_v52 = vadd.f32 0.001, %v1819_v30  ;;  %5107 = vrsqrt.f32 %v2076_v16  ;;  %v1940_v4 = vld [vmem:[%s7146_s18 + $0x2e8] sm:$0xff]  ;;  %v5096_v56 = vpop.eup %5095  ;;  %v8573_v55 = vpop.permute.xlu1 %2675  ;;  %v11368_v8 = vld [vmem:[#allocation165_spill] sm:$0xff]  ;;  %v11405_v34 = vld [vmem:[#allocation178_spill] sm:$0xff] }
 0x2ea   : > { %11360 = vst [vmem:[#allocation116_spill] sm:$0xff] %v8562_v50  ;;  %v2078_v39 = vadd.f32 0.001, %v1820_v9  ;;  %v1823_v14 = vmax.f32 %v1694_v7, 0.0  ;;  %v8564_v61 = vmul.f32 %v5092_v11, %v1939_v17  ;;  %v8569_v40 = vmul.f32 %v8521_v31, %v8521_v31  ;;  %v11362_v30 = vld [vmem:[#allocation55_spill] sm:$0xff]  ;;  %11363 = vst [vmem:[#allocation144_spill] sm:$0xff] %v8573_v55  ;;  %v8576_v59 = vpop.permute.xlu0 %2681  ;;  %v5098_v16 = vpop.eup %5097 }
 0x2eb   : > { %v2080_v46 = vadd.f32 0.001, %v1822_v41  ;;  %v1697_v5 = vsub.f32 %v1439_v48, %v8386_v21  ;;  %v1440_v1 = vmul.f32 0.020408163, %v11362_v30  ;;  %2799 = vrot.lane.b32.xlu1 %v2452_v38, %s5493_s19  ;;  %11364 = vst [vmem:[#allocation117_spill] sm:$0xff] %v8576_v59  ;;  %v1941_v9 = vld [vmem:[%s7146_s18 + $0x2f0] sm:$0xff]  ;;  %v8581_v7 = vmul.f32 %v8547_v2, %v8547_v2  ;;  %v5100_v48 = vpop.eup %5099 }
 0x2ec   : > { %11361 = vst [vmem:[#allocation129_spill] sm:$0xff] %v8564_v61  ;;  %v2079_v3 = vadd.f32 0.001, %v1821_v0  ;;  %v1696_v11 = vsub.f32 %v1438_v6, %v8310_v57  ;;  %v11365_v41 = vld [vmem:[#allocation52_spill] sm:$0xff]  ;;  %2801 = vrot.lane.b32.xlu0 %v2453_v27, %s5493_s19  ;;  %5109 = vrsqrt.f32 %v2077_v52  ;;  %v2082_v17 = vadd.f32 0.001, %v1824_v47 }
 0x2ed   : > { %v1441_v21 = vmul.f32 0.020408163, %v11365_v41  ;;  %v11366_v38 = vld [vmem:[#allocation95_spill] sm:$0xff]  ;;  %v8588_v55 = vmul.f32 %v5094_v54, %v1940_v4  ;;  %5111 = vrsqrt.f32 %v2078_v39  ;;  %v2081_v59 = vadd.f32 0.001, %v1823_v14  ;;  %v1942_v57 = vld [vmem:[%s7146_s18 + $0x2f8] sm:$0xff]  ;;  %v8597_v47 = vpop.permute.xlu1 %2679 }
 0x2ee   : > { %v2454_v30 = vmul.f32 %v8562_v50, %v11366_v38  ;;  %v2455_v0 = vmul.f32 %v8564_v61, %v11368_v8  ;;  %v8592_v45 = vmul.f32 %v5096_v56, %v1941_v9  ;;  %5113 = vrsqrt.f32 %v2080_v46  ;;  %v11370_v52 = vld [vmem:[#allocation54_spill] sm:$0xff]  ;;  %11371 = vst [vmem:[#allocation25_spill] sm:$0xff] %v8597_v47  ;;  %v8600_v54 = vpop.permute.xlu0 %2685  ;;  %v11373_v4 = vld [vmem:[#allocation57_spill] sm:$0xff]  ;;  %v11374_v46 = vld [vmem:[#allocation12_spill] sm:$0xff] }
 0x2ef   : > { %11367 = vst [vmem:[#allocation77_spill] sm:$0xff] %v8588_v55  ;;  %v1826_v6 = vmax.f32 %v1697_v5, 0.0  ;;  %v1698_v27 = vsub.f32 %v1440_v1, %v8342_v33  ;;  %v1443_v41 = vmul.f32 0.020408163, %v11370_v52  ;;  %11372 = vst [vmem:[#allocation79_spill] sm:$0xff] %v8600_v54  ;;  %v1943_v39 = vld [vmem:[%s7146_s18 + $0x300] sm:$0xff]  ;;  %5115 = vrsqrt.f32 %v2079_v3 }
 0x2f0   : > { %11369 = vst [vmem:[#allocation118_spill] sm:$0xff] %v8592_v45  ;;  %2803 = vrot.lane.b32.xlu1 %v2454_v30, %s5493_s19  ;;  %v1825_v14 = vmax.f32 %v1696_v11, 0.0  ;;  %v1699_v8 = vsub.f32 %v1441_v21, %v8426_v26  ;;  %v1442_v56 = vmul.f32 0.020408163, %v11373_v4  ;;  %2805 = vrot.lane.b32.xlu0 %v2455_v0, %s5493_s19  ;;  %v8607_v33 = vmul.f32 0.020408163, %v11374_v46  ;;  %v5102_v38 = vpop.eup %5101 }
 0x2f1   : > { %5117 = vrsqrt.f32 %v2082_v17  ;;  %v11375_v5 = vld [vmem:[#allocation98_spill] sm:$0xff]  ;;  %v8611_v9 = vmul.f32 %v5100_v48, %v1942_v57  ;;  %v11377_v30 = vld [vmem:[#allocation9_spill] sm:$0xff]  ;;  %v11378_v26 = vld [vmem:[#allocation168_spill] sm:$0xff]  ;;  %v8618_v21 = vmul.f32 %v5098_v16, %v1943_v39  ;;  %v2084_v4 = vadd.f32 0.001, %v1826_v6  ;;  %v8623_v48 = vpop.permute.xlu1 %2683 }
 0x2f2   : > { %v2456_v1 = vmul.f32 %v8588_v55, %v11375_v5  ;;  %v8614_v3 = vmul.f32 0.020408163, %v11377_v30  ;;  %5119 = vrsqrt.f32 %v2081_v59  ;;  %v2457_v11 = vmul.f32 %v8592_v45, %v11378_v26  ;;  %v1944_v0 = vld [vmem:[%s7146_s18 + $0x308] sm:$0xff]  ;;  %v5104_v52 = vpop.eup %5103  ;;  %v11380_v5 = vld [vmem:[#allocation172_spill] sm:$0xff]  ;;  %11381 = vst [vmem:[#allocation136_spill] sm:$0xff] %v8623_v48  ;;  %v8626_v57 = vpop.permute.xlu0 %2689  ;;  %v11384_v6 = vld [vmem:[#allocation13_spill] sm:$0xff] }
 0x2f3   : > { %11376 = vst [vmem:[#allocation4_spill] sm:$0xff] %v8611_v9  ;;  %11379 = vst [vmem:[#allocation151_spill] sm:$0xff] %v8618_v21  ;;  %v1827_v17 = vmax.f32 %v1698_v27, 0.0  ;;  %v1701_v46 = vsub.f32 %v1443_v41, %v8446_v12  ;;  %v1445_v47 = vmul.f32 0.020408163, %v11380_v5  ;;  %v1945_v59 = vld [vmem:[%s7146_s18 + $0x310] sm:$0xff]  ;;  %v1700_v16 = vsub.f32 %v1442_v56, %v8397_v28 }
 0x2f4   : > { %2807 = vrot.lane.b32.xlu1 %v2456_v1, %s5493_s19  ;;  %11382 = vst [vmem:[#allocation2_spill] sm:$0xff] %v8626_v57  ;;  %v2083_v30 = vadd.f32 0.001, %v1825_v14  ;;  %v1828_v26 = vmax.f32 %v1699_v8, 0.0  ;;  %v11383_v39 = vld [vmem:[#allocation175_spill] sm:$0xff]  ;;  %2809 = vrot.lane.b32.xlu0 %v2457_v11, %s5493_s19  ;;  %v8634_v12 = vmul.f32 %v8607_v33, %v8607_v33  ;;  %v11385_v41 = vld [vmem:[#allocation100_spill] sm:$0xff]  ;;  %v8641_v5 = vmul.f32 %v5102_v38, %v1944_v0  ;;  %v5106_v14 = vpop.eup %5105 }
 0x2f5   : > { %v1444_v54 = vmul.f32 0.020408163, %v11383_v39  ;;  %v8637_v27 = vmul.f32 0.020408163, %v11384_v6  ;;  %v2458_v1 = vmul.f32 %v8611_v9, %v11385_v41  ;;  %v8645_v28 = vmul.f32 %v8614_v3, %v8614_v3  ;;  %v11387_v8 = vld [vmem:[#allocation11_spill] sm:$0xff]  ;;  %v11388_v11 = vld [vmem:[#allocation102_spill] sm:$0xff]  ;;  %v8656_v0 = vpop.permute.xlu1 %2687 }
 0x2f6   : > { %11386 = vst [vmem:[#allocation6_spill] sm:$0xff] %v8641_v5  ;;  %v8648_v56 = vmul.f32 0.020408163, %v11387_v8  ;;  %v2459_v39 = vmul.f32 %v8618_v21, %v11388_v11  ;;  %v8652_v48 = vmul.f32 %v5104_v52, %v1945_v59  ;;  %v1946_v6 = vld [vmem:[%s7146_s18 + $0x318] sm:$0xff]  ;;  %v5108_v57 = vpop.eup %5107  ;;  %5121 = vrsqrt.f32 %v2084_v4  ;;  %11390 = vst [vmem:[#allocation83_spill] sm:$0xff] %v8656_v0  ;;  %v8659_v55 = vpop.permute.xlu0 %2693  ;;  %v1947_v8 = vld [vmem:[%s7146_s18 + $0x320] sm:$0xff] }
 0x2f7   : > { %v2085_v41 = vadd.f32 0.001, %v1827_v17  ;;  %v1830_v9 = vmax.f32 %v1701_v46, 0.0  ;;  %v1703_v38 = vsub.f32 %v1445_v47, %v8544_v35  ;;  %11391 = vst [vmem:[#allocation39_spill] sm:$0xff] %v8659_v55  ;;  %5123 = vrsqrt.f32 %v2083_v30  ;;  %v11392_v35 = vld [vmem:[#allocation176_spill] sm:$0xff]  ;;  %v11393_v17 = vld [vmem:[#allocation101_spill] sm:$0xff] }
 0x2f8   : > { %11389 = vst [vmem:[#allocation92_spill] sm:$0xff] %v8652_v48  ;;  %2811 = vrot.lane.b32.xlu1 %v2458_v1, %s5493_s19  ;;  %v2086_v45 = vadd.f32 0.001, %v1828_v26  ;;  %v1829_v11 = vmax.f32 %v1700_v16, 0.0  ;;  %v1702_v52 = vsub.f32 %v1444_v54, %v8442_v63  ;;  %2813 = vrot.lane.b32.xlu0 %v2459_v39, %s5493_s19  ;;  %v8666_v4 = vmul.f32 %v8637_v27, %v8637_v27  ;;  %v11395_v30 = vld [vmem:[#allocation14_spill] sm:$0xff]  ;;  %v11397_v54 = vld [vmem:[#allocation179_spill] sm:$0xff] }
 0x2f9   : > { %v1446_v47 = vmul.f32 0.020408163, %v11392_v35  ;;  %v2460_v46 = vmul.f32 %v8641_v5, %v11393_v17  ;;  %v8671_v59 = vmul.f32 %v5106_v14, %v1946_v6  ;;  %v5110_v1 = vpop.eup %5109  ;;  %v8674_v26 = vmul.f32 0.020408163, %v11395_v30  ;;  %v11396_v16 = vld [vmem:[#allocation174_spill] sm:$0xff]  ;;  %v1948_v55 = vld [vmem:[%s7146_s18 + $0x328] sm:$0xff]  ;;  %v8685_v6 = vpop.permute.xlu1 %2691 }
 0x2fa   : > { %v1447_v63 = vmul.f32 0.020408163, %v11396_v16  ;;  %v2461_v39 = vmul.f32 %v8652_v48, %v11397_v54  ;;  %v8679_v0 = vmul.f32 %v5108_v57, %v1947_v8  ;;  %v5112_v21 = vpop.eup %5111  ;;  %v11399_v35 = vld [vmem:[#allocation119_spill] sm:$0xff]  ;;  %5125 = vrsqrt.f32 %v2085_v41  ;;  %11400 = vst [vmem:[#allocation41_spill] sm:$0xff] %v8685_v6  ;;  %v8688_v30 = vpop.permute.xlu0 %2697  ;;  %v1949_v16 = vld [vmem:[%s7146_s18 + $0x330] sm:$0xff]  ;;  %v11404_v6 = vld [vmem:[#allocation177_spill] sm:$0xff] }
 0x2fb   : > { %11394 = vst [vmem:[#allocation138_spill] sm:$0xff] %v8671_v59  ;;  %v8683_v50 = vmul.f32 0.020408163, %v11399_v35  ;;  %v2088_v17 = vadd.f32 0.001, %v1830_v9  ;;  %v1832_v14 = vmax.f32 %v1703_v38, 0.0  ;;  %v5114_v5 = vpop.eup %5113  ;;  %5127 = vrsqrt.f32 %v2086_v45 }
 0x2fc   : > { %11398 = vst [vmem:[#allocation155_spill] sm:$0xff] %v8679_v0  ;;  %2815 = vrot.lane.b32.xlu1 %v2460_v46, %s5493_s19  ;;  %11401 = vst [vmem:[#allocation84_spill] sm:$0xff] %v8688_v30  ;;  %v11402_v61 = vld [vmem:[#allocation15_spill] sm:$0xff]  ;;  %v2087_v8 = vadd.f32 0.001, %v1829_v11  ;;  %v1831_v54 = vmax.f32 %v1702_v52, 0.0  ;;  %2817 = vrot.lane.b32.xlu0 %v2461_v39, %s5493_s19  ;;  %v5116_v41 = vpop.eup %5115  ;;  %v1704_v9 = vsub.f32 %v1446_v47, %v8518_v32 }
 0x2fd   : > { %v8692_v57 = vmul.f32 0.020408163, %v11402_v61  ;;  %v11403_v38 = vld [vmem:[#allocation103_spill] sm:$0xff]  ;;  %v2462_v46 = vmul.f32 %v8671_v59, %v11404_v6  ;;  %v8699_v30 = vmul.f32 %v5110_v1, %v1948_v55  ;;  %v1705_v61 = vsub.f32 %v1447_v63, %v8581_v7  ;;  %v11406_v11 = vld [vmem:[#allocation190_spill] sm:$0xff]  ;;  %v1950_v32 = vld [vmem:[%s7146_s18 + $0x338] sm:$0xff]  ;;  %v8711_v59 = vpop.permute.xlu1 %2695 }
 0x2fe   : > { %v1448_v35 = vmul.f32 0.020408163, %v11403_v38  ;;  %v5118_v48 = vpop.eup %5117  ;;  %v1449_v45 = vmul.f32 0.020408163, %v11405_v34  ;;  %v2463_v52 = vmul.f32 %v8679_v0, %v11406_v11  ;;  %v8705_v39 = vmul.f32 %v5112_v21, %v1949_v16  ;;  %v11407_v55 = vld [vmem:[#allocation183_spill] sm:$0xff]  ;;  %11408 = vst [vmem:[#allocation86_spill] sm:$0xff] %v8711_v59  ;;  %v8714_v34 = vpop.permute.xlu0 %2701 }
 0x2ff   : > { %v5120_v47 = vpop.eup %5119  ;;  %v1580_v38 = vmul.f32 %v8648_v56, %v8648_v56  ;;  %5129 = vrsqrt.f32 %v2088_v17  ;;  %v2090_v6 = vadd.f32 0.001, %v1832_v14  ;;  %v1451_v1 = vmul.f32 0.020408163, %v11407_v55  ;;  %11409 = vst [vmem:[#allocation3_spill] sm:$0xff] %v8714_v34  ;;  %v1951_v7 = vld [vmem:[%s7146_s18 + $0x340] sm:$0xff] }
 0x300   : > { %2819 = vrot.lane.b32.xlu1 %v2462_v46, %s5493_s19  ;;  %v8719_v21 = vmul.f32 %v8674_v26, %v8674_v26  ;;  %5131 = vrsqrt.f32 %v2087_v8  ;;  %v2089_v63 = vadd.f32 0.001, %v1831_v54  ;;  %v11410_v16 = vld [vmem:[#allocation184_spill] sm:$0xff]  ;;  %2821 = vrot.lane.b32.xlu0 %v2463_v52, %s5493_s19  ;;  %v1952_v17 = vld [vmem:[%s7146_s18 + $0x348] sm:$0xff]  ;;  %v1833_v14 = vmax.f32 %v1704_v9, 0.0 }
 0x301   : > { %v1450_v11 = vmul.f32 0.020408163, %v11410_v16  ;;  %v1706_v55 = vsub.f32 %v1448_v35, %v8569_v40  ;;  %v11411_v59 = vld [vmem:[#allocation60_spill] sm:$0xff]  ;;  %v8727_v0 = vmul.f32 %v5116_v41, %v1950_v32  ;;  %v1834_v60 = vmax.f32 %v1705_v61, 0.0  ;;  %v8738_v9 = vpop.permute.xlu1 %2699  ;;  %v1954_v61 = vld [vmem:[%s7146_s18 + $0x358] sm:$0xff] }
 0x302   : > { %v2464_v46 = vmul.f32 %v8699_v30, %v11411_v59  ;;  %v1953_v34 = vld [vmem:[%s7146_s18 + $0x350] sm:$0xff]  ;;  %v1707_v53 = vsub.f32 %v1449_v45, %v8645_v28  ;;  %v2465_v8 = vmul.f32 %v8705_v39, %v8148_v24  ;;  %v8733_v54 = vmul.f32 %v5114_v5, %v1951_v7  ;;  %11415 = vst [vmem:[#allocation43_spill] sm:$0xff] %v8738_v9  ;;  %v8741_v59 = vpop.permute.xlu0 %2705  ;;  %v11420_v9 = vld [vmem:[#allocation105_spill] sm:$0xff] }
 0x303   : > { %11412 = vst [vmem:[#allocation158_spill] sm:$0xff] %v8727_v0  ;;  %v11414_v52 = vld [vmem:[#allocation120_spill] sm:$0xff]  ;;  %5133 = vrsqrt.f32 %v2090_v6  ;;  %v1709_v40 = vsub.f32 %v1451_v1, %v1580_v38  ;;  %11416 = vst [vmem:[#allocation141_spill] sm:$0xff] %v8741_v59  ;;  %v8743_v41 = vmul.f32 %v5120_v47, %v1952_v17  ;;  %v5122_v28 = vpop.eup %5121  ;;  %v1582_v24 = vmul.f32 %v8683_v50, %v8683_v50  ;;  %v11418_v6 = vld [vmem:[#allocation125_spill] sm:$0xff] }
 0x304   : > { %11413 = vst [vmem:[#allocation85_spill] sm:$0xff] %v8733_v54  ;;  %v8736_v16 = vmul.f32 0.020408163, %v11414_v52  ;;  %2823 = vrot.lane.b32.xlu1 %v2464_v46, %s5493_s19  ;;  %5135 = vrsqrt.f32 %v2089_v63  ;;  %v1708_v5 = vsub.f32 %v1450_v11, %v8634_v12  ;;  %2825 = vrot.lane.b32.xlu0 %v2465_v8, %s5493_s19  ;;  %v8749_v35 = vmul.f32 %v5118_v48, %v1953_v34  ;;  %v5124_v45 = vpop.eup %5123  ;;  %v11419_v7 = vld [vmem:[#allocation64_spill] sm:$0xff]  ;;  %v1955_v17 = vld [vmem:[%s7146_s18 + $0x360] sm:$0xff] }
 0x305   : > { %11417 = vst [vmem:[#allocation142_spill] sm:$0xff] %v8743_v41  ;;  %v2091_v32 = vadd.f32 0.001, %v1833_v14  ;;  %v1835_v38 = vmax.f32 %v1706_v55, 0.0  ;;  %v1452_v1 = vmul.f32 0.020408163, %v11418_v6  ;;  %v2466_v47 = vmul.f32 %v8727_v0, %v11419_v7  ;;  %v8767_v14 = vpop.permute.xlu1 %2703 }
 0x306   : > { %v2092_v46 = vadd.f32 0.001, %v1834_v60  ;;  %v1836_v52 = vmax.f32 %v1707_v53, 0.0  ;;  %v1453_v63 = vmul.f32 0.020408163, %v11420_v9  ;;  %v2467_v12 = vmul.f32 %v8733_v54, %v8223_v49  ;;  %11421 = vst [vmem:[#allocation170_spill] sm:$0xff] %v8767_v14  ;;  %v8770_v53 = vpop.permute.xlu0 %2709 }
 0x307   : > { %v8761_v48 = vmul.f32 %v8692_v57, %v8692_v57  ;;  %v8765_v34 = vmul.f32 %v8736_v16, %v8736_v16  ;;  %v1838_v11 = vmax.f32 %v1709_v40, 0.0  ;;  %11422 = vst [vmem:[#allocation42_spill] sm:$0xff] %v8770_v53  ;;  %v2468_v60 = vmul.f32 %v8743_v41, %v8201_v19  ;;  %v5126_v49 = vpop.eup %5125  ;;  %v1956_v6 = vld [vmem:[%s7146_s18 + $0x368] sm:$0xff]  ;;  %v11423_v53 = vld [vmem:[#allocation124_spill] sm:$0xff] }
 0x308   : > { %2827 = vrot.lane.b32.xlu1 %v2466_v47, %s5493_s19  ;;  %v1837_v55 = vmax.f32 %v1708_v5, 0.0  ;;  %2829 = vrot.lane.b32.xlu0 %v2467_v12, %s5493_s19  ;;  %v2469_v8 = vmul.f32 %v8749_v35, %v8290_v51  ;;  %v8777_v9 = vmul.f32 %v5124_v45, %v1954_v61  ;;  %v8779_v40 = vmul.f32 %v5122_v28, %v1955_v17  ;;  %v5128_v7 = vpop.eup %5127  ;;  %v1957_v19 = vld [vmem:[%s7146_s18 + $0x370] sm:$0xff]  ;;  %v11424_v12 = vld [vmem:[#allocation67_spill] sm:$0xff]  ;;  %v11426_v61 = vld [vmem:[#allocation121_spill] sm:$0xff] }
 0x309   : > { %5137 = vrsqrt.f32 %v2091_v32  ;;  %v2093_v47 = vadd.f32 0.001, %v1835_v38  ;;  %v1710_v14 = vsub.f32 %v1452_v1, %v8666_v4  ;;  %v1454_v59 = vmul.f32 0.020408163, %v11423_v53  ;;  %v11425_v54 = vld [vmem:[#allocation16_spill] sm:$0xff]  ;;  %v8792_v32 = vpop.permute.xlu1 %2707  ;;  %v11428_v53 = vld [vmem:[#allocation69_spill] sm:$0xff] }
 0x30a   : > { %5139 = vrsqrt.f32 %v2092_v46  ;;  %v2094_v5 = vadd.f32 0.001, %v1836_v52  ;;  %v1711_v41 = vsub.f32 %v1453_v63, %v1582_v24  ;;  %v1455_v0 = vmul.f32 0.020408163, %v11424_v12  ;;  %11427 = vst [vmem:[#allocation8_spill] sm:$0xff] %v8792_v32  ;;  %v8795_v4 = vpop.permute.xlu0 %2713 }
 0x30b   : > { %v8787_v51 = vmul.f32 0.020408163, %v11425_v54  ;;  %v8790_v28 = vmul.f32 0.020408163, %v11426_v61  ;;  %v2096_v45 = vadd.f32 0.001, %v1838_v11  ;;  %v8797_v38 = vmul.f32 %v5126_v49, %v1956_v6 }
 0x30c   : > { %2831 = vrot.lane.b32.xlu1 %v2468_v60, %s5493_s19  ;;  %v5130_v24 = vpop.eup %5129  ;;  %v2095_v1 = vadd.f32 0.001, %v1837_v55  ;;  %2833 = vrot.lane.b32.xlu0 %v2469_v8, %s5493_s19  ;;  %v2470_v54 = vmul.f32 %v8777_v9, %v8283_v29  ;;  %v2471_v17 = vmul.f32 %v8779_v40, %v8324_v15  ;;  %v8804_v46 = vmul.f32 %v5128_v7, %v1957_v19  ;;  %v1958_v49 = vld [vmem:[%s7146_s18 + $0x378] sm:$0xff]  ;;  %v1959_v6 = vld [vmem:[%s7146_s18 + $0x380] sm:$0xff] }
 0x30d   : > { %v5132_v52 = vpop.eup %5131  ;;  %5141 = vrsqrt.f32 %v2093_v47  ;;  %v1839_v63 = vmax.f32 %v1710_v14, 0.0  ;;  %v1712_v11 = vsub.f32 %v1454_v59, %v8719_v21  ;;  %v1456_v60 = vmul.f32 0.020408163, %v11428_v53  ;;  %v11429_v29 = vld [vmem:[#allocation197_spill] sm:$0xff]  ;;  %v11430_v7 = vld [vmem:[#allocation18_spill] sm:$0xff]  ;;  %v8817_v14 = vpop.permute.xlu1 %2711 }
 0x30e   : > { %5143 = vrsqrt.f32 %v2094_v5  ;;  %v1840_v55 = vmax.f32 %v1711_v41, 0.0  ;;  %v1713_v8 = vsub.f32 %v1455_v0, %v8765_v34  ;;  %v1457_v12 = vmul.f32 0.020408163, %v11429_v29  ;;  %11431 = vst [vmem:[#allocation5_spill] sm:$0xff] %v8817_v14  ;;  %v8820_v21 = vpop.permute.xlu0 %2717  ;;  %v1960_v5 = vld [vmem:[%s7146_s18 + $0x388] sm:$0xff]  ;;  %v11433_v29 = vld [vmem:[#allocation68_spill] sm:$0xff] }
 0x30f   : > { %v1586_v15 = vmul.f32 %v8790_v28, %v8790_v28  ;;  %v8815_v19 = vmul.f32 0.020408163, %v11430_v7  ;;  %5145 = vrsqrt.f32 %v2096_v45  ;;  %11432 = vst [vmem:[#allocation148_spill] sm:$0xff] %v8820_v21  ;;  %v2472_v59 = vmul.f32 %v8797_v38, %v8313_v18  ;;  %v1961_v18 = vld [vmem:[%s7146_s18 + $0x390] sm:$0xff] }
 0x310   : > { %2835 = vrot.lane.b32.xlu1 %v2470_v54, %s5493_s19  ;;  %v5134_v0 = vpop.eup %5133  ;;  %5147 = vrsqrt.f32 %v2095_v1  ;;  %2837 = vrot.lane.b32.xlu0 %v2471_v17, %s5493_s19  ;;  %v2473_v41 = vmul.f32 %v8804_v46, %v8359_v37  ;;  %v8827_v34 = vmul.f32 %v5132_v52, %v1958_v49  ;;  %v8829_v47 = vmul.f32 %v5130_v24, %v1959_v6  ;;  %v11434_v17 = vld [vmem:[#allocation19_spill] sm:$0xff] }
 0x311   : > { %v5136_v61 = vpop.eup %5135  ;;  %v2097_v45 = vadd.f32 0.001, %v1839_v63  ;;  %v1841_v54 = vmax.f32 %v1712_v11, 0.0  ;;  %v1714_v53 = vsub.f32 %v1456_v60, %v8761_v48  ;;  %v1458_v7 = vmul.f32 0.020408163, %v11433_v29  ;;  %v8840_v52 = vpop.permute.xlu1 %2715  ;;  %v1962_v29 = vld [vmem:[%s7146_s18 + $0x398] sm:$0xff] }
 0x312   : > { %v2098_v14 = vadd.f32 0.001, %v1840_v55  ;;  %v1842_v1 = vmax.f32 %v1713_v8, 0.0  ;;  %v1715_v21 = vsub.f32 %v1457_v12, %v1586_v15  ;;  %v1459_v32 = vmul.f32 0.020408163, %v11434_v17  ;;  %v8843_v48 = vpop.permute.xlu0 %2721 }
 0x313   : > { %v1587_v37 = vmul.f32 %v8787_v51, %v8787_v51  ;;  %v1588_v24 = vmul.f32 %v8815_v19, %v8815_v19  ;;  %v2474_v63 = vmul.f32 %v8827_v34, %v8350_v20  ;;  %v2475_v11 = vmul.f32 %v8829_v47, %v8414_v42 }
 0x314   : > { %2839 = vrot.lane.b32.xlu1 %v2472_v59, %s5493_s19  ;;  %2841 = vrot.lane.b32.xlu0 %v2473_v41, %s5493_s19  ;;  %v8850_v60 = vmul.f32 %v5136_v61, %v1960_v5  ;;  %v8852_v49 = vmul.f32 %v5134_v0, %v1961_v18  ;;  %5149 = vrsqrt.f32 %v2097_v45  ;;  %v2099_v6 = vadd.f32 0.001, %v1841_v54  ;;  %v1963_v0 = vld [vmem:[%s7146_s18 + $0x3a0] sm:$0xff]  ;;  %v1964_v18 = vld [vmem:[%s7146_s18 + $0x3a8] sm:$0xff] }
 0x315   : > { %v1843_v55 = vmax.f32 %v1714_v53, 0.0  ;;  %v1716_v8 = vsub.f32 %v1458_v7, %v1587_v37  ;;  %5151 = vrsqrt.f32 %v2098_v14  ;;  %v2100_v15 = vadd.f32 0.001, %v1842_v1  ;;  %v8855_v20 = vpop.permute.xlu1 %2719 }
 0x316   : > { %v5138_v12 = vpop.eup %5137  ;;  %v1844_v59 = vmax.f32 %v1715_v21, 0.0  ;;  %v1717_v41 = vsub.f32 %v1459_v32, %v1588_v24  ;;  %v8858_v42 = vpop.permute.xlu0 %2725  ;;  %v2476_v5 = vmul.f32 %v8850_v60, %v8368_v13  ;;  %v2477_v14 = vmul.f32 %v8852_v49, %v8472_v43  ;;  %v1965_v43 = vld [vmem:[%s7146_s18 + $0x3b0] sm:$0xff] }
 0x317   : > { %v5140_v17 = vpop.eup %5139  ;;  %5153 = vrsqrt.f32 %v2099_v6  ;;  %v2101_v32 = vadd.f32 0.001, %v1843_v55  ;;  %v1845_v21 = vmax.f32 %v1716_v8, 0.0  ;;  %v8866_v61 = vmul.f32 %v5138_v12, %v1962_v29 }
 0x318   : > { %2843 = vrot.lane.b32.xlu1 %v2474_v63, %s5493_s19  ;;  %2845 = vrot.lane.b32.xlu0 %v2475_v11, %s5493_s19  ;;  %5155 = vrsqrt.f32 %v2100_v15  ;;  %v2102_v54 = vadd.f32 0.001, %v1844_v59  ;;  %v1846_v53 = vmax.f32 %v1717_v41, 0.0  ;;  %v8868_v7 = vmul.f32 %v5140_v17, %v1963_v0  ;;  %v1966_v59 = vld [vmem:[%s7146_s18 + $0x3b8] sm:$0xff]  ;;  %v1967_v17 = vld [vmem:[%s7146_s18 + $0x3c0] sm:$0xff] }
 0x319   : > { %v8871_v37 = vpop.permute.xlu1 %2723  ;;  %5157 = vrsqrt.f32 %v2101_v32  ;;  %v2103_v11 = vadd.f32 0.001, %v1845_v21  ;;  %v2478_v6 = vmul.f32 %v8866_v61, %v8469_v10  ;;  %v1968_v32 = vld [vmem:[%s7146_s18 + $0x3c8] sm:$0xff] }
 0x31a   : > { %v5142_v45 = vpop.eup %5141  ;;  %v8874_v13 = vpop.permute.xlu0 %2729  ;;  %5159 = vrsqrt.f32 %v2102_v54  ;;  %v2104_v8 = vadd.f32 0.001, %v1846_v53  ;;  %v2479_v12 = vmul.f32 %v8868_v7, %v8547_v2 }
 0x31b   : > { %v5144_v1 = vpop.eup %5143  ;;  %v8880_v55 = vmul.f32 %v5142_v45, %v1964_v18  ;;  %5161 = vrsqrt.f32 %v2103_v11 }
 0x31c   : > { %2847 = vrot.lane.b32.xlu1 %v2476_v5, %s5493_s19  ;;  %v5146_v24 = vpop.eup %5145  ;;  %2849 = vrot.lane.b32.xlu0 %v2477_v14, %s5493_s19  ;;  %v8884_v15 = vmul.f32 %v5144_v1, %v1965_v43  ;;  %5163 = vrsqrt.f32 %v2104_v8  ;;  %v1971_v8 = vld [vmem:[%s7146_s18 + $0x3e0] sm:$0xff] }
 0x31d   : > { %v5148_v63 = vpop.eup %5147  ;;  %v8887_v41 = vpop.permute.xlu1 %2727  ;;  %v2480_v10 = vmul.f32 %v8880_v55, %v8521_v31  ;;  %v8900_v14 = vmul.f32 %v5146_v24, %v1967_v17  ;;  %v1969_v31 = vld [vmem:[%s7146_s18 + $0x3d0] sm:$0xff]  ;;  %v1970_v24 = vld [vmem:[%s7146_s18 + $0x3d8] sm:$0xff] }
 0x31e   : > { %v8890_v29 = vpop.permute.xlu0 %2733  ;;  %v8896_v0 = vmul.f32 %v5148_v63, %v1966_v59  ;;  %v2481_v5 = vmul.f32 %v8884_v15, %v8614_v3 }
 0x31f   : > { %v2483_v1 = vmul.f32 %v8900_v14, %v8648_v56 }
 0x320   : > { %2851 = vrot.lane.b32.xlu1 %v2478_v6, %s5493_s19  ;;  %2853 = vrot.lane.b32.xlu0 %v2479_v12, %s5493_s19  ;;  %v2482_v53 = vmul.f32 %v8896_v0, %v8607_v33 }
 0x321   : > { %v5150_v2 = vpop.eup %5149  ;;  %v8903_v45 = vpop.permute.xlu1 %2731 }
 0x322   : > { %v5152_v21 = vpop.eup %5151  ;;  %v8906_v54 = vpop.permute.xlu0 %2737  ;;  %v8912_v18 = vmul.f32 %v5150_v2, %v1968_v32 }
 0x323   : > { %v8916_v43 = vmul.f32 %v5152_v21, %v1969_v31  ;;  %v1973_v21 = vld [vmem:[%s7146_s18 + $0x3f0] sm:$0xff] }
 0x324   : > { %2855 = vrot.lane.b32.xlu1 %v2480_v10, %s5493_s19  ;;  %2857 = vrot.lane.b32.xlu0 %v2481_v5, %s5493_s19  ;;  %v5154_v3 = vpop.eup %5153  ;;  %v2484_v33 = vmul.f32 %v8912_v18, %v8637_v27  ;;  %v1972_v10 = vld [vmem:[%s7146_s18 + $0x3e8] sm:$0xff] }
 0x325   : > { %v5156_v63 = vpop.eup %5155  ;;  %v8919_v11 = vpop.permute.xlu1 %2735  ;;  %v8928_v12 = vmul.f32 %v5154_v3, %v1970_v24  ;;  %v2485_v59 = vmul.f32 %v8916_v43, %v8683_v50 }
 0x326   : > { %v8922_v6 = vpop.permute.xlu0 %2741  ;;  %v5158_v56 = vpop.eup %5157  ;;  %v8932_v17 = vmul.f32 %v5156_v63, %v1971_v8 }
 0x327   : > { %v5160_v2 = vpop.eup %5159  ;;  %v2486_v27 = vmul.f32 %v8928_v12, %v8674_v26  ;;  %v8944_v31 = vmul.f32 %v5158_v56, %v1972_v10 }
 0x328   : > { %2859 = vrot.lane.b32.xlu1 %v2482_v53, %s5493_s19  ;;  %2861 = vrot.lane.b32.xlu0 %v2483_v1, %s5493_s19  ;;  %v5162_v50 = vpop.eup %5161  ;;  %v2487_v53 = vmul.f32 %v8932_v17, %v8736_v16  ;;  %v8948_v3 = vmul.f32 %v5160_v2, %v1973_v21  ;;  %v1974_v1 = vld [vmem:[%s7146_s18 + $0x3f8] sm:$0xff] }
 0x329   : > { %v8935_v5 = vpop.permute.xlu1 %2739  ;;  %v5164_v24 = vpop.eup %5163  ;;  %v2488_v26 = vmul.f32 %v8944_v31, %v8692_v57  ;;  %v8960_v56 = vmul.f32 %v5162_v50, %v1974_v1 }
 0x32a   : > { %v8938_v32 = vpop.permute.xlu0 %2745  ;;  %v2489_v16 = vmul.f32 %v8948_v3, %v8790_v28 }
 0x32b   : > { %v2490_v21 = vmul.f32 %v8960_v56, %v8787_v51 }
 0x32c   : > { %2863 = vrot.lane.b32.xlu1 %v2484_v33, %s5493_s19  ;;  %2865 = vrot.lane.b32.xlu0 %v2485_v59, %s5493_s19  ;;  %v1975_v33 = vld [vmem:[%s7146_s18 + $0x400] sm:$0xff] }
 0x32d   : > { %v8951_v63 = vpop.permute.xlu1 %2743  ;;  %v8964_v59 = vmul.f32 %v5164_v24, %v1975_v33  ;;  %v11438_v24 = vld [vmem:[#allocation187_spill] sm:$0xff]  ;;  %v11440_v33 = vld [vmem:[#allocation192_spill] sm:$0xff] }
 0x32e   : > { %v8954_v8 = vpop.permute.xlu0 %2749 }
 0x32f   : > { %v2491_v57 = vmul.f32 %v8964_v59, %v8815_v19 }
 0x330   : > { %2867 = vrot.lane.b32.xlu1 %v2486_v27, %s5493_s19  ;;  %2869 = vrot.lane.b32.xlu0 %v2487_v53, %s5493_s19  ;;  %v11436_v53 = vld [vmem:[#allocation193_spill] sm:$0xff] }
 0x331   : > { %v8966_v10 = vpop.permute.xlu1 %2747 }
 0x332   : > { %v8969_v2 = vpop.permute.xlu0 %2753 }
 0x334   : > { %2871 = vrot.lane.b32.xlu1 %v2488_v26, %s5493_s19  ;;  %2873 = vrot.lane.b32.xlu0 %v2489_v16, %s5493_s19  ;;  %v11442_v26 = vld [vmem:[#allocation34_spill] sm:$0xff] }
 0x335   : > { %v8976_v27 = vpop.permute.xlu1 %2751 }
 0x336   : > { %v8979_v28 = vpop.permute.xlu0 %2757 }
 0x338   : > { %2875 = vrot.lane.b32.xlu1 %v2490_v21, %s5493_s19  ;;  %2877 = vrot.lane.b32.xlu0 %v2491_v57, %s5493_s19  ;;  %v11444_v21 = vld [vmem:[#allocation122_spill] sm:$0xff] }
 0x339   : > { %v8982_v50 = vpop.permute.xlu1 %2755 }
 0x33a   : > { %11435 = vst [vmem:[#allocation152_spill] sm:$0xff] %v8982_v50  ;;  %v8985_v1 = vpop.permute.xlu0 %2761  ;;  %v11446_v50 = vld [vmem:[#allocation123_spill] sm:$0xff] }
 0x33b   : > { %11437 = vst [vmem:[#allocation160_spill] sm:$0xff] %v8985_v1  ;;  %v11448_v1 = vld [vmem:[#allocation126_spill] sm:$0xff] }
 0x33c   : > { %3139 = vperm.xlu1 %4903, %v11436_v53   ;;  %3144 = vperm.xlu0 %4904, %v11438_v24  }
 0x33d   : > { %v8988_v51 = vpop.permute.xlu1 %2759 }
 0x33e   : > { %11439 = vst [vmem:[#allocation44_spill] sm:$0xff] %v8988_v51  ;;  %v8991_v19 = vpop.permute.xlu0 %2765  ;;  %v11450_v51 = vld [vmem:[#allocation78_spill] sm:$0xff] }
 0x33f   : > { %11441 = vst [vmem:[#allocation162_spill] sm:$0xff] %v8991_v19  ;;  %v11452_v19 = vld [vmem:[#allocation130_spill] sm:$0xff] }
 0x340   : > { %3149 = vperm.xlu1 %4903, %v11440_v33   ;;  %3159 = vperm.xlu0 %4904, %v11442_v26  }
 0x341   : > { %v8994_v16 = vpop.permute.xlu1 %2763 }
 0x342   : > { %11443 = vst [vmem:[#allocation150_spill] sm:$0xff] %v8994_v16  ;;  %v8997_v57 = vpop.permute.xlu0 %2769  ;;  %v11454_v16 = vld [vmem:[#allocation132_spill] sm:$0xff] }
 0x343   : > { %11445 = vst [vmem:[#allocation163_spill] sm:$0xff] %v8997_v57  ;;  %v11456_v57 = vld [vmem:[#allocation134_spill] sm:$0xff] }
 0x344   : > { %3154 = vperm.xlu1 %4903, %v11444_v21   ;;  %3169 = vperm.xlu0 %4904, %v11446_v50  }
 0x345   : > { %v9000_v53 = vpop.permute.xlu1 %2767 }
 0x346   : > { %11447 = vst [vmem:[#allocation173_spill] sm:$0xff] %v9000_v53  ;;  %v9003_v24 = vpop.permute.xlu0 %2773  ;;  %v11458_v53 = vld [vmem:[#allocation137_spill] sm:$0xff] }
 0x347   : > { %11449 = vst [vmem:[#allocation48_spill] sm:$0xff] %v9003_v24  ;;  %v11460_v24 = vld [vmem:[#allocation135_spill] sm:$0xff] }
 0x348   : > { %3164 = vperm.xlu1 %4903, %v11448_v1   ;;  %3179 = vperm.xlu0 %4904, %v11450_v51  }
 0x349   : > { %v9006_v33 = vpop.permute.xlu1 %2771 }
 0x34a   : > { %11451 = vst [vmem:[#allocation164_spill] sm:$0xff] %v9006_v33  ;;  %v9009_v26 = vpop.permute.xlu0 %2777  ;;  %v11462_v33 = vld [vmem:[#allocation140_spill] sm:$0xff] }
 0x34b   : > { %11453 = vst [vmem:[#allocation10_spill] sm:$0xff] %v9009_v26  ;;  %v11464_v26 = vld [vmem:[#allocation31_spill] sm:$0xff] }
 0x34c   : > { %3174 = vperm.xlu1 %4903, %v11452_v19   ;;  %3189 = vperm.xlu0 %4904, %v11454_v16  }
 0x34d   : > { %v9012_v21 = vpop.permute.xlu1 %2775 }
 0x34e   : > { %11455 = vst [vmem:[#allocation91_spill] sm:$0xff] %v9012_v21  ;;  %v9015_v50 = vpop.permute.xlu0 %2781  ;;  %v11466_v21 = vld [vmem:[#allocation206_spill] sm:$0xff] }
 0x34f   : > { %11457 = vst [vmem:[#allocation109_spill] sm:$0xff] %v9015_v50  ;;  %v11468_v50 = vld [vmem:[#allocation205_spill] sm:$0xff] }
 0x350   : > { %3184 = vperm.xlu1 %4903, %v11456_v57   ;;  %3199 = vperm.xlu0 %4904, %v11458_v53  }
 0x351   : > { %v9018_v1 = vpop.permute.xlu1 %2779 }
 0x352   : > { %11459 = vst [vmem:[#allocation40_spill] sm:$0xff] %v9018_v1  ;;  %v9021_v51 = vpop.permute.xlu0 %2785  ;;  %v11470_v1 = vld [vmem:[#allocation30_spill] sm:$0xff] }
 0x353   : > { %11461 = vst [vmem:[#allocation7_spill] sm:$0xff] %v9021_v51  ;;  %v11472_v51 = vld [vmem:[#allocation147_spill] sm:$0xff] }
 0x354   : > { %3194 = vperm.xlu1 %4903, %v11460_v24   ;;  %3209 = vperm.xlu0 %4904, %v11462_v33  }
 0x355   : > { %v9024_v19 = vpop.permute.xlu1 %2783 }
 0x356   : > { %11463 = vst [vmem:[#allocation167_spill] sm:$0xff] %v9024_v19  ;;  %v9027_v16 = vpop.permute.xlu0 %2789  ;;  %v11474_v19 = vld [vmem:[#allocation90_spill] sm:$0xff] }
 0x357   : > { %11465 = vst [vmem:[#allocation50_spill] sm:$0xff] %v9027_v16  ;;  %v11476_v16 = vld [vmem:[#allocation35_spill] sm:$0xff] }
 0x358   : > { %3204 = vperm.xlu1 %4903, %v11464_v26   ;;  %3219 = vperm.xlu0 %4904, %v11466_v21  }
 0x359   : > { %v9030_v57 = vpop.permute.xlu1 %2787 }
 0x35a   : > { %11467 = vst [vmem:[#allocation156_spill] sm:$0xff] %v9030_v57  ;;  %v9033_v53 = vpop.permute.xlu0 %2793  ;;  %v11478_v57 = vld [vmem:[#allocation143_spill] sm:$0xff] }
 0x35b   : > { %11469 = vst [vmem:[#allocation161_spill] sm:$0xff] %v9033_v53  ;;  %v11480_v53 = vld [vmem:[#allocation146_spill] sm:$0xff] }
 0x35c   : > { %3214 = vperm.xlu1 %4903, %v11468_v50   ;;  %3229 = vperm.xlu0 %4904, %v11470_v1  }
 0x35d   : > { %v9036_v24 = vpop.permute.xlu1 %2791 }
 0x35e   : > { %11471 = vst [vmem:[#allocation55_spill] sm:$0xff] %v9036_v24  ;;  %v9039_v33 = vpop.permute.xlu0 %2797  ;;  %v11482_v24 = vld [vmem:[#allocation145_spill] sm:$0xff] }
 0x35f   : > { %11473 = vst [vmem:[#allocation52_spill] sm:$0xff] %v9039_v33  ;;  %v11484_v33 = vld [vmem:[#allocation149_spill] sm:$0xff] }
 0x360   : > { %3224 = vperm.xlu1 %4903, %v11472_v51   ;;  %3239 = vperm.xlu0 %4904, %v11474_v19  }
 0x361   : > { %v9042_v26 = vpop.permute.xlu1 %2795 }
 0x362   : > { %11475 = vst [vmem:[#allocation95_spill] sm:$0xff] %v9042_v26  ;;  %v9045_v21 = vpop.permute.xlu0 %2801  ;;  %v11486_v26 = vld [vmem:[#allocation37_spill] sm:$0xff] }
 0x363   : > { %11477 = vst [vmem:[#allocation165_spill] sm:$0xff] %v9045_v21  ;;  %v11488_v21 = vld [vmem:[#allocation32_spill] sm:$0xff] }
 0x364   : > { %3234 = vperm.xlu1 %4903, %v11476_v16   ;;  %3249 = vperm.xlu0 %4904, %v11478_v57  }
 0x365   : > { %v9048_v50 = vpop.permute.xlu1 %2799 }
 0x366   : > { %11479 = vst [vmem:[#allocation54_spill] sm:$0xff] %v9048_v50  ;;  %v9051_v1 = vpop.permute.xlu0 %2805  ;;  %v11490_v50 = vld [vmem:[#allocation36_spill] sm:$0xff] }
 0x367   : > { %11481 = vst [vmem:[#allocation57_spill] sm:$0xff] %v9051_v1  ;;  %v11492_v1 = vld [vmem:[#allocation153_spill] sm:$0xff] }
 0x368   : > { %3244 = vperm.xlu1 %4903, %v11480_v53   ;;  %3259 = vperm.xlu0 %4904, %v11482_v24  }
 0x369   : > { %v9054_v51 = vpop.permute.xlu1 %2803 }
 0x36a   : > { %11483 = vst [vmem:[#allocation12_spill] sm:$0xff] %v9054_v51  ;;  %v9057_v19 = vpop.permute.xlu0 %2809  ;;  %v11494_v51 = vld [vmem:[#allocation38_spill] sm:$0xff] }
 0x36b   : > { %11485 = vst [vmem:[#allocation98_spill] sm:$0xff] %v9057_v19  ;;  %v11496_v19 = vld [vmem:[#allocation154_spill] sm:$0xff] }
 0x36c   : > { %3254 = vperm.xlu1 %4903, %v11484_v33   ;;  %3269 = vperm.xlu0 %4904, %v11486_v26  }
 0x36d   : > { %v9060_v16 = vpop.permute.xlu1 %2807 }
 0x36e   : > { %11487 = vst [vmem:[#allocation9_spill] sm:$0xff] %v9060_v16  ;;  %v9063_v57 = vpop.permute.xlu0 %2813  ;;  %v11498_v16 = vld [vmem:[#allocation93_spill] sm:$0xff] }
 0x36f   : > { %11489 = vst [vmem:[#allocation168_spill] sm:$0xff] %v9063_v57  ;;  %v11500_v57 = vld [vmem:[#allocation157_spill] sm:$0xff] }
 0x370   : > { %3264 = vperm.xlu1 %4903, %v11488_v21   ;;  %3279 = vperm.xlu0 %4904, %v11490_v50  }
 0x371   : > { %v9066_v53 = vpop.permute.xlu1 %2811 }
 0x372   : > { %11491 = vst [vmem:[#allocation172_spill] sm:$0xff] %v9066_v53  ;;  %v9069_v24 = vpop.permute.xlu0 %2817  ;;  %v11502_v53 = vld [vmem:[#allocation159_spill] sm:$0xff] }
 0x373   : > { %11493 = vst [vmem:[#allocation175_spill] sm:$0xff] %v9069_v24  ;;  %v11504_v24 = vld [vmem:[#allocation94_spill] sm:$0xff] }
 0x374   : > { %3274 = vperm.xlu1 %4903, %v11492_v1   ;;  %3289 = vperm.xlu0 %4904, %v11494_v51  }
 0x375   : > { %v9072_v33 = vpop.permute.xlu1 %2815 }
 0x376   : > { %11495 = vst [vmem:[#allocation13_spill] sm:$0xff] %v9072_v33  ;;  %v9075_v26 = vpop.permute.xlu0 %2821  ;;  %v11506_v33 = vld [vmem:[#allocation45_spill] sm:$0xff] }
 0x377   : > { %11497 = vst [vmem:[#allocation100_spill] sm:$0xff] %v9075_v26  ;;  %v11508_v26 = vld [vmem:[#allocation96_spill] sm:$0xff] }
 0x378   : > { %3284 = vperm.xlu1 %4903, %v11496_v19   ;;  %3299 = vperm.xlu0 %4904, %v11498_v16  }
 0x379   : > { %v9078_v21 = vpop.permute.xlu1 %2819 }
 0x37a   : > { %11499 = vst [vmem:[#allocation11_spill] sm:$0xff] %v9078_v21  ;;  %v9081_v50 = vpop.permute.xlu0 %2825  ;;  %v11510_v21 = vld [vmem:[#allocation97_spill] sm:$0xff] }
 0x37b   : > { %11501 = vst [vmem:[#allocation102_spill] sm:$0xff] %v9081_v50  ;;  %v11512_v50 = vld [vmem:[#allocation47_spill] sm:$0xff] }
 0x37c   : > { %3294 = vperm.xlu1 %4903, %v11500_v57   ;;  %3309 = vperm.xlu0 %4904, %v11502_v53  }
 0x37d   : > { %v9084_v1 = vpop.permute.xlu1 %2823 }
 0x37e   : > { %11503 = vst [vmem:[#allocation176_spill] sm:$0xff] %v9084_v1  ;;  %v9087_v51 = vpop.permute.xlu0 %2829  ;;  %v11514_v1 = vld [vmem:[#allocation46_spill] sm:$0xff] }
 0x37f   : > { %11505 = vst [vmem:[#allocation101_spill] sm:$0xff] %v9087_v51  ;;  %v11516_v51 = vld [vmem:[#allocation49_spill] sm:$0xff] }
 0x380   : > { %3304 = vperm.xlu1 %4903, %v11504_v24   ;;  %3319 = vperm.xlu0 %4904, %v11506_v33  }
 0x381   : > { %v9090_v19 = vpop.permute.xlu1 %2827 }
 0x382   : > { %11507 = vst [vmem:[#allocation14_spill] sm:$0xff] %v9090_v19  ;;  %v9093_v16 = vpop.permute.xlu0 %2833  ;;  %v11518_v19 = vld [vmem:[#allocation99_spill] sm:$0xff] }
 0x383   : > { %11509 = vst [vmem:[#allocation174_spill] sm:$0xff] %v9093_v16  ;;  %v11520_v16 = vld [vmem:[#allocation51_spill] sm:$0xff] }
 0x384   : > { %3314 = vperm.xlu1 %4903, %v11508_v26   ;;  %3329 = vperm.xlu0 %4904, %v11510_v21  }
 0x385   : > { %v9096_v57 = vpop.permute.xlu1 %2831 }
 0x386   : > { %11511 = vst [vmem:[#allocation179_spill] sm:$0xff] %v9096_v57  ;;  %v9099_v53 = vpop.permute.xlu0 %2837  ;;  %v11522_v57 = vld [vmem:[#allocation53_spill] sm:$0xff] }
 0x387   : > { %11513 = vst [vmem:[#allocation119_spill] sm:$0xff] %v9099_v53  ;;  %v11524_v53 = vld [vmem:[#allocation166_spill] sm:$0xff] }
 0x388   : > { %3324 = vperm.xlu1 %4903, %v11512_v50   ;;  %3339 = vperm.xlu0 %4904, %v11514_v1  }
 0x389   : > { %v9102_v24 = vpop.permute.xlu1 %2835 }
 0x38a   : > { %11515 = vst [vmem:[#allocation15_spill] sm:$0xff] %v9102_v24  ;;  %v9105_v33 = vpop.permute.xlu0 %2841  ;;  %v11526_v24 = vld [vmem:[#allocation169_spill] sm:$0xff] }
 0x38b   : > { %11517 = vst [vmem:[#allocation103_spill] sm:$0xff] %v9105_v33  ;;  %v11528_v33 = vld [vmem:[#allocation181_spill] sm:$0xff] }
 0x38c   : > { %3334 = vperm.xlu1 %4903, %v11516_v51   ;;  %3349 = vperm.xlu0 %4904, %v11518_v19  }
 0x38d   : > { %v9108_v26 = vpop.permute.xlu1 %2839 }
 0x38e   : > { %11519 = vst [vmem:[#allocation177_spill] sm:$0xff] %v9108_v26  ;;  %v9111_v21 = vpop.permute.xlu0 %2845  ;;  %v11530_v26 = vld [vmem:[#allocation185_spill] sm:$0xff] }
 0x38f   : > { %11521 = vst [vmem:[#allocation178_spill] sm:$0xff] %v9111_v21  ;;  %v11532_v21 = vld [vmem:[#allocation171_spill] sm:$0xff] }
 0x390   : > { %3344 = vperm.xlu1 %4903, %v11520_v16   ;;  %3359 = vperm.xlu0 %4904, %v11522_v57  }
 0x391   : > { %v9114_v50 = vpop.permute.xlu1 %2843 }
 0x392   : > { %11523 = vst [vmem:[#allocation190_spill] sm:$0xff] %v9114_v50  ;;  %v9117_v1 = vpop.permute.xlu0 %2849  ;;  %v11534_v50 = vld [vmem:[#allocation59_spill] sm:$0xff] }
 0x393   : > { %11525 = vst [vmem:[#allocation183_spill] sm:$0xff] %v9117_v1  ;;  %v11536_v1 = vld [vmem:[#allocation56_spill] sm:$0xff] }
 0x394   : > { %3354 = vperm.xlu1 %4903, %v11524_v53   ;;  %3369 = vperm.xlu0 %4904, %v11526_v24  }
 0x395   : > { %v9120_v51 = vpop.permute.xlu1 %2847 }
 0x396   : > { %11527 = vst [vmem:[#allocation184_spill] sm:$0xff] %v9120_v51  ;;  %v9123_v19 = vpop.permute.xlu0 %2853  ;;  %v11538_v51 = vld [vmem:[#allocation61_spill] sm:$0xff] }
 0x397   : > { %11529 = vst [vmem:[#allocation60_spill] sm:$0xff] %v9123_v19  ;;  %v11540_v19 = vld [vmem:[#allocation58_spill] sm:$0xff] }
 0x398   : > { %3364 = vperm.xlu1 %4903, %v11528_v33   ;;  %3379 = vperm.xlu0 %4904, %v11530_v26  }
 0x399   : > { %v9126_v16 = vpop.permute.xlu1 %2851 }
 0x39a   : > { %11531 = vst [vmem:[#allocation120_spill] sm:$0xff] %v9126_v16  ;;  %v9129_v57 = vpop.permute.xlu0 %2857  ;;  %v11542_v16 = vld [vmem:[#allocation104_spill] sm:$0xff] }
 0x39b   : > { %11533 = vst [vmem:[#allocation125_spill] sm:$0xff] %v9129_v57  ;;  %v11544_v57 = vld [vmem:[#allocation63_spill] sm:$0xff] }
 0x39c   : > { %3374 = vperm.xlu1 %4903, %v11532_v21   ;;  %3389 = vperm.xlu0 %4904, %v11534_v50  }
 0x39d   : > { %v9132_v53 = vpop.permute.xlu1 %2855 }
 0x39e   : > { %11535 = vst [vmem:[#allocation64_spill] sm:$0xff] %v9132_v53  ;;  %v9135_v24 = vpop.permute.xlu0 %2861  ;;  %v11546_v53 = vld [vmem:[#allocation65_spill] sm:$0xff] }
 0x39f   : > { %11537 = vst [vmem:[#allocation105_spill] sm:$0xff] %v9135_v24  ;;  %v11548_v24 = vld [vmem:[#allocation62_spill] sm:$0xff] }
 0x3a0   : > { %3384 = vperm.xlu1 %4903, %v11536_v1   ;;  %3399 = vperm.xlu0 %4904, %v11538_v51   ;;  %v11549_v51 = vld [vmem:[#allocation106_spill] sm:$0xff] }
 0x3a1   : > { %v9138_v33 = vpop.permute.xlu1 %2859 }
 0x3a2   : > { %11539 = vst [vmem:[#allocation124_spill] sm:$0xff] %v9138_v33  ;;  %v9141_v26 = vpop.permute.xlu0 %2865 }
 0x3a3   : > { %11541 = vst [vmem:[#allocation67_spill] sm:$0xff] %v9141_v26  ;;  %v11552_v26 = vld [vmem:[#allocation189_spill] sm:$0xff] }
 0x3a4   : > { %3394 = vperm.xlu1 %4903, %v11540_v19   ;;  %3409 = vperm.xlu0 %4904, %v11542_v16   ;;  %v11553_v16 = vld [vmem:[#allocation66_spill] sm:$0xff] }
 0x3a5   : > { %v9144_v21 = vpop.permute.xlu1 %2863 }
 0x3a6   : > { %11543 = vst [vmem:[#allocation16_spill] sm:$0xff] %v9144_v21  ;;  %v9147_v50 = vpop.permute.xlu0 %2869 }
 0x3a7   : > { %11545 = vst [vmem:[#allocation121_spill] sm:$0xff] %v9147_v50 }
 0x3a8   : > { %3404 = vperm.xlu1 %4903, %v11544_v57   ;;  %3419 = vperm.xlu0 %4904, %v11546_v53   ;;  %v11555_v57 = vld [vmem:[#allocation198_spill] sm:$0xff]  ;;  %v11557_v53 = vld [vmem:[#allocation108_spill] sm:$0xff] }
 0x3a9   : > { %v9150_v1 = vpop.permute.xlu1 %2867 }
 0x3aa   : > { %11547 = vst [vmem:[#allocation69_spill] sm:$0xff] %v9150_v1  ;;  %v9154_v33 = vpop.permute.xlu0 %2873  ;;  %v11558_v1 = vld [vmem:[#allocation107_spill] sm:$0xff] }
 0x3ab   : > { %11550 = vst [vmem:[#allocation197_spill] sm:$0xff] %v9154_v33 }
 0x3ac   : > { %3414 = vperm.xlu1 %4903, %v11548_v24   ;;  %3429 = vperm.xlu0 %4904, %v11549_v51  }
 0x3ad   : > { %v9156_v19 = vpop.permute.xlu1 %2871 }
 0x3ae   : > { %11551 = vst [vmem:[#allocation18_spill] sm:$0xff] %v9156_v19  ;;  %v9160_v21 = vpop.permute.xlu0 %2877 }
 0x3af   : > { %11554 = vst [vmem:[#allocation68_spill] sm:$0xff] %v9160_v21  ;;  %v11566_v21 = vld [vmem:[#allocation24_spill] sm:$0xff] }
 0x3b0   : > { %3424 = vperm.xlu1 %4903, %v11552_v26   ;;  %3439 = vperm.xlu0 %4904, %v11553_v16  }
 0x3b1   : > { %v9163_v50 = vpop.permute.xlu1 %2875 }
 0x3b2   : > { %11556 = vst [vmem:[#allocation19_spill] sm:$0xff] %v9163_v50  ;;  %v11562_v50 = vld [vmem:[#allocation70_spill] sm:$0xff] }
 0x3b4   : > { %3434 = vperm.xlu1 %4903, %v11555_v57   ;;  %3449 = vperm.xlu0 %4904, %v11557_v53  }
 0x3b7   : > { %v9167_v24 = vpop.permute.xlu1 %3139  ;;  %v9169_v51 = vpop.permute.xlu0 %3144 }
 0x3b8   : > { %3444 = vperm.xlu1 %4903, %v11558_v1   ;;  %3459 = vperm.xlu0 %4904, %v8188_v22  }
 0x3bb   : > { %v9173_v26 = vpop.permute.xlu1 %3149  ;;  %v9175_v16 = vpop.permute.xlu0 %3159 }
 0x3bc   : > { %3454 = vperm.xlu1 %4903, %v8186_v62   ;;  %3469 = vperm.xlu0 %4904, %v8217_v36   ;;  %v11561_v62 = vld [vmem:[#allocation133_spill] sm:$0xff] }
 0x3bf   : > { %v9179_v57 = vpop.permute.xlu1 %3154  ;;  %v9181_v53 = vpop.permute.xlu0 %3169 }
 0x3c0   : > { %3464 = vperm.xlu1 %4903, %v8209_v58   ;;  %3479 = vperm.xlu0 %4904, %v8240_v23   ;;  %v11565_v58 = vld [vmem:[#allocation131_spill] sm:$0xff] }
 0x3c3   : > { %v9185_v1 = vpop.permute.xlu1 %3164  ;;  %v9187_v22 = vpop.permute.xlu0 %3179 }
 0x3c4   : > { %3474 = vperm.xlu1 %4903, %v8238_v25   ;;  %11559 = vst [vmem:[#allocation193_spill] sm:$0xff] %v9185_v1  ;;  %11560 = vst [vmem:[#allocation187_spill] sm:$0xff] %v9187_v22  ;;  %3489 = vperm.xlu0 %4904, %v11561_v62   ;;  %v11568_v25 = vld [vmem:[#allocation73_spill] sm:$0xff]  ;;  %v11569_v1 = vld [vmem:[#allocation20_spill] sm:$0xff] }
 0x3c7   : > { %v9191_v19 = vpop.permute.xlu1 %3174  ;;  %v9193_v36 = vpop.permute.xlu0 %3189 }
 0x3c8   : > { %3484 = vperm.xlu1 %4903, %v11562_v50   ;;  %11563 = vst [vmem:[#allocation192_spill] sm:$0xff] %v9191_v19  ;;  %11564 = vst [vmem:[#allocation34_spill] sm:$0xff] %v9193_v36  ;;  %3499 = vperm.xlu0 %4904, %v11565_v58   ;;  %v11572_v50 = vld [vmem:[#allocation200_spill] sm:$0xff]  ;;  %v11573_v19 = vld [vmem:[#allocation27_spill] sm:$0xff] }
 0x3cb   : > { %v9197_v33 = vpop.permute.xlu1 %3184  ;;  %v9199_v23 = vpop.permute.xlu0 %3199 }
 0x3cc   : > { %3494 = vperm.xlu1 %4903, %v11566_v21   ;;  %11567 = vst [vmem:[#allocation122_spill] sm:$0xff] %v9197_v33  ;;  %3509 = vperm.xlu0 %4904, %v11568_v25   ;;  %v11576_v21 = vld [vmem:[#allocation112_spill] sm:$0xff] }
 0x3cf   : > { %v9203_v22 = vpop.permute.xlu1 %3194  ;;  %v9205_v62 = vpop.permute.xlu0 %3209 }
 0x3d0   : > { %3504 = vperm.xlu1 %4903, %v11569_v1   ;;  %11570 = vst [vmem:[#allocation123_spill] sm:$0xff] %v9203_v22  ;;  %11571 = vst [vmem:[#allocation126_spill] sm:$0xff] %v9205_v62  ;;  %3519 = vperm.xlu0 %4904, %v11572_v50   ;;  %v11579_v1 = vld [vmem:[#allocation87_spill] sm:$0xff]  ;;  %v11580_v22 = vld [vmem:[#allocation88_spill] sm:$0xff] }
 0x3d3   : > { %v9209_v36 = vpop.permute.xlu1 %3204  ;;  %v9211_v58 = vpop.permute.xlu0 %3219 }
 0x3d4   : > { %3514 = vperm.xlu1 %4903, %v11573_v19   ;;  %11574 = vst [vmem:[#allocation78_spill] sm:$0xff] %v9209_v36  ;;  %11575 = vst [vmem:[#allocation130_spill] sm:$0xff] %v9211_v58  ;;  %3529 = vperm.xlu0 %4904, %v8381_v44   ;;  %v11583_v19 = vld [vmem:[#allocation191_spill] sm:$0xff] }
 0x3d5   : > { %v11584_v36 = vld [vmem:[#allocation203_spill] sm:$0xff] }
 0x3d7   : > { %v9215_v33 = vpop.permute.xlu1 %3214  ;;  %v9217_v25 = vpop.permute.xlu0 %3229 }
 0x3d8   : > { %3524 = vperm.xlu1 %4903, %v11576_v21   ;;  %11577 = vst [vmem:[#allocation132_spill] sm:$0xff] %v9215_v33  ;;  %11578 = vst [vmem:[#allocation134_spill] sm:$0xff] %v9217_v25  ;;  %3539 = vperm.xlu0 %4904, %v11579_v1   ;;  %v11587_v21 = vld [vmem:[#allocation28_spill] sm:$0xff]  ;;  %v11588_v33 = vld [vmem:[#allocation201_spill] sm:$0xff] }
 0x3db   : > { %v9221_v62 = vpop.permute.xlu1 %3224  ;;  %v9223_v50 = vpop.permute.xlu0 %3239 }
 0x3dc   : > { %3534 = vperm.xlu1 %4903, %v11580_v22   ;;  %11581 = vst [vmem:[#allocation137_spill] sm:$0xff] %v9221_v62  ;;  %11582 = vst [vmem:[#allocation135_spill] sm:$0xff] %v9223_v50  ;;  %3549 = vperm.xlu0 %4904, %v11583_v19   ;;  %v11591_v22 = vld [vmem:[#allocation29_spill] sm:$0xff] }
 0x3dd   : > { %v11592_v62 = vld [vmem:[#allocation113_spill] sm:$0xff] }
 0x3df   : > { %v9227_v58 = vpop.permute.xlu1 %3234  ;;  %v9229_v44 = vpop.permute.xlu0 %3249 }
 0x3e0   : > { %3544 = vperm.xlu1 %4903, %v11584_v36   ;;  %11585 = vst [vmem:[#allocation140_spill] sm:$0xff] %v9227_v58  ;;  %11586 = vst [vmem:[#allocation31_spill] sm:$0xff] %v9229_v44  ;;  %3559 = vperm.xlu0 %4904, %v11587_v21   ;;  %v11595_v36 = vld [vmem:[#allocation199_spill] sm:$0xff]  ;;  %v11596_v58 = vld [vmem:[#allocation114_spill] sm:$0xff] }
 0x3e3   : > { %v9233_v25 = vpop.permute.xlu1 %3244  ;;  %v9235_v1 = vpop.permute.xlu0 %3259 }
 0x3e4   : > { %3554 = vperm.xlu1 %4903, %v11588_v33   ;;  %11589 = vst [vmem:[#allocation206_spill] sm:$0xff] %v9233_v25  ;;  %11590 = vst [vmem:[#allocation205_spill] sm:$0xff] %v9235_v1  ;;  %3569 = vperm.xlu0 %4904, %v11591_v22   ;;  %v11599_v33 = vld [vmem:[#allocation76_spill] sm:$0xff]  ;;  %v11600_v25 = vld [vmem:[#allocation23_spill] sm:$0xff] }
 0x3e7   : > { %v9239_v50 = vpop.permute.xlu1 %3254  ;;  %v9241_v19 = vpop.permute.xlu0 %3269 }
 0x3e8   : > { %3564 = vperm.xlu1 %4903, %v11592_v62   ;;  %11593 = vst [vmem:[#allocation30_spill] sm:$0xff] %v9239_v50  ;;  %11594 = vst [vmem:[#allocation147_spill] sm:$0xff] %v9241_v19  ;;  %3579 = vperm.xlu0 %4904, %v11595_v36   ;;  %v11603_v62 = vld [vmem:[#allocation129_spill] sm:$0xff]  ;;  %v11604_v50 = vld [vmem:[#allocation116_spill] sm:$0xff] }
 0x3eb   : > { %v9245_v44 = vpop.permute.xlu1 %3264  ;;  %v9247_v21 = vpop.permute.xlu0 %3279 }
 0x3ec   : > { %3574 = vperm.xlu1 %4903, %v11596_v58   ;;  %11597 = vst [vmem:[#allocation90_spill] sm:$0xff] %v9245_v44  ;;  %11598 = vst [vmem:[#allocation35_spill] sm:$0xff] %v9247_v21  ;;  %3589 = vperm.xlu0 %4904, %v11599_v33   ;;  %v11607_v58 = vld [vmem:[#allocation118_spill] sm:$0xff]  ;;  %v11608_v44 = vld [vmem:[#allocation77_spill] sm:$0xff] }
 0x3ef   : > { %v9251_v1 = vpop.permute.xlu1 %3274  ;;  %v9253_v22 = vpop.permute.xlu0 %3289 }
 0x3f0   : > { %3584 = vperm.xlu1 %4903, %v11600_v25   ;;  %11601 = vst [vmem:[#allocation143_spill] sm:$0xff] %v9251_v1  ;;  %11602 = vst [vmem:[#allocation146_spill] sm:$0xff] %v9253_v22  ;;  %3599 = vperm.xlu0 %4904, %v11603_v62   ;;  %v11611_v25 = vld [vmem:[#allocation151_spill] sm:$0xff]  ;;  %v11612_v1 = vld [vmem:[#allocation4_spill] sm:$0xff] }
 0x3f3   : > { %v9257_v19 = vpop.permute.xlu1 %3284  ;;  %v9259_v36 = vpop.permute.xlu0 %3299 }
 0x3f4   : > { %3594 = vperm.xlu1 %4903, %v11604_v50   ;;  %11605 = vst [vmem:[#allocation145_spill] sm:$0xff] %v9257_v19  ;;  %11606 = vst [vmem:[#allocation149_spill] sm:$0xff] %v9259_v36  ;;  %3609 = vperm.xlu0 %4904, %v11607_v58   ;;  %v11613_v50 = vld [vmem:[#allocation92_spill] sm:$0xff]  ;;  %v11614_v19 = vld [vmem:[#allocation6_spill] sm:$0xff] }
 0x3f7   : > { %v9263_v21 = vpop.permute.xlu1 %3294  ;;  %v9265_v33 = vpop.permute.xlu0 %3309 }
 0x3f8   : > { %3604 = vperm.xlu1 %4903, %v11608_v44   ;;  %11609 = vst [vmem:[#allocation37_spill] sm:$0xff] %v9263_v21  ;;  %11610 = vst [vmem:[#allocation32_spill] sm:$0xff] %v9265_v33  ;;  %3619 = vperm.xlu0 %4904, %v11611_v25   ;;  %v11617_v44 = vld [vmem:[#allocation155_spill] sm:$0xff]  ;;  %v11618_v21 = vld [vmem:[#allocation138_spill] sm:$0xff] }
 0x3fb   : > { %v9269_v22 = vpop.permute.xlu1 %3304  ;;  %v9271_v62 = vpop.permute.xlu0 %3319 }
 0x3fc   : > { %3614 = vperm.xlu1 %4903, %v11612_v1   ;;  %3629 = vperm.xlu0 %4904, %v11613_v50  }
 0x3ff   : > { %v9275_v36 = vpop.permute.xlu1 %3314  ;;  %v9277_v58 = vpop.permute.xlu0 %3329 }
 0x400   : > { %3624 = vperm.xlu1 %4903, %v11614_v19   ;;  %11615 = vst [vmem:[#allocation36_spill] sm:$0xff] %v9275_v36  ;;  %11616 = vst [vmem:[#allocation153_spill] sm:$0xff] %v9277_v58  ;;  %3639 = vperm.xlu0 %4904, %v11617_v44   ;;  %v11620_v19 = vld [vmem:[#allocation85_spill] sm:$0xff]  ;;  %v11621_v36 = vld [vmem:[#allocation158_spill] sm:$0xff] }
 0x403   : > { %v9281_v33 = vpop.permute.xlu1 %3324  ;;  %v9283_v25 = vpop.permute.xlu0 %3339 }
 0x404   : > { %3634 = vperm.xlu1 %4903, %v11618_v21   ;;  %11619 = vst [vmem:[#allocation38_spill] sm:$0xff] %v9281_v33  ;;  %3649 = vperm.xlu0 %4904, %v8705_v39   ;;  %v11622_v21 = vld [vmem:[#allocation142_spill] sm:$0xff] }
 0x407   : > { %v9287_v1 = vpop.permute.xlu1 %3334  ;;  %v9289_v50 = vpop.permute.xlu0 %3349 }
 0x408   : > { %3644 = vperm.xlu1 %4903, %v8699_v30   ;;  %3659 = vperm.xlu0 %4904, %v11620_v19  }
 0x40b   : > { %v9293_v58 = vpop.permute.xlu1 %3344  ;;  %v9295_v44 = vpop.permute.xlu0 %3359 }
 0x40c   : > { %3654 = vperm.xlu1 %4903, %v11621_v36   ;;  %3669 = vperm.xlu0 %4904, %v8749_v35  }
 0x40f   : > { %v9299_v33 = vpop.permute.xlu1 %3354  ;;  %v9301_v39 = vpop.permute.xlu0 %3369 }
 0x410   : > { %3664 = vperm.xlu1 %4903, %v11622_v21   ;;  %3679 = vperm.xlu0 %4904, %v8779_v40  }
 0x413   : > { %v9305_v30 = vpop.permute.xlu1 %3364  ;;  %v9307_v19 = vpop.permute.xlu0 %3379 }
 0x414   : > { %3674 = vperm.xlu1 %4903, %v8777_v9   ;;  %3689 = vperm.xlu0 %4904, %v8804_v46  }
 0x417   : > { %v9311_v36 = vpop.permute.xlu1 %3374  ;;  %v9313_v35 = vpop.permute.xlu0 %3389 }
 0x418   : > { %3684 = vperm.xlu1 %4903, %v8797_v38   ;;  %3699 = vperm.xlu0 %4904, %v8829_v47  }
 0x41b   : > { %v9317_v21 = vpop.permute.xlu1 %3384  ;;  %v9319_v40 = vpop.permute.xlu0 %3399 }
 0x41c   : > { %3694 = vperm.xlu1 %4903, %v8827_v34   ;;  %3709 = vperm.xlu0 %4904, %v8852_v49  }
 0x41f   : > { %v9323_v9 = vpop.permute.xlu1 %3394  ;;  %v9325_v46 = vpop.permute.xlu0 %3409 }
 0x420   : > { %3704 = vperm.xlu1 %4903, %v8850_v60   ;;  %3719 = vperm.xlu0 %4904, %v8868_v7  }
 0x423   : > { %v9329_v38 = vpop.permute.xlu1 %3404  ;;  %v9331_v47 = vpop.permute.xlu0 %3419 }
 0x424   : > { %3714 = vperm.xlu1 %4903, %v8866_v61   ;;  %3729 = vperm.xlu0 %4904, %v8884_v15  }
 0x427   : > { %v9335_v34 = vpop.permute.xlu1 %3414  ;;  %v9337_v49 = vpop.permute.xlu0 %3429 }
 0x428   : > { %3724 = vperm.xlu1 %4903, %v8880_v55   ;;  %3739 = vperm.xlu0 %4904, %v8900_v14  }
 0x42b   : > { %v9341_v60 = vpop.permute.xlu1 %3424  ;;  %v9343_v61 = vpop.permute.xlu0 %3439 }
 0x42c   : > { %3734 = vperm.xlu1 %4903, %v8896_v0   ;;  %11623 = vst [vmem:[#allocation154_spill] sm:$0xff] %v9341_v60  ;;  %11624 = vst [vmem:[#allocation93_spill] sm:$0xff] %v9343_v61  ;;  %3749 = vperm.xlu0 %4904, %v8916_v43   ;;  %v5227_v43 = vld [vmem:[%s7146_s18 + $0x8] sm:$0xff]  ;;  %v11639_v60 = vld [vmem:[#allocation22_spill] sm:$0xff] }
 0x42f   : > { %v9347_v7 = vpop.permute.xlu1 %3434  ;;  %v9349_v55 = vpop.permute.xlu0 %3449 }
 0x430   : > { %3744 = vperm.xlu1 %4903, %v8912_v18   ;;  %11625 = vst [vmem:[#allocation157_spill] sm:$0xff] %v9347_v7  ;;  %11626 = vst [vmem:[#allocation159_spill] sm:$0xff] %v9349_v55  ;;  %3759 = vperm.xlu0 %4904, %v8932_v17   ;;  %v11631_v17 = vld [vmem:[#allocation81_spill] sm:$0xff] }
 0x431   : > { %v3009_v7 = vsub.f32 %v5227_v43, %v11631_v17  ;;  %v5230_v17 = vld [vmem:[%s7146_s18 + $0x10] sm:$0xff] }
 0x433   : > { %v9353_v15 = vpop.permute.xlu1 %3444  ;;  %v9355_v0 = vpop.permute.xlu0 %3459 }
 0x434   : > { %3754 = vperm.xlu1 %4903, %v8928_v12   ;;  %11627 = vst [vmem:[#allocation94_spill] sm:$0xff] %v9353_v15  ;;  %11628 = vst [vmem:[#allocation45_spill] sm:$0xff] %v9355_v0  ;;  %3769 = vperm.xlu0 %4904, %v8948_v3   ;;  %v5495_v3 = vmov 1  }
 0x437   : > { %v9359_v14 = vpop.permute.xlu1 %3454  ;;  %v9361_v18 = vpop.permute.xlu0 %3469 }
 0x438   : > { %3764 = vperm.xlu1 %4903, %v8944_v31   ;;  %11629 = vst [vmem:[#allocation96_spill] sm:$0xff] %v9359_v14  ;;  %11630 = vst [vmem:[#allocation97_spill] sm:$0xff] %v9361_v18  ;;  %3779 = vperm.xlu0 %4904, %v8964_v59   ;;  %v5228_v31 = vld [vmem:[%s7146_s18] sm:$0xff]  ;;  %v11634_v14 = vld [vmem:[#allocation17_spill] sm:$0xff] }
 0x439   : > { %v3008_v0 = vsub.f32 %v5228_v31, %v11634_v14  ;;  %v5229_v18 = vld [vmem:[%s7146_s18 + $0x20] sm:$0xff]  ;;  %v11635_v59 = vld [vmem:[#allocation21_spill] sm:$0xff] }
 0x43a   : > { %v3012_v55 = vsub.f32 %v5229_v18, %v11635_v59  ;;  %v5232_v18 = vld [vmem:[%s7146_s18 + $0x18] sm:$0xff] }
 0x43b   : > { %v9367_v12 = vpop.permute.xlu1 %3464  ;;  %v9369_v15 = vpop.permute.xlu0 %3479 }
 0x43c   : > { %3774 = vperm.xlu1 %4903, %v8960_v56   ;;  %11632 = vst [vmem:[#allocation47_spill] sm:$0xff] %v9367_v12  ;;  %11633 = vst [vmem:[#allocation46_spill] sm:$0xff] %v9369_v15  ;;  %4906 = vset.pattern.permute.xlu0 %v5495_v3  ;;  %v11638_v12 = vld [vmem:[#allocation71_spill] sm:$0xff] }
 0x43d   : > { %3918 = vperm.xlu0 %4906, %v3009_v7   ;;  %v3010_v15 = vsub.f32 %v5230_v17, %v11638_v12  ;;  %v5231_v7 = vld [vmem:[%s7146_s18 + $0x30] sm:$0xff] }
 0x43e   : > { %v3014_v14 = vsub.f32 %v5231_v7, %v11639_v60  ;;  %v5234_v60 = vld [vmem:[%s7146_s18 + $0x28] sm:$0xff]  ;;  %v11646_v17 = vld [vmem:[#allocation72_spill] sm:$0xff] }
 0x43f   : > { %v9375_v43 = vpop.permute.xlu1 %3474  ;;  %v9377_v56 = vpop.permute.xlu0 %3489  ;;  %v3013_v7 = vsub.f32 %v5234_v60, %v11646_v17  ;;  %v5238_v17 = vld [vmem:[%s7146_s18 + $0x48] sm:$0xff] }
 0x440   : > { %4905 = vset.pattern.permute.xlu1 %v5495_v3  ;;  %11636 = vst [vmem:[#allocation49_spill] sm:$0xff] %v9375_v43  ;;  %11637 = vst [vmem:[#allocation99_spill] sm:$0xff] %v9377_v56  ;;  %v11642_v3 = vld [vmem:[#allocation75_spill] sm:$0xff] }
 0x441   : > { %3913 = vperm.xlu1 %4905, %v3008_v0   ;;  %3933 = vperm.xlu0 %4906, %v3012_v55   ;;  %v3011_v59 = vsub.f32 %v5232_v18, %v11642_v3  ;;  %v5233_v0 = vld [vmem:[%s7146_s18 + $0x40] sm:$0xff]  ;;  %v5236_v3 = vld [vmem:[%s7146_s18 + $0x38] sm:$0xff] }
 0x442   : > { %v11643_v55 = vld [vmem:[#allocation110_spill] sm:$0xff] }
 0x443   : > { %v9383_v31 = vpop.permute.xlu1 %3484  ;;  %v9385_v61 = vpop.permute.xlu0 %3499  ;;  %v3016_v43 = vsub.f32 %v5233_v0, %v11643_v55  ;;  %v11650_v0 = vld [vmem:[#allocation80_spill] sm:$0xff] }
 0x444   : > { %11640 = vst [vmem:[#allocation51_spill] sm:$0xff] %v9383_v31  ;;  %11641 = vst [vmem:[#allocation53_spill] sm:$0xff] %v9385_v61  ;;  %v3015_v55 = vsub.f32 %v5236_v3, %v11650_v0  ;;  %v5240_v0 = vld [vmem:[%s7146_s18 + $0x58] sm:$0xff] }
 0x445   : > { %3923 = vperm.xlu1 %4905, %v3010_v15   ;;  %3943 = vperm.xlu0 %4906, %v3014_v14   ;;  %v5235_v15 = vld [vmem:[%s7146_s18 + $0x50] sm:$0xff] }
 0x446   : > { %v11647_v14 = vld [vmem:[#allocation180_spill] sm:$0xff] }
 0x447   : > { %v9391_v56 = vpop.permute.xlu1 %3494  ;;  %v9393_v12 = vpop.permute.xlu0 %3509  ;;  %v3018_v31 = vsub.f32 %v5235_v15, %v11647_v14  ;;  %v11654_v15 = vld [vmem:[#allocation111_spill] sm:$0xff] }
 0x448   : > { %11644 = vst [vmem:[#allocation166_spill] sm:$0xff] %v9391_v56  ;;  %11645 = vst [vmem:[#allocation169_spill] sm:$0xff] %v9393_v12  ;;  %v3017_v14 = vsub.f32 %v5238_v17, %v11654_v15  ;;  %v5242_v15 = vld [vmem:[%s7146_s18 + $0x68] sm:$0xff] }
 0x449   : > { %3928 = vperm.xlu1 %4905, %v3011_v59   ;;  %3953 = vperm.xlu0 %4906, %v3016_v43   ;;  %v5237_v59 = vld [vmem:[%s7146_s18 + $0x60] sm:$0xff] }
 0x44a   : > { %v11651_v43 = vld [vmem:[#allocation182_spill] sm:$0xff] }
 0x44b   : > { %v9399_v61 = vpop.permute.xlu1 %3504  ;;  %v9401_v18 = vpop.permute.xlu0 %3519  ;;  %v3020_v56 = vsub.f32 %v5237_v59, %v11651_v43  ;;  %v11658_v59 = vld [vmem:[#allocation188_spill] sm:$0xff] }
 0x44c   : > { %11648 = vst [vmem:[#allocation181_spill] sm:$0xff] %v9399_v61  ;;  %11649 = vst [vmem:[#allocation185_spill] sm:$0xff] %v9401_v18  ;;  %v3019_v43 = vsub.f32 %v5240_v0, %v11658_v59  ;;  %v5244_v59 = vld [vmem:[%s7146_s18 + $0x78] sm:$0xff] }
 0x44d   : > { %3938 = vperm.xlu1 %4905, %v3013_v7   ;;  %3963 = vperm.xlu0 %4906, %v3018_v31   ;;  %v5239_v7 = vld [vmem:[%s7146_s18 + $0x70] sm:$0xff]  ;;  %v11655_v31 = vld [vmem:[#allocation82_spill] sm:$0xff] }
 0x44e   : > { %v3022_v61 = vsub.f32 %v5239_v7, %v11655_v31  ;;  %v11662_v7 = vld [vmem:[#allocation186_spill] sm:$0xff] }
 0x44f   : > { %v9407_v12 = vpop.permute.xlu1 %3514  ;;  %v9409_v60 = vpop.permute.xlu0 %3529  ;;  %v3021_v31 = vsub.f32 %v5242_v15, %v11662_v7  ;;  %v5246_v7 = vld [vmem:[%s7146_s18 + $0x88] sm:$0xff] }
 0x450   : > { %11652 = vst [vmem:[#allocation171_spill] sm:$0xff] %v9407_v12  ;;  %11653 = vst [vmem:[#allocation59_spill] sm:$0xff] %v9409_v60 }
 0x451   : > { %3948 = vperm.xlu1 %4905, %v3015_v55   ;;  %3973 = vperm.xlu0 %4906, %v3020_v56   ;;  %v5241_v55 = vld [vmem:[%s7146_s18 + $0x80] sm:$0xff] }
 0x452   : > { %v11659_v56 = vld [vmem:[#allocation194_spill] sm:$0xff] }
 0x453   : > { %v9415_v18 = vpop.permute.xlu1 %3524  ;;  %v9417_v3 = vpop.permute.xlu0 %3539  ;;  %v3024_v12 = vsub.f32 %v5241_v55, %v11659_v56  ;;  %v11666_v55 = vld [vmem:[#allocation139_spill] sm:$0xff] }
 0x454   : > { %11656 = vst [vmem:[#allocation56_spill] sm:$0xff] %v9415_v18  ;;  %11657 = vst [vmem:[#allocation61_spill] sm:$0xff] %v9417_v3  ;;  %v3023_v56 = vsub.f32 %v5244_v59, %v11666_v55  ;;  %v5248_v55 = vld [vmem:[%s7146_s18 + $0x98] sm:$0xff] }
 0x455   : > { %3958 = vperm.xlu1 %4905, %v3017_v14   ;;  %3983 = vperm.xlu0 %4906, %v3022_v61   ;;  %v5243_v14 = vld [vmem:[%s7146_s18 + $0x90] sm:$0xff]  ;;  %v11663_v61 = vld [vmem:[#allocation26_spill] sm:$0xff] }
 0x456   : > { %v3026_v18 = vsub.f32 %v5243_v14, %v11663_v61  ;;  %v11670_v14 = vld [vmem:[#allocation196_spill] sm:$0xff] }
 0x457   : > { %v9423_v60 = vpop.permute.xlu1 %3534  ;;  %v9425_v17 = vpop.permute.xlu0 %3549  ;;  %v3025_v61 = vsub.f32 %v5246_v7, %v11670_v14  ;;  %v5250_v14 = vld [vmem:[%s7146_s18 + $0xa8] sm:$0xff] }
 0x458   : > { %11660 = vst [vmem:[#allocation58_spill] sm:$0xff] %v9423_v60  ;;  %11661 = vst [vmem:[#allocation104_spill] sm:$0xff] %v9425_v17 }
 0x459   : > { %3968 = vperm.xlu1 %4905, %v3019_v43   ;;  %3993 = vperm.xlu0 %4906, %v3024_v12   ;;  %v5245_v43 = vld [vmem:[%s7146_s18 + $0xa0] sm:$0xff]  ;;  %v11667_v12 = vld [vmem:[#allocation204_spill] sm:$0xff] }
 0x45a   : > { %v3028_v60 = vsub.f32 %v5245_v43, %v11667_v12  ;;  %v11674_v43 = vld [vmem:[#allocation202_spill] sm:$0xff] }
 0x45b   : > { %v9431_v3 = vpop.permute.xlu1 %3544  ;;  %v9433_v0 = vpop.permute.xlu0 %3559  ;;  %v3027_v12 = vsub.f32 %v5248_v55, %v11674_v43  ;;  %v5252_v43 = vld [vmem:[%s7146_s18 + $0xb8] sm:$0xff] }
 0x45c   : > { %11664 = vst [vmem:[#allocation63_spill] sm:$0xff] %v9431_v3  ;;  %11665 = vst [vmem:[#allocation65_spill] sm:$0xff] %v9433_v0 }
 0x45d   : > { %3978 = vperm.xlu1 %4905, %v3021_v31   ;;  %4003 = vperm.xlu0 %4906, %v3026_v18   ;;  %v5247_v31 = vld [vmem:[%s7146_s18 + $0xb0] sm:$0xff]  ;;  %v11671_v18 = vld [vmem:[#allocation89_spill] sm:$0xff] }
 0x45e   : > { %v3030_v3 = vsub.f32 %v5247_v31, %v11671_v18  ;;  %v11678_v31 = vld [vmem:[#allocation195_spill] sm:$0xff] }
 0x45f   : > { %v9439_v17 = vpop.permute.xlu1 %3554  ;;  %v9441_v15 = vpop.permute.xlu0 %3569  ;;  %v3029_v18 = vsub.f32 %v5250_v14, %v11678_v31  ;;  %v5254_v31 = vld [vmem:[%s7146_s18 + $0xc8] sm:$0xff] }
 0x460   : > { %11668 = vst [vmem:[#allocation62_spill] sm:$0xff] %v9439_v17  ;;  %11669 = vst [vmem:[#allocation106_spill] sm:$0xff] %v9441_v15 }
 0x461   : > { %3988 = vperm.xlu1 %4905, %v3023_v56   ;;  %4013 = vperm.xlu0 %4906, %v3028_v60   ;;  %v5249_v56 = vld [vmem:[%s7146_s18 + $0xc0] sm:$0xff] }
 0x462   : > { %v11675_v60 = vld [vmem:[#allocation74_spill] sm:$0xff] }
 0x463   : > { %v9447_v0 = vpop.permute.xlu1 %3564  ;;  %v9449_v59 = vpop.permute.xlu0 %3579  ;;  %v3032_v17 = vsub.f32 %v5249_v56, %v11675_v60  ;;  %v11682_v56 = vld [vmem:[#allocation128_spill] sm:$0xff] }
 0x464   : > { %11672 = vst [vmem:[#allocation189_spill] sm:$0xff] %v9447_v0  ;;  %11673 = vst [vmem:[#allocation66_spill] sm:$0xff] %v9449_v59  ;;  %v3031_v60 = vsub.f32 %v5252_v43, %v11682_v56  ;;  %v5256_v56 = vld [vmem:[%s7146_s18 + $0xd8] sm:$0xff] }
 0x465   : > { %3998 = vperm.xlu1 %4905, %v3025_v61   ;;  %4023 = vperm.xlu0 %4906, %v3030_v3   ;;  %v5251_v61 = vld [vmem:[%s7146_s18 + $0xd0] sm:$0xff]  ;;  %v11679_v3 = vld [vmem:[#allocation33_spill] sm:$0xff] }
 0x466   : > { %v3034_v0 = vsub.f32 %v5251_v61, %v11679_v3  ;;  %v11686_v61 = vld [vmem:[#allocation115_spill] sm:$0xff] }
 0x467   : > { %v9455_v15 = vpop.permute.xlu1 %3574  ;;  %v9457_v7 = vpop.permute.xlu0 %3589  ;;  %v3033_v3 = vsub.f32 %v5254_v31, %v11686_v61  ;;  %v5258_v61 = vld [vmem:[%s7146_s18 + $0xe8] sm:$0xff] }
 0x468   : > { %11676 = vst [vmem:[#allocation198_spill] sm:$0xff] %v9455_v15  ;;  %11677 = vst [vmem:[#allocation108_spill] sm:$0xff] %v9457_v7 }
 0x469   : > { %4008 = vperm.xlu1 %4905, %v3027_v12   ;;  %4033 = vperm.xlu0 %4906, %v3032_v17   ;;  %v5253_v12 = vld [vmem:[%s7146_s18 + $0xe0] sm:$0xff]  ;;  %v11683_v17 = vld [vmem:[#allocation127_spill] sm:$0xff] }
 0x46a   : > { %v3036_v15 = vsub.f32 %v5253_v12, %v11683_v17  ;;  %v11690_v12 = vld [vmem:[#allocation144_spill] sm:$0xff] }
 0x46b   : > { %v9463_v59 = vpop.permute.xlu1 %3584  ;;  %v9465_v55 = vpop.permute.xlu0 %3599  ;;  %v3035_v17 = vsub.f32 %v5256_v56, %v11690_v12  ;;  %v5260_v12 = vld [vmem:[%s7146_s18 + $0xf8] sm:$0xff] }
 0x46c   : > { %11680 = vst [vmem:[#allocation107_spill] sm:$0xff] %v9463_v59  ;;  %11681 = vst [vmem:[#allocation133_spill] sm:$0xff] %v9465_v55 }
 0x46d   : > { %4018 = vperm.xlu1 %4905, %v3029_v18   ;;  %4043 = vperm.xlu0 %4906, %v3034_v0   ;;  %v5255_v18 = vld [vmem:[%s7146_s18 + $0xf0] sm:$0xff]  ;;  %v11687_v0 = vld [vmem:[#allocation117_spill] sm:$0xff] }
 0x46e   : > { %v3038_v59 = vsub.f32 %v5255_v18, %v11687_v0  ;;  %v11694_v18 = vld [vmem:[#allocation25_spill] sm:$0xff] }
 0x46f   : > { %v9471_v7 = vpop.permute.xlu1 %3594  ;;  %v9473_v14 = vpop.permute.xlu0 %3609  ;;  %v3037_v0 = vsub.f32 %v5258_v61, %v11694_v18  ;;  %v5262_v18 = vld [vmem:[%s7146_s18 + $0x108] sm:$0xff] }
 0x470   : > { %11684 = vst [vmem:[#allocation70_spill] sm:$0xff] %v9471_v7  ;;  %11685 = vst [vmem:[#allocation131_spill] sm:$0xff] %v9473_v14 }
 0x471   : > { %4028 = vperm.xlu1 %4905, %v3031_v60   ;;  %4053 = vperm.xlu0 %4906, %v3036_v15   ;;  %v5257_v60 = vld [vmem:[%s7146_s18 + $0x100] sm:$0xff]  ;;  %v11691_v15 = vld [vmem:[#allocation79_spill] sm:$0xff] }
 0x472   : > { %v3040_v7 = vsub.f32 %v5257_v60, %v11691_v15  ;;  %v11698_v60 = vld [vmem:[#allocation136_spill] sm:$0xff] }
 0x473   : > { %v9479_v55 = vpop.permute.xlu1 %3604  ;;  %v9481_v43 = vpop.permute.xlu0 %3619  ;;  %v3039_v15 = vsub.f32 %v5260_v12, %v11698_v60  ;;  %v5264_v60 = vld [vmem:[%s7146_s18 + $0x118] sm:$0xff] }
 0x474   : > { %11688 = vst [vmem:[#allocation24_spill] sm:$0xff] %v9479_v55  ;;  %11689 = vst [vmem:[#allocation73_spill] sm:$0xff] %v9481_v43 }
 0x475   : > { %4038 = vperm.xlu1 %4905, %v3033_v3   ;;  %4063 = vperm.xlu0 %4906, %v3038_v59   ;;  %v5259_v3 = vld [vmem:[%s7146_s18 + $0x110] sm:$0xff]  ;;  %v11695_v59 = vld [vmem:[#allocation2_spill] sm:$0xff] }
 0x476   : > { %v3042_v55 = vsub.f32 %v5259_v3, %v11695_v59  ;;  %v11702_v3 = vld [vmem:[#allocation83_spill] sm:$0xff] }
 0x477   : > { %v9487_v14 = vpop.permute.xlu1 %3614  ;;  %v9489_v31 = vpop.permute.xlu0 %3629  ;;  %v3041_v59 = vsub.f32 %v5262_v18, %v11702_v3  ;;  %v5266_v3 = vld [vmem:[%s7146_s18 + $0x128] sm:$0xff] }
 0x478   : > { %11692 = vst [vmem:[#allocation20_spill] sm:$0xff] %v9487_v14  ;;  %11693 = vst [vmem:[#allocation200_spill] sm:$0xff] %v9489_v31 }
 0x479   : > { %4048 = vperm.xlu1 %4905, %v3035_v17   ;;  %4073 = vperm.xlu0 %4906, %v3040_v7   ;;  %v5261_v17 = vld [vmem:[%s7146_s18 + $0x120] sm:$0xff]  ;;  %v11699_v7 = vld [vmem:[#allocation39_spill] sm:$0xff] }
 0x47a   : > { %v3044_v14 = vsub.f32 %v5261_v17, %v11699_v7  ;;  %v11706_v17 = vld [vmem:[#allocation41_spill] sm:$0xff] }
 0x47b   : > { %v9495_v43 = vpop.permute.xlu1 %3624  ;;  %v9497_v56 = vpop.permute.xlu0 %3639  ;;  %v3043_v7 = vsub.f32 %v5264_v60, %v11706_v17  ;;  %v5268_v17 = vld [vmem:[%s7146_s18 + $0x138] sm:$0xff] }
 0x47c   : > { %11696 = vst [vmem:[#allocation27_spill] sm:$0xff] %v9495_v43  ;;  %11697 = vst [vmem:[#allocation112_spill] sm:$0xff] %v9497_v56 }
 0x47d   : > { %4058 = vperm.xlu1 %4905, %v3037_v0   ;;  %4083 = vperm.xlu0 %4906, %v3042_v55   ;;  %v5263_v0 = vld [vmem:[%s7146_s18 + $0x130] sm:$0xff] }
 0x47e   : > { %v11703_v55 = vld [vmem:[#allocation84_spill] sm:$0xff] }
 0x47f   : > { %v9503_v31 = vpop.permute.xlu1 %3634  ;;  %v9505_v61 = vpop.permute.xlu0 %3649  ;;  %v3046_v43 = vsub.f32 %v5263_v0, %v11703_v55  ;;  %v11710_v0 = vld [vmem:[#allocation86_spill] sm:$0xff] }
 0x480   : > { %11700 = vst [vmem:[#allocation87_spill] sm:$0xff] %v9503_v31  ;;  %11701 = vst [vmem:[#allocation88_spill] sm:$0xff] %v9505_v61  ;;  %v3045_v55 = vsub.f32 %v5266_v3, %v11710_v0  ;;  %v5270_v0 = vld [vmem:[%s7146_s18 + $0x148] sm:$0xff] }
 0x481   : > { %4068 = vperm.xlu1 %4905, %v3039_v15   ;;  %4093 = vperm.xlu0 %4906, %v3044_v14   ;;  %v5265_v15 = vld [vmem:[%s7146_s18 + $0x140] sm:$0xff]  ;;  %v11707_v14 = vld [vmem:[#allocation3_spill] sm:$0xff] }
 0x482   : > { %v3048_v31 = vsub.f32 %v5265_v15, %v11707_v14  ;;  %v11713_v15 = vld [vmem:[#allocation43_spill] sm:$0xff] }
 0x483   : > { %v9511_v56 = vpop.permute.xlu1 %3644  ;;  %v9513_v12 = vpop.permute.xlu0 %3659  ;;  %v3047_v14 = vsub.f32 %v5268_v17, %v11713_v15  ;;  %v5272_v15 = vld [vmem:[%s7146_s18 + $0x158] sm:$0xff] }
 0x484   : > { %11704 = vst [vmem:[#allocation191_spill] sm:$0xff] %v9511_v56  ;;  %11705 = vst [vmem:[#allocation203_spill] sm:$0xff] %v9513_v12 }
 0x485   : > { %4078 = vperm.xlu1 %4905, %v3041_v59   ;;  %4103 = vperm.xlu0 %4906, %v3046_v43   ;;  %v5267_v59 = vld [vmem:[%s7146_s18 + $0x150] sm:$0xff]  ;;  %v11711_v43 = vld [vmem:[#allocation141_spill] sm:$0xff] }
 0x486   : > { %v3050_v56 = vsub.f32 %v5267_v59, %v11711_v43  ;;  %v11717_v59 = vld [vmem:[#allocation170_spill] sm:$0xff] }
 0x487   : > { %v9519_v61 = vpop.permute.xlu1 %3654  ;;  %v9521_v18 = vpop.permute.xlu0 %3669  ;;  %v3049_v43 = vsub.f32 %v5270_v0, %v11717_v59  ;;  %v11721_v59 = vld [vmem:[#allocation5_spill] sm:$0xff] }
 0x488   : > { %11708 = vst [vmem:[#allocation28_spill] sm:$0xff] %v9519_v61  ;;  %11709 = vst [vmem:[#allocation201_spill] sm:$0xff] %v9521_v18 }
 0x489   : > { %4088 = vperm.xlu1 %4905, %v3043_v7   ;;  %4113 = vperm.xlu0 %4906, %v3048_v31   ;;  %v5269_v7 = vld [vmem:[%s7146_s18 + $0x160] sm:$0xff] }
 0x48a   : > { %v11714_v31 = vld [vmem:[#allocation42_spill] sm:$0xff] }
 0x48b   : > { %v9527_v12 = vpop.permute.xlu1 %3664  ;;  %v9529_v60 = vpop.permute.xlu0 %3679  ;;  %v3052_v61 = vsub.f32 %v5269_v7, %v11714_v31  ;;  %v11719_v7 = vld [vmem:[#allocation8_spill] sm:$0xff] }
 0x48c   : > { %11712 = vst [vmem:[#allocation29_spill] sm:$0xff] %v9527_v12  ;;  %v3051_v31 = vsub.f32 %v5272_v15, %v11719_v7  ;;  %v5276_v7 = vld [vmem:[%s7146_s18 + $0x178] sm:$0xff] }
 0x48d   : > { %4098 = vperm.xlu1 %4905, %v3045_v55   ;;  %4123 = vperm.xlu0 %4906, %v3050_v56   ;;  %v5271_v55 = vld [vmem:[%s7146_s18 + $0x170] sm:$0xff] }
 0x48e   : > { %v3054_v56 = vsub.f32 %v5271_v55, %v8795_v4  ;;  %v5274_v4 = vld [vmem:[%s7146_s18 + $0x168] sm:$0xff] }
 0x48f   : > { %v9535_v18 = vpop.permute.xlu1 %3674  ;;  %v9537_v3 = vpop.permute.xlu0 %3689  ;;  %v3053_v55 = vsub.f32 %v5274_v4, %v11721_v59 }
 0x490   : > { %11715 = vst [vmem:[#allocation113_spill] sm:$0xff] %v9535_v18  ;;  %11716 = vst [vmem:[#allocation199_spill] sm:$0xff] %v9537_v3 }
 0x491   : > { %4108 = vperm.xlu1 %4905, %v3047_v14   ;;  %4133 = vperm.xlu0 %4906, %v3052_v61   ;;  %v5273_v14 = vld [vmem:[%s7146_s18 + $0x180] sm:$0xff]  ;;  %v11720_v61 = vld [vmem:[#allocation148_spill] sm:$0xff] }
 0x492   : > { %v3056_v18 = vsub.f32 %v5273_v14, %v11720_v61  ;;  %v3055_v14 = vsub.f32 %v5276_v7, %v8840_v52 }
 0x493   : > { %v9543_v12 = vpop.permute.xlu1 %3684  ;;  %v9545_v17 = vpop.permute.xlu0 %3699 }
 0x494   : > { %11718 = vst [vmem:[#allocation114_spill] sm:$0xff] %v9543_v12 }
 0x495   : > { %4118 = vperm.xlu1 %4905, %v3049_v43   ;;  %4143 = vperm.xlu0 %4906, %v3054_v56   ;;  %v5275_v43 = vld [vmem:[%s7146_s18 + $0x190] sm:$0xff] }
 0x496   : > { %v3058_v56 = vsub.f32 %v5275_v43, %v8843_v48  ;;  %v5278_v48 = vld [vmem:[%s7146_s18 + $0x188] sm:$0xff] }
 0x497   : > { %v9551_v3 = vpop.permute.xlu1 %3694  ;;  %v9553_v0 = vpop.permute.xlu0 %3709  ;;  %v3057_v59 = vsub.f32 %v5278_v48, %v8855_v20 }
 0x499   : > { %4128 = vperm.xlu1 %4905, %v3051_v31   ;;  %4153 = vperm.xlu0 %4906, %v3056_v18   ;;  %v5277_v31 = vld [vmem:[%s7146_s18 + $0x1a0] sm:$0xff] }
 0x49a   : > { %v3060_v18 = vsub.f32 %v5277_v31, %v8858_v42  ;;  %v5280_v42 = vld [vmem:[%s7146_s18 + $0x198] sm:$0xff] }
 0x49b   : > { %v9559_v12 = vpop.permute.xlu1 %3704  ;;  %v9561_v15 = vpop.permute.xlu0 %3719  ;;  %v3059_v7 = vsub.f32 %v5280_v42, %v8871_v37 }
 0x49d   : > { %4138 = vperm.xlu1 %4905, %v3053_v55   ;;  %4163 = vperm.xlu0 %4906, %v3058_v56   ;;  %v5279_v55 = vld [vmem:[%s7146_s18 + $0x1b0] sm:$0xff] }
 0x49e   : > { %v3062_v43 = vsub.f32 %v5279_v55, %v8874_v13  ;;  %v5282_v13 = vld [vmem:[%s7146_s18 + $0x1a8] sm:$0xff] }
 0x49f   : > { %v9567_v61 = vpop.permute.xlu1 %3714  ;;  %v9569_v4 = vpop.permute.xlu0 %3729  ;;  %v3061_v48 = vsub.f32 %v5282_v13, %v8887_v41 }
 0x4a1   : > { %4148 = vperm.xlu1 %4905, %v3055_v14   ;;  %4173 = vperm.xlu0 %4906, %v3060_v18   ;;  %v5281_v14 = vld [vmem:[%s7146_s18 + $0x1c0] sm:$0xff] }
 0x4a2   : > { %v3064_v31 = vsub.f32 %v5281_v14, %v8890_v29  ;;  %v5284_v29 = vld [vmem:[%s7146_s18 + $0x1b8] sm:$0xff] }
 0x4a3   : > { %v9575_v56 = vpop.permute.xlu1 %3724  ;;  %v9577_v52 = vpop.permute.xlu0 %3739  ;;  %v3063_v42 = vsub.f32 %v5284_v29, %v8903_v45 }
 0x4a5   : > { %4158 = vperm.xlu1 %4905, %v3057_v59   ;;  %4183 = vperm.xlu0 %4906, %v3062_v43   ;;  %v5283_v59 = vld [vmem:[%s7146_s18 + $0x1d0] sm:$0xff] }
 0x4a6   : > { %v3066_v55 = vsub.f32 %v5283_v59, %v8906_v54  ;;  %v5286_v54 = vld [vmem:[%s7146_s18 + $0x1c8] sm:$0xff] }
 0x4a7   : > { %v9583_v18 = vpop.permute.xlu1 %3734  ;;  %v9585_v20 = vpop.permute.xlu0 %3749  ;;  %v3065_v13 = vsub.f32 %v5286_v54, %v8919_v11  ;;  %v5290_v11 = vld [vmem:[%s5525_s15 + $0x8] sm:$0xff] }
 0x4a9   : > { %4168 = vperm.xlu1 %4905, %v3059_v7   ;;  %4193 = vperm.xlu0 %4906, %v3064_v31   ;;  %v5285_v7 = vld [vmem:[%s7146_s18 + $0x1e0] sm:$0xff] }
 0x4aa   : > { %v3068_v14 = vsub.f32 %v5285_v7, %v8922_v6  ;;  %v5288_v6 = vld [vmem:[%s7146_s18 + $0x1d8] sm:$0xff] }
 0x4ab   : > { %v9591_v43 = vpop.permute.xlu1 %3744  ;;  %v9593_v37 = vpop.permute.xlu0 %3759  ;;  %v3067_v29 = vsub.f32 %v5288_v6, %v8935_v5  ;;  %v5291_v5 = vld [vmem:[%s7146_s18 + $0x1e8] sm:$0xff] }
 0x4ad   : > { %4178 = vperm.xlu1 %4905, %v3061_v48   ;;  %4203 = vperm.xlu0 %4906, %v3066_v55   ;;  %v5287_v48 = vld [vmem:[%s7146_s18 + $0x1f0] sm:$0xff] }
 0x4ae   : > { %v3070_v59 = vsub.f32 %v5287_v48, %v8938_v32  ;;  %v3069_v48 = vsub.f32 %v5291_v5, %v8951_v63  ;;  %v5296_v5 = vld [vmem:[%s5525_s15 + $0x10] sm:$0xff] }
 0x4af   : > { %v9599_v31 = vpop.permute.xlu1 %3754  ;;  %v9601_v41 = vpop.permute.xlu0 %3769 }
 0x4b1   : > { %4188 = vperm.xlu1 %4905, %v3063_v42   ;;  %4213 = vperm.xlu0 %4906, %v3068_v14   ;;  %v5289_v42 = vld [vmem:[%s7146_s18 + $0x200] sm:$0xff]  ;;  %v3783_v14 = vmul.f32 %v5290_v11, %v9169_v51 }
 0x4b2   : > { %v3072_v7 = vsub.f32 %v5289_v42, %v8954_v8  ;;  %v5292_v8 = vld [vmem:[%s5525_s15] sm:$0xff] }
 0x4b3   : > { %v9607_v55 = vpop.permute.xlu1 %3764  ;;  %v9609_v45 = vpop.permute.xlu0 %3779  ;;  %v3782_v51 = vmul.f32 %v5292_v8, %v9167_v24  ;;  %v5298_v8 = vld [vmem:[%s5525_s15 + $0x30] sm:$0xff] }
 0x4b5   : > { %4198 = vperm.xlu1 %4905, %v3065_v13   ;;  %4223 = vperm.xlu0 %4906, %v3070_v59   ;;  %v5293_v59 = vld [vmem:[%s7146_s18 + $0x210] sm:$0xff] }
 0x4b6   : > { %v3074_v6 = vsub.f32 %v5293_v59, %v8969_v2  ;;  %v3784_v2 = vmul.f32 %v5296_v5, %v9173_v26  ;;  %v5299_v26 = vld [vmem:[%s7146_s18 + $0x208] sm:$0xff] }
 0x4b7   : > { %v9617_v32 = vpop.permute.xlu1 %3774 }
 0x4b8   : > { %v3919_v54 = vpop.permute.xlu0 %3918 }
 0x4b9   : > { %4208 = vperm.xlu1 %4905, %v3067_v29   ;;  %v4557_v13 = vadd.f32 %v3919_v54, %v3783_v14  ;;  %4233 = vperm.xlu0 %4906, %v3072_v7   ;;  %v5294_v29 = vld [vmem:[%s5525_s15 + $0x20] sm:$0xff]  ;;  %v5295_v54 = vld [vmem:[%s7146_s18 + $0x1f8] sm:$0xff] }
 0x4ba   : > { %v3786_v42 = vmul.f32 %v5294_v29, %v9175_v16  ;;  %v3071_v24 = vsub.f32 %v5295_v54, %v8966_v10  ;;  %v5297_v16 = vld [vmem:[%s7146_s18 + $0x220] sm:$0xff]  ;;  %v3073_v29 = vsub.f32 %v5299_v26, %v8976_v27  ;;  %v5306_v26 = vld [vmem:[%s5525_s15 + $0x50] sm:$0xff] }
 0x4bb   : > { %4686 = vst.msk [vmem:[%s9623_s22 + $0x8] sm:$0xff] %vm298_vm0, %v4557_v13  ;;  %v3076_v13 = vsub.f32 %v5297_v16, %v8979_v28  ;;  %v11724_v16 = vld [vmem:[#allocation152_spill] sm:$0xff] }
 0x4bc   : > { %v3914_v7 = vpop.permute.xlu1 %3913  ;;  %v3934_v63 = vpop.permute.xlu0 %3933 }
 0x4bd   : > { %v4556_v11 = vadd.f32 %v3914_v7, %v3782_v51  ;;  %4218 = vperm.xlu1 %4905, %v3069_v48   ;;  %v4560_v14 = vadd.f32 %v3934_v63, %v3786_v42  ;;  %4243 = vperm.xlu0 %4906, %v3074_v6   ;;  %v3788_v48 = vmul.f32 %v5298_v8, %v9181_v53  ;;  %v5300_v42 = vld [vmem:[%s5525_s15 + $0x18] sm:$0xff]  ;;  %v5301_v53 = vld [vmem:[%s7146_s18 + $0x230] sm:$0xff]  ;;  %v5302_v63 = vld [vmem:[%s5525_s15 + $0x40] sm:$0xff] }
 0x4be   : > { %v3785_v28 = vmul.f32 %v5300_v42, %v9179_v57  ;;  %v11722_v7 = vld [vmem:[#allocation160_spill] sm:$0xff]  ;;  %v5303_v57 = vld [vmem:[%s7146_s18 + $0x218] sm:$0xff]  ;;  %v5304_v8 = vld [vmem:[%s5525_s15 + $0x28] sm:$0xff] }
 0x4bf   : > { %4685 = vst.msk [vmem:[%s9623_s22] sm:$0xff] %vm298_vm0, %v4556_v11  ;;  %4689 = vst.msk [vmem:[%s9623_s22 + $0x20] sm:$0xff] %vm298_vm0, %v4560_v14  ;;  %v3078_v11 = vsub.f32 %v5301_v53, %v11722_v7  ;;  %v11723_v14 = vld [vmem:[#allocation187_spill] sm:$0xff] }
 0x4c0   : > { %v3924_v51 = vpop.permute.xlu1 %3923  ;;  %v3944_v59 = vpop.permute.xlu0 %3943  ;;  %v3790_v54 = vmul.f32 %v5302_v63, %v11723_v14  ;;  %v5307_v63 = vld [vmem:[%s7146_s18 + $0x228] sm:$0xff]  ;;  %v11728_v14 = vld [vmem:[#allocation44_spill] sm:$0xff] }
 0x4c1   : > { %v4558_v10 = vadd.f32 %v3924_v51, %v3784_v2  ;;  %4228 = vperm.xlu1 %4905, %v3071_v24   ;;  %v4562_v6 = vadd.f32 %v3944_v59, %v3788_v48  ;;  %4253 = vperm.xlu0 %4906, %v3076_v13   ;;  %v3075_v13 = vsub.f32 %v5303_v57, %v11724_v16  ;;  %v11725_v48 = vld [vmem:[#allocation193_spill] sm:$0xff]  ;;  %v11726_v59 = vld [vmem:[#allocation162_spill] sm:$0xff]  ;;  %v5309_v57 = vld [vmem:[%s7146_s18 + $0x250] sm:$0xff] }
 0x4c2   : > { %v3787_v51 = vmul.f32 %v5304_v8, %v11725_v48  ;;  %v5310_v8 = vld [vmem:[%s5525_s15 + $0x60] sm:$0xff] }
 0x4c3   : > { %4687 = vst.msk [vmem:[%s9623_s22 + $0x10] sm:$0xff] %vm298_vm0, %v4558_v10  ;;  %4691 = vst.msk [vmem:[%s9623_s22 + $0x30] sm:$0xff] %vm298_vm0, %v4562_v6  ;;  %v5305_v10 = vld [vmem:[%s7146_s18 + $0x240] sm:$0xff] }
 0x4c4   : > { %v3929_v24 = vpop.permute.xlu1 %3928  ;;  %v3954_v5 = vpop.permute.xlu0 %3953  ;;  %v3080_v6 = vsub.f32 %v5305_v10, %v11726_v59 }
 0x4c5   : > { %v4559_v27 = vadd.f32 %v3929_v24, %v3785_v28  ;;  %4238 = vperm.xlu1 %4905, %v3073_v29   ;;  %v4564_v2 = vadd.f32 %v3954_v5, %v3790_v54  ;;  %4263 = vperm.xlu0 %4906, %v3078_v11   ;;  %v11727_v29 = vld [vmem:[#allocation34_spill] sm:$0xff]  ;;  %v3077_v54 = vsub.f32 %v5307_v63, %v11728_v14  ;;  %v5308_v24 = vld [vmem:[%s5525_s15 + $0x38] sm:$0xff]  ;;  %v5314_v63 = vld [vmem:[%s5525_s15 + $0x70] sm:$0xff] }
 0x4c6   : > { %v3792_v42 = vmul.f32 %v5306_v26, %v11727_v29  ;;  %v11731_v26 = vld [vmem:[#allocation150_spill] sm:$0xff] }
 0x4c7   : > { %4688 = vst.msk [vmem:[%s9623_s22 + $0x18] sm:$0xff] %vm298_vm0, %v4559_v27  ;;  %4693 = vst.msk [vmem:[%s9623_s22 + $0x40] sm:$0xff] %vm298_vm0, %v4564_v2  ;;  %v11729_v27 = vld [vmem:[#allocation192_spill] sm:$0xff]  ;;  %v11730_v2 = vld [vmem:[#allocation163_spill] sm:$0xff] }
 0x4c8   : > { %v3939_v28 = vpop.permute.xlu1 %3938  ;;  %v3964_v7 = vpop.permute.xlu0 %3963  ;;  %v3789_v5 = vmul.f32 %v5308_v24, %v11729_v27  ;;  %v3082_v16 = vsub.f32 %v5309_v57, %v11730_v2  ;;  %v11734_v14 = vld [vmem:[#allocation126_spill] sm:$0xff]  ;;  %v5315_v2 = vld [vmem:[%s7146_s18 + $0x248] sm:$0xff] }
 0x4c9   : > { %v4561_v53 = vadd.f32 %v3939_v28, %v3787_v51  ;;  %4248 = vperm.xlu1 %4905, %v3075_v13   ;;  %v4566_v11 = vadd.f32 %v3964_v7, %v3792_v42  ;;  %4273 = vperm.xlu0 %4906, %v3080_v6   ;;  %v3794_v13 = vmul.f32 %v5310_v8, %v9199_v23  ;;  %v5311_v6 = vld [vmem:[%s7146_s18 + $0x238] sm:$0xff]  ;;  %v5312_v42 = vld [vmem:[%s5525_s15 + $0x48] sm:$0xff]  ;;  %v11732_v28 = vld [vmem:[#allocation122_spill] sm:$0xff] }
 0x4ca   : > { %v3079_v29 = vsub.f32 %v5311_v6, %v11731_v26  ;;  %v5313_v23 = vld [vmem:[%s7146_s18 + $0x260] sm:$0xff]  ;;  %v11733_v7 = vld [vmem:[#allocation48_spill] sm:$0xff] }
 0x4cb   : > { %4690 = vst.msk [vmem:[%s9623_s22 + $0x28] sm:$0xff] %vm298_vm0, %v4561_v53  ;;  %4695 = vst.msk [vmem:[%s9623_s22 + $0x50] sm:$0xff] %vm298_vm0, %v4566_v11  ;;  %v3791_v53 = vmul.f32 %v5312_v42, %v11732_v28  ;;  %v3084_v11 = vsub.f32 %v5313_v23, %v11733_v7  ;;  %v5318_v26 = vld [vmem:[%s5525_s15 + $0x80] sm:$0xff] }
 0x4cc   : > { %v3949_v48 = vpop.permute.xlu1 %3948  ;;  %v3974_v10 = vpop.permute.xlu0 %3973 }
 0x4cd   : > { %v4563_v51 = vadd.f32 %v3949_v48, %v3789_v5  ;;  %4258 = vperm.xlu1 %4905, %v3077_v54   ;;  %v4568_v59 = vadd.f32 %v3974_v10, %v3794_v13  ;;  %4283 = vperm.xlu0 %4906, %v3082_v16   ;;  %v3796_v54 = vmul.f32 %v5314_v63, %v11734_v14  ;;  %v11735_v16 = vld [vmem:[#allocation173_spill] sm:$0xff]  ;;  %v11736_v48 = vld [vmem:[#allocation123_spill] sm:$0xff]  ;;  %v5317_v10 = vld [vmem:[%s7146_s18 + $0x270] sm:$0xff] }
 0x4ce   : > { %v3081_v8 = vsub.f32 %v5315_v2, %v11735_v16  ;;  %v5316_v13 = vld [vmem:[%s5525_s15 + $0x58] sm:$0xff]  ;;  %v11739_v63 = vld [vmem:[#allocation164_spill] sm:$0xff] }
 0x4cf   : > { %4692 = vst.msk [vmem:[%s9623_s22 + $0x38] sm:$0xff] %vm298_vm0, %v4563_v51  ;;  %4697 = vst.msk [vmem:[%s9623_s22 + $0x60] sm:$0xff] %vm298_vm0, %v4568_v59  ;;  %v3793_v51 = vmul.f32 %v5316_v13, %v11736_v48  ;;  %v11737_v59 = vld [vmem:[#allocation10_spill] sm:$0xff]  ;;  %v5322_v16 = vld [vmem:[%s5525_s15 + $0x90] sm:$0xff] }
 0x4d0   : > { %v3959_v24 = vpop.permute.xlu1 %3958  ;;  %v3984_v5 = vpop.permute.xlu0 %3983  ;;  %v3086_v6 = vsub.f32 %v5317_v10, %v11737_v59 }
 0x4d1   : > { %v4565_v27 = vadd.f32 %v3959_v24, %v3791_v53  ;;  %4268 = vperm.xlu1 %4905, %v3079_v29   ;;  %v4570_v57 = vadd.f32 %v3984_v5, %v3796_v54  ;;  %4293 = vperm.xlu0 %4906, %v3084_v11   ;;  %v11738_v29 = vld [vmem:[#allocation130_spill] sm:$0xff]  ;;  %v5319_v11 = vld [vmem:[%s7146_s18 + $0x258] sm:$0xff]  ;;  %v5320_v54 = vld [vmem:[%s5525_s15 + $0x68] sm:$0xff] }
 0x4d2   : > { %v3798_v42 = vmul.f32 %v5318_v26, %v11738_v29  ;;  %v3083_v14 = vsub.f32 %v5319_v11, %v11739_v63  ;;  %v11740_v24 = vld [vmem:[#allocation78_spill] sm:$0xff]  ;;  %v11743_v26 = vld [vmem:[#allocation91_spill] sm:$0xff] }
 0x4d3   : > { %4694 = vst.msk [vmem:[%s9623_s22 + $0x48] sm:$0xff] %vm298_vm0, %v4565_v27  ;;  %4699 = vst.msk [vmem:[%s9623_s22 + $0x70] sm:$0xff] %vm298_vm0, %v4570_v57  ;;  %v3795_v27 = vmul.f32 %v5320_v54, %v11740_v24  ;;  %v5321_v5 = vld [vmem:[%s7146_s18 + $0x280] sm:$0xff]  ;;  %v11741_v57 = vld [vmem:[#allocation109_spill] sm:$0xff] }
 0x4d4   : > { %v3969_v28 = vpop.permute.xlu1 %3968  ;;  %v3994_v23 = vpop.permute.xlu0 %3993  ;;  %v3088_v2 = vsub.f32 %v5321_v5, %v11741_v57  ;;  %v5326_v63 = vld [vmem:[%s5525_s15 + $0xa0] sm:$0xff] }
 0x4d5   : > { %v4567_v53 = vadd.f32 %v3969_v28, %v3793_v51  ;;  %4278 = vperm.xlu1 %4905, %v3081_v8   ;;  %v4572_v7 = vadd.f32 %v3994_v23, %v3798_v42  ;;  %4303 = vperm.xlu0 %4906, %v3086_v6   ;;  %v11742_v8 = vld [vmem:[#allocation134_spill] sm:$0xff]  ;;  %v5323_v6 = vld [vmem:[%s7146_s18 + $0x268] sm:$0xff]  ;;  %v5324_v42 = vld [vmem:[%s5525_s15 + $0x78] sm:$0xff] }
 0x4d6   : > { %v3800_v13 = vmul.f32 %v5322_v16, %v11742_v8  ;;  %v3085_v29 = vsub.f32 %v5323_v6, %v11743_v26  ;;  %v11744_v28 = vld [vmem:[#allocation132_spill] sm:$0xff] }
 0x4d7   : > { %4696 = vst.msk [vmem:[%s9623_s22 + $0x58] sm:$0xff] %vm298_vm0, %v4567_v53  ;;  %4701 = vst.msk [vmem:[%s9623_s22 + $0x80] sm:$0xff] %vm298_vm0, %v4572_v7  ;;  %v3797_v53 = vmul.f32 %v5324_v42, %v11744_v28  ;;  %v5325_v23 = vld [vmem:[%s7146_s18 + $0x290] sm:$0xff]  ;;  %v11745_v7 = vld [vmem:[#allocation7_spill] sm:$0xff] }
 0x4d8   : > { %v3979_v48 = vpop.permute.xlu1 %3978  ;;  %v4004_v10 = vpop.permute.xlu0 %4003  ;;  %v3090_v11 = vsub.f32 %v5325_v23, %v11745_v7  ;;  %v11747_v16 = vld [vmem:[#allocation40_spill] sm:$0xff] }
 0x4d9   : > { %v4569_v51 = vadd.f32 %v3979_v48, %v3795_v27  ;;  %4288 = vperm.xlu1 %4905, %v3083_v14   ;;  %v4574_v59 = vadd.f32 %v4004_v10, %v3800_v13  ;;  %4313 = vperm.xlu0 %4906, %v3088_v2   ;;  %v11746_v14 = vld [vmem:[#allocation135_spill] sm:$0xff]  ;;  %v5327_v2 = vld [vmem:[%s7146_s18 + $0x278] sm:$0xff]  ;;  %v5329_v10 = vld [vmem:[%s7146_s18 + $0x2a0] sm:$0xff] }
 0x4da   : > { %v3802_v54 = vmul.f32 %v5326_v63, %v11746_v14  ;;  %v3087_v8 = vsub.f32 %v5327_v2, %v11747_v16  ;;  %v5328_v13 = vld [vmem:[%s5525_s15 + $0x88] sm:$0xff]  ;;  %v11748_v48 = vld [vmem:[#allocation137_spill] sm:$0xff]  ;;  %v5330_v26 = vld [vmem:[%s5525_s15 + $0xb0] sm:$0xff] }
 0x4db   : > { %4698 = vst.msk [vmem:[%s9623_s22 + $0x68] sm:$0xff] %vm298_vm0, %v4569_v51  ;;  %4703 = vst.msk [vmem:[%s9623_s22 + $0x90] sm:$0xff] %vm298_vm0, %v4574_v59  ;;  %v3799_v51 = vmul.f32 %v5328_v13, %v11748_v48  ;;  %v11749_v59 = vld [vmem:[#allocation50_spill] sm:$0xff]  ;;  %v11751_v63 = vld [vmem:[#allocation167_spill] sm:$0xff] }
 0x4dc   : > { %v3989_v24 = vpop.permute.xlu1 %3988  ;;  %v4014_v5 = vpop.permute.xlu0 %4013  ;;  %v3092_v6 = vsub.f32 %v5329_v10, %v11749_v59  ;;  %v5334_v16 = vld [vmem:[%s5525_s15 + $0xc0] sm:$0xff] }
 0x4dd   : > { %v4571_v27 = vadd.f32 %v3989_v24, %v3797_v53  ;;  %4298 = vperm.xlu1 %4905, %v3085_v29   ;;  %v4576_v57 = vadd.f32 %v4014_v5, %v3802_v54  ;;  %4323 = vperm.xlu0 %4906, %v3090_v11   ;;  %v11750_v29 = vld [vmem:[#allocation31_spill] sm:$0xff]  ;;  %v5332_v54 = vld [vmem:[%s5525_s15 + $0x98] sm:$0xff]  ;;  %v11752_v24 = vld [vmem:[#allocation140_spill] sm:$0xff] }
 0x4de   : > { %v3804_v42 = vmul.f32 %v5330_v26, %v11750_v29  ;;  %v5331_v11 = vld [vmem:[%s7146_s18 + $0x288] sm:$0xff]  ;;  %v5333_v5 = vld [vmem:[%s7146_s18 + $0x2b0] sm:$0xff] }
 0x4df   : > { %4700 = vst.msk [vmem:[%s9623_s22 + $0x78] sm:$0xff] %vm298_vm0, %v4571_v27  ;;  %4705 = vst.msk [vmem:[%s9623_s22 + $0xa0] sm:$0xff] %vm298_vm0, %v4576_v57  ;;  %v3089_v14 = vsub.f32 %v5331_v11, %v11751_v63  ;;  %v3801_v27 = vmul.f32 %v5332_v54, %v11752_v24  ;;  %v11753_v57 = vld [vmem:[#allocation161_spill] sm:$0xff]  ;;  %v11755_v26 = vld [vmem:[#allocation156_spill] sm:$0xff] }
 0x4e0   : > { %v3999_v28 = vpop.permute.xlu1 %3998  ;;  %v4024_v23 = vpop.permute.xlu0 %4023  ;;  %v3094_v2 = vsub.f32 %v5333_v5, %v11753_v57  ;;  %v5338_v63 = vld [vmem:[%s5525_s15 + $0xd0] sm:$0xff] }
 0x4e1   : > { %v4573_v53 = vadd.f32 %v3999_v28, %v3799_v51  ;;  %4308 = vperm.xlu1 %4905, %v3087_v8   ;;  %v4578_v7 = vadd.f32 %v4024_v23, %v3804_v42  ;;  %4333 = vperm.xlu0 %4906, %v3092_v6   ;;  %v11754_v8 = vld [vmem:[#allocation205_spill] sm:$0xff]  ;;  %v5336_v42 = vld [vmem:[%s5525_s15 + $0xa8] sm:$0xff]  ;;  %v11756_v28 = vld [vmem:[#allocation206_spill] sm:$0xff] }
 0x4e2   : > { %v3806_v13 = vmul.f32 %v5334_v16, %v11754_v8  ;;  %v5335_v6 = vld [vmem:[%s7146_s18 + $0x298] sm:$0xff]  ;;  %v5337_v23 = vld [vmem:[%s7146_s18 + $0x2c0] sm:$0xff]  ;;  %v11759_v16 = vld [vmem:[#allocation55_spill] sm:$0xff] }
 0x4e3   : > { %4702 = vst.msk [vmem:[%s9623_s22 + $0x88] sm:$0xff] %vm298_vm0, %v4573_v53  ;;  %4707 = vst.msk [vmem:[%s9623_s22 + $0xb0] sm:$0xff] %vm298_vm0, %v4578_v7  ;;  %v3091_v29 = vsub.f32 %v5335_v6, %v11755_v26  ;;  %v3803_v53 = vmul.f32 %v5336_v42, %v11756_v28  ;;  %v11757_v7 = vld [vmem:[#allocation52_spill] sm:$0xff]  ;;  %v5342_v26 = vld [vmem:[%s5525_s15 + $0xe0] sm:$0xff] }
 0x4e4   : > { %v4009_v48 = vpop.permute.xlu1 %4008  ;;  %v4034_v10 = vpop.permute.xlu0 %4033  ;;  %v3096_v11 = vsub.f32 %v5337_v23, %v11757_v7 }
 0x4e5   : > { %v4575_v51 = vadd.f32 %v4009_v48, %v3801_v27  ;;  %4318 = vperm.xlu1 %4905, %v3089_v14   ;;  %v4580_v59 = vadd.f32 %v4034_v10, %v3806_v13  ;;  %4343 = vperm.xlu0 %4906, %v3094_v2   ;;  %v11758_v14 = vld [vmem:[#allocation147_spill] sm:$0xff]  ;;  %v5340_v13 = vld [vmem:[%s5525_s15 + $0xb8] sm:$0xff]  ;;  %v11760_v48 = vld [vmem:[#allocation30_spill] sm:$0xff] }
 0x4e6   : > { %v3808_v54 = vmul.f32 %v5338_v63, %v11758_v14  ;;  %v5339_v2 = vld [vmem:[%s7146_s18 + $0x2a8] sm:$0xff]  ;;  %v5341_v10 = vld [vmem:[%s7146_s18 + $0x2d0] sm:$0xff] }
 0x4e7   : > { %4704 = vst.msk [vmem:[%s9623_s22 + $0x98] sm:$0xff] %vm298_vm0, %v4575_v51  ;;  %4709 = vst.msk [vmem:[%s9623_s22 + $0xc0] sm:$0xff] %vm298_vm0, %v4580_v59  ;;  %v3093_v8 = vsub.f32 %v5339_v2, %v11759_v16  ;;  %v3805_v51 = vmul.f32 %v5340_v13, %v11760_v48  ;;  %v11761_v59 = vld [vmem:[#allocation165_spill] sm:$0xff]  ;;  %v11763_v63 = vld [vmem:[#allocation95_spill] sm:$0xff] }
 0x4e8   : > { %v4019_v24 = vpop.permute.xlu1 %4018  ;;  %v4044_v5 = vpop.permute.xlu0 %4043  ;;  %v3098_v6 = vsub.f32 %v5341_v10, %v11761_v59  ;;  %v5346_v16 = vld [vmem:[%s5525_s15 + $0xf0] sm:$0xff] }
 0x4e9   : > { %v4577_v27 = vadd.f32 %v4019_v24, %v3803_v53  ;;  %4328 = vperm.xlu1 %4905, %v3091_v29   ;;  %v4582_v57 = vadd.f32 %v4044_v5, %v3808_v54  ;;  %4353 = vperm.xlu0 %4906, %v3096_v11   ;;  %v11762_v29 = vld [vmem:[#allocation35_spill] sm:$0xff]  ;;  %v5343_v11 = vld [vmem:[%s7146_s18 + $0x2b8] sm:$0xff]  ;;  %v11764_v24 = vld [vmem:[#allocation90_spill] sm:$0xff] }
 0x4ea   : > { %v3810_v42 = vmul.f32 %v5342_v26, %v11762_v29  ;;  %v3095_v14 = vsub.f32 %v5343_v11, %v11763_v63  ;;  %v5344_v54 = vld [vmem:[%s5525_s15 + $0xc8] sm:$0xff]  ;;  %v5345_v5 = vld [vmem:[%s7146_s18 + $0x2e0] sm:$0xff] }
 0x4eb   : > { %4706 = vst.msk [vmem:[%s9623_s22 + $0xa8] sm:$0xff] %vm298_vm0, %v4577_v27  ;;  %4711 = vst.msk [vmem:[%s9623_s22 + $0xd0] sm:$0xff] %vm298_vm0, %v4582_v57  ;;  %v3807_v27 = vmul.f32 %v5344_v54, %v11764_v24  ;;  %v11765_v57 = vld [vmem:[#allocation57_spill] sm:$0xff]  ;;  %v11767_v26 = vld [vmem:[#allocation54_spill] sm:$0xff] }
 0x4ec   : > { %v4029_v28 = vpop.permute.xlu1 %4028  ;;  %v4054_v23 = vpop.permute.xlu0 %4053  ;;  %v3100_v2 = vsub.f32 %v5345_v5, %v11765_v57  ;;  %v5350_v63 = vld [vmem:[%s5525_s15 + $0x100] sm:$0xff] }
 0x4ed   : > { %v4579_v53 = vadd.f32 %v4029_v28, %v3805_v51  ;;  %4338 = vperm.xlu1 %4905, %v3093_v8   ;;  %v4584_v7 = vadd.f32 %v4054_v23, %v3810_v42  ;;  %4363 = vperm.xlu0 %4906, %v3098_v6   ;;  %v11766_v8 = vld [vmem:[#allocation146_spill] sm:$0xff]  ;;  %v5347_v6 = vld [vmem:[%s7146_s18 + $0x2c8] sm:$0xff]  ;;  %v5348_v42 = vld [vmem:[%s5525_s15 + $0xd8] sm:$0xff] }
 0x4ee   : > { %v3812_v13 = vmul.f32 %v5346_v16, %v11766_v8  ;;  %v3097_v29 = vsub.f32 %v5347_v6, %v11767_v26  ;;  %v11768_v28 = vld [vmem:[#allocation143_spill] sm:$0xff]  ;;  %v5349_v23 = vld [vmem:[%s7146_s18 + $0x2f0] sm:$0xff] }
 0x4ef   : > { %4708 = vst.msk [vmem:[%s9623_s22 + $0xb8] sm:$0xff] %vm298_vm0, %v4579_v53  ;;  %4713 = vst.msk [vmem:[%s9623_s22 + $0xe0] sm:$0xff] %vm298_vm0, %v4584_v7  ;;  %v3809_v53 = vmul.f32 %v5348_v42, %v11768_v28  ;;  %v11769_v7 = vld [vmem:[#allocation98_spill] sm:$0xff]  ;;  %v11771_v16 = vld [vmem:[#allocation12_spill] sm:$0xff] }
 0x4f0   : > { %v4039_v48 = vpop.permute.xlu1 %4038  ;;  %v4064_v10 = vpop.permute.xlu0 %4063  ;;  %v3102_v11 = vsub.f32 %v5349_v23, %v11769_v7  ;;  %v5354_v26 = vld [vmem:[%s5525_s15 + $0x110] sm:$0xff] }
 0x4f1   : > { %v4581_v51 = vadd.f32 %v4039_v48, %v3807_v27  ;;  %4348 = vperm.xlu1 %4905, %v3095_v14   ;;  %v4586_v59 = vadd.f32 %v4064_v10, %v3812_v13  ;;  %4373 = vperm.xlu0 %4906, %v3100_v2   ;;  %v11770_v14 = vld [vmem:[#allocation149_spill] sm:$0xff]  ;;  %v5352_v13 = vld [vmem:[%s5525_s15 + $0xe8] sm:$0xff]  ;;  %v5353_v10 = vld [vmem:[%s7146_s18 + $0x300] sm:$0xff] }
 0x4f2   : > { %v3814_v54 = vmul.f32 %v5350_v63, %v11770_v14  ;;  %v5351_v2 = vld [vmem:[%s7146_s18 + $0x2d8] sm:$0xff] }
 0x4f3   : > { %4710 = vst.msk [vmem:[%s9623_s22 + $0xc8] sm:$0xff] %vm298_vm0, %v4581_v51  ;;  %4715 = vst.msk [vmem:[%s9623_s22 + $0xf0] sm:$0xff] %vm298_vm0, %v4586_v59  ;;  %v3099_v8 = vsub.f32 %v5351_v2, %v11771_v16  ;;  %v11772_v48 = vld [vmem:[#allocation145_spill] sm:$0xff]  ;;  %v11773_v59 = vld [vmem:[#allocation168_spill] sm:$0xff] }
 0x4f4   : > { %v4049_v24 = vpop.permute.xlu1 %4048  ;;  %v4074_v5 = vpop.permute.xlu0 %4073  ;;  %v3811_v51 = vmul.f32 %v5352_v13, %v11772_v48  ;;  %v3104_v6 = vsub.f32 %v5353_v10, %v11773_v59  ;;  %v11775_v63 = vld [vmem:[#allocation9_spill] sm:$0xff]  ;;  %v5358_v16 = vld [vmem:[%s5525_s15 + $0x120] sm:$0xff] }
 0x4f5   : > { %v4583_v27 = vadd.f32 %v4049_v24, %v3809_v53  ;;  %4358 = vperm.xlu1 %4905, %v3097_v29   ;;  %v4588_v57 = vadd.f32 %v4074_v5, %v3814_v54  ;;  %4383 = vperm.xlu0 %4906, %v3102_v11   ;;  %v11774_v29 = vld [vmem:[#allocation32_spill] sm:$0xff]  ;;  %v5355_v11 = vld [vmem:[%s7146_s18 + $0x2e8] sm:$0xff]  ;;  %v5356_v54 = vld [vmem:[%s5525_s15 + $0xf8] sm:$0xff] }
 0x4f6   : > { %v3816_v42 = vmul.f32 %v5354_v26, %v11774_v29  ;;  %v3101_v14 = vsub.f32 %v5355_v11, %v11775_v63  ;;  %v11776_v24 = vld [vmem:[#allocation37_spill] sm:$0xff]  ;;  %v5357_v5 = vld [vmem:[%s7146_s18 + $0x310] sm:$0xff]  ;;  %v5360_v29 = vld [vmem:[%s5525_s15 + $0x108] sm:$0xff] }
 0x4f7   : > { %4712 = vst.msk [vmem:[%s9623_s22 + $0xd8] sm:$0xff] %vm298_vm0, %v4583_v27  ;;  %4717 = vst.msk [vmem:[%s9623_s22 + $0x100] sm:$0xff] %vm298_vm0, %v4588_v57  ;;  %v3813_v27 = vmul.f32 %v5356_v54, %v11776_v24  ;;  %v11777_v57 = vld [vmem:[#allocation175_spill] sm:$0xff]  ;;  %v5359_v59 = vld [vmem:[%s7146_s18 + $0x2f8] sm:$0xff] }
 0x4f8   : > { %v4059_v28 = vpop.permute.xlu1 %4058  ;;  %v4084_v23 = vpop.permute.xlu0 %4083  ;;  %v3106_v2 = vsub.f32 %v5357_v5, %v11777_v57  ;;  %v5364_v57 = vld [vmem:[%s5525_s15 + $0x118] sm:$0xff] }
 0x4f9   : > { %v4585_v53 = vadd.f32 %v4059_v28, %v3811_v51  ;;  %4368 = vperm.xlu1 %4905, %v3099_v8   ;;  %v4590_v7 = vadd.f32 %v4084_v23, %v3816_v42  ;;  %4393 = vperm.xlu0 %4906, %v3104_v6   ;;  %v3818_v8 = vmul.f32 %v5358_v16, %v9271_v62  ;;  %v11778_v6 = vld [vmem:[#allocation172_spill] sm:$0xff]  ;;  %v5361_v62 = vld [vmem:[%s7146_s18 + $0x320] sm:$0xff] }
 0x4fa   : > { %v3103_v26 = vsub.f32 %v5359_v59, %v11778_v6  ;;  %v3815_v42 = vmul.f32 %v5360_v29, %v9269_v22  ;;  %v11779_v28 = vld [vmem:[#allocation100_spill] sm:$0xff]  ;;  %v5363_v22 = vld [vmem:[%s7146_s18 + $0x308] sm:$0xff] }
 0x4fb   : > { %4714 = vst.msk [vmem:[%s9623_s22 + $0xe8] sm:$0xff] %vm298_vm0, %v4585_v53  ;;  %4719 = vst.msk [vmem:[%s9623_s22 + $0x110] sm:$0xff] %vm298_vm0, %v4590_v7  ;;  %v3108_v53 = vsub.f32 %v5361_v62, %v11779_v28  ;;  %v5362_v23 = vld [vmem:[%s5525_s15 + $0x130] sm:$0xff]  ;;  %v11780_v7 = vld [vmem:[#allocation153_spill] sm:$0xff] }
 0x4fc   : > { %v4069_v13 = vpop.permute.xlu1 %4068  ;;  %v4094_v51 = vpop.permute.xlu0 %4093  ;;  %v3820_v11 = vmul.f32 %v5362_v23, %v11780_v7  ;;  %v11784_v62 = vld [vmem:[#allocation11_spill] sm:$0xff]  ;;  %v11785_v23 = vld [vmem:[#allocation38_spill] sm:$0xff] }
 0x4fd   : > { %v4587_v48 = vadd.f32 %v4069_v13, %v3813_v27  ;;  %4378 = vperm.xlu1 %4905, %v3101_v14   ;;  %v4592_v10 = vadd.f32 %v4094_v51, %v3818_v8  ;;  %4403 = vperm.xlu0 %4906, %v3106_v2   ;;  %v11781_v27 = vld [vmem:[#allocation13_spill] sm:$0xff]  ;;  %v11782_v2 = vld [vmem:[#allocation36_spill] sm:$0xff]  ;;  %v11783_v13 = vld [vmem:[#allocation102_spill] sm:$0xff] }
 0x4fe   : > { %v3105_v5 = vsub.f32 %v5363_v22, %v11781_v27  ;;  %v3817_v16 = vmul.f32 %v5364_v57, %v11782_v2  ;;  %v5365_v8 = vld [vmem:[%s7146_s18 + $0x330] sm:$0xff]  ;;  %v5366_v51 = vld [vmem:[%s5525_s15 + $0x140] sm:$0xff]  ;;  %v5371_v57 = vld [vmem:[%s7146_s18 + $0x328] sm:$0xff] }
 0x4ff   : > { %4716 = vst.msk [vmem:[%s9623_s22 + $0xf8] sm:$0xff] %vm298_vm0, %v4587_v48  ;;  %4721 = vst.msk [vmem:[%s9623_s22 + $0x120] sm:$0xff] %vm298_vm0, %v4592_v10  ;;  %v3110_v48 = vsub.f32 %v5365_v8, %v11783_v13  ;;  %v3822_v10 = vmul.f32 %v5366_v51, %v9283_v25  ;;  %v5369_v25 = vld [vmem:[%s7146_s18 + $0x340] sm:$0xff]  ;;  %v11787_v2 = vld [vmem:[#allocation176_spill] sm:$0xff] }
 0x500   : > { %v4079_v63 = vpop.permute.xlu1 %4078  ;;  %v4104_v54 = vpop.permute.xlu0 %4103  ;;  %v5372_v8 = vld [vmem:[%s5525_s15 + $0x138] sm:$0xff] }
 0x501   : > { %v4589_v14 = vadd.f32 %v4079_v63, %v3815_v42  ;;  %4388 = vperm.xlu1 %4905, %v3103_v26   ;;  %v4594_v24 = vadd.f32 %v4104_v54, %v3820_v11  ;;  %4413 = vperm.xlu0 %4906, %v3108_v53   ;;  %v5367_v42 = vld [vmem:[%s7146_s18 + $0x318] sm:$0xff]  ;;  %v5368_v53 = vld [vmem:[%s5525_s15 + $0x128] sm:$0xff]  ;;  %v3821_v13 = vmul.f32 %v5372_v8, %v9287_v1 }
 0x502   : > { %v3107_v28 = vsub.f32 %v5367_v42, %v11784_v62  ;;  %v3819_v7 = vmul.f32 %v5368_v53, %v11785_v23  ;;  %v11786_v11 = vld [vmem:[#allocation101_spill] sm:$0xff]  ;;  %v11789_v62 = vld [vmem:[#allocation14_spill] sm:$0xff]  ;;  %v5376_v53 = vld [vmem:[%s5525_s15 + $0x148] sm:$0xff] }
 0x503   : > { %4718 = vst.msk [vmem:[%s9623_s22 + $0x108] sm:$0xff] %vm298_vm0, %v4589_v14  ;;  %4723 = vst.msk [vmem:[%s9623_s22 + $0x130] sm:$0xff] %vm298_vm0, %v4594_v24  ;;  %v3112_v63 = vsub.f32 %v5369_v25, %v11786_v11  ;;  %v5370_v14 = vld [vmem:[%s5525_s15 + $0x150] sm:$0xff]  ;;  %v5375_v1 = vld [vmem:[%s7146_s18 + $0x338] sm:$0xff]  ;;  %v3823_v23 = vmul.f32 %v5376_v53, %v9293_v58 }
 0x504   : > { %v4089_v59 = vpop.permute.xlu1 %4088  ;;  %v4114_v26 = vpop.permute.xlu0 %4113  ;;  %v3824_v54 = vmul.f32 %v5370_v14, %v9289_v50  ;;  %v5373_v50 = vld [vmem:[%s7146_s18 + $0x350] sm:$0xff]  ;;  %v5379_v58 = vld [vmem:[%s7146_s18 + $0x348] sm:$0xff] }
 0x505   : > { %v4591_v6 = vadd.f32 %v4089_v59, %v3817_v16  ;;  %4398 = vperm.xlu1 %4905, %v3105_v5   ;;  %v4596_v29 = vadd.f32 %v4114_v26, %v3822_v10  ;;  %4423 = vperm.xlu0 %4906, %v3110_v48   ;;  %v3109_v16 = vsub.f32 %v5371_v57, %v11787_v2  ;;  %v11788_v48 = vld [vmem:[#allocation174_spill] sm:$0xff]  ;;  %v5378_v11 = vld [vmem:[%s5525_s15 + $0x170] sm:$0xff]  ;;  %v5380_v57 = vld [vmem:[%s5525_s15 + $0x158] sm:$0xff] }
 0x506   : > { %v3114_v51 = vsub.f32 %v5373_v50, %v11788_v48  ;;  %v5374_v10 = vld [vmem:[%s5525_s15 + $0x160] sm:$0xff]  ;;  %v3825_v2 = vmul.f32 %v5380_v57, %v9299_v33  ;;  %v5383_v33 = vld [vmem:[%s7146_s18 + $0x358] sm:$0xff] }
 0x507   : > { %4720 = vst.msk [vmem:[%s9623_s22 + $0x118] sm:$0xff] %vm298_vm0, %v4591_v6  ;;  %4725 = vst.msk [vmem:[%s9623_s22 + $0x140] sm:$0xff] %vm298_vm0, %v4596_v29  ;;  %v3826_v59 = vmul.f32 %v5374_v10, %v9295_v44  ;;  %v5377_v44 = vld [vmem:[%s7146_s18 + $0x360] sm:$0xff] }
 0x508   : > { %v4099_v24 = vpop.permute.xlu1 %4098  ;;  %v4124_v27 = vpop.permute.xlu0 %4123 }
 0x509   : > { %v4593_v22 = vadd.f32 %v4099_v24, %v3819_v7  ;;  %4408 = vperm.xlu1 %4905, %v3107_v28   ;;  %v4598_v5 = vadd.f32 %v4124_v27, %v3824_v54  ;;  %4433 = vperm.xlu0 %4906, %v3112_v63   ;;  %v3111_v28 = vsub.f32 %v5375_v1, %v11789_v62  ;;  %v11790_v7 = vld [vmem:[#allocation119_spill] sm:$0xff]  ;;  %v11794_v1 = vld [vmem:[#allocation178_spill] sm:$0xff] }
 0x50a   : > { %v3116_v25 = vsub.f32 %v5377_v44, %v11790_v7  ;;  %v3828_v63 = vmul.f32 %v5378_v11, %v9301_v39  ;;  %v11791_v27 = vld [vmem:[#allocation179_spill] sm:$0xff]  ;;  %v5381_v39 = vld [vmem:[%s7146_s18 + $0x370] sm:$0xff]  ;;  %v11795_v11 = vld [vmem:[#allocation177_spill] sm:$0xff] }
 0x50b   : > { %4722 = vst.msk [vmem:[%s9623_s22 + $0x128] sm:$0xff] %vm298_vm0, %v4593_v22  ;;  %4727 = vst.msk [vmem:[%s9623_s22 + $0x150] sm:$0xff] %vm298_vm0, %v4598_v5  ;;  %v3113_v5 = vsub.f32 %v5379_v58, %v11791_v27  ;;  %v5390_v58 = vld [vmem:[%s5525_s15 + $0x1a0] sm:$0xff] }
 0x50c   : > { %v4109_v6 = vpop.permute.xlu1 %4108  ;;  %v4134_v29 = vpop.permute.xlu0 %4133  ;;  %v3834_v27 = vmul.f32 %v5390_v58, %v9319_v40  ;;  %v5393_v40 = vld [vmem:[%s7146_s18 + $0x3a0] sm:$0xff]  ;;  %v5402_v58 = vld [vmem:[%s5525_s15 + $0x1d0] sm:$0xff] }
 0x50d   : > { %v4595_v26 = vadd.f32 %v4109_v6, %v3821_v13  ;;  %4418 = vperm.xlu1 %4905, %v3109_v16   ;;  %v4600_v42 = vadd.f32 %v4134_v29, %v3826_v59  ;;  %4443 = vperm.xlu0 %4906, %v3114_v51   ;;  %v11792_v16 = vld [vmem:[#allocation103_spill] sm:$0xff]  ;;  %v5382_v13 = vld [vmem:[%s5525_s15 + $0x180] sm:$0xff] }
 0x50e   : > { %v3118_v8 = vsub.f32 %v5381_v39, %v11792_v16  ;;  %v3830_v50 = vmul.f32 %v5382_v13, %v9307_v19  ;;  %v11793_v6 = vld [vmem:[#allocation15_spill] sm:$0xff]  ;;  %v5385_v19 = vld [vmem:[%s7146_s18 + $0x380] sm:$0xff] }
 0x50f   : > { %4724 = vst.msk [vmem:[%s9623_s22 + $0x138] sm:$0xff] %vm298_vm0, %v4595_v26  ;;  %4729 = vst.msk [vmem:[%s9623_s22 + $0x160] sm:$0xff] %vm298_vm0, %v4600_v42  ;;  %v3115_v26 = vsub.f32 %v5383_v33, %v11793_v6  ;;  %v5384_v29 = vld [vmem:[%s5525_s15 + $0x168] sm:$0xff]  ;;  %v3120_v62 = vsub.f32 %v5385_v19, %v11794_v1  ;;  %v11797_v16 = vld [vmem:[#allocation190_spill] sm:$0xff] }
 0x510   : > { %v4119_v14 = vpop.permute.xlu1 %4118  ;;  %v4144_v24 = vpop.permute.xlu0 %4143  ;;  %v3827_v42 = vmul.f32 %v5384_v29, %v9305_v30  ;;  %v5387_v30 = vld [vmem:[%s7146_s18 + $0x368] sm:$0xff]  ;;  %v5396_v1 = vld [vmem:[%s5525_s15 + $0x198] sm:$0xff] }
 0x511   : > { %v4597_v54 = vadd.f32 %v4119_v14, %v3823_v23  ;;  %4428 = vperm.xlu1 %4905, %v3111_v28   ;;  %v4602_v22 = vadd.f32 %v4144_v24, %v3828_v63  ;;  %4453 = vperm.xlu0 %4906, %v3116_v25   ;;  %v5386_v28 = vld [vmem:[%s5525_s15 + $0x190] sm:$0xff]  ;;  %v3117_v63 = vsub.f32 %v5387_v30, %v11795_v11  ;;  %v5388_v14 = vld [vmem:[%s5525_s15 + $0x178] sm:$0xff]  ;;  %v11796_v24 = vld [vmem:[#allocation183_spill] sm:$0xff] }
 0x512   : > { %v3832_v53 = vmul.f32 %v5386_v28, %v9313_v35  ;;  %v5389_v35 = vld [vmem:[%s7146_s18 + $0x390] sm:$0xff]  ;;  %v5392_v13 = vld [vmem:[%s5525_s15 + $0x188] sm:$0xff]  ;;  %v11800_v28 = vld [vmem:[#allocation125_spill] sm:$0xff] }
 0x513   : > { %4726 = vst.msk [vmem:[%s9623_s22 + $0x148] sm:$0xff] %vm298_vm0, %v4597_v54  ;;  %4731 = vst.msk [vmem:[%s9623_s22 + $0x170] sm:$0xff] %vm298_vm0, %v4602_v22  ;;  %v3829_v54 = vmul.f32 %v5388_v14, %v9311_v36  ;;  %v3122_v22 = vsub.f32 %v5389_v35, %v11796_v24  ;;  %v5391_v36 = vld [vmem:[%s7146_s18 + $0x378] sm:$0xff] }
 0x514   : > { %v4129_v48 = vpop.permute.xlu1 %4128  ;;  %v4154_v10 = vpop.permute.xlu0 %4153  ;;  %v11802_v24 = vld [vmem:[#allocation105_spill] sm:$0xff] }
 0x515   : > { %v4599_v51 = vadd.f32 %v4129_v48, %v3825_v2  ;;  %4438 = vperm.xlu1 %4905, %v3113_v5   ;;  %v4604_v59 = vadd.f32 %v4154_v10, %v3830_v50  ;;  %4463 = vperm.xlu0 %4906, %v3118_v8   ;;  %v3119_v8 = vsub.f32 %v5391_v36, %v11797_v16  ;;  %v11798_v48 = vld [vmem:[#allocation60_spill] sm:$0xff] }
 0x516   : > { %v3831_v50 = vmul.f32 %v5392_v13, %v9317_v21  ;;  %v5394_v10 = vld [vmem:[%s5525_s15 + $0x1b0] sm:$0xff]  ;;  %v5395_v21 = vld [vmem:[%s7146_s18 + $0x388] sm:$0xff] }
 0x517   : > { %4728 = vst.msk [vmem:[%s9623_s22 + $0x158] sm:$0xff] %vm298_vm0, %v4599_v51  ;;  %4733 = vst.msk [vmem:[%s9623_s22 + $0x180] sm:$0xff] %vm298_vm0, %v4604_v59  ;;  %v3124_v51 = vsub.f32 %v5393_v40, %v11798_v48  ;;  %v3836_v59 = vmul.f32 %v5394_v10, %v9325_v46  ;;  %v5397_v46 = vld [vmem:[%s7146_s18 + $0x3b0] sm:$0xff]  ;;  %v5406_v48 = vld [vmem:[%s5525_s15 + $0x1e0] sm:$0xff] }
 0x518   : > { %v4139_v23 = vpop.permute.xlu1 %4138  ;;  %v4164_v7 = vpop.permute.xlu0 %4163  ;;  %v11803_v36 = vld [vmem:[#allocation64_spill] sm:$0xff] }
 0x519   : > { %v4601_v44 = vadd.f32 %v4139_v23, %v3827_v42  ;;  %4448 = vperm.xlu1 %4905, %v3115_v26   ;;  %v4606_v25 = vadd.f32 %v4164_v7, %v3832_v53  ;;  %4473 = vperm.xlu0 %4906, %v3120_v62   ;;  %v11799_v42 = vld [vmem:[#allocation184_spill] sm:$0xff]  ;;  %v3833_v62 = vmul.f32 %v5396_v1, %v9323_v9  ;;  %v5398_v23 = vld [vmem:[%s5525_s15 + $0x1c0] sm:$0xff]  ;;  %v5399_v9 = vld [vmem:[%s7146_s18 + $0x398] sm:$0xff] }
 0x51a   : > { %v3121_v19 = vsub.f32 %v5395_v21, %v11799_v42  ;;  %v3126_v53 = vsub.f32 %v5397_v46, %v11800_v28  ;;  %v5408_v42 = vld [vmem:[%s5525_s15 + $0x1c8] sm:$0xff]  ;;  %v11808_v46 = vld [vmem:[#allocation121_spill] sm:$0xff] }
 0x51b   : > { %4730 = vst.msk [vmem:[%s9623_s22 + $0x168] sm:$0xff] %vm298_vm0, %v4601_v44  ;;  %4735 = vst.msk [vmem:[%s9623_s22 + $0x190] sm:$0xff] %vm298_vm0, %v4606_v25  ;;  %v3838_v44 = vmul.f32 %v5398_v23, %v9331_v47  ;;  %v5401_v47 = vld [vmem:[%s7146_s18 + $0x3c0] sm:$0xff]  ;;  %v11809_v23 = vld [vmem:[#allocation159_spill] sm:$0xff] }
 0x51c   : > { %v4149_v5 = vpop.permute.xlu1 %4148  ;;  %v4174_v2 = vpop.permute.xlu0 %4173 }
 0x51d   : > { %v4603_v57 = vadd.f32 %v4149_v5, %v3829_v54  ;;  %4458 = vperm.xlu1 %4905, %v3117_v63   ;;  %v4608_v39 = vadd.f32 %v4174_v2, %v3834_v27  ;;  %4483 = vperm.xlu0 %4906, %v3122_v22   ;;  %v11801_v63 = vld [vmem:[#allocation120_spill] sm:$0xff]  ;;  %v5400_v54 = vld [vmem:[%s5525_s15 + $0x1a8] sm:$0xff]  ;;  %v3128_v22 = vsub.f32 %v5401_v47, %v11802_v24 }
 0x51e   : > { %v3123_v14 = vsub.f32 %v5399_v9, %v11801_v63  ;;  %v3835_v35 = vmul.f32 %v5400_v54, %v9329_v38  ;;  %v3840_v27 = vmul.f32 %v5402_v58, %v9337_v49  ;;  %v5403_v38 = vld [vmem:[%s7146_s18 + $0x3a8] sm:$0xff]  ;;  %v5405_v49 = vld [vmem:[%s7146_s18 + $0x3d0] sm:$0xff]  ;;  %v5412_v54 = vld [vmem:[%s5525_s15 + $0x1d8] sm:$0xff] }
 0x51f   : > { %4732 = vst.msk [vmem:[%s9623_s22 + $0x178] sm:$0xff] %vm298_vm0, %v4603_v57  ;;  %4737 = vst.msk [vmem:[%s9623_s22 + $0x1a0] sm:$0xff] %vm298_vm0, %v4608_v39  ;;  %v3125_v16 = vsub.f32 %v5403_v38, %v11803_v36  ;;  %v5411_v9 = vld [vmem:[%s7146_s18 + $0x3c8] sm:$0xff]  ;;  %v11810_v63 = vld [vmem:[#allocation16_spill] sm:$0xff] }
 0x520   : > { %v4159_v33 = vpop.permute.xlu1 %4158  ;;  %v4184_v26 = vpop.permute.xlu0 %4183  ;;  %v5413_v24 = vld [vmem:[%s7146_s18 + $0x3f0] sm:$0xff] }
 0x521   : > { %v4605_v6 = vadd.f32 %v4159_v33, %v3831_v50  ;;  %4468 = vperm.xlu1 %4905, %v3119_v8   ;;  %v4610_v29 = vadd.f32 %v4184_v26, %v3836_v59  ;;  %4493 = vperm.xlu0 %4906, %v3124_v51   ;;  %v5404_v8 = vld [vmem:[%s5525_s15 + $0x1b8] sm:$0xff]  ;;  %v11804_v50 = vld [vmem:[#allocation67_spill] sm:$0xff] }
 0x522   : > { %v3837_v13 = vmul.f32 %v5404_v8, %v9335_v34  ;;  %v3130_v40 = vsub.f32 %v5405_v49, %v11804_v50  ;;  %v11805_v51 = vld [vmem:[#allocation93_spill] sm:$0xff]  ;;  %v5416_v49 = vld [vmem:[%s5525_s15 + $0x1e8] sm:$0xff]  ;;  %v11815_v50 = vld [vmem:[#allocation94_spill] sm:$0xff] }
 0x523   : > { %4734 = vst.msk [vmem:[%s9623_s22 + $0x188] sm:$0xff] %vm298_vm0, %v4605_v6  ;;  %4739 = vst.msk [vmem:[%s9623_s22 + $0x1b0] sm:$0xff] %vm298_vm0, %v4610_v29  ;;  %v3842_v10 = vmul.f32 %v5406_v48, %v11805_v51  ;;  %v5407_v34 = vld [vmem:[%s7146_s18 + $0x3b8] sm:$0xff]  ;;  %v11806_v29 = vld [vmem:[#allocation124_spill] sm:$0xff] }
 0x524   : > { %v4169_v7 = vpop.permute.xlu1 %4168  ;;  %v4194_v30 = vpop.permute.xlu0 %4193  ;;  %v3127_v21 = vsub.f32 %v5407_v34, %v11806_v29  ;;  %v11814_v8 = vld [vmem:[#allocation69_spill] sm:$0xff]  ;;  %v5417_v48 = vld [vmem:[%s7146_s18 + $0x400] sm:$0xff]  ;;  %v11816_v51 = vld [vmem:[#allocation68_spill] sm:$0xff] }
 0x525   : > { %v4607_v25 = vadd.f32 %v4169_v7, %v3833_v62  ;;  %4478 = vperm.xlu1 %4905, %v3121_v19   ;;  %v4612_v11 = vadd.f32 %v4194_v30, %v3838_v44  ;;  %4503 = vperm.xlu0 %4906, %v3126_v53   ;;  %v11807_v19 = vld [vmem:[#allocation154_spill] sm:$0xff]  ;;  %v5410_v53 = vld [vmem:[%s5525_s15 + $0x1f0] sm:$0xff] }
 0x526   : > { %v3839_v1 = vmul.f32 %v5408_v42, %v11807_v19  ;;  %v5409_v62 = vld [vmem:[%s7146_s18 + $0x3e0] sm:$0xff]  ;;  %v3844_v44 = vmul.f32 %v5410_v53, %v11809_v23  ;;  %v5419_v42 = vld [vmem:[%s7146_s18 + $0x3e8] sm:$0xff] }
 0x527   : > { %4736 = vst.msk [vmem:[%s9623_s22 + $0x198] sm:$0xff] %vm298_vm0, %v4607_v25  ;;  %4741 = vst.msk [vmem:[%s9623_s22 + $0x1c0] sm:$0xff] %vm298_vm0, %v4612_v11  ;;  %v3132_v28 = vsub.f32 %v5409_v62, %v11808_v46  ;;  %v11818_v19 = vld [vmem:[#allocation18_spill] sm:$0xff]  ;;  %v5420_v62 = vld [vmem:[%s5525_s15 + $0x1f8] sm:$0xff] }
 0x528   : > { %v4179_v5 = vpop.permute.xlu1 %4178  ;;  %v4204_v2 = vpop.permute.xlu0 %4203  ;;  %v11819_v46 = vld [vmem:[#allocation96_spill] sm:$0xff]  ;;  %v5421_v53 = vld [vmem:[%s5525_s15 + $0x220] sm:$0xff] }
 0x529   : > { %v4609_v57 = vadd.f32 %v4179_v5, %v3835_v35  ;;  %4488 = vperm.xlu1 %4905, %v3123_v14   ;;  %v4614_v39 = vadd.f32 %v4204_v2, %v3840_v27  ;;  %4513 = vperm.xlu0 %4906, %v3128_v22   ;;  %v3129_v14 = vsub.f32 %v5411_v9, %v11810_v63  ;;  %v11811_v35 = vld [vmem:[#allocation157_spill] sm:$0xff]  ;;  %v5414_v27 = vld [vmem:[%s5525_s15 + $0x200] sm:$0xff]  ;;  %v11821_v63 = vld [vmem:[#allocation19_spill] sm:$0xff] }
 0x52a   : > { %v3841_v47 = vmul.f32 %v5412_v54, %v11811_v35  ;;  %v11812_v22 = vld [vmem:[#allocation197_spill] sm:$0xff]  ;;  %v11820_v23 = vld [vmem:[#allocation46_spill] sm:$0xff]  ;;  %v5423_v54 = vld [vmem:[%s5525_s15 + $0x208] sm:$0xff] }
 0x52b   : > { %4738 = vst.msk [vmem:[%s9623_s22 + $0x1a8] sm:$0xff] %vm298_vm0, %v4609_v57  ;;  %4743 = vst.msk [vmem:[%s9623_s22 + $0x1d0] sm:$0xff] %vm298_vm0, %v4614_v39  ;;  %v3134_v58 = vsub.f32 %v5413_v24, %v11812_v22  ;;  %v11813_v5 = vld [vmem:[#allocation45_spill] sm:$0xff]  ;;  %v11822_v35 = vld [vmem:[#allocation47_spill] sm:$0xff] }
 0x52c   : > { %v4189_v59 = vpop.permute.xlu1 %4188  ;;  %v4214_v6 = vpop.permute.xlu0 %4213  ;;  %v3846_v57 = vmul.f32 %v5414_v27, %v11813_v5  ;;  %v5422_v9 = vld [vmem:[%s7146_s18 + $0x3f8] sm:$0xff]  ;;  %v5424_v24 = vld [vmem:[%s5525_s15 + $0x230] sm:$0xff]  ;;  %v11823_v22 = vld [vmem:[#allocation99_spill] sm:$0xff] }
 0x52d   : > { %v4611_v33 = vadd.f32 %v4189_v59, %v3837_v13  ;;  %4498 = vperm.xlu1 %4905, %v3125_v16   ;;  %v4616_v26 = vadd.f32 %v4214_v6, %v3842_v10  ;;  %4523 = vperm.xlu0 %4906, %v3130_v40   ;;  %v5415_v16 = vld [vmem:[%s7146_s18 + $0x3d8] sm:$0xff]  ;;  %v3843_v40 = vmul.f32 %v5416_v49, %v11815_v50  ;;  %v5418_v59 = vld [vmem:[%s5525_s15 + $0x210] sm:$0xff] }
 0x52e   : > { %v3131_v13 = vsub.f32 %v5415_v16, %v11814_v8  ;;  %v3136_v10 = vsub.f32 %v5417_v48, %v11816_v51  ;;  %v5426_v16 = vld [vmem:[%s5525_s15 + $0x240] sm:$0xff]  ;;  %v11825_v8 = vld [vmem:[#allocation53_spill] sm:$0xff]  ;;  %v5427_v51 = vld [vmem:[%s5525_s15 + $0x228] sm:$0xff] }
 0x52f   : > { %4740 = vst.msk [vmem:[%s9623_s22 + $0x1b8] sm:$0xff] %vm298_vm0, %v4611_v33  ;;  %4745 = vst.msk [vmem:[%s9623_s22 + $0x1e0] sm:$0xff] %vm298_vm0, %v4616_v26  ;;  %v11817_v33 = vld [vmem:[#allocation97_spill] sm:$0xff] }
 0x530   : > { %v4199_v7 = vpop.permute.xlu1 %4198  ;;  %v4224_v30 = vpop.permute.xlu0 %4223  ;;  %v3848_v6 = vmul.f32 %v5418_v59, %v11817_v33  ;;  %v5428_v33 = vld [vmem:[%s5525_s15 + $0x250] sm:$0xff] }
 0x531   : > { %v4613_v25 = vadd.f32 %v4199_v7, %v3839_v1  ;;  %4508 = vperm.xlu1 %4905, %v3127_v21   ;;  %v4618_v11 = vadd.f32 %v4224_v30, %v3844_v44  ;;  %4533 = vperm.xlu0 %4906, %v3132_v28   ;;  %v3133_v1 = vsub.f32 %v5419_v42, %v11818_v19  ;;  %v5429_v19 = vld [vmem:[%s5525_s15 + $0x238] sm:$0xff] }
 0x532   : > { %v3845_v28 = vmul.f32 %v5420_v62, %v11819_v46  ;;  %v3850_v44 = vmul.f32 %v5421_v53, %v11820_v23  ;;  %v5430_v46 = vld [vmem:[%s5525_s15 + $0x260] sm:$0xff] }
 0x533   : > { %4742 = vst.msk [vmem:[%s9623_s22 + $0x1c8] sm:$0xff] %vm298_vm0, %v4613_v25  ;;  %4747 = vst.msk [vmem:[%s9623_s22 + $0x1f0] sm:$0xff] %vm298_vm0, %v4618_v11 }
 0x534   : > { %v4209_v2 = vpop.permute.xlu1 %4208  ;;  %v4234_v38 = vpop.permute.xlu0 %4233 }
 0x535   : > { %v4615_v39 = vadd.f32 %v4209_v2, %v3841_v47  ;;  %4518 = vperm.xlu1 %4905, %v3129_v14   ;;  %v4620_v36 = vadd.f32 %v4234_v38, %v3846_v57  ;;  %4543 = vperm.xlu0 %4906, %v3134_v58   ;;  %v3135_v14 = vsub.f32 %v5422_v9, %v11821_v63  ;;  %v11824_v38 = vld [vmem:[#allocation49_spill] sm:$0xff]  ;;  %v5432_v63 = vld [vmem:[%s5525_s15 + $0x270] sm:$0xff] }
 0x536   : > { %v3847_v47 = vmul.f32 %v5423_v54, %v11822_v35  ;;  %v3852_v58 = vmul.f32 %v5424_v24, %v11823_v22 }
 0x537   : > { %4744 = vst.msk [vmem:[%s9623_s22 + $0x1d8] sm:$0xff] %vm298_vm0, %v4615_v39  ;;  %4749 = vst.msk [vmem:[%s9623_s22 + $0x200] sm:$0xff] %vm298_vm0, %v4620_v36  ;;  %v5425_v39 = vld [vmem:[%s5525_s15 + $0x218] sm:$0xff] }
 0x538   : > { %v4219_v26 = vpop.permute.xlu1 %4218  ;;  %v4244_v29 = vpop.permute.xlu0 %4243  ;;  %v3849_v36 = vmul.f32 %v5425_v39, %v11824_v38 }
 0x539   : > { %v4617_v34 = vadd.f32 %v4219_v26, %v3843_v40  ;;  %4528 = vperm.xlu1 %4905, %v3131_v13   ;;  %v4622_v21 = vadd.f32 %v4244_v29, %v3848_v6  ;;  %4553 = vperm.xlu0 %4906, %v3136_v10   ;;  %v3854_v13 = vmul.f32 %v5426_v16, %v11825_v8  ;;  %v11826_v10 = vld [vmem:[#allocation51_spill] sm:$0xff]  ;;  %v11827_v6 = vld [vmem:[#allocation169_spill] sm:$0xff] }
 0x53a   : > { %v3851_v59 = vmul.f32 %v5427_v51, %v11826_v10  ;;  %v3856_v26 = vmul.f32 %v5428_v33, %v11827_v6 }
 0x53b   : > { %4746 = vst.msk [vmem:[%s9623_s22 + $0x1e8] sm:$0xff] %vm298_vm0, %v4617_v34  ;;  %4751 = vst.msk [vmem:[%s9623_s22 + $0x210] sm:$0xff] %vm298_vm0, %v4622_v21 }
 0x53c   : > { %v4229_v7 = vpop.permute.xlu1 %4228  ;;  %v4254_v30 = vpop.permute.xlu0 %4253 }
 0x53d   : > { %v4619_v25 = vadd.f32 %v4229_v7, %v3845_v28  ;;  %4538 = vperm.xlu1 %4905, %v3133_v1   ;;  %v4624_v11 = vadd.f32 %v4254_v30, %v3850_v44  ;;  %v11828_v1 = vld [vmem:[#allocation166_spill] sm:$0xff]  ;;  %v11829_v28 = vld [vmem:[#allocation185_spill] sm:$0xff]  ;;  %v5431_v30 = vld [vmem:[%s5525_s15 + $0x248] sm:$0xff] }
 0x53e   : > { %v3853_v62 = vmul.f32 %v5429_v19, %v11828_v1  ;;  %v3858_v53 = vmul.f32 %v5430_v46, %v11829_v28 }
 0x53f   : > { %4748 = vst.msk [vmem:[%s9623_s22 + $0x1f8] sm:$0xff] %vm298_vm0, %v4619_v25  ;;  %4753 = vst.msk [vmem:[%s9623_s22 + $0x220] sm:$0xff] %vm298_vm0, %v4624_v11  ;;  %v11830_v11 = vld [vmem:[#allocation181_spill] sm:$0xff] }
 0x540   : > { %v4239_v27 = vpop.permute.xlu1 %4238  ;;  %v4264_v57 = vpop.permute.xlu0 %4263  ;;  %v3855_v9 = vmul.f32 %v5431_v30, %v11830_v11 }
 0x541   : > { %v4621_v5 = vadd.f32 %v4239_v27, %v3847_v47  ;;  %4548 = vperm.xlu1 %4905, %v3135_v14   ;;  %v4626_v2 = vadd.f32 %v4264_v57, %v3852_v58  ;;  %v11831_v14 = vld [vmem:[#allocation59_spill] sm:$0xff]  ;;  %v5433_v58 = vld [vmem:[%s5525_s15 + $0x258] sm:$0xff]  ;;  %v5434_v57 = vld [vmem:[%s5525_s15 + $0x280] sm:$0xff] }
 0x542   : > { %v3860_v54 = vmul.f32 %v5432_v63, %v11831_v14  ;;  %v11832_v27 = vld [vmem:[#allocation171_spill] sm:$0xff] }
 0x543   : > { %4750 = vst.msk [vmem:[%s9623_s22 + $0x208] sm:$0xff] %vm298_vm0, %v4621_v5  ;;  %4755 = vst.msk [vmem:[%s9623_s22 + $0x230] sm:$0xff] %vm298_vm0, %v4626_v2  ;;  %v3857_v5 = vmul.f32 %v5433_v58, %v11832_v27  ;;  %v11833_v2 = vld [vmem:[#allocation61_spill] sm:$0xff] }
 0x544   : > { %v4249_v49 = vpop.permute.xlu1 %4248  ;;  %v4274_v40 = vpop.permute.xlu0 %4273  ;;  %v3862_v39 = vmul.f32 %v5434_v57, %v11833_v2 }
 0x545   : > { %v4623_v50 = vadd.f32 %v4249_v49, %v3849_v36  ;;  %v4628_v48 = vadd.f32 %v4274_v40, %v3854_v13  ;;  %v5435_v13 = vld [vmem:[%s5525_s15 + $0x268] sm:$0xff]  ;;  %v11834_v49 = vld [vmem:[#allocation56_spill] sm:$0xff] }
 0x546   : > { %v5436_v40 = vld [vmem:[%s5525_s15 + $0x290] sm:$0xff] }
 0x547   : > { %4752 = vst.msk [vmem:[%s9623_s22 + $0x218] sm:$0xff] %vm298_vm0, %v4623_v50  ;;  %4757 = vst.msk [vmem:[%s9623_s22 + $0x240] sm:$0xff] %vm298_vm0, %v4628_v48  ;;  %v3859_v50 = vmul.f32 %v5435_v13, %v11834_v49  ;;  %v11835_v48 = vld [vmem:[#allocation104_spill] sm:$0xff] }
 0x548   : > { %v4259_v34 = vpop.permute.xlu1 %4258  ;;  %v4284_v21 = vpop.permute.xlu0 %4283  ;;  %v3864_v51 = vmul.f32 %v5436_v40, %v11835_v48 }
 0x549   : > { %v4625_v29 = vadd.f32 %v4259_v34, %v3851_v59  ;;  %v4630_v42 = vadd.f32 %v4284_v21, %v3856_v26  ;;  %v5437_v26 = vld [vmem:[%s5525_s15 + $0x278] sm:$0xff]  ;;  %v11836_v34 = vld [vmem:[#allocation58_spill] sm:$0xff] }
 0x54a   : > { %v5438_v21 = vld [vmem:[%s5525_s15 + $0x2a0] sm:$0xff] }
 0x54b   : > { %4754 = vst.msk [vmem:[%s9623_s22 + $0x228] sm:$0xff] %vm298_vm0, %v4625_v29  ;;  %4759 = vst.msk [vmem:[%s9623_s22 + $0x250] sm:$0xff] %vm298_vm0, %v4630_v42  ;;  %v3861_v29 = vmul.f32 %v5437_v26, %v11836_v34  ;;  %v11837_v42 = vld [vmem:[#allocation65_spill] sm:$0xff] }
 0x54c   : > { %v4269_v23 = vpop.permute.xlu1 %4268  ;;  %v4294_v7 = vpop.permute.xlu0 %4293  ;;  %v3866_v19 = vmul.f32 %v5438_v21, %v11837_v42 }
 0x54d   : > { %v4627_v44 = vadd.f32 %v4269_v23, %v3853_v62  ;;  %v4632_v25 = vadd.f32 %v4294_v7, %v3858_v53  ;;  %v5439_v53 = vld [vmem:[%s5525_s15 + $0x288] sm:$0xff]  ;;  %v5440_v7 = vld [vmem:[%s5525_s15 + $0x2b0] sm:$0xff] }
 0x54e   : > { %v11838_v23 = vld [vmem:[#allocation63_spill] sm:$0xff] }
 0x54f   : > { %4756 = vst.msk [vmem:[%s9623_s22 + $0x238] sm:$0xff] %vm298_vm0, %v4627_v44  ;;  %4761 = vst.msk [vmem:[%s9623_s22 + $0x260] sm:$0xff] %vm298_vm0, %v4632_v25  ;;  %v3863_v44 = vmul.f32 %v5439_v53, %v11838_v23  ;;  %v11839_v25 = vld [vmem:[#allocation106_spill] sm:$0xff] }
 0x550   : > { %v4279_v35 = vpop.permute.xlu1 %4278  ;;  %v4304_v24 = vpop.permute.xlu0 %4303  ;;  %v3868_v30 = vmul.f32 %v5440_v7, %v11839_v25 }
 0x551   : > { %v4629_v47 = vadd.f32 %v4279_v35, %v3855_v9  ;;  %v4634_v22 = vadd.f32 %v4304_v24, %v3860_v54  ;;  %v5441_v54 = vld [vmem:[%s5525_s15 + $0x298] sm:$0xff]  ;;  %v11840_v35 = vld [vmem:[#allocation62_spill] sm:$0xff] }
 0x552   : > { %v5442_v24 = vld [vmem:[%s5525_s15 + $0x2c0] sm:$0xff] }
 0x553   : > { %4758 = vst.msk [vmem:[%s9623_s22 + $0x248] sm:$0xff] %vm298_vm0, %v4629_v47  ;;  %4763 = vst.msk [vmem:[%s9623_s22 + $0x270] sm:$0xff] %vm298_vm0, %v4634_v22  ;;  %v3865_v47 = vmul.f32 %v5441_v54, %v11840_v35  ;;  %v11841_v22 = vld [vmem:[#allocation66_spill] sm:$0xff] }
 0x554   : > { %v4289_v38 = vpop.permute.xlu1 %4288  ;;  %v4314_v16 = vpop.permute.xlu0 %4313  ;;  %v3870_v58 = vmul.f32 %v5442_v24, %v11841_v22 }
 0x555   : > { %v4631_v36 = vadd.f32 %v4289_v38, %v3857_v5  ;;  %v4636_v8 = vadd.f32 %v4314_v16, %v3862_v39  ;;  %v5443_v39 = vld [vmem:[%s5525_s15 + $0x2a8] sm:$0xff]  ;;  %v11842_v38 = vld [vmem:[#allocation189_spill] sm:$0xff]  ;;  %v5444_v16 = vld [vmem:[%s5525_s15 + $0x2d0] sm:$0xff] }
 0x557   : > { %4760 = vst.msk [vmem:[%s9623_s22 + $0x258] sm:$0xff] %vm298_vm0, %v4631_v36  ;;  %4765 = vst.msk [vmem:[%s9623_s22 + $0x280] sm:$0xff] %vm298_vm0, %v4636_v8  ;;  %v3867_v36 = vmul.f32 %v5443_v39, %v11842_v38  ;;  %v11843_v8 = vld [vmem:[#allocation108_spill] sm:$0xff] }
 0x558   : > { %v4299_v10 = vpop.permute.xlu1 %4298  ;;  %v4324_v33 = vpop.permute.xlu0 %4323  ;;  %v3872_v13 = vmul.f32 %v5444_v16, %v11843_v8 }
 0x559   : > { %v4633_v59 = vadd.f32 %v4299_v10, %v3859_v50  ;;  %v4638_v6 = vadd.f32 %v4324_v33, %v3864_v51  ;;  %v5445_v51 = vld [vmem:[%s5525_s15 + $0x2b8] sm:$0xff]  ;;  %v11844_v10 = vld [vmem:[#allocation198_spill] sm:$0xff] }
 0x55a   : > { %v5446_v33 = vld [vmem:[%s5525_s15 + $0x2e0] sm:$0xff] }
 0x55b   : > { %4762 = vst.msk [vmem:[%s9623_s22 + $0x268] sm:$0xff] %vm298_vm0, %v4633_v59  ;;  %4767 = vst.msk [vmem:[%s9623_s22 + $0x290] sm:$0xff] %vm298_vm0, %v4638_v6  ;;  %v3869_v59 = vmul.f32 %v5445_v51, %v11844_v10  ;;  %v11845_v6 = vld [vmem:[#allocation133_spill] sm:$0xff] }
 0x55c   : > { %v4309_v1 = vpop.permute.xlu1 %4308  ;;  %v4334_v46 = vpop.permute.xlu0 %4333  ;;  %v3874_v26 = vmul.f32 %v5446_v33, %v11845_v6 }
 0x55d   : > { %v4635_v62 = vadd.f32 %v4309_v1, %v3861_v29  ;;  %v4640_v28 = vadd.f32 %v4334_v46, %v3866_v19  ;;  %v5447_v19 = vld [vmem:[%s5525_s15 + $0x2c8] sm:$0xff]  ;;  %v5448_v46 = vld [vmem:[%s5525_s15 + $0x2f0] sm:$0xff] }
 0x55e   : > { %v11846_v1 = vld [vmem:[#allocation107_spill] sm:$0xff] }
 0x55f   : > { %4764 = vst.msk [vmem:[%s9623_s22 + $0x278] sm:$0xff] %vm298_vm0, %v4635_v62  ;;  %4769 = vst.msk [vmem:[%s9623_s22 + $0x2a0] sm:$0xff] %vm298_vm0, %v4640_v28  ;;  %v3871_v62 = vmul.f32 %v5447_v19, %v11846_v1  ;;  %v11847_v28 = vld [vmem:[#allocation131_spill] sm:$0xff] }
 0x560   : > { %v4319_v11 = vpop.permute.xlu1 %4318  ;;  %v4344_v63 = vpop.permute.xlu0 %4343  ;;  %v3876_v53 = vmul.f32 %v5448_v46, %v11847_v28 }
 0x561   : > { %v4637_v9 = vadd.f32 %v4319_v11, %v3863_v44  ;;  %v4642_v14 = vadd.f32 %v4344_v63, %v3868_v30  ;;  %v5449_v30 = vld [vmem:[%s5525_s15 + $0x2d8] sm:$0xff]  ;;  %v11848_v11 = vld [vmem:[#allocation70_spill] sm:$0xff] }
 0x562   : > { %v5450_v63 = vld [vmem:[%s5525_s15 + $0x300] sm:$0xff] }
 0x563   : > { %4766 = vst.msk [vmem:[%s9623_s22 + $0x288] sm:$0xff] %vm298_vm0, %v4637_v9  ;;  %4771 = vst.msk [vmem:[%s9623_s22 + $0x2b0] sm:$0xff] %vm298_vm0, %v4642_v14  ;;  %v3873_v9 = vmul.f32 %v5449_v30, %v11848_v11  ;;  %v11849_v14 = vld [vmem:[#allocation73_spill] sm:$0xff] }
 0x564   : > { %v4329_v27 = vpop.permute.xlu1 %4328  ;;  %v4354_v57 = vpop.permute.xlu0 %4353  ;;  %v3878_v54 = vmul.f32 %v5450_v63, %v11849_v14 }
 0x565   : > { %v4639_v5 = vadd.f32 %v4329_v27, %v3865_v47  ;;  %v4644_v2 = vadd.f32 %v4354_v57, %v3870_v58  ;;  %v5451_v58 = vld [vmem:[%s5525_s15 + $0x2e8] sm:$0xff]  ;;  %v11850_v27 = vld [vmem:[#allocation24_spill] sm:$0xff] }
 0x566   : > { %v5452_v57 = vld [vmem:[%s5525_s15 + $0x310] sm:$0xff] }
 0x567   : > { %4768 = vst.msk [vmem:[%s9623_s22 + $0x298] sm:$0xff] %vm298_vm0, %v4639_v5  ;;  %4773 = vst.msk [vmem:[%s9623_s22 + $0x2c0] sm:$0xff] %vm298_vm0, %v4644_v2  ;;  %v3875_v5 = vmul.f32 %v5451_v58, %v11850_v27  ;;  %v11851_v2 = vld [vmem:[#allocation200_spill] sm:$0xff] }
 0x568   : > { %v4339_v49 = vpop.permute.xlu1 %4338  ;;  %v4364_v40 = vpop.permute.xlu0 %4363  ;;  %v3880_v39 = vmul.f32 %v5452_v57, %v11851_v2 }
 0x569   : > { %v4641_v50 = vadd.f32 %v4339_v49, %v3867_v36  ;;  %v4646_v48 = vadd.f32 %v4364_v40, %v3872_v13  ;;  %v5453_v13 = vld [vmem:[%s5525_s15 + $0x2f8] sm:$0xff]  ;;  %v11852_v49 = vld [vmem:[#allocation20_spill] sm:$0xff]  ;;  %v5454_v40 = vld [vmem:[%s5525_s15 + $0x320] sm:$0xff] }
 0x56b   : > { %4770 = vst.msk [vmem:[%s9623_s22 + $0x2a8] sm:$0xff] %vm298_vm0, %v4641_v50  ;;  %4775 = vst.msk [vmem:[%s9623_s22 + $0x2d0] sm:$0xff] %vm298_vm0, %v4646_v48  ;;  %v3877_v50 = vmul.f32 %v5453_v13, %v11852_v49  ;;  %v11853_v48 = vld [vmem:[#allocation112_spill] sm:$0xff] }
 0x56c   : > { %v4349_v34 = vpop.permute.xlu1 %4348  ;;  %v4374_v21 = vpop.permute.xlu0 %4373  ;;  %v3882_v51 = vmul.f32 %v5454_v40, %v11853_v48  ;;  %v5463_v48 = vld [vmem:[%s5525_s15 + $0x348] sm:$0xff] }
 0x56d   : > { %v4643_v29 = vadd.f32 %v4349_v34, %v3869_v59  ;;  %v4648_v42 = vadd.f32 %v4374_v21, %v3874_v26  ;;  %v5455_v26 = vld [vmem:[%s5525_s15 + $0x308] sm:$0xff]  ;;  %v5456_v21 = vld [vmem:[%s5525_s15 + $0x330] sm:$0xff] }
 0x56e   : > { %v11854_v34 = vld [vmem:[#allocation27_spill] sm:$0xff] }
 0x56f   : > { %4772 = vst.msk [vmem:[%s9623_s22 + $0x2b8] sm:$0xff] %vm298_vm0, %v4643_v29  ;;  %4777 = vst.msk [vmem:[%s9623_s22 + $0x2e0] sm:$0xff] %vm298_vm0, %v4648_v42  ;;  %v3879_v29 = vmul.f32 %v5455_v26, %v11854_v34  ;;  %v11855_v42 = vld [vmem:[#allocation88_spill] sm:$0xff] }
 0x570   : > { %v4359_v23 = vpop.permute.xlu1 %4358  ;;  %v4384_v7 = vpop.permute.xlu0 %4383  ;;  %v3884_v19 = vmul.f32 %v5456_v21, %v11855_v42  ;;  %v5465_v21 = vld [vmem:[%s5525_s15 + $0x358] sm:$0xff] }
 0x571   : > { %v4645_v44 = vadd.f32 %v4359_v23, %v3871_v62  ;;  %v4650_v25 = vadd.f32 %v4384_v7, %v3876_v53  ;;  %v5457_v53 = vld [vmem:[%s5525_s15 + $0x318] sm:$0xff]  ;;  %v11856_v23 = vld [vmem:[#allocation87_spill] sm:$0xff]  ;;  %v5458_v7 = vld [vmem:[%s5525_s15 + $0x340] sm:$0xff] }
 0x572   : > { %v11863_v42 = vld [vmem:[#allocation113_spill] sm:$0xff] }
 0x573   : > { %4774 = vst.msk [vmem:[%s9623_s22 + $0x2c8] sm:$0xff] %vm298_vm0, %v4645_v44  ;;  %4779 = vst.msk [vmem:[%s9623_s22 + $0x2f0] sm:$0xff] %vm298_vm0, %v4650_v25  ;;  %v3881_v44 = vmul.f32 %v5457_v53, %v11856_v23  ;;  %v11857_v25 = vld [vmem:[#allocation203_spill] sm:$0xff] }
 0x574   : > { %v4369_v35 = vpop.permute.xlu1 %4368  ;;  %v4394_v24 = vpop.permute.xlu0 %4393  ;;  %v3886_v30 = vmul.f32 %v5458_v7, %v11857_v25  ;;  %v11864_v7 = vld [vmem:[#allocation114_spill] sm:$0xff] }
 0x575   : > { %v4647_v47 = vadd.f32 %v4369_v35, %v3873_v9  ;;  %v4652_v22 = vadd.f32 %v4394_v24, %v3878_v54  ;;  %v5459_v54 = vld [vmem:[%s5525_s15 + $0x328] sm:$0xff]  ;;  %v5460_v24 = vld [vmem:[%s5525_s15 + $0x350] sm:$0xff] }
 0x576   : > { %v11858_v35 = vld [vmem:[#allocation191_spill] sm:$0xff] }
 0x577   : > { %4776 = vst.msk [vmem:[%s9623_s22 + $0x2d8] sm:$0xff] %vm298_vm0, %v4647_v47  ;;  %4781 = vst.msk [vmem:[%s9623_s22 + $0x300] sm:$0xff] %vm298_vm0, %v4652_v22  ;;  %v3883_v47 = vmul.f32 %v5459_v54, %v11858_v35  ;;  %v11859_v22 = vld [vmem:[#allocation201_spill] sm:$0xff] }
 0x578   : > { %v4379_v38 = vpop.permute.xlu1 %4378  ;;  %v4404_v16 = vpop.permute.xlu0 %4403  ;;  %v3888_v58 = vmul.f32 %v5460_v24, %v11859_v22  ;;  %v5469_v54 = vld [vmem:[%s5525_s15 + $0x378] sm:$0xff] }
 0x579   : > { %v4649_v36 = vadd.f32 %v4379_v38, %v3875_v5  ;;  %v4654_v8 = vadd.f32 %v4404_v16, %v3880_v39  ;;  %v5461_v39 = vld [vmem:[%s5525_s15 + $0x338] sm:$0xff]  ;;  %v11860_v38 = vld [vmem:[#allocation28_spill] sm:$0xff]  ;;  %v5462_v16 = vld [vmem:[%s5525_s15 + $0x360] sm:$0xff]  ;;  %v3893_v35 = vmul.f32 %v5469_v54, %v9551_v3 }
 0x57a   : > { %v5472_v3 = vld [vmem:[%s5525_s15 + $0x3b0] sm:$0xff] }
 0x57b   : > { %4778 = vst.msk [vmem:[%s9623_s22 + $0x2e8] sm:$0xff] %vm298_vm0, %v4649_v36  ;;  %4783 = vst.msk [vmem:[%s9623_s22 + $0x310] sm:$0xff] %vm298_vm0, %v4654_v8  ;;  %v3885_v36 = vmul.f32 %v5461_v39, %v11860_v38  ;;  %v3890_v8 = vmul.f32 %v5462_v16, %v9529_v60  ;;  %v5473_v16 = vld [vmem:[%s5525_s15 + $0x398] sm:$0xff] }
 0x57c   : > { %v4389_v10 = vpop.permute.xlu1 %4388  ;;  %v4414_v33 = vpop.permute.xlu0 %4413 }
 0x57d   : > { %v4651_v59 = vadd.f32 %v4389_v10, %v3877_v50  ;;  %v4656_v6 = vadd.f32 %v4414_v33, %v3882_v51  ;;  %v11861_v51 = vld [vmem:[#allocation29_spill] sm:$0xff]  ;;  %v11862_v33 = vld [vmem:[#allocation199_spill] sm:$0xff] }
 0x57e   : > { %v3887_v10 = vmul.f32 %v5463_v48, %v11861_v51  ;;  %v5475_v48 = vld [vmem:[%s5525_s15 + $0x3a8] sm:$0xff] }
 0x57f   : > { %4780 = vst.msk [vmem:[%s9623_s22 + $0x2f8] sm:$0xff] %vm298_vm0, %v4651_v59  ;;  %4785 = vst.msk [vmem:[%s9623_s22 + $0x320] sm:$0xff] %vm298_vm0, %v4656_v6  ;;  %v5464_v59 = vld [vmem:[%s5525_s15 + $0x370] sm:$0xff]  ;;  %v3899_v51 = vmul.f32 %v5475_v48, %v9575_v56  ;;  %v5478_v56 = vld [vmem:[%s5525_s15 + $0x3e0] sm:$0xff] }
 0x580   : > { %v4399_v1 = vpop.permute.xlu1 %4398  ;;  %v4424_v46 = vpop.permute.xlu0 %4423  ;;  %v3892_v6 = vmul.f32 %v5464_v59, %v11862_v33 }
 0x581   : > { %v4653_v62 = vadd.f32 %v4399_v1, %v3879_v29  ;;  %v4658_v28 = vadd.f32 %v4424_v46, %v3884_v19  ;;  %v3889_v19 = vmul.f32 %v5465_v21, %v11863_v42  ;;  %v5466_v1 = vld [vmem:[%s5525_s15 + $0x380] sm:$0xff] }
 0x583   : > { %4782 = vst.msk [vmem:[%s9623_s22 + $0x308] sm:$0xff] %vm298_vm0, %v4653_v62  ;;  %4787 = vst.msk [vmem:[%s9623_s22 + $0x330] sm:$0xff] %vm298_vm0, %v4658_v28  ;;  %v3894_v62 = vmul.f32 %v5466_v1, %v9545_v17 }
 0x584   : > { %v4409_v11 = vpop.permute.xlu1 %4408  ;;  %v4434_v63 = vpop.permute.xlu0 %4433 }
 0x585   : > { %v4655_v9 = vadd.f32 %v4409_v11, %v3881_v44  ;;  %v4660_v14 = vadd.f32 %v4434_v63, %v3886_v30  ;;  %v5467_v44 = vld [vmem:[%s5525_s15 + $0x368] sm:$0xff]  ;;  %v5468_v30 = vld [vmem:[%s5525_s15 + $0x390] sm:$0xff] }
 0x586   : > { %v3891_v25 = vmul.f32 %v5467_v44, %v11864_v7  ;;  %v3896_v11 = vmul.f32 %v5468_v30, %v9553_v0 }
 0x587   : > { %4784 = vst.msk [vmem:[%s9623_s22 + $0x318] sm:$0xff] %vm298_vm0, %v4655_v9  ;;  %4789 = vst.msk [vmem:[%s9623_s22 + $0x340] sm:$0xff] %vm298_vm0, %v4660_v14 }
 0x588   : > { %v4419_v27 = vpop.permute.xlu1 %4418  ;;  %v4444_v57 = vpop.permute.xlu0 %4443 }
 0x589   : > { %v4657_v5 = vadd.f32 %v4419_v27, %v3883_v47  ;;  %v4662_v2 = vadd.f32 %v4444_v57, %v3888_v58  ;;  %v5470_v47 = vld [vmem:[%s5525_s15 + $0x3a0] sm:$0xff] }
 0x58a   : > { %v3898_v24 = vmul.f32 %v5470_v47, %v9561_v15 }
 0x58b   : > { %4786 = vst.msk [vmem:[%s9623_s22 + $0x328] sm:$0xff] %vm298_vm0, %v4657_v5  ;;  %4791 = vst.msk [vmem:[%s9623_s22 + $0x350] sm:$0xff] %vm298_vm0, %v4662_v2  ;;  %v5471_v5 = vld [vmem:[%s5525_s15 + $0x388] sm:$0xff]  ;;  %v3900_v2 = vmul.f32 %v5472_v3, %v9569_v4 }
 0x58c   : > { %v4429_v13 = vpop.permute.xlu1 %4428  ;;  %v4454_v50 = vpop.permute.xlu0 %4453  ;;  %v3895_v57 = vmul.f32 %v5471_v5, %v9559_v12  ;;  %v5474_v12 = vld [vmem:[%s5525_s15 + $0x3c0] sm:$0xff] }
 0x58d   : > { %v4659_v49 = vadd.f32 %v4429_v13, %v3885_v36  ;;  %v4664_v40 = vadd.f32 %v4454_v50, %v3890_v8  ;;  %v3897_v8 = vmul.f32 %v5473_v16, %v9567_v61  ;;  %v3902_v13 = vmul.f32 %v5474_v12, %v9577_v52  ;;  %v5476_v61 = vld [vmem:[%s5525_s15 + $0x3d0] sm:$0xff] }
 0x58f   : > { %4788 = vst.msk [vmem:[%s9623_s22 + $0x338] sm:$0xff] %vm298_vm0, %v4659_v49  ;;  %4793 = vst.msk [vmem:[%s9623_s22 + $0x360] sm:$0xff] %vm298_vm0, %v4664_v40 }
 0x590   : > { %v4439_v60 = vpop.permute.xlu1 %4438  ;;  %v4464_v34 = vpop.permute.xlu0 %4463 }
 0x591   : > { %v4661_v26 = vadd.f32 %v4439_v60, %v3887_v10  ;;  %v4666_v29 = vadd.f32 %v4464_v34, %v3892_v6  ;;  %v3904_v10 = vmul.f32 %v5476_v61, %v9585_v20  ;;  %v5477_v60 = vld [vmem:[%s5525_s15 + $0x3b8] sm:$0xff]  ;;  %v3906_v34 = vmul.f32 %v5478_v56, %v9593_v37 }
 0x593   : > { %4790 = vst.msk [vmem:[%s9623_s22 + $0x348] sm:$0xff] %vm298_vm0, %v4661_v26  ;;  %4795 = vst.msk [vmem:[%s9623_s22 + $0x370] sm:$0xff] %vm298_vm0, %v4666_v29  ;;  %v3901_v26 = vmul.f32 %v5477_v60, %v9583_v18  ;;  %v5480_v18 = vld [vmem:[%s5525_s15 + $0x3f0] sm:$0xff] }
 0x594   : > { %v4449_v46 = vpop.permute.xlu1 %4448  ;;  %v4474_v53 = vpop.permute.xlu0 %4473 }
 0x595   : > { %v4663_v28 = vadd.f32 %v4449_v46, %v3889_v19  ;;  %v4668_v23 = vadd.f32 %v4474_v53, %v3894_v62  ;;  %v5479_v19 = vld [vmem:[%s5525_s15 + $0x3c8] sm:$0xff]  ;;  %v3908_v62 = vmul.f32 %v5480_v18, %v9601_v41 }
 0x596   : > { %v3903_v1 = vmul.f32 %v5479_v19, %v9591_v43  ;;  %v5482_v43 = vld [vmem:[%s5525_s15 + $0x400] sm:$0xff] }
 0x597   : > { %4792 = vst.msk [vmem:[%s9623_s22 + $0x358] sm:$0xff] %vm298_vm0, %v4663_v28  ;;  %4797 = vst.msk [vmem:[%s9623_s22 + $0x380] sm:$0xff] %vm298_vm0, %v4668_v23  ;;  %v5481_v23 = vld [vmem:[%s5525_s15 + $0x3d8] sm:$0xff]  ;;  %v3910_v7 = vmul.f32 %v5482_v43, %v9609_v45 }
 0x598   : > { %v4459_v17 = vpop.permute.xlu1 %4458  ;;  %v4484_v63 = vpop.permute.xlu0 %4483  ;;  %v3905_v44 = vmul.f32 %v5481_v23, %v9599_v31 }
 0x599   : > { %v4665_v9 = vadd.f32 %v4459_v17, %v3891_v25  ;;  %v4670_v14 = vadd.f32 %v4484_v63, %v3896_v11  ;;  %v5483_v17 = vld [vmem:[%s5525_s15 + $0x3e8] sm:$0xff] }
 0x59b   : > { %4794 = vst.msk [vmem:[%s9623_s22 + $0x368] sm:$0xff] %vm298_vm0, %v4665_v9  ;;  %4799 = vst.msk [vmem:[%s9623_s22 + $0x390] sm:$0xff] %vm298_vm0, %v4670_v14  ;;  %v3907_v9 = vmul.f32 %v5483_v17, %v9607_v55  ;;  %v5484_v14 = vld [vmem:[%s5525_s15 + $0x3f8] sm:$0xff] }
 0x59c   : > { %v4469_v0 = vpop.permute.xlu1 %4468  ;;  %v4494_v58 = vpop.permute.xlu0 %4493  ;;  %v3909_v54 = vmul.f32 %v5484_v14, %v9617_v32 }
 0x59d   : > { %v4667_v22 = vadd.f32 %v4469_v0, %v3893_v35  ;;  %v4672_v27 = vadd.f32 %v4494_v58, %v3898_v24 }
 0x59f   : > { %4796 = vst.msk [vmem:[%s9623_s22 + $0x378] sm:$0xff] %vm298_vm0, %v4667_v22  ;;  %4801 = vst.msk [vmem:[%s9623_s22 + $0x3a0] sm:$0xff] %vm298_vm0, %v4672_v27 }
 0x5a0   : > { %v4479_v15 = vpop.permute.xlu1 %4478  ;;  %v4504_v38 = vpop.permute.xlu0 %4503 }
 0x5a1   : > { %v4669_v39 = vadd.f32 %v4479_v15, %v3895_v57  ;;  %v4674_v36 = vadd.f32 %v4504_v38, %v3900_v2 }
 0x5a3   : > { %4798 = vst.msk [vmem:[%s9623_s22 + $0x388] sm:$0xff] %vm298_vm0, %v4669_v39  ;;  %4803 = vst.msk [vmem:[%s9623_s22 + $0x3b0] sm:$0xff] %vm298_vm0, %v4674_v36 }
 0x5a4   : > { %v4489_v4 = vpop.permute.xlu1 %4488  ;;  %v4514_v50 = vpop.permute.xlu0 %4513 }
 0x5a5   : > { %v4671_v49 = vadd.f32 %v4489_v4, %v3897_v8  ;;  %v4676_v40 = vadd.f32 %v4514_v50, %v3902_v13 }
 0x5a7   : > { %4800 = vst.msk [vmem:[%s9623_s22 + $0x398] sm:$0xff] %vm298_vm0, %v4671_v49  ;;  %4805 = vst.msk [vmem:[%s9623_s22 + $0x3c0] sm:$0xff] %vm298_vm0, %v4676_v40 }
 0x5a8   : > { %v4499_v52 = vpop.permute.xlu1 %4498  ;;  %v4524_v33 = vpop.permute.xlu0 %4523 }
 0x5a9   : > { %v4673_v59 = vadd.f32 %v4499_v52, %v3899_v51  ;;  %v4678_v6 = vadd.f32 %v4524_v33, %v3904_v10 }
 0x5ab   : > { %4802 = vst.msk [vmem:[%s9623_s22 + $0x3a8] sm:$0xff] %vm298_vm0, %v4673_v59  ;;  %4807 = vst.msk [vmem:[%s9623_s22 + $0x3d0] sm:$0xff] %vm298_vm0, %v4678_v6 }
 0x5ac   : > { %v4509_v20 = vpop.permute.xlu1 %4508  ;;  %v4534_v21 = vpop.permute.xlu0 %4533 }
 0x5ad   : > { %v4675_v29 = vadd.f32 %v4509_v20, %v3901_v26  ;;  %v4680_v42 = vadd.f32 %v4534_v21, %v3906_v34 }
 0x5af   : > { %4804 = vst.msk [vmem:[%s9623_s22 + $0x3b8] sm:$0xff] %vm298_vm0, %v4675_v29  ;;  %4809 = vst.msk [vmem:[%s9623_s22 + $0x3e0] sm:$0xff] %vm298_vm0, %v4680_v42 }
 0x5b0   : > { %v4519_v37 = vpop.permute.xlu1 %4518  ;;  %v4544_v28 = vpop.permute.xlu0 %4543 }
 0x5b1   : > { %v4677_v46 = vadd.f32 %v4519_v37, %v3903_v1  ;;  %v4682_v53 = vadd.f32 %v4544_v28, %v3908_v62 }
 0x5b3   : > { %4806 = vst.msk [vmem:[%s9623_s22 + $0x3c8] sm:$0xff] %vm298_vm0, %v4677_v46  ;;  %4811 = vst.msk [vmem:[%s9623_s22 + $0x3f0] sm:$0xff] %vm298_vm0, %v4682_v53 }
 0x5b4   : > { %v4529_v41 = vpop.permute.xlu1 %4528  ;;  %v4554_v30 = vpop.permute.xlu0 %4553 }
 0x5b5   : > { %v4679_v25 = vadd.f32 %v4529_v41, %v3905_v44  ;;  %v4684_v11 = vadd.f32 %v4554_v30, %v3910_v7 }
 0x5b7   : > { %4808 = vst.msk [vmem:[%s9623_s22 + $0x3d8] sm:$0xff] %vm298_vm0, %v4679_v25  ;;  %4813 = vst.msk [vmem:[%s9623_s22 + $0x400] sm:$0xff] %vm298_vm0, %v4684_v11 }
 0x5b8   : > { %v4539_v31 = vpop.permute.xlu1 %4538 }
 0x5b9   : > { %v4681_v63 = vadd.f32 %v4539_v31, %v3907_v9 }
 0x5bb   : > { %4810 = vst.msk [vmem:[%s9623_s22 + $0x3e8] sm:$0xff] %vm298_vm0, %v4681_v63 }
 0x5bc   : > { %v4549_v45 = vpop.permute.xlu1 %4548 }
 0x5bd   : > { %v4683_v35 = vadd.f32 %v4549_v45, %v3909_v54 }
 0x5bf   : > { %4812 = vst.msk [vmem:[%s9623_s22 + $0x3f8] sm:$0xff] %vm298_vm0, %v4683_v35 }
 0x5c0 PF: > { %s12_s9 = sadd.s32 1, %s5491_s9  }
 0x5c1   : > { %p9_p4 = scmp.ge.s32.totalorder %s12_s9, 4  }
 0x5c3   :  { %11 = sbr.rel (!%p9_p4) target bundleno = 1 (0x1), region = 61 }

</bundles_post_ra>
